<compile_context>
chip_gen: v6e
topology: v6e:2x2x1
jax: 0.10.0
libtpu: 0.0.40
codegen_flags: <defaults>
</compile_context>

<pallas_src>
import jax
import jax.numpy as jnp
from jax.experimental import pallas as pl
from jax.experimental.pallas import tpu as pltpu


# ----------------------------------------------------------------------------
# In-kernel helpers
# ----------------------------------------------------------------------------
def _col_select(n_src, n_dst, offset, stride=1):
    """(n_src, n_dst) 0/1 f32 matrix; output column d picks source column
    stride*d + offset.  Right-multiplying by it performs a static column shift
    or stride-2 subsample on the lane axis via a tiny MXU matmul, avoiding
    lane-offset slices / rolls / minor-dim reshapes entirely."""
    src = jax.lax.broadcasted_iota(jnp.int32, (n_src, n_dst), 0)
    dst = jax.lax.broadcasted_iota(jnp.int32, (n_src, n_dst), 1)
    return jnp.where(src == dst * stride + offset, 1.0, 0.0)


def _conv3x3_prelu(x, w_ref, b_ref, a_ref):
    """VALID 3x3 conv + per-channel PReLU in channel-major layout.

    x:     (H, Cin, W) f32   (H leading, channels on sublanes, width on lanes)
    w_ref: (Cout, 9*Cin) bf16 with k = j*(3*Cin) + i*Cin + cin
    b_ref, a_ref: (Cout, 1) f32
    returns (H-2, Cout, W-2) f32
    """
    H, Cin, W = x.shape
    Cout = w_ref.shape[0]
    Ho, Wo = H - 2, W - 2

    # Row taps: three leading-dim slices stacked along the contraction axis.
    xr = jnp.concatenate([x[i:i + Ho] for i in range(3)], axis=1)   # (Ho, 3Cin, W)
    xr2 = xr.reshape(Ho * 3 * Cin, W)

    # Column taps: three tiny f32 selection matmuls (exact, lane-safe shifts).
    cols = [
        jnp.dot(xr2, _col_select(W, Wo, j),
                preferred_element_type=jnp.float32).reshape(Ho, 3 * Cin, Wo)
        for j in range(3)
    ]
    patches = jnp.concatenate(cols, axis=1)                          # (Ho, 9Cin, Wo)

    # Single im2col matmul (K = 9*Cin), bf16 operands, f32 accumulation.
    # H rows are the batch dim, so the lane (width) axis is never reshaped.
    wb = jnp.broadcast_to(w_ref[...][None], (Ho, Cout, 9 * Cin))
    y = jnp.einsum("hck,hkw->hcw", wb, patches.astype(jnp.bfloat16),
                   preferred_element_type=jnp.float32)               # (Ho, Cout, Wo)

    y = y + b_ref[...][None]                                         # bias
    return jnp.where(y > 0.0, y, a_ref[...][None] * y)               # PReLU


def _maxpool2x2(x):
    """MaxPool2d(kernel=2, stride=2), floor mode, on a (H, C, W) value."""
    H, C, W = x.shape
    Hp, Wp = H // 2, W // 2
    r = jnp.max(x[:2 * Hp].reshape(Hp, 2, C, W), axis=1)             # row pairs
    r2 = r.reshape(Hp * C, W)
    c0 = jnp.dot(r2, _col_select(W, Wp, 0, stride=2),
                 preferred_element_type=jnp.float32)
    c1 = jnp.dot(r2, _col_select(W, Wp, 1, stride=2),
                 preferred_element_type=jnp.float32)
    return jnp.maximum(c0, c1).reshape(Hp, C, Wp)                    # col pairs


# ----------------------------------------------------------------------------
# Fused kernel
# ----------------------------------------------------------------------------
def _pnet_kernel(x_ref, w1_ref, b1_ref, a1_ref, w2_ref, b2_ref, a2_ref,
                 w3_ref, b3_ref, a3_ref, wh_ref, bh_ref, out_ref):
    x = x_ref[0]                                                     # (H, 3, W)

    y = _conv3x3_prelu(x, w1_ref, b1_ref, a1_ref)                    # (H1, 10, W1)
    y = _maxpool2x2(y)                                               # (Hp, 10, Wp)
    y = _conv3x3_prelu(y, w2_ref, b2_ref, a2_ref)                    # (H2, 16, W2)
    y = _conv3x3_prelu(y, w3_ref, b3_ref, a3_ref)                    # (H3, 32, W3)

    H3, C3, W3 = y.shape
    # Fused 1x1 heads: row 0 = classification logit, rows 1..4 = bbox offsets.
    whb = jnp.broadcast_to(wh_ref[...][None], (H3, 5, C3))
    z = jnp.einsum("hck,hkw->hcw", whb, y.astype(jnp.bfloat16),
                   preferred_element_type=jnp.float32) + bh_ref[...][None]

    # Sigmoid only on channel 0 (iota mask) and ONE full-block store.
    ch = jax.lax.broadcasted_iota(jnp.int32, z.shape, 1)
    z = jnp.where(ch == 0, jax.nn.sigmoid(z), z)
    out_ref[0] = z


# ----------------------------------------------------------------------------
# Wrapper (public API: NCHW in, NCHW out, like the PyTorch module)
# ----------------------------------------------------------------------------
def pnet_forward(params, x_nchw):
    N, C, H, W = x_nchw.shape
    H1, W1 = H - 2, W - 2
    Hp, Wp = H1 // 2, W1 // 2
    H2, W2 = Hp - 2, Wp - 2
    H3, W3 = H2 - 2, W2 - 2

    # Layout plumbing only: (N, C, H, W) -> (N, H, C, W) so channels sit on
    # sublanes and width on lanes inside the kernel.
    x = jnp.transpose(x_nchw, (0, 2, 1, 3)).astype(jnp.float32)

    def pspec(shape):
        return pl.BlockSpec(shape, lambda n: (0,) * len(shape))

    out = pl.pallas_call(
        _pnet_kernel,
        out_shape=jax.ShapeDtypeStruct((N, H3, 5, W3), jnp.float32),
        grid=(N,),
        in_specs=[
            pl.BlockSpec((1, H, C, W), lambda n: (n, 0, 0, 0)),
            pspec((10, 27)), pspec((10, 1)), pspec((10, 1)),
            pspec((16, 90)), pspec((16, 1)), pspec((16, 1)),
            pspec((32, 144)), pspec((32, 1)), pspec((32, 1)),
            pspec((5, 32)), pspec((5, 1)),
        ],
        out_specs=pl.BlockSpec((1, H3, 5, W3), lambda n: (n, 0, 0, 0)),
        compiler_params=pltpu.CompilerParams(
            dimension_semantics=("parallel",)),
    )(x, params["w1"], params["b1"], params["a1"],
      params["w2"], params["b2"], params["a2"],
      params["w3"], params["b3"], params["a3"],
      params["wh"], params["bh"])

    out = jnp.transpose(out, (0, 2, 1, 3))     # (N, 5, H3, W3), cheap XLA op
    label = out[:, 0:1]                        # (N, 1, H3, W3)
    offset = out[:, 1:5]                       # (N, 4, H3, W3)
    return label, offset


# ----------------------------------------------------------------------------
# Parameter init (mirrors xavier_uniform + bias=0.1 + PReLU slope 0.25)
# ----------------------------------------------------------------------------
def _xavier_conv_oihw(key, cout, cin, kh, kw):
    fan_in = cin * kh * kw
    fan_out = cout * kh * kw
    bound = (6.0 / (fan_in + fan_out)) ** 0.5
    return jax.random.uniform(key, (cout, cin, kh, kw), jnp.float32,
                              -bound, bound)


def _oihw_to_k(w):
    # OIHW -> (Cout, 9*Cin) with k = j*(3*Cin) + i*Cin + cin (matches kernel).
    cout, cin, kh, kw = w.shape
    return jnp.transpose(w, (0, 3, 2, 1)).reshape(cout, kh * kw * cin)


def init_pnet_params(key):
    ks = jax.random.split(key, 5)
    raw = {
        "w1": _xavier_conv_oihw(ks[0], 10, 3, 3, 3),
        "b1": jnp.full((10,), 0.1, jnp.float32),
        "a1": jnp.full((10,), 0.25, jnp.float32),     # nn.PReLU() default slope
        "w2": _xavier_conv_oihw(ks[1], 16, 10, 3, 3),
        "b2": jnp.full((16,), 0.1, jnp.float32),
        "a2": jnp.full((16,), 0.25, jnp.float32),
        "w3": _xavier_conv_oihw(ks[2], 32, 16, 3, 3),
        "b3": jnp.full((32,), 0.1, jnp.float32),
        "a3": jnp.full((32,), 0.25, jnp.float32),
        "w41": _xavier_conv_oihw(ks[3], 1, 32, 1, 1),
        "b41": jnp.full((1,), 0.1, jnp.float32),
        "w42": _xavier_conv_oihw(ks[4], 4, 32, 1, 1),
        "b42": jnp.full((4,), 0.1, jnp.float32),
    }
    kparams = {
        "w1": _oihw_to_k(raw["w1"]).astype(jnp.bfloat16),
        "b1": raw["b1"].reshape(10, 1), "a1": raw["a1"].reshape(10, 1),
        "w2": _oihw_to_k(raw["w2"]).astype(jnp.bfloat16),
        "b2": raw["b2"].reshape(16, 1), "a2": raw["a2"].reshape(16, 1),
        "w3": _oihw_to_k(raw["w3"]).astype(jnp.bfloat16),
        "b3": raw["b3"].reshape(32, 1), "a3": raw["a3"].reshape(32, 1),
        # fused heads: row 0 = conv4_1 (label), rows 1..4 = conv4_2 (offsets)
        "wh": jnp.concatenate([raw["w41"].reshape(1, 32),
                               raw["w42"].reshape(4, 32)],
                              axis=0).astype(jnp.bfloat16),
        "bh": jnp.concatenate([raw["b41"], raw["b42"]]).reshape(5, 1),
    }
    return kparams, raw


# ----------------------------------------------------------------------------
# Pure-JAX (XLA) f32 reference of the PyTorch module, for correctness checking
# ----------------------------------------------------------------------------
def pnet_reference(raw, x_nchw):
    def conv(x, w, b):
        y = jax.lax.conv_general_dilated(
            x, w, window_strides=(1, 1), padding="VALID",
            dimension_numbers=("NCHW", "OIHW", "NCHW"))
        return y + b.reshape(1, -1, 1, 1)

    def prelu(x, a):
        return jnp.where(x > 0, x, a.reshape(1, -1, 1, 1) * x)

    y = prelu(conv(x_nchw, raw["w1"], raw["b1"]), raw["a1"])
    y = jax.lax.reduce_window(y, -jnp.inf, jax.lax.max,
                              (1, 1, 2, 2), (1, 1, 2, 2), "VALID")
    y = prelu(conv(y, raw["w2"], raw["b2"]), raw["a2"])
    y = prelu(conv(y, raw["w3"], raw["b3"]), raw["a3"])
    label = jax.nn.sigmoid(conv(y, raw["w41"], raw["b41"]))
    offset = conv(y, raw["w42"], raw["b42"])
    return label, offset


if __name__ == "__main__":
    key = jax.random.PRNGKey(0)
    pkey, xkey = jax.random.split(key)
    kparams, raw = init_pnet_params(pkey)

    # Small NCHW input consistent with PNet (needs >= 12x12 spatial).
    x = jax.random.normal(xkey, (2, 3, 18, 18), jnp.float32)

    fwd = jax.jit(pnet_forward)
    label, offset = jax.block_until_ready(fwd(kparams, x))

    assert label.shape == (2, 1, 4, 4), label.shape
    assert offset.shape == (2, 4, 4, 4), offset.shape

    # Tolerance accounts for bf16 MXU operands (f32 accumulation) across the
    # three stacked convs vs. the pure-f32 XLA reference.
    lab_ref, off_ref = pnet_reference(raw, x)
    assert jnp.allclose(label, lab_ref, atol=3e-2, rtol=3e-2), \
        float(jnp.max(jnp.abs(label - lab_ref)))
    assert jnp.allclose(offset, off_ref, atol=3e-2, rtol=3e-2), \
        float(jnp.max(jnp.abs(offset - off_ref)))

    print("KERNEL_OK")
</pallas_src>

<mosaic_0001>
module attributes {stable_mosaic.version = 11 : i64} {
  func.func @_pnet_kernel(%arg0: i32, %arg1: memref<1x18x3x18xf32, #tpu.memory_space<vmem>>, %arg2: memref<10x27xbf16, #tpu.memory_space<vmem>>, %arg3: memref<10x1xf32, #tpu.memory_space<vmem>>, %arg4: memref<10x1xf32, #tpu.memory_space<vmem>>, %arg5: memref<16x90xbf16, #tpu.memory_space<vmem>>, %arg6: memref<16x1xf32, #tpu.memory_space<vmem>>, %arg7: memref<16x1xf32, #tpu.memory_space<vmem>>, %arg8: memref<32x144xbf16, #tpu.memory_space<vmem>>, %arg9: memref<32x1xf32, #tpu.memory_space<vmem>>, %arg10: memref<32x1xf32, #tpu.memory_space<vmem>>, %arg11: memref<5x32xbf16, #tpu.memory_space<vmem>>, %arg12: memref<5x1xf32, #tpu.memory_space<vmem>>, %arg13: memref<1x4x5x4xf32, #tpu.memory_space<vmem>>) attributes {dimension_semantics = [#tpu.dimension_semantics<parallel>], iteration_bounds = array<i64: 2>, scalar_prefetch = 0 : i64, scratch_operands = 0 : i64, tpu.core_type = #tpu.core_type<tc>, window_params = [{transform_indices = @transform_0, window_bounds = array<i64: 1, 18, 3, 18>}, {pipeline_mode = #tpu.pipeline_mode<synchronous>, transform_indices = @transform_1, window_bounds = array<i64: 10, 27>}, {pipeline_mode = #tpu.pipeline_mode<synchronous>, transform_indices = @transform_2, window_bounds = array<i64: 10, 1>}, {pipeline_mode = #tpu.pipeline_mode<synchronous>, transform_indices = @transform_3, window_bounds = array<i64: 10, 1>}, {pipeline_mode = #tpu.pipeline_mode<synchronous>, transform_indices = @transform_4, window_bounds = array<i64: 16, 90>}, {pipeline_mode = #tpu.pipeline_mode<synchronous>, transform_indices = @transform_5, window_bounds = array<i64: 16, 1>}, {pipeline_mode = #tpu.pipeline_mode<synchronous>, transform_indices = @transform_6, window_bounds = array<i64: 16, 1>}, {pipeline_mode = #tpu.pipeline_mode<synchronous>, transform_indices = @transform_7, window_bounds = array<i64: 32, 144>}, {pipeline_mode = #tpu.pipeline_mode<synchronous>, transform_indices = @transform_8, window_bounds = array<i64: 32, 1>}, {pipeline_mode = #tpu.pipeline_mode<synchronous>, transform_indices = @transform_9, window_bounds = array<i64: 32, 1>}, {pipeline_mode = #tpu.pipeline_mode<synchronous>, transform_indices = @transform_10, window_bounds = array<i64: 5, 32>}, {pipeline_mode = #tpu.pipeline_mode<synchronous>, transform_indices = @transform_11, window_bounds = array<i64: 5, 1>}, {transform_indices = @transform_12, window_bounds = array<i64: 1, 4, 5, 4>}]} {
    %c0 = arith.constant 0 : index
    %c0_0 = arith.constant 0 : index
    %c0_1 = arith.constant 0 : index
    %c0_2 = arith.constant 0 : index
    %0 = vector.load %arg1[%c0, %c0_0, %c0_1, %c0_2] : memref<1x18x3x18xf32, #tpu.memory_space<vmem>>, vector<1x18x3x18xf32>
    %1 = vector.shape_cast %0 : vector<1x18x3x18xf32> to vector<18x3x18xf32>
    %2 = vector.extract_strided_slice %1 {offsets = [0, 0, 0], sizes = [16, 3, 18], strides = [1, 1, 1]} : vector<18x3x18xf32> to vector<16x3x18xf32>
    %3 = vector.extract_strided_slice %1 {offsets = [1, 0, 0], sizes = [16, 3, 18], strides = [1, 1, 1]} : vector<18x3x18xf32> to vector<16x3x18xf32>
    %4 = vector.extract_strided_slice %1 {offsets = [2, 0, 0], sizes = [16, 3, 18], strides = [1, 1, 1]} : vector<18x3x18xf32> to vector<16x3x18xf32>
    %5 = tpu.concatenate %2, %3, %4 in 1 : vector<16x3x18xf32>, vector<16x3x18xf32>, vector<16x3x18xf32> -> vector<16x9x18xf32>
    %6 = vector.shape_cast %5 : vector<16x9x18xf32> to vector<144x18xf32>
    %7 = tpu.iota {dimensions = array<i32: 0>} : vector<18x16xi32>
    %8 = tpu.iota {dimensions = array<i32: 1>} : vector<18x16xi32>
    %c1_i32 = arith.constant 1 : i32
    %9 = vector.broadcast %c1_i32 : i32 to vector<18x16xi32>
    %10 = arith.muli %8, %9 : vector<18x16xi32>
    %c0_i32 = arith.constant 0 : i32
    %11 = vector.broadcast %c0_i32 : i32 to vector<18x16xi32>
    %12 = arith.addi %10, %11 : vector<18x16xi32>
    %13 = arith.cmpi eq, %7, %12 : vector<18x16xi32>
    %cst = arith.constant 1.000000e+00 : f32
    %cst_3 = arith.constant 0.000000e+00 : f32
    %14 = vector.broadcast %cst : f32 to vector<18x16xf32>
    %15 = vector.broadcast %cst_3 : f32 to vector<18x16xf32>
    %16 = arith.select %13, %14, %15 : vector<18x16xi1>, vector<18x16xf32>
    %cst_4 = arith.constant dense<0.000000e+00> : vector<144x16xf32>
    %17 = tpu.matmul %6, %16, %cst_4 {dimension_numbers = #tpu.dot_dimension_numbers<[1], [0], [0], [1], [0, 0, 1, 1], [], []>} : vector<144x18xf32>, vector<18x16xf32>, vector<144x16xf32> -> vector<144x16xf32>
    %18 = vector.shape_cast %17 : vector<144x16xf32> to vector<16x9x16xf32>
    %19 = tpu.iota {dimensions = array<i32: 0>} : vector<18x16xi32>
    %20 = tpu.iota {dimensions = array<i32: 1>} : vector<18x16xi32>
    %c1_i32_5 = arith.constant 1 : i32
    %21 = vector.broadcast %c1_i32_5 : i32 to vector<18x16xi32>
    %22 = arith.muli %20, %21 : vector<18x16xi32>
    %c1_i32_6 = arith.constant 1 : i32
    %23 = vector.broadcast %c1_i32_6 : i32 to vector<18x16xi32>
    %24 = arith.addi %22, %23 : vector<18x16xi32>
    %25 = arith.cmpi eq, %19, %24 : vector<18x16xi32>
    %cst_7 = arith.constant 1.000000e+00 : f32
    %cst_8 = arith.constant 0.000000e+00 : f32
    %26 = vector.broadcast %cst_7 : f32 to vector<18x16xf32>
    %27 = vector.broadcast %cst_8 : f32 to vector<18x16xf32>
    %28 = arith.select %25, %26, %27 : vector<18x16xi1>, vector<18x16xf32>
    %cst_9 = arith.constant dense<0.000000e+00> : vector<144x16xf32>
    %29 = tpu.matmul %6, %28, %cst_9 {dimension_numbers = #tpu.dot_dimension_numbers<[1], [0], [0], [1], [0, 0, 1, 1], [], []>} : vector<144x18xf32>, vector<18x16xf32>, vector<144x16xf32> -> vector<144x16xf32>
    %30 = vector.shape_cast %29 : vector<144x16xf32> to vector<16x9x16xf32>
    %31 = tpu.iota {dimensions = array<i32: 0>} : vector<18x16xi32>
    %32 = tpu.iota {dimensions = array<i32: 1>} : vector<18x16xi32>
    %c1_i32_10 = arith.constant 1 : i32
    %33 = vector.broadcast %c1_i32_10 : i32 to vector<18x16xi32>
    %34 = arith.muli %32, %33 : vector<18x16xi32>
    %c2_i32 = arith.constant 2 : i32
    %35 = vector.broadcast %c2_i32 : i32 to vector<18x16xi32>
    %36 = arith.addi %34, %35 : vector<18x16xi32>
    %37 = arith.cmpi eq, %31, %36 : vector<18x16xi32>
    %cst_11 = arith.constant 1.000000e+00 : f32
    %cst_12 = arith.constant 0.000000e+00 : f32
    %38 = vector.broadcast %cst_11 : f32 to vector<18x16xf32>
    %39 = vector.broadcast %cst_12 : f32 to vector<18x16xf32>
    %40 = arith.select %37, %38, %39 : vector<18x16xi1>, vector<18x16xf32>
    %cst_13 = arith.constant dense<0.000000e+00> : vector<144x16xf32>
    %41 = tpu.matmul %6, %40, %cst_13 {dimension_numbers = #tpu.dot_dimension_numbers<[1], [0], [0], [1], [0, 0, 1, 1], [], []>} : vector<144x18xf32>, vector<18x16xf32>, vector<144x16xf32> -> vector<144x16xf32>
    %42 = vector.shape_cast %41 : vector<144x16xf32> to vector<16x9x16xf32>
    %43 = tpu.concatenate %18, %30, %42 in 1 : vector<16x9x16xf32>, vector<16x9x16xf32>, vector<16x9x16xf32> -> vector<16x27x16xf32>
    %c0_14 = arith.constant 0 : index
    %c0_15 = arith.constant 0 : index
    %44 = vector.load %arg2[%c0_14, %c0_15] : memref<10x27xbf16, #tpu.memory_space<vmem>>, vector<10x27xbf16>
    %45 = vector.shape_cast %44 : vector<10x27xbf16> to vector<1x10x27xbf16>
    %46 = vector.shape_cast %45 : vector<1x10x27xbf16> to vector<1x10x27xbf16>
    %47 = vector.broadcast %46 : vector<1x10x27xbf16> to vector<16x10x27xbf16>
    %48 = arith.truncf %43 : vector<16x27x16xf32> to vector<16x27x16xbf16>
    "tpu.trace_start"() <{level = 10 : i32, message = "hck,hkw->hcw"}> : () -> ()
    %cst_16 = arith.constant dense<0.000000e+00> : vector<16x10x16xf32>
    %49 = tpu.matmul %47, %48, %cst_16 {dimension_numbers = #tpu.dot_dimension_numbers<[2], [1], [1], [2], [0, 0, 0, 1, 1, 2], [0], [0]>} : vector<16x10x27xbf16>, vector<16x27x16xbf16>, vector<16x10x16xf32> -> vector<16x10x16xf32>
    "tpu.trace_stop"() : () -> ()
    %c0_17 = arith.constant 0 : index
    %c0_18 = arith.constant 0 : index
    %50 = vector.load %arg3[%c0_17, %c0_18] : memref<10x1xf32, #tpu.memory_space<vmem>>, vector<10x1xf32>
    %51 = vector.shape_cast %50 : vector<10x1xf32> to vector<1x10x1xf32>
    %52 = vector.broadcast %51 : vector<1x10x1xf32> to vector<16x10x16xf32>
    %53 = arith.addf %49, %52 : vector<16x10x16xf32>
    %cst_19 = arith.constant 0.000000e+00 : f32
    %54 = vector.broadcast %cst_19 : f32 to vector<16x10x16xf32>
    %55 = arith.cmpf ogt, %53, %54 : vector<16x10x16xf32>
    %c0_20 = arith.constant 0 : index
    %c0_21 = arith.constant 0 : index
    %56 = vector.load %arg4[%c0_20, %c0_21] : memref<10x1xf32, #tpu.memory_space<vmem>>, vector<10x1xf32>
    %57 = vector.shape_cast %56 : vector<10x1xf32> to vector<1x10x1xf32>
    %58 = vector.broadcast %57 : vector<1x10x1xf32> to vector<16x10x16xf32>
    %59 = arith.mulf %58, %53 : vector<16x10x16xf32>
    %60 = arith.select %55, %53, %59 : vector<16x10x16xi1>, vector<16x10x16xf32>
    %61 = vector.shape_cast %60 : vector<16x10x16xf32> to vector<8x2x10x16xf32>
    %cst_22 = arith.constant dense<0xFF800000> : vector<8x10x16xf32>
    %62 = vector.multi_reduction <maximumf>, %61, %cst_22 [1] : vector<8x2x10x16xf32> to vector<8x10x16xf32>
    %63 = vector.shape_cast %62 : vector<8x10x16xf32> to vector<80x16xf32>
    %64 = tpu.iota {dimensions = array<i32: 0>} : vector<16x8xi32>
    %65 = tpu.iota {dimensions = array<i32: 1>} : vector<16x8xi32>
    %c2_i32_23 = arith.constant 2 : i32
    %66 = vector.broadcast %c2_i32_23 : i32 to vector<16x8xi32>
    %67 = arith.muli %65, %66 : vector<16x8xi32>
    %c0_i32_24 = arith.constant 0 : i32
    %68 = vector.broadcast %c0_i32_24 : i32 to vector<16x8xi32>
    %69 = arith.addi %67, %68 : vector<16x8xi32>
    %70 = arith.cmpi eq, %64, %69 : vector<16x8xi32>
    %cst_25 = arith.constant 1.000000e+00 : f32
    %cst_26 = arith.constant 0.000000e+00 : f32
    %71 = vector.broadcast %cst_25 : f32 to vector<16x8xf32>
    %72 = vector.broadcast %cst_26 : f32 to vector<16x8xf32>
    %73 = arith.select %70, %71, %72 : vector<16x8xi1>, vector<16x8xf32>
    %cst_27 = arith.constant dense<0.000000e+00> : vector<80x8xf32>
    %74 = tpu.matmul %63, %73, %cst_27 {dimension_numbers = #tpu.dot_dimension_numbers<[1], [0], [0], [1], [0, 0, 1, 1], [], []>} : vector<80x16xf32>, vector<16x8xf32>, vector<80x8xf32> -> vector<80x8xf32>
    %75 = tpu.iota {dimensions = array<i32: 0>} : vector<16x8xi32>
    %76 = tpu.iota {dimensions = array<i32: 1>} : vector<16x8xi32>
    %c2_i32_28 = arith.constant 2 : i32
    %77 = vector.broadcast %c2_i32_28 : i32 to vector<16x8xi32>
    %78 = arith.muli %76, %77 : vector<16x8xi32>
    %c1_i32_29 = arith.constant 1 : i32
    %79 = vector.broadcast %c1_i32_29 : i32 to vector<16x8xi32>
    %80 = arith.addi %78, %79 : vector<16x8xi32>
    %81 = arith.cmpi eq, %75, %80 : vector<16x8xi32>
    %cst_30 = arith.constant 1.000000e+00 : f32
    %cst_31 = arith.constant 0.000000e+00 : f32
    %82 = vector.broadcast %cst_30 : f32 to vector<16x8xf32>
    %83 = vector.broadcast %cst_31 : f32 to vector<16x8xf32>
    %84 = arith.select %81, %82, %83 : vector<16x8xi1>, vector<16x8xf32>
    %cst_32 = arith.constant dense<0.000000e+00> : vector<80x8xf32>
    %85 = tpu.matmul %63, %84, %cst_32 {dimension_numbers = #tpu.dot_dimension_numbers<[1], [0], [0], [1], [0, 0, 1, 1], [], []>} : vector<80x16xf32>, vector<16x8xf32>, vector<80x8xf32> -> vector<80x8xf32>
    %86 = arith.maximumf %74, %85 : vector<80x8xf32>
    %87 = vector.shape_cast %86 : vector<80x8xf32> to vector<8x10x8xf32>
    %88 = vector.extract_strided_slice %87 {offsets = [0, 0, 0], sizes = [6, 10, 8], strides = [1, 1, 1]} : vector<8x10x8xf32> to vector<6x10x8xf32>
    %89 = vector.extract_strided_slice %87 {offsets = [1, 0, 0], sizes = [6, 10, 8], strides = [1, 1, 1]} : vector<8x10x8xf32> to vector<6x10x8xf32>
    %90 = vector.extract_strided_slice %87 {offsets = [2, 0, 0], sizes = [6, 10, 8], strides = [1, 1, 1]} : vector<8x10x8xf32> to vector<6x10x8xf32>
    %91 = tpu.concatenate %88, %89, %90 in 1 : vector<6x10x8xf32>, vector<6x10x8xf32>, vector<6x10x8xf32> -> vector<6x30x8xf32>
    %92 = vector.shape_cast %91 : vector<6x30x8xf32> to vector<180x8xf32>
    %93 = tpu.iota {dimensions = array<i32: 0>} : vector<8x6xi32>
    %94 = tpu.iota {dimensions = array<i32: 1>} : vector<8x6xi32>
    %c1_i32_33 = arith.constant 1 : i32
    %95 = vector.broadcast %c1_i32_33 : i32 to vector<8x6xi32>
    %96 = arith.muli %94, %95 : vector<8x6xi32>
    %c0_i32_34 = arith.constant 0 : i32
    %97 = vector.broadcast %c0_i32_34 : i32 to vector<8x6xi32>
    %98 = arith.addi %96, %97 : vector<8x6xi32>
    %99 = arith.cmpi eq, %93, %98 : vector<8x6xi32>
    %cst_35 = arith.constant 1.000000e+00 : f32
    %cst_36 = arith.constant 0.000000e+00 : f32
    %100 = vector.broadcast %cst_35 : f32 to vector<8x6xf32>
    %101 = vector.broadcast %cst_36 : f32 to vector<8x6xf32>
    %102 = arith.select %99, %100, %101 : vector<8x6xi1>, vector<8x6xf32>
    %cst_37 = arith.constant dense<0.000000e+00> : vector<180x6xf32>
    %103 = tpu.matmul %92, %102, %cst_37 {dimension_numbers = #tpu.dot_dimension_numbers<[1], [0], [0], [1], [0, 0, 1, 1], [], []>} : vector<180x8xf32>, vector<8x6xf32>, vector<180x6xf32> -> vector<180x6xf32>
    %104 = vector.shape_cast %103 : vector<180x6xf32> to vector<6x30x6xf32>
    %105 = tpu.iota {dimensions = array<i32: 0>} : vector<8x6xi32>
    %106 = tpu.iota {dimensions = array<i32: 1>} : vector<8x6xi32>
    %c1_i32_38 = arith.constant 1 : i32
    %107 = vector.broadcast %c1_i32_38 : i32 to vector<8x6xi32>
    %108 = arith.muli %106, %107 : vector<8x6xi32>
    %c1_i32_39 = arith.constant 1 : i32
    %109 = vector.broadcast %c1_i32_39 : i32 to vector<8x6xi32>
    %110 = arith.addi %108, %109 : vector<8x6xi32>
    %111 = arith.cmpi eq, %105, %110 : vector<8x6xi32>
    %cst_40 = arith.constant 1.000000e+00 : f32
    %cst_41 = arith.constant 0.000000e+00 : f32
    %112 = vector.broadcast %cst_40 : f32 to vector<8x6xf32>
    %113 = vector.broadcast %cst_41 : f32 to vector<8x6xf32>
    %114 = arith.select %111, %112, %113 : vector<8x6xi1>, vector<8x6xf32>
    %cst_42 = arith.constant dense<0.000000e+00> : vector<180x6xf32>
    %115 = tpu.matmul %92, %114, %cst_42 {dimension_numbers = #tpu.dot_dimension_numbers<[1], [0], [0], [1], [0, 0, 1, 1], [], []>} : vector<180x8xf32>, vector<8x6xf32>, vector<180x6xf32> -> vector<180x6xf32>
    %116 = vector.shape_cast %115 : vector<180x6xf32> to vector<6x30x6xf32>
    %117 = tpu.iota {dimensions = array<i32: 0>} : vector<8x6xi32>
    %118 = tpu.iota {dimensions = array<i32: 1>} : vector<8x6xi32>
    %c1_i32_43 = arith.constant 1 : i32
    %119 = vector.broadcast %c1_i32_43 : i32 to vector<8x6xi32>
    %120 = arith.muli %118, %119 : vector<8x6xi32>
    %c2_i32_44 = arith.constant 2 : i32
    %121 = vector.broadcast %c2_i32_44 : i32 to vector<8x6xi32>
    %122 = arith.addi %120, %121 : vector<8x6xi32>
    %123 = arith.cmpi eq, %117, %122 : vector<8x6xi32>
    %cst_45 = arith.constant 1.000000e+00 : f32
    %cst_46 = arith.constant 0.000000e+00 : f32
    %124 = vector.broadcast %cst_45 : f32 to vector<8x6xf32>
    %125 = vector.broadcast %cst_46 : f32 to vector<8x6xf32>
    %126 = arith.select %123, %124, %125 : vector<8x6xi1>, vector<8x6xf32>
    %cst_47 = arith.constant dense<0.000000e+00> : vector<180x6xf32>
    %127 = tpu.matmul %92, %126, %cst_47 {dimension_numbers = #tpu.dot_dimension_numbers<[1], [0], [0], [1], [0, 0, 1, 1], [], []>} : vector<180x8xf32>, vector<8x6xf32>, vector<180x6xf32> -> vector<180x6xf32>
    %128 = vector.shape_cast %127 : vector<180x6xf32> to vector<6x30x6xf32>
    %129 = tpu.concatenate %104, %116, %128 in 1 : vector<6x30x6xf32>, vector<6x30x6xf32>, vector<6x30x6xf32> -> vector<6x90x6xf32>
    %c0_48 = arith.constant 0 : index
    %c0_49 = arith.constant 0 : index
    %130 = vector.load %arg5[%c0_48, %c0_49] : memref<16x90xbf16, #tpu.memory_space<vmem>>, vector<16x90xbf16>
    %131 = vector.shape_cast %130 : vector<16x90xbf16> to vector<1x16x90xbf16>
    %132 = vector.shape_cast %131 : vector<1x16x90xbf16> to vector<1x16x90xbf16>
    %133 = vector.broadcast %132 : vector<1x16x90xbf16> to vector<6x16x90xbf16>
    %134 = arith.truncf %129 : vector<6x90x6xf32> to vector<6x90x6xbf16>
    "tpu.trace_start"() <{level = 10 : i32, message = "hck,hkw->hcw"}> : () -> ()
    %cst_50 = arith.constant dense<0.000000e+00> : vector<6x16x6xf32>
    %135 = tpu.matmul %133, %134, %cst_50 {dimension_numbers = #tpu.dot_dimension_numbers<[2], [1], [1], [2], [0, 0, 0, 1, 1, 2], [0], [0]>} : vector<6x16x90xbf16>, vector<6x90x6xbf16>, vector<6x16x6xf32> -> vector<6x16x6xf32>
    "tpu.trace_stop"() : () -> ()
    %c0_51 = arith.constant 0 : index
    %c0_52 = arith.constant 0 : index
    %136 = vector.load %arg6[%c0_51, %c0_52] : memref<16x1xf32, #tpu.memory_space<vmem>>, vector<16x1xf32>
    %137 = vector.shape_cast %136 : vector<16x1xf32> to vector<1x16x1xf32>
    %138 = vector.broadcast %137 : vector<1x16x1xf32> to vector<6x16x6xf32>
    %139 = arith.addf %135, %138 : vector<6x16x6xf32>
    %cst_53 = arith.constant 0.000000e+00 : f32
    %140 = vector.broadcast %cst_53 : f32 to vector<6x16x6xf32>
    %141 = arith.cmpf ogt, %139, %140 : vector<6x16x6xf32>
    %c0_54 = arith.constant 0 : index
    %c0_55 = arith.constant 0 : index
    %142 = vector.load %arg7[%c0_54, %c0_55] : memref<16x1xf32, #tpu.memory_space<vmem>>, vector<16x1xf32>
    %143 = vector.shape_cast %142 : vector<16x1xf32> to vector<1x16x1xf32>
    %144 = vector.broadcast %143 : vector<1x16x1xf32> to vector<6x16x6xf32>
    %145 = arith.mulf %144, %139 : vector<6x16x6xf32>
    %146 = arith.select %141, %139, %145 : vector<6x16x6xi1>, vector<6x16x6xf32>
    %147 = vector.extract_strided_slice %146 {offsets = [0, 0, 0], sizes = [4, 16, 6], strides = [1, 1, 1]} : vector<6x16x6xf32> to vector<4x16x6xf32>
    %148 = vector.extract_strided_slice %146 {offsets = [1, 0, 0], sizes = [4, 16, 6], strides = [1, 1, 1]} : vector<6x16x6xf32> to vector<4x16x6xf32>
    %149 = vector.extract_strided_slice %146 {offsets = [2, 0, 0], sizes = [4, 16, 6], strides = [1, 1, 1]} : vector<6x16x6xf32> to vector<4x16x6xf32>
    %150 = tpu.concatenate %147, %148, %149 in 1 : vector<4x16x6xf32>, vector<4x16x6xf32>, vector<4x16x6xf32> -> vector<4x48x6xf32>
    %151 = vector.shape_cast %150 : vector<4x48x6xf32> to vector<192x6xf32>
    %152 = tpu.iota {dimensions = array<i32: 0>} : vector<6x4xi32>
    %153 = tpu.iota {dimensions = array<i32: 1>} : vector<6x4xi32>
    %c1_i32_56 = arith.constant 1 : i32
    %154 = vector.broadcast %c1_i32_56 : i32 to vector<6x4xi32>
    %155 = arith.muli %153, %154 : vector<6x4xi32>
    %c0_i32_57 = arith.constant 0 : i32
    %156 = vector.broadcast %c0_i32_57 : i32 to vector<6x4xi32>
    %157 = arith.addi %155, %156 : vector<6x4xi32>
    %158 = arith.cmpi eq, %152, %157 : vector<6x4xi32>
    %cst_58 = arith.constant 1.000000e+00 : f32
    %cst_59 = arith.constant 0.000000e+00 : f32
    %159 = vector.broadcast %cst_58 : f32 to vector<6x4xf32>
    %160 = vector.broadcast %cst_59 : f32 to vector<6x4xf32>
    %161 = arith.select %158, %159, %160 : vector<6x4xi1>, vector<6x4xf32>
    %cst_60 = arith.constant dense<0.000000e+00> : vector<192x4xf32>
    %162 = tpu.matmul %151, %161, %cst_60 {dimension_numbers = #tpu.dot_dimension_numbers<[1], [0], [0], [1], [0, 0, 1, 1], [], []>} : vector<192x6xf32>, vector<6x4xf32>, vector<192x4xf32> -> vector<192x4xf32>
    %163 = vector.shape_cast %162 : vector<192x4xf32> to vector<4x48x4xf32>
    %164 = tpu.iota {dimensions = array<i32: 0>} : vector<6x4xi32>
    %165 = tpu.iota {dimensions = array<i32: 1>} : vector<6x4xi32>
    %c1_i32_61 = arith.constant 1 : i32
    %166 = vector.broadcast %c1_i32_61 : i32 to vector<6x4xi32>
    %167 = arith.muli %165, %166 : vector<6x4xi32>
    %c1_i32_62 = arith.constant 1 : i32
    %168 = vector.broadcast %c1_i32_62 : i32 to vector<6x4xi32>
    %169 = arith.addi %167, %168 : vector<6x4xi32>
    %170 = arith.cmpi eq, %164, %169 : vector<6x4xi32>
    %cst_63 = arith.constant 1.000000e+00 : f32
    %cst_64 = arith.constant 0.000000e+00 : f32
    %171 = vector.broadcast %cst_63 : f32 to vector<6x4xf32>
    %172 = vector.broadcast %cst_64 : f32 to vector<6x4xf32>
    %173 = arith.select %170, %171, %172 : vector<6x4xi1>, vector<6x4xf32>
    %cst_65 = arith.constant dense<0.000000e+00> : vector<192x4xf32>
    %174 = tpu.matmul %151, %173, %cst_65 {dimension_numbers = #tpu.dot_dimension_numbers<[1], [0], [0], [1], [0, 0, 1, 1], [], []>} : vector<192x6xf32>, vector<6x4xf32>, vector<192x4xf32> -> vector<192x4xf32>
    %175 = vector.shape_cast %174 : vector<192x4xf32> to vector<4x48x4xf32>
    %176 = tpu.iota {dimensions = array<i32: 0>} : vector<6x4xi32>
    %177 = tpu.iota {dimensions = array<i32: 1>} : vector<6x4xi32>
    %c1_i32_66 = arith.constant 1 : i32
    %178 = vector.broadcast %c1_i32_66 : i32 to vector<6x4xi32>
    %179 = arith.muli %177, %178 : vector<6x4xi32>
    %c2_i32_67 = arith.constant 2 : i32
    %180 = vector.broadcast %c2_i32_67 : i32 to vector<6x4xi32>
    %181 = arith.addi %179, %180 : vector<6x4xi32>
    %182 = arith.cmpi eq, %176, %181 : vector<6x4xi32>
    %cst_68 = arith.constant 1.000000e+00 : f32
    %cst_69 = arith.constant 0.000000e+00 : f32
    %183 = vector.broadcast %cst_68 : f32 to vector<6x4xf32>
    %184 = vector.broadcast %cst_69 : f32 to vector<6x4xf32>
    %185 = arith.select %182, %183, %184 : vector<6x4xi1>, vector<6x4xf32>
    %cst_70 = arith.constant dense<0.000000e+00> : vector<192x4xf32>
    %186 = tpu.matmul %151, %185, %cst_70 {dimension_numbers = #tpu.dot_dimension_numbers<[1], [0], [0], [1], [0, 0, 1, 1], [], []>} : vector<192x6xf32>, vector<6x4xf32>, vector<192x4xf32> -> vector<192x4xf32>
    %187 = vector.shape_cast %186 : vector<192x4xf32> to vector<4x48x4xf32>
    %188 = tpu.concatenate %163, %175, %187 in 1 : vector<4x48x4xf32>, vector<4x48x4xf32>, vector<4x48x4xf32> -> vector<4x144x4xf32>
    %c0_71 = arith.constant 0 : index
    %c0_72 = arith.constant 0 : index
    %189 = vector.load %arg8[%c0_71, %c0_72] : memref<32x144xbf16, #tpu.memory_space<vmem>>, vector<32x144xbf16>
    %190 = vector.shape_cast %189 : vector<32x144xbf16> to vector<1x32x144xbf16>
    %191 = vector.shape_cast %190 : vector<1x32x144xbf16> to vector<1x32x144xbf16>
    %192 = vector.broadcast %191 : vector<1x32x144xbf16> to vector<4x32x144xbf16>
    %193 = arith.truncf %188 : vector<4x144x4xf32> to vector<4x144x4xbf16>
    "tpu.trace_start"() <{level = 10 : i32, message = "hck,hkw->hcw"}> : () -> ()
    %cst_73 = arith.constant dense<0.000000e+00> : vector<4x32x4xf32>
    %194 = tpu.matmul %192, %193, %cst_73 {dimension_numbers = #tpu.dot_dimension_numbers<[2], [1], [1], [2], [0, 0, 0, 1, 1, 2], [0], [0]>} : vector<4x32x144xbf16>, vector<4x144x4xbf16>, vector<4x32x4xf32> -> vector<4x32x4xf32>
    "tpu.trace_stop"() : () -> ()
    %c0_74 = arith.constant 0 : index
    %c0_75 = arith.constant 0 : index
    %195 = vector.load %arg9[%c0_74, %c0_75] : memref<32x1xf32, #tpu.memory_space<vmem>>, vector<32x1xf32>
    %196 = vector.shape_cast %195 : vector<32x1xf32> to vector<1x32x1xf32>
    %197 = vector.broadcast %196 : vector<1x32x1xf32> to vector<4x32x4xf32>
    %198 = arith.addf %194, %197 : vector<4x32x4xf32>
    %cst_76 = arith.constant 0.000000e+00 : f32
    %199 = vector.broadcast %cst_76 : f32 to vector<4x32x4xf32>
    %200 = arith.cmpf ogt, %198, %199 : vector<4x32x4xf32>
    %c0_77 = arith.constant 0 : index
    %c0_78 = arith.constant 0 : index
    %201 = vector.load %arg10[%c0_77, %c0_78] : memref<32x1xf32, #tpu.memory_space<vmem>>, vector<32x1xf32>
    %202 = vector.shape_cast %201 : vector<32x1xf32> to vector<1x32x1xf32>
    %203 = vector.broadcast %202 : vector<1x32x1xf32> to vector<4x32x4xf32>
    %204 = arith.mulf %203, %198 : vector<4x32x4xf32>
    %205 = arith.select %200, %198, %204 : vector<4x32x4xi1>, vector<4x32x4xf32>
    %c0_79 = arith.constant 0 : index
    %c0_80 = arith.constant 0 : index
    %206 = vector.load %arg11[%c0_79, %c0_80] : memref<5x32xbf16, #tpu.memory_space<vmem>>, vector<5x32xbf16>
    %207 = vector.shape_cast %206 : vector<5x32xbf16> to vector<1x5x32xbf16>
    %208 = vector.shape_cast %207 : vector<1x5x32xbf16> to vector<1x5x32xbf16>
    %209 = vector.broadcast %208 : vector<1x5x32xbf16> to vector<4x5x32xbf16>
    %210 = arith.truncf %205 : vector<4x32x4xf32> to vector<4x32x4xbf16>
    "tpu.trace_start"() <{level = 10 : i32, message = "hck,hkw->hcw"}> : () -> ()
    %cst_81 = arith.constant dense<0.000000e+00> : vector<4x5x4xf32>
    %211 = tpu.matmul %209, %210, %cst_81 {dimension_numbers = #tpu.dot_dimension_numbers<[2], [1], [1], [2], [0, 0, 0, 1, 1, 2], [0], [0]>} : vector<4x5x32xbf16>, vector<4x32x4xbf16>, vector<4x5x4xf32> -> vector<4x5x4xf32>
    "tpu.trace_stop"() : () -> ()
    %c0_82 = arith.constant 0 : index
    %c0_83 = arith.constant 0 : index
    %212 = vector.load %arg12[%c0_82, %c0_83] : memref<5x1xf32, #tpu.memory_space<vmem>>, vector<5x1xf32>
    %213 = vector.shape_cast %212 : vector<5x1xf32> to vector<1x5x1xf32>
    %214 = vector.broadcast %213 : vector<1x5x1xf32> to vector<4x5x4xf32>
    %215 = arith.addf %211, %214 : vector<4x5x4xf32>
    %216 = tpu.iota {dimensions = array<i32: 1>} : vector<4x5x4xi32>
    %c0_i32_84 = arith.constant 0 : i32
    %217 = vector.broadcast %c0_i32_84 : i32 to vector<4x5x4xi32>
    %218 = arith.cmpi eq, %216, %217 : vector<4x5x4xi32>
    %219 = arith.negf %215 : vector<4x5x4xf32>
    %220 = math.exp %219 : vector<4x5x4xf32>
    %cst_85 = arith.constant 1.000000e+00 : f32
    %221 = vector.broadcast %cst_85 : f32 to vector<4x5x4xf32>
    %222 = arith.addf %221, %220 : vector<4x5x4xf32>
    %223 = arith.divf %221, %222 : vector<4x5x4xf32>
    %224 = arith.select %218, %223, %215 : vector<4x5x4xi1>, vector<4x5x4xf32>
    %c0_86 = arith.constant 0 : index
    %c0_87 = arith.constant 0 : index
    %c0_88 = arith.constant 0 : index
    %c0_89 = arith.constant 0 : index
    %225 = vector.load %arg13[%c0_86, %c0_87, %c0_88, %c0_89] : memref<1x4x5x4xf32, #tpu.memory_space<vmem>>, vector<1x4x5x4xf32>
    %226 = vector.shape_cast %225 : vector<1x4x5x4xf32> to vector<4x5x4xf32>
    %227 = vector.shape_cast %224 : vector<4x5x4xf32> to vector<1x4x5x4xf32>
    tpu.vector_store %arg13[%c0_86, %c0_87, %c0_88, %c0_89], %227 {strides = array<i32>} : memref<1x4x5x4xf32, #tpu.memory_space<vmem>>, vector<1x4x5x4xf32>,
    return
  }
  func.func @transform_0(%arg0: i32) -> (i32, i32, i32, i32) {
    %c0_i32 = arith.constant 0 : i32
    %c0_i32_0 = arith.constant 0 : i32
    %c0_i32_1 = arith.constant 0 : i32
    %c0_i32_2 = arith.constant 0 : i32
    return %arg0, %c0_i32, %c0_i32_0, %c0_i32_1 : i32, i32, i32, i32
  }
  func.func @transform_1(%arg0: i32) -> (i32, i32) {
    %c0_i32 = arith.constant 0 : i32
    %c0_i32_0 = arith.constant 0 : i32
    %c0_i32_1 = arith.constant 0 : i32
    return %c0_i32, %c0_i32_0 : i32, i32
  }
  func.func @transform_2(%arg0: i32) -> (i32, i32) {
    %c0_i32 = arith.constant 0 : i32
    %c0_i32_0 = arith.constant 0 : i32
    %c0_i32_1 = arith.constant 0 : i32
    return %c0_i32, %c0_i32_0 : i32, i32
  }
  func.func @transform_3(%arg0: i32) -> (i32, i32) {
    %c0_i32 = arith.constant 0 : i32
    %c0_i32_0 = arith.constant 0 : i32
    %c0_i32_1 = arith.constant 0 : i32
    return %c0_i32, %c0_i32_0 : i32, i32
  }
  func.func @transform_4(%arg0: i32) -> (i32, i32) {
    %c0_i32 = arith.constant 0 : i32
    %c0_i32_0 = arith.constant 0 : i32
    %c0_i32_1 = arith.constant 0 : i32
    return %c0_i32, %c0_i32_0 : i32, i32
  }
  func.func @transform_5(%arg0: i32) -> (i32, i32) {
    %c0_i32 = arith.constant 0 : i32
    %c0_i32_0 = arith.constant 0 : i32
    %c0_i32_1 = arith.constant 0 : i32
    return %c0_i32, %c0_i32_0 : i32, i32
  }
  func.func @transform_6(%arg0: i32) -> (i32, i32) {
    %c0_i32 = arith.constant 0 : i32
    %c0_i32_0 = arith.constant 0 : i32
    %c0_i32_1 = arith.constant 0 : i32
    return %c0_i32, %c0_i32_0 : i32, i32
  }
  func.func @transform_7(%arg0: i32) -> (i32, i32) {
    %c0_i32 = arith.constant 0 : i32
    %c0_i32_0 = arith.constant 0 : i32
    %c0_i32_1 = arith.constant 0 : i32
    return %c0_i32, %c0_i32_0 : i32, i32
  }
  func.func @transform_8(%arg0: i32) -> (i32, i32) {
    %c0_i32 = arith.constant 0 : i32
    %c0_i32_0 = arith.constant 0 : i32
    %c0_i32_1 = arith.constant 0 : i32
    return %c0_i32, %c0_i32_0 : i32, i32
  }
  func.func @transform_9(%arg0: i32) -> (i32, i32) {
    %c0_i32 = arith.constant 0 : i32
    %c0_i32_0 = arith.constant 0 : i32
    %c0_i32_1 = arith.constant 0 : i32
    return %c0_i32, %c0_i32_0 : i32, i32
  }
  func.func @transform_10(%arg0: i32) -> (i32, i32) {
    %c0_i32 = arith.constant 0 : i32
    %c0_i32_0 = arith.constant 0 : i32
    %c0_i32_1 = arith.constant 0 : i32
    return %c0_i32, %c0_i32_0 : i32, i32
  }
  func.func @transform_11(%arg0: i32) -> (i32, i32) {
    %c0_i32 = arith.constant 0 : i32
    %c0_i32_0 = arith.constant 0 : i32
    %c0_i32_1 = arith.constant 0 : i32
    return %c0_i32, %c0_i32_0 : i32, i32
  }
  func.func @transform_12(%arg0: i32) -> (i32, i32, i32, i32) {
    %c0_i32 = arith.constant 0 : i32
    %c0_i32_0 = arith.constant 0 : i32
    %c0_i32_1 = arith.constant 0 : i32
    %c0_i32_2 = arith.constant 0 : i32
    return %arg0, %c0_i32, %c0_i32_0, %c0_i32_1 : i32, i32, i32, i32
  }
}

</mosaic_0001>

<bundles_post_ra>
// kernel: pnet_forward.1
= control target key start
LH: loop header
LB: loop body
LE: loop exit
PB: predicated region body
PF: predicated region fallthrough
CT: control target
= control target key end

     0   :  { %s18073_s21 = smov 0   ;;  %s22977_s0 = inlined_call_operand.vmem [shape: f32[2,18,3,18], index: 0, kind: input, shape index: {}]   ;;  %s22978_s1 = inlined_call_operand.vmem [shape: bf16[10,27], index: 1, kind: input, shape index: {}]   ;;  %s22979_s2 = inlined_call_operand.vmem [shape: f32[10,1], index: 2, kind: input, shape index: {}]   ;;  %s22980_s3 = inlined_call_operand.vmem [shape: f32[10,1], index: 3, kind: input, shape index: {}]   ;;  %s22981_s4 = inlined_call_operand.vmem [shape: bf16[16,90], index: 4, kind: input, shape index: {}]   ;;  %s22982_s5 = inlined_call_operand.vmem [shape: f32[16,1], index: 5, kind: input, shape index: {}]   ;;  %s22983_s6 = inlined_call_operand.vmem [shape: f32[16,1], index: 6, kind: input, shape index: {}]   ;;  %s22984_s7 = inlined_call_operand.vmem [shape: bf16[32,144], index: 7, kind: input, shape index: {}]   ;;  %s22985_s8 = inlined_call_operand.vmem [shape: f32[32,1], index: 8, kind: input, shape index: {}]   ;;  %s22986_s9 = inlined_call_operand.vmem [shape: f32[32,1], index: 9, kind: input, shape index: {}]   ;;  %s22987_s10 = inlined_call_operand.vmem [shape: bf16[5,32], index: 10, kind: input, shape index: {}]   ;;  %s22988_s11 = inlined_call_operand.vmem [shape: f32[5,1], index: 11, kind: input, shape index: {}]   ;;  %s22989_s12 = inlined_call_operand.vmem [shape: f32[2,4,5,4], index: 12, kind: output, shape index: {}]  }
   0x1 LB: > { %s16516_s22 = sadd.s32 4294967295, %s17999_s21   ;;  %p16520_p0 = scmp.ge.s32.totalorder %s17999_s21, 1  ;;  %s17999_s21 = sphi %s18073_s21, %s22_s21  }
   0x2   : > { %p362_p1 = scmp.lt.s32.totalorder %s17999_s21, 3 }
   0x4   : > { %p363_p2 = pnand %p16520_p0, %p362_p1 }
   0x6   : > { %366 = sbr.rel (%p363_p2) target bundleno = 2412 (0x96c), region = 68 }
   0xb   : > { %v568_v0 = vlaneseq  ;;  %p404_p3 = scmp.lt.s32.totalorder %s16516_s22, 1  ;;  %v18001_v1 = vmov 1966171168   ;;  %vm2503_vm0 = vcmask 1041408   ;;  %vm514_vm1 = vcmask 1042432  }
   0xc   : > { %v566_v2 = vunpack.c.l.s4 %v18001_v1  ;;  %vm531_vm4 = vcmask 1045504   ;;  %v22992_v10 = vmov 0.0   ;;  %v22990_v24 = vmov 1.0  }
   0xd   : > { %v18081_v3 = vshrl.u32 %v568_v0, 7  ;;  %v18083_v4 = vand.u32 127, %v568_v0  ;;  %s23532_s22 = smov (!%p404_p3, %s16516_s22), 1  ;;  %vm2466_vm9 = vcmask 146432   ;;  %vm8932_vm13 = vcmask 1044480  }
   0xe   : > { %v567_v5 = vunpack.c.0.s8 %v566_v2  ;;  %s17951_s23 = smul.u32 72, %s23532_s22  ;;  %vm8844_vm14 = vcmask 1040384   ;;  %vm18005_vm15 = vmmov 0   ;;  %s16894_s27 = sshll.u32 %s23532_s22, 5 }
   0xf   : > { %23110 = vst [vmem:[#allocation2_spill] sm:$0xff] %v18081_v3  ;;  %23111 = vst [vmem:[#allocation3_spill] sm:$0xff] %v18083_v4  ;;  %v18088_v6 = vadd.s32 16, %v18081_v3  ;;  %v18091_v7 = vadd.s32 1, %v18083_v4  ;;  %v18094_v8 = vadd.s32 8, %v18081_v3  ;;  %vm1578_vm7 = vcmp.eq.s32.totalorder %v18081_v3, %v18083_v4  ;;  %s22956_s30 = scalar_lea.vmem %s22989_s12, %s16894_s27 }
  0x10   : > { %v18098_v9 = vsub.s32 %v567_v5, %v18081_v3  ;;  %s18107_s26 = scalar_lea.vmem %s22977_s0, %s17951_s23  ;;  %v18128_v18 = vadd.s32 2, %v18083_v4 }
  0x11   : > { %23112 = vst [vmem:[#allocation4_spill] sm:$0xff] %v18091_v7  ;;  %23113 = vst [vmem:[#allocation5_spill] sm:$0xff] %v18094_v8  ;;  %vm1580_vm2 = vcmp.eq.s32.totalorder %v18088_v6, %v18083_v4  ;;  %vm3565_vm3 = vcmp.eq.s32.totalorder %v18088_v6, %v18091_v7  ;;  %vm1579_vm5 = vcmp.eq.s32.totalorder %v18094_v8, %v18083_v4  ;;  %v415_v13 = vld [vmem:[%s18107_s26] sm:$0x7]  ;;  %v416_v14 = vld [vmem:[%s18107_s26 + $0x4] sm:$0x7] }
  0x12   : > { %v1583_v11 = vsel %vm1580_vm2, 1.0, %v22992_v10  ;;  %v3568_v12 = vsel %vm3565_vm3, 1.0, %v22992_v10  ;;  %vm3564_vm6 = vcmp.eq.s32.totalorder %v18094_v8, %v18091_v7  ;;  %vm3563_vm8 = vcmp.eq.s32.totalorder %v18081_v3, %v18091_v7  ;;  %v417_v15 = vld [vmem:[%s18107_s26 + $0x8] sm:$0x7]  ;;  %v18125_v17 = vld [vmem:[%s18107_s26 + $0xc] sm:$0x7] }
  0x13   : > { %17231 = vmatprep.subr.msk.mxu0 %vm2503_vm0, %v1583_v11  ;;  %17264 = vmatprep.subr.msk.mxu1 %vm2503_vm0, %v3568_v12  ;;  %v449_v16 = vrot.slane %v416_v14, 5  ;;  %23114 = vst [vmem:[#allocation6_spill] sm:$0xff] %v18128_v18  ;;  %v450_v19 = vrot.slane %v417_v15, 5  ;;  %v482_v20 = vrot.slane %v417_v15, 2  ;;  %v483_v21 = vrot.slane %v18125_v17, 2 }
  0x14   : > { %17232 = vmatpush3.msk.msra.mxu0 %vm2503_vm0, %v1583_v11  ;;  %17265 = vmatpush3.msk.msra.mxu1 %vm2503_vm0, %v3568_v12  ;;  %v18134_v22 = vld [vmem:[%s18107_s26 + $0x10] sm:$0x7]  ;;  %v451_v23 = vrot.slane %v18125_v17, 5  ;;  %v18148_v27 = vld [vmem:[%s18107_s26 + $0x14] sm:$0x7]  ;;  %vm4630_vm10 = vcmp.eq.s32.totalorder %v18088_v6, %v18128_v18  ;;  %vm4629_vm11 = vcmp.eq.s32.totalorder %v18094_v8, %v18128_v18  ;;  %vm4628_vm12 = vcmp.eq.s32.totalorder %v18081_v3, %v18128_v18 }
  0x15   : > { %17233 = vmatprep.subr.msk.mxu0 %vm1579_vm5, %v22990_v24  ;;  %17266 = vmatprep.subr.msk.mxu1 %vm3564_vm6, %v22990_v24  ;;  %v515_v25 = vsel %vm514_vm1, %v415_v13, %v449_v16  ;;  %v484_v26 = vrot.slane %v18134_v22, 2  ;;  %v452_v28 = vrot.slane %v18134_v22, 5  ;;  %v18152_v29 = vld [vmem:[%s18107_s26 + $0x18] sm:$0x7]  ;;  %v516_v31 = vsel %vm514_vm1, %v416_v14, %v450_v19 }
  0x16   : > { %17234 = vmatpush3.msk.msra.mxu0 %vm1579_vm5, %v22990_v24  ;;  %17267 = vmatpush3.msk.msra.mxu1 %vm3564_vm6, %v22990_v24  ;;  %v532_v30 = vsel %vm531_vm4, %v515_v25, %v482_v20  ;;  %v619_v32 = vrot.slane %v482_v20, %v18098_v9  ;;  %v485_v33 = vrot.slane %v18148_v27, 2  ;;  %v533_v36 = vsel %vm531_vm4, %v516_v31, %v483_v21 }
  0x17   : > { %17235 = vmatprep.subr.msk.mxu0 %vm1578_vm7, %v22990_v24  ;;  %17268 = vmatprep.subr.msk.mxu1 %vm3563_vm8, %v22990_v24  ;;  %v564_v34 = vcombine.high %v532_v30, %v532_v30  ;;  %v571_v35 = vrot.slane %v532_v30, %v18098_v9  ;;  %v453_v37 = vrot.slane %v18148_v27, 5  ;;  %v627_v39 = vcombine.high %v533_v36, %v533_v36 }
  0x18   : > { %17236 = vmatpush3.msk.msra.mxu0 %vm1578_vm7, %v22990_v24  ;;  %17269 = vmatpush3.msk.msra.mxu1 %vm3563_vm8, %v22990_v24  ;;  %v626_v38 = vrot.slane %v619_v32, %v18098_v9  ;;  %v634_v40 = vrot.slane %v533_v36, %v18098_v9  ;;  %v486_v41 = vrot.slane %v18152_v29, 2  ;;  %v517_v45 = vsel %vm514_vm1, %v417_v15, %v451_v23 }
  0x19   : > { %v578_v42 = vrot.slane %v564_v34, %v18098_v9  ;;  %v579_v43 = vcombine.high %v571_v35, %v571_v35  ;;  %v587_v44 = vrot.slane %v571_v35, %v18098_v9  ;;  %17330 = vmatprep.subr.bf16.mxu1 %v22992_v10  ;;  %v641_v46 = vrot.slane %v627_v39, %v18098_v9 }
  0x1a   : > { %v642_v47 = vcombine.high %v634_v40, %v634_v40  ;;  %v650_v48 = vrot.slane %v634_v40, %v18098_v9  ;;  %v534_v49 = vsel %vm531_vm4, %v517_v45, %v484_v26  ;;  %v682_v53 = vrot.slane %v483_v21, %v18098_v9 }
  0x1b   : > { %v580_v50 = vcombine.high %v578_v42, %v578_v42  ;;  %v594_v51 = vrot.slane %v578_v42, %v18098_v9  ;;  %v601_v52 = vrot.slane %v579_v43, %v18098_v9  ;;  %v643_v54 = vcombine.high %v641_v46, %v641_v46 }
  0x1c   : > { %v657_v55 = vrot.slane %v641_v46, %v18098_v9  ;;  %v664_v56 = vrot.slane %v642_v47, %v18098_v9  ;;  %v672_v57 = vcombine.high %v650_v48, %v650_v48  ;;  %v1633_v61 = vcombine.low %v626_v38, %v650_v48 }
  0x1d   : > { %v608_v58 = vrot.slane %v580_v50, %v18098_v9  ;;  %v1584_v59 = vcombine.low %v587_v44, %v601_v52  ;;  %v16524_v60 = vcombine.high %v587_v44, %v601_v52  ;;  %v671_v62 = vrot.slane %v643_v54, %v18098_v9  ;;  %v18236_v54 = vld [vmem:[%s18107_s26 + $0x1c] sm:$0x7] }
  0x1e   : > { %v673_v63 = vcombine.high %v657_v55, %v657_v55  ;;  %v674_v0 = vcombine.high %v664_v56, %v664_v56  ;;  %v1634_v1 = vcombine.low %v664_v56, %v672_v57  ;;  %v1643_v15 = vrot.slane %v1633_v61, %v18098_v9 }
  0x1f   : > { %v1586_v2 = vcombine.low %v594_v51, %v608_v58  ;;  %v16525_v5 = vcombine.high %v594_v51, %v608_v58  ;;  %v1594_v11 = vrot.slane %v1584_v59, %v18098_v9  ;;  %v1601_v12 = vrot.slane %v16524_v60, %v18098_v9 }
  0x20   : > { %v1635_v13 = vcombine.low %v674_v0, %v657_v55  ;;  %v1636_v14 = vcombine.low %v671_v62, %v673_v63  ;;  %v1650_v16 = vrot.slane %v1634_v1, %v18098_v9  ;;  %v675_v23 = vcombine.high %v671_v62, %v671_v62 }
  0x21   : > { %v1608_v19 = vrot.slane %v1586_v2, %v18098_v9  ;;  %v1615_v20 = vrot.slane %v16525_v5, %v18098_v9  ;;  %v1616_v21 = vcombine.low %v1594_v11, %v1601_v12  ;;  %v689_v32 = vrot.slane %v682_v53, %v18098_v9 }
  0x22   : > { %v1657_v25 = vrot.slane %v1635_v13, %v18098_v9  ;;  %v1664_v30 = vrot.slane %v1636_v14, %v18098_v9  ;;  %v1665_v31 = vcombine.low %v1643_v15, %v1650_v16  ;;  %v690_v36 = vcombine.high %v534_v49, %v534_v49 }
  0x23   : > { %v1617_v34 = vcombine.low %v1608_v19, %v1615_v20  ;;  %v1624_v35 = vrot.slane %v1616_v21, %v18098_v9  ;;  %v697_v38 = vrot.slane %v534_v49, %v18098_v9  ;;  %v1682_v42 = vcombine.low %v675_v23, %v689_v32 }
  0x24   : > { %v1666_v39 = vcombine.low %v1657_v25, %v1664_v30  ;;  %v1673_v40 = vrot.slane %v1665_v31, %v18098_v9  ;;  %v518_v43 = vsel %vm514_vm1, %v18125_v17, %v452_v28  ;;  %v704_v45 = vrot.slane %v690_v36, %v18098_v9 }
  0x25   : > { %v1631_v44 = vrot.slane %v1617_v34, %v18098_v9  ;;  %v705_v46 = vcombine.high %v697_v38, %v697_v38  ;;  %v713_v47 = vrot.slane %v697_v38, %v18098_v9  ;;  %v1692_v49 = vrot.slane %v1682_v42, %v18098_v9 }
  0x26   : > { %v1680_v48 = vrot.slane %v1666_v39, %v18098_v9  ;;  %v535_v50 = vsel %vm531_vm4, %v518_v43, %v485_v33  ;;  %v745_v51 = vrot.slane %v484_v26, %v18098_v9  ;;  %v706_v28 = vcombine.high %v704_v45, %v704_v45 }
  0x27   : > { %v18231_v17 = vcombine.low %v1624_v35, %v1631_v44  ;;  %v720_v52 = vrot.slane %v704_v45, %v18098_v9  ;;  %v727_v53 = vrot.slane %v705_v46, %v18098_v9  ;;  %v753_v57 = vcombine.high %v535_v50, %v535_v50 }
  0x28   : > { %v18238_v55 = vcombine.low %v1673_v40, %v1680_v48  ;;  %v752_v56 = vrot.slane %v745_v51, %v18098_v9  ;;  %v760_v58 = vrot.slane %v535_v50, %v18098_v9  ;;  %v734_v26 = vrot.slane %v706_v28, %v18098_v9 }
  0x29   : > { %17237 = vmatprep.mubr.msk.f32.mxu0 %vm2466_vm9, %v18231_v17  ;;  %17270 = vmatprep.mubr.msk.f32.mxu1 %vm2466_vm9, %v18231_v17  ;;  %v1683_v59 = vcombine.low %v713_v47, %v727_v53  ;;  %v16526_v60 = vcombine.high %v713_v47, %v727_v53  ;;  %v454_v61 = vrot.slane %v18152_v29, 5  ;;  %v767_v62 = vrot.slane %v753_v57, %v18098_v9 }
  0x2a   : > { %17238 = vmatmul.mubr.msk.f32.vlgmr.msra.gmra.mxu0 %vm2466_vm9, %v18238_v55  ;;  %17271 = vmatmul.mubr.msk.f32.vlgmr.msra.gmra.mxu1 %vm2466_vm9, %v18238_v55  ;;  %v768_v63 = vcombine.high %v760_v58, %v760_v58  ;;  %v776_v0 = vrot.slane %v760_v58, %v18098_v9  ;;  %v487_v1 = vrot.slane %v18236_v54, 2  ;;  %v1685_v2 = vcombine.low %v720_v52, %v734_v26 }
  0x2b   : > { %v1699_v5 = vrot.slane %v1683_v59, %v18098_v9  ;;  %v1706_v11 = vrot.slane %v16526_v60, %v18098_v9  ;;  %v16527_v12 = vcombine.high %v720_v52, %v734_v26  ;;  %v783_v13 = vrot.slane %v767_v62, %v18098_v9 }
  0x2c   : > { %v790_v14 = vrot.slane %v768_v63, %v18098_v9  ;;  %v798_v15 = vcombine.high %v776_v0, %v776_v0  ;;  %v1732_v16 = vcombine.low %v752_v56, %v776_v0  ;;  %v1713_v19 = vrot.slane %v1685_v2, %v18098_v9 }
  0x2d   : > { %v1714_v20 = vcombine.low %v1692_v49, %v1699_v5  ;;  %v1741_v21 = vrot.slane %v16527_v12, %v18098_v9  ;;  %v519_v23 = vsel %vm514_vm1, %v18134_v22, %v453_v37  ;;  %v769_v36 = vcombine.high %v767_v62, %v767_v62 }
  0x2e   : > { %v800_v25 = vcombine.high %v790_v14, %v790_v14  ;;  %v1733_v30 = vcombine.low %v790_v14, %v798_v15  ;;  %v1748_v31 = vrot.slane %v1732_v16, %v18098_v9  ;;  %v536_v32 = vsel %vm531_vm4, %v519_v23, %v486_v41 }
  0x2f   : > { %v1715_v34 = vcombine.low %v1706_v11, %v1713_v19  ;;  %v1722_v35 = vrot.slane %v1714_v20, %v18098_v9  ;;  %v799_v38 = vcombine.high %v783_v13, %v783_v13  ;;  %v808_v22 = vrot.slane %v485_v33, %v18098_v9  ;;  %v18304_v11 = vld [vmem:[%s18107_s26 + $0x20] sm:$0x7] }
  0x30   : > { %v1734_v39 = vcombine.low %v800_v25, %v783_v13  ;;  %v1755_v40 = vrot.slane %v1733_v30, %v18098_v9  ;;  %v1763_v42 = vcombine.low %v1741_v21, %v1748_v31  ;;  %v797_v43 = vrot.slane %v769_v36, %v18098_v9 }
  0x31   : > { %v1729_v37 = vrot.slane %v1715_v34, %v18098_v9  ;;  %v823_v44 = vrot.slane %v536_v32, %v18098_v9  ;;  %v520_v45 = vsel %vm514_vm1, %v18148_v27, %v454_v61  ;;  %v815_v48 = vrot.slane %v808_v22, %v18098_v9 }
  0x32   : > { %v1762_v46 = vrot.slane %v1734_v39, %v18098_v9  ;;  %v1771_v47 = vrot.slane %v1763_v42, %v18098_v9  ;;  %v537_v49 = vsel %vm531_vm4, %v520_v45, %v487_v1  ;;  %v801_v50 = vcombine.high %v797_v43, %v797_v43 }
  0x33   : > { %v18285_v33 = vcombine.low %v1722_v35, %v1729_v37  ;;  %v831_v51 = vcombine.high %v823_v44, %v823_v44  ;;  %v839_v28 = vrot.slane %v823_v44, %v18098_v9  ;;  %v1780_v53 = vcombine.low %v797_v43, %v799_v38 }
  0x34   : > { %v1764_v52 = vcombine.low %v1755_v40, %v1762_v46  ;;  %v816_v56 = vcombine.high %v536_v32, %v536_v32  ;;  %v871_v27 = vrot.slane %v486_v41, %v18098_v9  ;;  %v1781_v58 = vcombine.low %v801_v50, %v815_v48  ;;  %v18333_v48 = vld [vmem:[%s18107_s26 + $0x24] sm:$0x7] }
  0x35   : > { %17240 = vmatprep.mubr.msk.f32.mxu0 %vm2466_vm9, %v18285_v33  ;;  %17273 = vmatprep.mubr.msk.f32.mxu1 %vm2466_vm9, %v18285_v33  ;;  %v853_v57 = vrot.slane %v831_v51, %v18098_v9  ;;  %v886_v26 = vrot.slane %v537_v49, %v18098_v9  ;;  %v455_v59 = vrot.slane %v18236_v54, 5  ;;  %v1790_v61 = vrot.slane %v1780_v53, %v18098_v9 }
  0x36   : > { %v1778_v60 = vrot.slane %v1764_v52, %v18098_v9  ;;  %v830_v62 = vrot.slane %v816_v56, %v18098_v9  ;;  %v878_v41 = vrot.slane %v871_v27, %v18098_v9  ;;  %v1797_v2 = vrot.slane %v1781_v58, %v18098_v9 }
  0x37   : > { %v1782_v63 = vcombine.low %v839_v28, %v853_v57  ;;  %v16528_v0 = vcombine.high %v839_v28, %v853_v57  ;;  %v894_v5 = vcombine.high %v886_v26, %v886_v26  ;;  %v902_v15 = vrot.slane %v886_v26, %v18098_v9 }
  0x38   : > { %v18306_v12 = vcombine.low %v1771_v47, %v1778_v60  ;;  %v832_v13 = vcombine.high %v830_v62, %v830_v62  ;;  %v846_v14 = vrot.slane %v830_v62, %v18098_v9  ;;  %v1812_v20 = vcombine.low %v1790_v61, %v1797_v2 }
  0x39   : > { %v1804_v16 = vrot.slane %v1782_v63, %v18098_v9  ;;  %v1811_v19 = vrot.slane %v16528_v0, %v18098_v9  ;;  %v916_v21 = vrot.slane %v894_v5, %v18098_v9  ;;  %v924_v25 = vcombine.high %v902_v15, %v902_v15 }
  0x3a   : > { %17241 = vmatmul.mubr.msk.f32.gmra.mxu0 %vm2466_vm9, %v18306_v12  ;;  %17274 = vmatmul.mubr.msk.f32.gmra.mxu1 %vm2466_vm9, %v18306_v12  ;;  %v860_v23 = vrot.slane %v832_v13, %v18098_v9  ;;  %v1831_v30 = vcombine.low %v878_v41, %v902_v15  ;;  %v488_v31 = vrot.slane %v18304_v11, 2  ;;  %v1820_v34 = vrot.slane %v1812_v20, %v18098_v9 }
  0x3b   : > { %v1813_v32 = vcombine.low %v1804_v16, %v1811_v19  ;;  %v521_v35 = vsel %vm514_vm1, %v18152_v29, %v455_v59  ;;  %v879_v36 = vcombine.high %v537_v49, %v537_v49  ;;  %v1832_v40 = vcombine.low %v916_v21, %v924_v25 }
  0x3c   : > { %v1829_v38 = vcombine.low %v846_v14, %v860_v23  ;;  %v16529_v39 = vcombine.high %v846_v14, %v860_v23  ;;  %v1853_v42 = vrot.slane %v1831_v30, %v18098_v9  ;;  %v538_v37 = vsel %vm531_vm4, %v521_v35, %v488_v31 }
  0x3d   : > { %v1827_v22 = vrot.slane %v1813_v32, %v18098_v9  ;;  %v893_v43 = vrot.slane %v879_v36, %v18098_v9  ;;  %v926_v44 = vcombine.high %v916_v21, %v916_v21  ;;  %v1860_v47 = vrot.slane %v1832_v40, %v18098_v9 }
  0x3e   : > { %v1839_v45 = vrot.slane %v1829_v38, %v18098_v9  ;;  %v1846_v46 = vrot.slane %v16529_v39, %v18098_v9  ;;  %v934_v29 = vrot.slane %v487_v1, %v18098_v9  ;;  %v949_v28 = vrot.slane %v538_v37, %v18098_v9 }
  0x3f   : > { %v18335_v49 = vcombine.low %v1820_v34, %v1827_v22  ;;  %v895_v50 = vcombine.high %v893_v43, %v893_v43  ;;  %v909_v51 = vrot.slane %v893_v43, %v18098_v9  ;;  %v1862_v53 = vcombine.low %v1853_v42, %v1860_v47  ;;  %v18373_v42 = vld [vmem:[%s18107_s26 + $0x28] sm:$0x7] }
  0x40   : > { %v1861_v52 = vcombine.low %v1839_v45, %v1846_v46  ;;  %v941_v56 = vrot.slane %v934_v29, %v18098_v9  ;;  %v456_v27 = vrot.slane %v18304_v11, 5  ;;  %v957_v58 = vcombine.high %v949_v28, %v949_v28 }
  0x41   : > { %17243 = vmatprep.mubr.msk.f32.mxu0 %vm2466_vm9, %v18335_v49  ;;  %17276 = vmatprep.mubr.msk.f32.mxu1 %vm2466_vm9, %v18335_v49  ;;  %v923_v1 = vrot.slane %v895_v50, %v18098_v9  ;;  %v925_v57 = vcombine.high %v909_v51, %v909_v51  ;;  %v489_v26 = vrot.slane %v18333_v48, 2  ;;  %v1876_v60 = vrot.slane %v1862_v53, %v18098_v9 }
  0x42   : > { %v1869_v59 = vrot.slane %v1861_v52, %v18098_v9  ;;  %v965_v61 = vrot.slane %v949_v28, %v18098_v9  ;;  %v1878_v62 = vcombine.low %v926_v44, %v909_v51  ;;  %v979_v63 = vrot.slane %v957_v58, %v18098_v9 }
  0x43   : > { %v927_v41 = vcombine.high %v923_v1, %v923_v1  ;;  %v1879_v0 = vcombine.low %v923_v1, %v925_v57  ;;  %v522_v2 = vsel %vm514_vm1, %v18236_v54, %v456_v27  ;;  %v942_v15 = vcombine.high %v538_v37, %v538_v37 }
  0x44   : > { %v18353_v5 = vcombine.low %v1869_v59, %v1876_v60  ;;  %v1888_v13 = vrot.slane %v1878_v62, %v18098_v9  ;;  %v539_v14 = vsel %vm531_vm4, %v522_v2, %v489_v26  ;;  %v1881_v19 = vcombine.low %v965_v61, %v979_v63 }
  0x45   : > { %v1880_v16 = vcombine.low %v927_v41, %v941_v56  ;;  %v1895_v20 = vrot.slane %v1879_v0, %v18098_v9  ;;  %v997_v21 = vrot.slane %v488_v31, %v18098_v9  ;;  %v956_v54 = vrot.slane %v942_v15, %v18098_v9 }
  0x46   : > { %17244 = vmatmul.mubr.msk.f32.gmra.mxu0 %vm2466_vm9, %v18353_v5  ;;  %17277 = vmatmul.mubr.msk.f32.gmra.mxu1 %vm2466_vm9, %v18353_v5  ;;  %v1012_v23 = vrot.slane %v539_v14, %v18098_v9  ;;  %v16530_v25 = vcombine.high %v965_v61, %v979_v63  ;;  %v457_v30 = vrot.slane %v18333_v48, 5  ;;  %v1909_v34 = vrot.slane %v1881_v19, %v18098_v9 }
  0x47   : > { %v1902_v32 = vrot.slane %v1880_v16, %v18098_v9  ;;  %v1910_v35 = vcombine.low %v1888_v13, %v1895_v20  ;;  %v1004_v31 = vrot.slane %v997_v21, %v18098_v9  ;;  %v958_v36 = vcombine.high %v956_v54, %v956_v54  ;;  %v18397_v13 = vld [vmem:[%s18107_s26 + $0x2c] sm:$0x7] }
  0x48   : > { %v972_v38 = vrot.slane %v956_v54, %v18098_v9  ;;  %v1028_v39 = vrot.slane %v1012_v23, %v18098_v9  ;;  %v1937_v40 = vrot.slane %v16530_v25, %v18098_v9  ;;  %v1005_v43 = vcombine.high %v539_v14, %v539_v14 }
  0x49   : > { %v1911_v22 = vcombine.low %v1902_v32, %v1909_v34  ;;  %v1918_v37 = vrot.slane %v1910_v35, %v18098_v9  ;;  %v1020_v44 = vcombine.high %v1012_v23, %v1012_v23  ;;  %v986_v45 = vrot.slane %v958_v36, %v18098_v9 }
  0x4a   : > { %v1930_v46 = vcombine.low %v1004_v31, %v1028_v39  ;;  %v1050_v47 = vcombine.high %v1028_v39, %v1028_v39  ;;  %v1060_v29 = vrot.slane %v489_v26, %v18098_v9  ;;  %v1019_v51 = vrot.slane %v1005_v43, %v18098_v9 }
  0x4b   : > { %v1925_v50 = vrot.slane %v1911_v22, %v18098_v9  ;;  %v1042_v28 = vrot.slane %v1020_v44, %v18098_v9  ;;  %v490_v52 = vrot.slane %v18373_v42, 2  ;;  %v1928_v53 = vcombine.low %v972_v38, %v986_v45 }
  0x4c   : > { %v16531_v56 = vcombine.high %v972_v38, %v986_v45  ;;  %v1958_v27 = vrot.slane %v1930_v46, %v18098_v9  ;;  %v1067_v1 = vrot.slane %v1060_v29, %v18098_v9  ;;  %v1021_v58 = vcombine.high %v1019_v51, %v1019_v51 }
  0x4d   : > { %v18384_v57 = vcombine.low %v1918_v37, %v1925_v50  ;;  %v1035_v26 = vrot.slane %v1019_v51, %v18098_v9  ;;  %v1052_v59 = vcombine.high %v1042_v28, %v1042_v28  ;;  %v1944_v60 = vrot.slane %v1928_v53, %v18098_v9 }
  0x4e   : > { %v1951_v61 = vrot.slane %v16531_v56, %v18098_v9  ;;  %v1976_v62 = vcombine.low %v1042_v28, %v1050_v47  ;;  %v523_v41 = vsel %vm514_vm1, %v18304_v11, %v457_v30  ;;  %v1049_v63 = vrot.slane %v1021_v58, %v18098_v9  ;;  %v18418_v47 = vld [vmem:[%s18107_s26 + $0x30] sm:$0x7] }
  0x4f   : > { %17246 = vmatprep.mubr.msk.f32.mxu0 %vm2466_vm9, %v18384_v57  ;;  %17279 = vmatprep.mubr.msk.f32.mxu1 %vm2466_vm9, %v18384_v57  ;;  %v1051_v0 = vcombine.high %v1035_v26, %v1035_v26  ;;  %v1977_v2 = vcombine.low %v1052_v59, %v1035_v26  ;;  %v458_v14 = vrot.slane %v18373_v42, 5  ;;  %v1959_v15 = vcombine.low %v1937_v40, %v1944_v60 }
  0x50   : > { %v1960_v16 = vcombine.low %v1951_v61, %v1958_v27  ;;  %v1986_v19 = vrot.slane %v1976_v62, %v18098_v9  ;;  %v540_v11 = vsel %vm531_vm4, %v523_v41, %v490_v52  ;;  %v1053_v20 = vcombine.high %v1049_v63, %v1049_v63 }
  0x51   : > { %v1978_v21 = vcombine.low %v1049_v63, %v1051_v0  ;;  %v1993_v54 = vrot.slane %v1977_v2, %v18098_v9  ;;  %v1068_v23 = vcombine.high %v540_v11, %v540_v11  ;;  %v1967_v25 = vrot.slane %v1959_v15, %v18098_v9 }
  0x52   : > { %v1974_v30 = vrot.slane %v1960_v16, %v18098_v9  ;;  %v1075_v32 = vrot.slane %v540_v11, %v18098_v9  ;;  %v491_v34 = vrot.slane %v18397_v13, 2  ;;  %v1979_v35 = vcombine.low %v1053_v20, %v1067_v1 }
  0x53   : > { %v2000_v31 = vrot.slane %v1978_v21, %v18098_v9  ;;  %v2008_v36 = vcombine.low %v1986_v19, %v1993_v54  ;;  %v1082_v38 = vrot.slane %v1068_v23, %v18098_v9  ;;  %v524_v37 = vsel %vm514_vm1, %v18333_v48, %v458_v14 }
  0x54   : > { %v18409_v39 = vcombine.low %v1967_v25, %v1974_v30  ;;  %v1083_v40 = vcombine.high %v1075_v32, %v1075_v32  ;;  %v1091_v22 = vrot.slane %v1075_v32, %v18098_v9  ;;  %v2007_v43 = vrot.slane %v1979_v35, %v18098_v9 }
  0x55   : > { %v2016_v44 = vrot.slane %v2008_v36, %v18098_v9  ;;  %v1084_v45 = vcombine.high %v1082_v38, %v1082_v38  ;;  %v1098_v46 = vrot.slane %v1082_v38, %v18098_v9  ;;  %v541_v48 = vsel %vm531_vm4, %v524_v37, %v491_v34 }
  0x56   : > { %17247 = vmatmul.mubr.msk.f32.gmra.mxu0 %vm2466_vm9, %v18409_v39  ;;  %17280 = vmatmul.mubr.msk.f32.gmra.mxu1 %vm2466_vm9, %v18409_v39  ;;  %v1105_v29 = vrot.slane %v1083_v40, %v18098_v9  ;;  %v1123_v50 = vrot.slane %v490_v52, %v18098_v9  ;;  %v459_v51 = vrot.slane %v18397_v13, 5  ;;  %v2009_v28 = vcombine.low %v2000_v31, %v2007_v43 }
  0x57   : > { %v1112_v53 = vrot.slane %v1084_v45, %v18098_v9  ;;  %v1131_v56 = vcombine.high %v541_v48, %v541_v48  ;;  %v1138_v27 = vrot.slane %v541_v48, %v18098_v9  ;;  %v492_v59 = vrot.slane %v18418_v47, 2 }
  0x58   : > { %v2025_v1 = vcombine.low %v1091_v22, %v1105_v29  ;;  %v16532_v58 = vcombine.high %v1091_v22, %v1105_v29  ;;  %v1130_v26 = vrot.slane %v1123_v50, %v18098_v9  ;;  %v2023_v60 = vrot.slane %v2009_v28, %v18098_v9 }
  0x59   : > { %v2027_v61 = vcombine.low %v1098_v46, %v1112_v53  ;;  %v16533_v62 = vcombine.high %v1098_v46, %v1112_v53  ;;  %v1145_v52 = vrot.slane %v1131_v56, %v18098_v9  ;;  %v1146_v0 = vcombine.high %v1138_v27, %v1138_v27 }
  0x5a   : > { %v2035_v41 = vrot.slane %v2025_v1, %v18098_v9  ;;  %v2042_v63 = vrot.slane %v16532_v58, %v18098_v9  ;;  %v1154_v2 = vrot.slane %v1138_v27, %v18098_v9  ;;  %v18439_v14 = vcombine.low %v2016_v44, %v2023_v60  ;;  %v18457_v44 = vld [vmem:[%s18107_s26 + $0x34] sm:$0x7]  ;;  %v18477_v60 = vld [vmem:[%s18107_s26 + $0x38] sm:$0x7] }
  0x5b   : > { %v2049_v15 = vrot.slane %v2027_v61, %v18098_v9  ;;  %v2056_v16 = vrot.slane %v16533_v62, %v18098_v9  ;;  %v1147_v19 = vcombine.high %v1145_v52, %v1145_v52  ;;  %v1161_v20 = vrot.slane %v1145_v52, %v18098_v9 }
  0x5c   : > { %v2057_v11 = vcombine.low %v2035_v41, %v2042_v63  ;;  %v1168_v21 = vrot.slane %v1146_v0, %v18098_v9  ;;  %v1176_v54 = vcombine.high %v1154_v2, %v1154_v2  ;;  %17249 = vmatprep.mubr.msk.f32.mxu0 %vm2466_vm9, %v18439_v14  ;;  %17282 = vmatprep.mubr.msk.f32.mxu1 %vm2466_vm9, %v18439_v14  ;;  %v460_v32 = vrot.slane %v18418_v47, 5 }
  0x5d   : > { %v2058_v23 = vcombine.low %v2049_v15, %v2056_v16  ;;  %v1175_v25 = vrot.slane %v1147_v19, %v18098_v9  ;;  %v2074_v30 = vcombine.low %v1130_v26, %v1154_v2  ;;  %v1177_v31 = vcombine.high %v1161_v20, %v1161_v20 }
  0x5e   : > { %v2065_v35 = vrot.slane %v2057_v11, %v18098_v9  ;;  %v1178_v36 = vcombine.high %v1168_v21, %v1168_v21  ;;  %v2075_v38 = vcombine.low %v1168_v21, %v1176_v54  ;;  %v525_v37 = vsel %vm514_vm1, %v18373_v42, %v459_v51 }
  0x5f   : > { %v2072_v40 = vrot.slane %v2058_v23, %v18098_v9  ;;  %v2084_v22 = vrot.slane %v2074_v30, %v18098_v9  ;;  %v1179_v43 = vcombine.high %v1175_v25, %v1175_v25  ;;  %v2077_v46 = vcombine.low %v1175_v25, %v1177_v31 }
  0x60   : > { %v2076_v45 = vcombine.low %v1178_v36, %v1161_v20  ;;  %v2091_v29 = vrot.slane %v2075_v38, %v18098_v9  ;;  %v542_v48 = vsel %vm531_vm4, %v525_v37, %v492_v59  ;;  %v1186_v28 = vrot.slane %v491_v34, %v18098_v9 }
  0x61   : > { %v18461_v50 = vcombine.low %v2065_v35, %v2072_v40  ;;  %v1194_v53 = vcombine.high %v542_v48, %v542_v48  ;;  %v1201_v56 = vrot.slane %v542_v48, %v18098_v9  ;;  %v2105_v51 = vrot.slane %v2077_v46, %v18098_v9 }
  0x62   : > { %v2098_v42 = vrot.slane %v2076_v45, %v18098_v9  ;;  %v2106_v27 = vcombine.low %v2084_v22, %v2091_v29  ;;  %v493_v1 = vrot.slane %v18457_v44, 2  ;;  %v1193_v58 = vrot.slane %v1186_v28, %v18098_v9 }
  0x63   : > { %17250 = vmatmul.mubr.msk.f32.gmra.mxu0 %vm2466_vm9, %v18461_v50  ;;  %17283 = vmatmul.mubr.msk.f32.gmra.mxu1 %vm2466_vm9, %v18461_v50  ;;  %v1208_v34 = vrot.slane %v1194_v53, %v18098_v9  ;;  %v1209_v26 = vcombine.high %v1201_v56, %v1201_v56  ;;  %v461_v61 = vrot.slane %v18457_v44, 5  ;;  %v1217_v41 = vrot.slane %v1201_v56, %v18098_v9 }
  0x64   : > { %v2107_v62 = vcombine.low %v2098_v42, %v2105_v51  ;;  %v2114_v52 = vrot.slane %v2106_v27, %v18098_v9  ;;  %v526_v63 = vsel %vm514_vm1, %v18397_v13, %v460_v32  ;;  %v2123_v16 = vcombine.low %v1179_v43, %v1193_v58 }
  0x65   : > { %v1210_v0 = vcombine.high %v1208_v34, %v1208_v34  ;;  %v1224_v2 = vrot.slane %v1208_v34, %v18098_v9  ;;  %v1231_v15 = vrot.slane %v1209_v26, %v18098_v9  ;;  %v543_v11 = vsel %vm531_vm4, %v526_v63, %v493_v1 }
  0x66   : > { %v2121_v19 = vrot.slane %v2107_v62, %v18098_v9  ;;  %v1249_v20 = vrot.slane %v492_v59, %v18098_v9  ;;  %v494_v21 = vrot.slane %v18477_v60, 2  ;;  %v2133_v13 = vrot.slane %v2123_v16, %v18098_v9  ;;  %v18516_v62 = vld [vmem:[%s18107_s26 + $0x3c] sm:$0x7] }
  0x67   : > { %v1238_v54 = vrot.slane %v1210_v0, %v18098_v9  ;;  %v2124_v23 = vcombine.low %v1217_v41, %v1231_v15  ;;  %v16534_v25 = vcombine.high %v1217_v41, %v1231_v15  ;;  %v1257_v35 = vcombine.high %v543_v11, %v543_v11 }
  0x68   : > { %v18492_v30 = vcombine.low %v2114_v52, %v2121_v19  ;;  %v1256_v32 = vrot.slane %v1249_v20, %v18098_v9  ;;  %v1264_v31 = vrot.slane %v543_v11, %v18098_v9  ;;  %v462_v45 = vrot.slane %v18477_v60, 5 }
  0x69   : > { %v2126_v36 = vcombine.low %v1224_v2, %v1238_v54  ;;  %v2140_v38 = vrot.slane %v2124_v23, %v18098_v9  ;;  %v2147_v59 = vrot.slane %v16534_v25, %v18098_v9  ;;  %v16535_v40 = vcombine.high %v1224_v2, %v1238_v54 }
  0x6a   : > { %17252 = vmatprep.mubr.msk.f32.mxu0 %vm2466_vm9, %v18492_v30  ;;  %17285 = vmatprep.mubr.msk.f32.mxu1 %vm2466_vm9, %v18492_v30  ;;  %v1271_v22 = vrot.slane %v1257_v35, %v18098_v9  ;;  %v1272_v37 = vcombine.high %v1264_v31, %v1264_v31  ;;  %v1280_v43 = vrot.slane %v1264_v31, %v18098_v9  ;;  %v495_v20 = vrot.slane %v18516_v62, 2 }
  0x6b   : > { %v2154_v46 = vrot.slane %v2126_v36, %v18098_v9  ;;  %v2155_v29 = vcombine.low %v2133_v13, %v2140_v38  ;;  %v2182_v48 = vrot.slane %v16535_v40, %v18098_v9  ;;  %v527_v28 = vsel %vm514_vm1, %v18418_v47, %v461_v61  ;;  %v18541_v40 = vld [vmem:[%s18107_s26 + $0x40] sm:$0x7] }
  0x6c   : > { %v1287_v53 = vrot.slane %v1271_v22, %v18098_v9  ;;  %v1294_v56 = vrot.slane %v1272_v37, %v18098_v9  ;;  %v1302_v42 = vcombine.high %v1280_v43, %v1280_v43  ;;  %v2173_v51 = vcombine.low %v1256_v32, %v1280_v43 }
  0x6d   : > { %v2156_v27 = vcombine.low %v2147_v59, %v2154_v46  ;;  %v2163_v58 = vrot.slane %v2155_v29, %v18098_v9  ;;  %v544_v34 = vsel %vm531_vm4, %v527_v28, %v494_v21  ;;  %v1273_v26 = vcombine.high %v1271_v22, %v1271_v22 }
  0x6e   : > { %v1304_v52 = vcombine.high %v1294_v56, %v1294_v56  ;;  %v2174_v41 = vcombine.low %v1294_v56, %v1302_v42  ;;  %v2189_v47 = vrot.slane %v2173_v51, %v18098_v9  ;;  %v1303_v61 = vcombine.high %v1287_v53, %v1287_v53 }
  0x6f   : > { %v2170_v63 = vrot.slane %v2156_v27, %v18098_v9  ;;  %v1301_v0 = vrot.slane %v1273_v26, %v18098_v9  ;;  %v1312_v2 = vrot.slane %v493_v1, %v18098_v9  ;;  %v1327_v15 = vrot.slane %v544_v34, %v18098_v9 }
  0x70   : > { %v2175_v16 = vcombine.low %v1304_v52, %v1287_v53  ;;  %v2196_v19 = vrot.slane %v2174_v41, %v18098_v9  ;;  %v2204_v11 = vcombine.low %v2182_v48, %v2189_v47  ;;  %v528_v59 = vsel %vm514_vm1, %v18457_v44, %v462_v45 }
  0x71   : > { %v18527_v54 = vcombine.low %v2163_v58, %v2170_v63  ;;  %v1305_v23 = vcombine.high %v1301_v0, %v1301_v0  ;;  %v1319_v25 = vrot.slane %v1312_v2, %v18098_v9  ;;  %v1335_v13 = vcombine.high %v1327_v15, %v1327_v15 }
  0x72   : > { %v2203_v1 = vrot.slane %v2175_v16, %v18098_v9  ;;  %v2212_v32 = vrot.slane %v2204_v11, %v18098_v9  ;;  %v1343_v35 = vrot.slane %v1327_v15, %v18098_v9  ;;  %v2221_v31 = vcombine.low %v1301_v0, %v1303_v61 }
  0x73   : > { %17253 = vmatmul.mubr.msk.f32.gmra.mxu0 %vm2466_vm9, %v18527_v54  ;;  %17286 = vmatmul.mubr.msk.f32.gmra.mxu1 %vm2466_vm9, %v18527_v54  ;;  %v1357_v36 = vrot.slane %v1335_v13, %v18098_v9  ;;  %v2222_v38 = vcombine.low %v1305_v23, %v1319_v25  ;;  %v463_v22 = vrot.slane %v18516_v62, 5  ;;  %v545_v46 = vsel %vm531_vm4, %v528_v59, %v495_v20 }
  0x74   : > { %v2205_v37 = vcombine.low %v2196_v19, %v2203_v1  ;;  %v2231_v43 = vrot.slane %v2221_v31, %v18098_v9  ;;  %v1320_v29 = vcombine.high %v544_v34, %v544_v34  ;;  %v1375_v56 = vrot.slane %v494_v21, %v18098_v9 }
  0x75   : > { %v2223_v48 = vcombine.low %v1343_v35, %v1357_v36  ;;  %v16536_v28 = vcombine.high %v1343_v35, %v1357_v36  ;;  %v2238_v53 = vrot.slane %v2222_v38, %v18098_v9  ;;  %v1390_v42 = vrot.slane %v545_v46, %v18098_v9  ;;  %v18579_v38 = vld [vmem:[%s18107_s26 + $0x44] sm:$0x7] }
  0x76   : > { %v2219_v44 = vrot.slane %v2205_v37, %v18098_v9  ;;  %v1334_v45 = vrot.slane %v1320_v29, %v18098_v9  ;;  %v464_v51 = vrot.slane %v18541_v40, 5  ;;  %v1382_v26 = vrot.slane %v1375_v56, %v18098_v9 }
  0x77   : > { %v2245_v27 = vrot.slane %v2223_v48, %v18098_v9  ;;  %v2252_v58 = vrot.slane %v16536_v28, %v18098_v9  ;;  %v2253_v34 = vcombine.low %v2231_v43, %v2238_v53  ;;  %v1398_v47 = vcombine.high %v1390_v42, %v1390_v42 }
  0x78   : > { %v18557_v52 = vcombine.low %v2212_v32, %v2219_v44  ;;  %v1336_v41 = vcombine.high %v1334_v45, %v1334_v45  ;;  %v1350_v21 = vrot.slane %v1334_v45, %v18098_v9  ;;  %v1406_v0 = vrot.slane %v1390_v42, %v18098_v9 }
  0x79   : > { %v2254_v61 = vcombine.low %v2245_v27, %v2252_v58  ;;  %v2261_v63 = vrot.slane %v2253_v34, %v18098_v9  ;;  %v496_v2 = vrot.slane %v18541_v40, 2  ;;  %v1420_v16 = vrot.slane %v1398_v47, %v18098_v9 }
  0x7a   : > { %17255 = vmatprep.mubr.msk.f32.mxu0 %vm2466_vm9, %v18557_v52  ;;  %17288 = vmatprep.mubr.msk.f32.mxu1 %vm2466_vm9, %v18557_v52  ;;  %v1364_v15 = vrot.slane %v1336_v41, %v18098_v9  ;;  %v529_v19 = vsel %vm514_vm1, %v18477_v60, %v463_v22  ;;  %v4633_v11 = vsel %vm4630_vm10, 1.0, %v22992_v10  ;;  %v1428_v25 = vcombine.high %v1406_v0, %v1406_v0 }
  0x7b   : > { %v2268_v23 = vrot.slane %v2254_v61, %v18098_v9  ;;  %v2272_v13 = vcombine.low %v1382_v26, %v1406_v0  ;;  %v546_v1 = vsel %vm531_vm4, %v529_v19, %v496_v2  ;;  %17297 = vmatprep.subr.msk.mxu0 %vm2503_vm0, %v4633_v11  ;;  %v1383_v31 = vcombine.high %v545_v46, %v545_v46 }
  0x7c   : > { %v2270_v32 = vcombine.low %v1350_v21, %v1364_v15  ;;  %v16537_v35 = vcombine.high %v1350_v21, %v1364_v15  ;;  %v1430_v36 = vcombine.high %v1420_v16, %v1420_v16  ;;  %17298 = vmatpush3.msk.msra.mxu0 %vm2503_vm0, %v4633_v11  ;;  %v2273_v6 = vcombine.low %v1420_v16, %v1428_v25 }
  0x7d   : > { %v18582_v60 = vcombine.low %v2261_v63, %v2268_v23  ;;  %v2294_v59 = vrot.slane %v2272_v13, %v18098_v9  ;;  %v1438_v40 = vrot.slane %v495_v20, %v18098_v9  ;;  %v1397_v43 = vrot.slane %v1383_v31, %v18098_v9  ;;  %17299 = vmatprep.subr.msk.mxu0 %vm4629_vm11, %v22990_v24 }
  0x7e   : > { %v2280_v22 = vrot.slane %v2270_v32, %v18098_v9  ;;  %v2287_v37 = vrot.slane %v16537_v35, %v18098_v9  ;;  %v1453_v46 = vrot.slane %v546_v1, %v18098_v9  ;;  %v2301_v29 = vrot.slane %v2273_v6, %v18098_v9  ;;  %17300 = vmatpush3.msk.msra.mxu0 %vm4629_vm11, %v22990_v24 }
  0x7f   : > { %17256 = vmatmul.mubr.msk.f32.gmra.mxu0 %vm2466_vm9, %v18582_v60  ;;  %17289 = vmatmul.mubr.msk.f32.gmra.mxu1 %vm2466_vm9, %v18582_v60  ;;  %v1445_v48 = vrot.slane %v1438_v40, %v18098_v9  ;;  %v497_v20 = vrot.slane %v18579_v38, 2  ;;  %v530_v28 = vsel %vm514_vm1, %v18516_v62, %v464_v51  ;;  %v1399_v56 = vcombine.high %v1397_v43, %v1397_v43 }
  0x80   : > { %v2302_v53 = vcombine.low %v2280_v22, %v2287_v37  ;;  %v1413_v44 = vrot.slane %v1397_v43, %v18098_v9  ;;  %v1461_v45 = vcombine.high %v1453_v46, %v1453_v46  ;;  %v2303_v42 = vcombine.low %v2294_v59, %v2301_v29  ;;  %17301 = vmatprep.subr.msk.mxu0 %vm4628_vm12, %v22990_v24 }
  0x81   : > { %v1469_v27 = vrot.slane %v1453_v46, %v18098_v9  ;;  %v547_v58 = vsel %vm531_vm4, %v530_v28, %v497_v20  ;;  %v1446_v34 = vcombine.high %v546_v1, %v546_v1  ;;  %v1427_v41 = vrot.slane %v1399_v56, %v18098_v9  ;;  %17302 = vmatpush3.msk.msra.mxu0 %vm4628_vm12, %v22990_v24 }
  0x82   : > { %v2310_v26 = vrot.slane %v2302_v53, %v18098_v9  ;;  %v1429_v21 = vcombine.high %v1413_v44, %v1413_v44  ;;  %v1483_v47 = vrot.slane %v1461_v45, %v18098_v9  ;;  %v2317_v62 = vrot.slane %v2303_v42, %v18098_v9  ;;  %17370 = vmatprep.subr.bf16.mxu0 %v22992_v10 }
  0x83   : > { %v2319_v51 = vcombine.low %v1430_v36, %v1413_v44  ;;  %v1460_v61 = vrot.slane %v1446_v34, %v18098_v9  ;;  %v1501_v63 = vrot.slane %v496_v2, %v18098_v9  ;;  %v1431_v0 = vcombine.high %v1427_v41, %v1427_v41 }
  0x84   : > { %v2320_v15 = vcombine.low %v1427_v41, %v1429_v21  ;;  %v2322_v16 = vcombine.low %v1469_v27, %v1483_v47  ;;  %v1516_v19 = vrot.slane %v547_v58, %v18098_v9  ;;  %v18609_v11 = vcombine.low %v2310_v26, %v2317_v62 }
  0x85   : > { %v2329_v23 = vrot.slane %v2319_v51, %v18098_v9  ;;  %v1462_v25 = vcombine.high %v1460_v61, %v1460_v61  ;;  %v1476_v13 = vrot.slane %v1460_v61, %v18098_v9  ;;  %v2321_v1 = vcombine.low %v1431_v0, %v1445_v48 }
  0x86   : > { %v2336_v32 = vrot.slane %v2320_v15, %v18098_v9  ;;  %v2350_v35 = vrot.slane %v2322_v16, %v18098_v9  ;;  %v1508_v31 = vrot.slane %v1501_v63, %v18098_v9  ;;  %17258 = vmatprep.mubr.msk.f32.mxu0 %vm2466_vm9, %v18609_v11  ;;  %17291 = vmatprep.mubr.msk.f32.mxu1 %vm2466_vm9, %v18609_v11  ;;  %vm8928_vm1 = vcmask 220160  }
  0x87   : > { %v1490_v2 = vrot.slane %v1462_v25, %v18098_v9  ;;  %v1532_v36 = vrot.slane %v1516_v19, %v18098_v9  ;;  %v16538_v38 = vcombine.high %v1469_v27, %v1483_v47  ;;  %v2343_v6 = vrot.slane %v2321_v1, %v18098_v9 }
  0x88   : > { %v2351_v59 = vcombine.low %v2329_v23, %v2336_v32  ;;  %v1509_v40 = vcombine.high %v547_v58, %v547_v58  ;;  %v1524_v22 = vcombine.high %v1516_v19, %v1516_v19  ;;  %v1564_v62 = vrot.slane %v497_v20, %v18098_v9 }
  0x89   : > { %v2369_v37 = vcombine.low %v1476_v13, %v1490_v2  ;;  %v16539_v43 = vcombine.high %v1476_v13, %v1490_v2  ;;  %v2371_v46 = vcombine.low %v1508_v31, %v1532_v36  ;;  %v2378_v29 = vrot.slane %v16538_v38, %v18098_v9 }
  0x8a   : > { %v2352_v48 = vcombine.low %v2343_v6, %v2350_v35  ;;  %v2359_v28 = vrot.slane %v2351_v59, %v18098_v9  ;;  %v1523_v53 = vrot.slane %v1509_v40, %v18098_v9  ;;  %v1546_v56 = vrot.slane %v1524_v22, %v18098_v9 }
  0x8b   : > { %v2385_v44 = vrot.slane %v2369_v37, %v18098_v9  ;;  %v2392_v45 = vrot.slane %v16539_v43, %v18098_v9  ;;  %v2399_v42 = vrot.slane %v2371_v46, %v18098_v9  ;;  %v1554_v27 = vcombine.high %v1532_v36, %v1532_v36 }
  0x8c   : > { %v2366_v58 = vrot.slane %v2352_v48, %v18098_v9  ;;  %v1525_v34 = vcombine.high %v1523_v53, %v1523_v53  ;;  %v1539_v26 = vrot.slane %v1523_v53, %v18098_v9  ;;  %v1556_v41 = vcombine.high %v1546_v56, %v1546_v56 }
  0x8d   : > { %v2400_v21 = vcombine.low %v2378_v29, %v2385_v44  ;;  %v2401_v47 = vcombine.low %v2392_v45, %v2399_v42  ;;  %v2417_v51 = vcombine.low %v1546_v56, %v1554_v27  ;;  %v1571_v23 = vrot.slane %v1564_v62, %v18098_v9 }
  0x8e   : > { %v2367_v61 = vcombine.low %v2359_v28, %v2366_v58  ;;  %v1553_v63 = vrot.slane %v1525_v34, %v18098_v9  ;;  %v1555_v0 = vcombine.high %v1539_v26, %v1539_v26  ;;  %v2418_v15 = vcombine.low %v1556_v41, %v1539_v26 }
  0x8f   : > { %v2408_v16 = vrot.slane %v2400_v21, %v18098_v9  ;;  %v2415_v19 = vrot.slane %v2401_v47, %v18098_v9  ;;  %v2427_v25 = vrot.slane %v2417_v51, %v18098_v9  ;;  %vm9747_vm10 = vcmask 130048  }
  0x90   : > { %17259 = vmatmul.mubr.msk.f32.gmra.mxu0 %vm2466_vm9, %v2367_v61  ;;  %17292 = vmatmul.mubr.msk.f32.gmra.mxu1 %vm2466_vm9, %v2367_v61  ;;  %v1557_v13 = vcombine.high %v1553_v63, %v1553_v63  ;;  %v2419_v20 = vcombine.low %v1553_v63, %v1555_v0  ;;  %v2434_v1 = vrot.slane %v2418_v15, %v18098_v9 }
  0x91   : > { %v2416_v32 = vcombine.low %v2408_v16, %v2415_v19 }
  0x92   : > { %v2420_v35 = vcombine.low %v1557_v13, %v1571_v23  ;;  %v2441_v31 = vrot.slane %v2419_v20, %v18098_v9  ;;  %v2449_v2 = vcombine.low %v2427_v25, %v2434_v1 }
  0x93   : > { %17261 = vmatprep.mubr.msk.f32.mxu0 %vm2466_vm9, %v2416_v32  ;;  %17294 = vmatprep.mubr.msk.f32.mxu1 %vm2466_vm9, %v2416_v32 }
  0x94   : > { %v2448_v36 = vrot.slane %v2420_v35, %v18098_v9  ;;  %v2457_v6 = vrot.slane %v2449_v2, %v18098_v9 }
  0x96   : > { %v2450_v38 = vcombine.low %v2441_v31, %v2448_v36 }
  0x98   : > { %v2464_v59 = vrot.slane %v2450_v38, %v18098_v9 }
  0x9a   : > { %v2465_v40 = vcombine.low %v2457_v6, %v2464_v59 }
  0x9c   : > { %17262 = vmatmul.mubr.msk.f32.gmra.mxu0 %vm2466_vm9, %v2465_v40  ;;  %17295 = vmatmul.mubr.msk.f32.gmra.mxu1 %vm2466_vm9, %v2465_v40 }
  0x9d   : > { %17303 = vmatprep.mubr.msk.f32.mxu0 %vm2466_vm9, %v18231_v17 }
  0xa0   : > { %17304 = vmatmul.mubr.msk.f32.vlgmr.msra.gmra.mxu0 %vm2466_vm9, %v18238_v55 }
  0xa1   : > { %17306 = vmatprep.mubr.msk.f32.mxu0 %vm2466_vm9, %v18285_v33 }
  0xa4   : > { %17307 = vmatmul.mubr.msk.f32.gmra.mxu0 %vm2466_vm9, %v18306_v12 }
  0xa5   : > { %17309 = vmatprep.mubr.msk.f32.mxu0 %vm2466_vm9, %v18335_v49 }
  0xa8   : > { %17310 = vmatmul.mubr.msk.f32.gmra.mxu0 %vm2466_vm9, %v18353_v5 }
  0xa9   : > { %17312 = vmatprep.mubr.msk.f32.mxu0 %vm2466_vm9, %v18384_v57 }
  0xac   : > { %17313 = vmatmul.mubr.msk.f32.gmra.mxu0 %vm2466_vm9, %v18409_v39 }
  0xad   : > { %17315 = vmatprep.mubr.msk.f32.mxu0 %vm2466_vm9, %v18439_v14 }
  0xb0   : > { %17316 = vmatmul.mubr.msk.f32.gmra.mxu0 %vm2466_vm9, %v18461_v50 }
  0xb1   : > { %17318 = vmatprep.mubr.msk.f32.mxu0 %vm2466_vm9, %v18492_v30 }
  0xb4   : > { %17319 = vmatmul.mubr.msk.f32.gmra.mxu0 %vm2466_vm9, %v18527_v54 }
  0xb5   : > { %17321 = vmatprep.mubr.msk.f32.mxu0 %vm2466_vm9, %v18557_v52 }
  0xb8   : > { %17322 = vmatmul.mubr.msk.f32.gmra.mxu0 %vm2466_vm9, %v18582_v60 }
  0xb9   : > { %17324 = vmatprep.mubr.msk.f32.mxu0 %vm2466_vm9, %v18609_v11 }
  0xbc   : > { %17325 = vmatmul.mubr.msk.f32.gmra.mxu0 %vm2466_vm9, %v2367_v61 }
  0xbd   : > { %17327 = vmatprep.mubr.msk.f32.mxu0 %vm2466_vm9, %v2416_v32 }
  0xc0   : > { %17328 = vmatmul.mubr.msk.f32.gmra.mxu0 %vm2466_vm9, %v2465_v40 }
  0xea   : > { %v17239_v17 = vpop.f32.mrf.mxu0  ;;  %v17272_v55 = vpop.f32.mrf.mxu1 }
  0xeb   : > { %v2736_v33 = vrot.slane %v17239_v17, %v18098_v9  ;;  %v3794_v12 = vcombine.high %v17272_v55, %v17272_v55  ;;  %v3801_v49 = vrot.slane %v17272_v55, %v18098_v9  ;;  %v2729_v5 = vcombine.high %v17239_v17, %v17239_v17 }
  0xec   : > { %v2573_v30 = vpop.f32.mrf.mxu0  ;;  %v3638_v28 = vpop.f32.mrf.mxu1 }
  0xed   : > { %v3808_v57 = vrot.slane %v3794_v12, %v18098_v9  ;;  %v2744_v39 = vcombine.high %v2736_v33, %v2736_v33  ;;  %v3809_v14 = vcombine.high %v3801_v49, %v3801_v49  ;;  %v2743_v54 = vrot.slane %v2729_v5, %v18098_v9 }
  0xee   : > { %v2752_v52 = vrot.slane %v2736_v33, %v18098_v9  ;;  %v18704_v11 = vrot.slane %v3801_v49, %v18098_v9  ;;  %v2680_v46 = vcombine.high %v2573_v30, %v2573_v30  ;;  %v2687_v29 = vrot.slane %v2573_v30, %v18098_v9 }
  0xef   : > { %v3810_v50 = vcombine.high %v3808_v57, %v3808_v57  ;;  %v2766_v60 = vrot.slane %v2744_v39, %v18098_v9  ;;  %v3824_v22 = vrot.slane %v3808_v57, %v18098_v9  ;;  %v3831_v37 = vrot.slane %v3809_v14, %v18098_v9 }
  0xf0   : > { %v2745_v48 = vcombine.high %v2743_v54, %v2743_v54  ;;  %v2759_v53 = vrot.slane %v2743_v54, %v18098_v9  ;;  %v2774_v56 = vcombine.high %v2752_v52, %v2752_v52  ;;  %v2694_v58 = vrot.slane %v2680_v46, %v18098_v9 }
  0xf1   : > { %v3838_v43 = vrot.slane %v3810_v50, %v18098_v9  ;;  %v2776_v44 = vcombine.high %v2766_v60, %v2766_v60  ;;  %v6796_v45 = vcombine.low %v3831_v37, %v3831_v37  ;;  %v16619_v42 = vcombine.high %v18704_v11, %v3831_v37 }
  0xf2   : > { %v2695_v26 = vcombine.high %v2687_v29, %v2687_v29  ;;  %v3745_v41 = vcombine.high %v3638_v28, %v3638_v28  ;;  %v3752_v21 = vrot.slane %v3638_v28, %v18098_v9  ;;  %v18715_v47 = vrot.slane %v2745_v48, %v18098_v9 }
  0xf3   : > { %v6798_v27 = vcombine.low %v3824_v22, %v3838_v43  ;;  %v16620_v34 = vcombine.high %v3824_v22, %v3838_v43  ;;  %v5747_v62 = vrot.slane %v2752_v52, %v18098_v9  ;;  %v2775_v51 = vcombine.high %v2759_v53, %v2759_v53 }
  0xf4   : > { %v3759_v61 = vrot.slane %v3745_v41, %v18098_v9  ;;  %v3760_v63 = vcombine.high %v3752_v21, %v3752_v21  ;;  %v3768_v0 = vrot.slane %v3752_v21, %v18098_v9  ;;  %v5755_v15 = vcombine.low %v2766_v60, %v2774_v56 }
  0xf5   : > { %v5756_v16 = vcombine.low %v2776_v44, %v2759_v53  ;;  %v6806_v19 = vrot.slane %v6796_v45, %v18098_v9  ;;  %v6813_v23 = vrot.slane %v16619_v42, %v18098_v9  ;;  %v6820_v13 = vrot.slane %v6798_v27, %v18098_v9 }
  0xf6   : > { %v6827_v20 = vrot.slane %v16620_v34, %v18098_v9  ;;  %v2696_v1 = vcombine.high %v2694_v58, %v2694_v58  ;;  %v2717_v32 = vrot.slane %v2695_v26, %v18098_v9  ;;  %v3761_v35 = vcombine.high %v3759_v61, %v3759_v61 }
  0xf7   : > { %v3775_v31 = vrot.slane %v3759_v61, %v18098_v9  ;;  %v3782_v2 = vrot.slane %v3760_v63, %v18098_v9  ;;  %v18728_v36 = vcombine.low %v18715_v47, %v2775_v51  ;;  %v2703_v38 = vrot.slane %v2687_v29, %v18098_v9 }
  0xf8   : > { %v3790_v6 = vcombine.high %v3768_v0, %v3768_v0  ;;  %v18732_v40 = vrot.slane %v5747_v62, %v18098_v9  ;;  %v5772_v17 = vrot.slane %v5756_v16, %v18098_v9  ;;  %v6828_v55 = vcombine.low %v6806_v19, %v6813_v23 }
  0xf9   : > { %v5765_v12 = vrot.slane %v5755_v15, %v18098_v9  ;;  %v6829_v49 = vcombine.low %v6820_v13, %v6827_v20  ;;  %v2724_v5 = vrot.slane %v2696_v1, %v18098_v9  ;;  %v5692_v57 = vcombine.low %v2703_v38, %v2717_v32 }
  0xfa   : > { %v17242_v25 = vpop.f32.mrf.mxu0  ;;  %v3789_v39 = vrot.slane %v3761_v35, %v18098_v9  ;;  %v3791_v14 = vcombine.high %v3775_v31, %v3775_v31  ;;  %v3792_v50 = vcombine.high %v3782_v2, %v3782_v2  ;;  %v6732_v30 = vcombine.low %v3768_v0, %v3768_v0  ;;  %v17275_v45 = vpop.f32.mrf.mxu1 }
  0xfb   : > { %v2827_v59 = vcombine.high %v17242_v25, %v17242_v25  ;;  %v2834_v33 = vrot.slane %v17242_v25, %v18098_v9  ;;  %v5779_v54 = vrot.slane %v18728_v36, %v18098_v9  ;;  %v2710_v52 = vrot.slane %v2694_v58, %v18098_v9 }
  0xfc   : > { %v6733_v60 = vcombine.low %v3782_v2, %v3790_v6  ;;  %v18743_v37 = vcombine.low %v5765_v12, %v5772_v17  ;;  %v18746_v43 = vrot.slane %v6828_v55, %v18098_v9  ;;  %v16603_v46 = vcombine.high %v2703_v38, %v2717_v32  ;;  %v2583_v48 = vpop.f32.mrf.mxu0  ;;  %v3648_v55 = vpop.f32.mrf.mxu1 }
  0xfd   : > { %v2841_v22 = vrot.slane %v2827_v59, %v18098_v9  ;;  %v2842_v29 = vcombine.high %v2834_v33, %v2834_v33  ;;  %v18749_v28 = vrot.slane %v6829_v49, %v18098_v9  ;;  %v5694_v53 = vcombine.low %v2710_v52, %v2724_v5 }
  0xfe   : > { %v16604_v56 = vcombine.high %v2710_v52, %v2724_v5  ;;  %v18752_v44 = vrot.slane %v5692_v57, %v18098_v9  ;;  %v6734_v42 = vcombine.low %v3792_v50, %v3775_v31  ;;  %v6735_v27 = vcombine.low %v3789_v39, %v3791_v14 }
  0xff   : > { %v6742_v58 = vrot.slane %v6732_v30, %v18098_v9  ;;  %v3892_v34 = vcombine.high %v17275_v45, %v17275_v45  ;;  %v6749_v26 = vrot.slane %v6733_v60, %v18098_v9  ;;  %v2843_v41 = vcombine.high %v2841_v22, %v2841_v22 }
 0x100   : > { %v3899_v21 = vrot.slane %v17275_v45, %v18098_v9  ;;  %v2778_v62 = vcombine.high %v2583_v48, %v2583_v48  ;;  %v18758_v51 = vrot.slane %v16603_v46, %v18098_v9  ;;  %v2857_v61 = vrot.slane %v2841_v22, %v18098_v9 }
 0x101   : > { %v2864_v63 = vrot.slane %v2842_v29, %v18098_v9  ;;  %v3906_v0 = vrot.slane %v3892_v34, %v18098_v9  ;;  %v18764_v15 = vrot.slane %v5694_v53, %v18098_v9  ;;  %v2785_v19 = vrot.slane %v2583_v48, %v18098_v9 }
 0x102   : > { %v3907_v16 = vcombine.high %v3899_v21, %v3899_v21  ;;  %v2792_v23 = vrot.slane %v2778_v62, %v18098_v9  ;;  %v18769_v25 = vrot.slane %v16604_v56, %v18098_v9  ;;  %v3793_v13 = vcombine.high %v3789_v39, %v3789_v39 }
 0x103   : > { %v2850_v20 = vrot.slane %v2834_v33, %v18098_v9  ;;  %v3908_v1 = vcombine.high %v3906_v0, %v3906_v0  ;;  %v6756_v32 = vrot.slane %v6734_v42, %v18098_v9  ;;  %v6763_v35 = vrot.slane %v6735_v27, %v18098_v9 }
 0x104   : > { %v18774_v31 = vcombine.low %v6742_v58, %v6749_v26  ;;  %v18777_v2 = vrot.slane %v2843_v41, %v18098_v9  ;;  %v2873_v38 = vcombine.high %v2857_v61, %v2857_v61  ;;  %v2874_v6 = vcombine.high %v2864_v63, %v2864_v63 }
 0x105   : > { %v18780_v59 = vrot.slane %v3899_v21, %v18098_v9  ;;  %v3922_v17 = vrot.slane %v3906_v0, %v18098_v9  ;;  %v3929_v33 = vrot.slane %v3907_v16, %v18098_v9  ;;  %v3936_v12 = vrot.slane %v3908_v1, %v18098_v9 }
 0x106   : > { %v2793_v49 = vcombine.high %v2785_v19, %v2785_v19  ;;  %v2794_v5 = vcombine.high %v2792_v23, %v2792_v23  ;;  %v18786_v57 = vcombine.low %v3793_v13, %v18704_v11  ;;  %v2777_v14 = vcombine.high %v18715_v47, %v18715_v47 }
 0x107   : > { %v3937_v39 = vcombine.high %v18780_v59, %v18780_v59  ;;  %v2801_v50 = vrot.slane %v2785_v19, %v18098_v9  ;;  %v2872_v52 = vcombine.high %v2850_v20, %v2850_v20  ;;  %v5821_v60 = vcombine.low %v2850_v20, %v2864_v63 }
 0x108   : > { %v3843_v22 = vcombine.high %v3648_v55, %v3648_v55  ;;  %v18795_v46 = vcombine.low %v6756_v32, %v6763_v35  ;;  %v5881_v29 = vcombine.low %v2874_v6, %v2857_v61  ;;  %v5882_v11 = vcombine.low %v18777_v2, %v2873_v38  ;;  %v17245_v61 = vpop.f32.mrf.mxu0 }
 0x109   : > { %v3850_v48 = vrot.slane %v3648_v55, %v18098_v9  ;;  %v16622_v53 = vcombine.high %v3929_v33, %v3929_v33  ;;  %v6925_v56 = vcombine.low %v3922_v17, %v3936_v12  ;;  %v2815_v45 = vrot.slane %v2793_v49, %v18098_v9 }
 0x10a   : > { %v2822_v47 = vrot.slane %v2794_v5, %v18098_v9  ;;  %v6909_v58 = vcombine.low %v3929_v33, %v3937_v39  ;;  %v5758_v34 = vcombine.low %v2777_v14, %v2801_v50  ;;  %v18806_v26 = vrot.slane %v5821_v60, %v18098_v9 }
 0x10b   : > { %v18809_v41 = vrot.slane %v2872_v52, %v18098_v9  ;;  %v2808_v21 = vrot.slane %v2792_v23, %v18098_v9  ;;  %v3857_v62 = vrot.slane %v3843_v22, %v18098_v9  ;;  %v5891_v63 = vrot.slane %v5881_v29, %v18098_v9 }
 0x10c   : > { %v5898_v0 = vrot.slane %v5882_v11, %v18098_v9  ;;  %v16623_v16 = vcombine.high %v3922_v17, %v3936_v12  ;;  %v3858_v19 = vcombine.high %v3850_v48, %v3850_v48  ;;  %v6934_v13 = vrot.slane %v16622_v53, %v18098_v9 }
 0x10d   : > { %23115 = vst [vmem:[#allocation7_spill] sm:$0xff] %v18809_v41  ;;  %v6941_v20 = vrot.slane %v6925_v56, %v18098_v9  ;;  %v5810_v1 = vrot.slane %v2815_v45, %v18098_v9  ;;  %v5819_v32 = vcombine.low %v2808_v21, %v2822_v47  ;;  %v6916_v35 = vrot.slane %v6909_v58, %v18098_v9 }
 0x10e   : > { %v5786_v23 = vrot.slane %v5758_v34, %v18098_v9  ;;  %v2925_v38 = vcombine.high %v17245_v61, %v17245_v61  ;;  %v2932_v6 = vrot.slane %v17245_v61, %v18098_v9  ;;  %v16605_v55 = vcombine.high %v2801_v50, %v2815_v45  ;;  %v17278_v34 = vpop.f32.mrf.mxu1 }
 0x10f   : > { %v16606_v33 = vcombine.high %v2808_v21, %v2822_v47  ;;  %v3859_v49 = vcombine.high %v3857_v62, %v3857_v62  ;;  %v3866_v17 = vrot.slane %v3850_v48, %v18098_v9  ;;  %v18824_v5 = vcombine.low %v5891_v63, %v5898_v0 }
 0x110   : > { %v18827_v39 = vrot.slane %v16623_v16, %v18098_v9  ;;  %v3880_v14 = vrot.slane %v3858_v19, %v18098_v9  ;;  %v6956_v52 = vcombine.low %v6934_v13, %v6941_v20  ;;  %v18831_v60 = vrot.slane %v5810_v1, %v18098_v9 }
 0x111   : > { %23116 = vst [vmem:[#allocation8_spill] sm:$0xff] %v18824_v5  ;;  %v18834_v50 = vrot.slane %v5819_v32, %v18098_v9  ;;  %v3873_v22 = vrot.slane %v3857_v62, %v18098_v9  ;;  %v18838_v29 = vrot.slane %v6916_v35, %v18098_v9  ;;  %v18843_v11 = vcombine.low %v5779_v54, %v5786_v23  ;;  %v2593_v54 = vpop.f32.mrf.mxu0 }
 0x112   : > { %v2939_v48 = vrot.slane %v2925_v38, %v18098_v9  ;;  %v2940_v53 = vcombine.high %v2932_v6, %v2932_v6  ;;  %v18847_v56 = vrot.slane %v16605_v55, %v18098_v9  ;;  %v18850_v45 = vrot.slane %v16606_v33, %v18098_v9 }
 0x113   : > { %23117 = vst [vmem:[#allocation9_spill] sm:$0xff] %v18834_v50  ;;  %v3887_v47 = vrot.slane %v3859_v49, %v18098_v9  ;;  %v16621_v58 = vcombine.high %v3866_v17, %v3866_v17  ;;  %v3890_v21 = vcombine.high %v3880_v14, %v3880_v14  ;;  %v6845_v62 = vcombine.low %v3866_v17, %v3880_v14 }
 0x114   : > { %23118 = vst [vmem:[#allocation10_spill] sm:$0xff] %v18847_v56  ;;  %v3990_v61 = vcombine.high %v17278_v34, %v17278_v34  ;;  %v3997_v36 = vrot.slane %v17278_v34, %v18098_v9  ;;  %v18855_v63 = vrot.slane %v6956_v52, %v18098_v9  ;;  %v3889_v16 = vcombine.high %v3873_v22, %v3873_v22  ;;  %v3658_v34 = vpop.f32.mrf.mxu1 }
 0x115   : > { %v2948_v19 = vrot.slane %v2932_v6, %v18098_v9  ;;  %v2941_v13 = vcombine.high %v2939_v48, %v2939_v48  ;;  %v18861_v20 = vrot.slane %v2939_v48, %v18098_v9  ;;  %v2962_v1 = vrot.slane %v2940_v53, %v18098_v9 }
 0x116   : > { %23119 = vst [vmem:[#allocation11_spill] sm:$0xff] %v18855_v63  ;;  %v4004_v32 = vrot.slane %v3990_v61, %v18098_v9  ;;  %v3891_v35 = vcombine.high %v3887_v47, %v3887_v47  ;;  %v6870_v23 = vrot.slane %v16621_v58, %v18098_v9  ;;  %v2876_v38 = vcombine.high %v2593_v54, %v2593_v54 }
 0x117   : > { %v2883_v55 = vrot.slane %v2593_v54, %v18098_v9  ;;  %v18868_v33 = vrot.slane %v6845_v62, %v18098_v9  ;;  %v6861_v49 = vcombine.low %v3890_v21, %v3873_v22  ;;  %v4005_v17 = vcombine.high %v3997_v36, %v3997_v36 }
 0x118   : > { %v4006_v6 = vcombine.high %v4004_v32, %v4004_v32  ;;  %v2875_v14 = vcombine.high %v18777_v2, %v18777_v2  ;;  %v2890_v52 = vrot.slane %v2876_v38, %v18098_v9  ;;  %v6862_v61 = vcombine.low %v3887_v47, %v3889_v16 }
 0x119   : > { %v2891_v48 = vcombine.high %v2883_v55, %v2883_v55  ;;  %v2899_v53 = vrot.slane %v2883_v55, %v18098_v9  ;;  %v18875_v58 = vrot.slane %v2941_v13, %v18098_v9  ;;  %v2971_v62 = vcombine.high %v18861_v20, %v18861_v20 }
 0x11a   : > { %v5946_v54 = vcombine.low %v2948_v19, %v2962_v1  ;;  %v16608_v22 = vcombine.high %v2948_v19, %v2962_v1  ;;  %v4020_v21 = vrot.slane %v4004_v32, %v18098_v9  ;;  %v4034_v24 = vrot.slane %v4006_v6, %v18098_v9 }
 0x11b   : > { %v2913_v2 = vrot.slane %v2891_v48, %v18098_v9  ;;  %v4027_v55 = vrot.slane %v4005_v17, %v18098_v9  ;;  %v2921_v47 = vcombine.high %v2899_v53, %v2899_v53  ;;  %v3941_v16 = vcombine.high %v3658_v34, %v3658_v34 }
 0x11c   : > { %v6863_v13 = vcombine.low %v3891_v35, %v18780_v59  ;;  %v2892_v12 = vcombine.high %v2890_v52, %v2890_v52  ;;  %v5883_v0 = vcombine.low %v2875_v14, %v2899_v53  ;;  %v3948_v42 = vrot.slane %v3658_v34, %v18098_v9 }
 0x11d   : > { %v6877_v19 = vrot.slane %v6861_v49, %v18098_v9  ;;  %v18889_v1 = vrot.slane %v3997_v36, %v18098_v9  ;;  %v4037_v32 = vcombine.high %v4027_v55, %v4027_v55  ;;  %v5884_v6 = vcombine.low %v2913_v2, %v2921_v47  ;;  %v17248_v36 = vpop.f32.mrf.mxu0 }
 0x11e   : > { %v6884_v48 = vrot.slane %v6862_v61, %v18098_v9  ;;  %v18893_v38 = vrot.slane %v5946_v54, %v18098_v9  ;;  %v7052_v17 = vcombine.low %v4034_v24, %v4034_v24  ;;  %v16625_v10 = vcombine.high %v4020_v21, %v4034_v24 }
 0x11f   : > { %v18896_v59 = vrot.slane %v16608_v22, %v18098_v9  ;;  %v5905_v35 = vrot.slane %v5883_v0, %v18098_v9  ;;  %v5912_v14 = vrot.slane %v5884_v6, %v18098_v9  ;;  %v3955_v49 = vrot.slane %v3941_v16, %v18098_v9 }
 0x120   : > { %23120 = vst [vmem:[#allocation12_spill] sm:$0xff] %v18893_v38  ;;  %v5999_v53 = vrot.slane %v18861_v20, %v18098_v9  ;;  %v18904_v34 = vcombine.low %v18875_v58, %v2971_v62  ;;  %v2920_v61 = vrot.slane %v2892_v12, %v18098_v9  ;;  %v3956_v54 = vcombine.high %v3948_v42, %v3948_v42  ;;  %v2603_v12 = vpop.f32.mrf.mxu0 }
 0x121   : > { %23121 = vst [vmem:[#allocation13_spill] sm:$0xff] %v18896_v59  ;;  %v4035_v24 = vcombine.high %v18889_v1, %v18889_v1  ;;  %v7037_v22 = vcombine.low %v4037_v32, %v4020_v21  ;;  %v2906_v0 = vrot.slane %v2890_v52, %v18098_v9  ;;  %v18910_v47 = vcombine.low %v5905_v35, %v5912_v14 }
 0x122   : > { %v7062_v16 = vrot.slane %v7052_v17, %v18098_v9  ;;  %v7069_v6 = vrot.slane %v16625_v10, %v18098_v9  ;;  %v2923_v30 = vcombine.high %v2913_v2, %v2913_v2  ;;  %v3023_v20 = vcombine.high %v17248_v36, %v17248_v36 }
 0x123   : > { %23122 = vst [vmem:[#allocation14_spill] sm:$0xff] %v18910_v47  ;;  %v6891_v62 = vrot.slane %v6863_v13, %v18098_v9  ;;  %v18915_v27 = vcombine.low %v6870_v23, %v6877_v19  ;;  %v3957_v18 = vcombine.high %v3955_v49, %v3955_v49  ;;  %v5944_v7 = vcombine.low %v2906_v0, %v2920_v61 }
 0x124   : > { %v16607_v21 = vcombine.high %v2906_v0, %v2920_v61  ;;  %v3964_v52 = vrot.slane %v3948_v42, %v18098_v9  ;;  %v3978_v32 = vrot.slane %v3956_v54, %v18098_v9  ;;  %v18922_v17 = vrot.slane %v5999_v53, %v18098_v9 }
 0x125   : > { %23123 = vst [vmem:[#allocation15_spill] sm:$0xff] %v18915_v27  ;;  %v18926_v2 = vcombine.low %v4027_v55, %v4035_v24  ;;  %v7044_v23 = vrot.slane %v7037_v22, %v18098_v9  ;;  %v7084_v13 = vcombine.low %v7062_v16, %v7069_v6  ;;  %v18930_v19 = vrot.slane %v2923_v30, %v18098_v9 }
 0x126   : > { %23124 = vst [vmem:[#allocation16_spill] sm:$0xff] %v18922_v17  ;;  %v3971_v35 = vrot.slane %v3955_v49, %v18098_v9  ;;  %v3037_v42 = vrot.slane %v3023_v20, %v18098_v9  ;;  %v18934_v14 = vcombine.low %v6884_v48, %v6891_v62  ;;  %v3985_v61 = vrot.slane %v3957_v18, %v18098_v9  ;;  %v17281_v49 = vpop.f32.mrf.mxu1 }
 0x127   : > { %23125 = vst [vmem:[#allocation17_spill] sm:$0xff] %v18926_v2  ;;  %23126 = vst [vmem:[#allocation18_spill] sm:$0xff] %v18930_v19  ;;  %v3030_v55 = vrot.slane %v17248_v36, %v18098_v9  ;;  %v18941_v54 = vrot.slane %v5944_v7, %v18098_v9  ;;  %v18944_v24 = vrot.slane %v16607_v21, %v18098_v9 }
 0x128   : > { %23127 = vst [vmem:[#allocation19_spill] sm:$0xff] %v18934_v14  ;;  %v6927_v30 = vcombine.low %v3964_v52, %v3978_v32  ;;  %v16624_v22 = vcombine.high %v3964_v52, %v3978_v32  ;;  %v18949_v0 = vrot.slane %v7044_v23, %v18098_v9  ;;  %v4088_v16 = vcombine.high %v17281_v49, %v17281_v49  ;;  %v3668_v53 = vpop.f32.mrf.mxu1 }
 0x129   : > { %23128 = vst [vmem:[#allocation20_spill] sm:$0xff] %v18941_v54  ;;  %23129 = vst [vmem:[#allocation21_spill] sm:$0xff] %v18944_v24  ;;  %v4095_v18 = vrot.slane %v17281_v49, %v18098_v9  ;;  %v18953_v36 = vrot.slane %v7084_v13, %v18098_v9  ;;  %v3987_v6 = vcombine.high %v3971_v35, %v3971_v35 }
 0x12a   : > { %23130 = vst [vmem:[#allocation22_spill] sm:$0xff] %v18949_v0  ;;  %v3039_v20 = vcombine.high %v3037_v42, %v3037_v42  ;;  %v3989_v62 = vcombine.high %v3985_v61, %v3985_v61  ;;  %v6988_v21 = vcombine.low %v3971_v35, %v3971_v35  ;;  %v3038_v52 = vcombine.high %v3030_v55, %v3030_v55 }
 0x12b   : > { %v4103_v32 = vcombine.high %v4095_v18, %v4095_v18  ;;  %v6955_v48 = vrot.slane %v6927_v30, %v18098_v9  ;;  %v18961_v49 = vrot.slane %v16624_v22, %v18098_v9  ;;  %v3053_v13 = vrot.slane %v3037_v42, %v18098_v9 }
 0x12c   : > { %v3046_v7 = vrot.slane %v3030_v55, %v18098_v9  ;;  %v4102_v10 = vrot.slane %v4088_v16, %v18098_v9  ;;  %v18967_v35 = vrot.slane %v4095_v18, %v18098_v9  ;;  %v6989_v8 = vcombine.low %v3985_v61, %v3987_v6 }
 0x12d   : > { %23131 = vst [vmem:[#allocation23_spill] sm:$0xff] %v18961_v49  ;;  %v4125_v3 = vrot.slane %v4103_v32, %v18098_v9  ;;  %v18971_v23 = vrot.slane %v3039_v20, %v18098_v9  ;;  %v2974_v30 = vcombine.high %v2603_v12, %v2603_v12  ;;  %v2981_v22 = vrot.slane %v2603_v12, %v18098_v9 }
 0x12e   : > { %v18975_v4 = vcombine.low %v3989_v62, %v18889_v1  ;;  %v6998_v42 = vrot.slane %v6988_v21, %v18098_v9  ;;  %v3060_v55 = vrot.slane %v3038_v52, %v18098_v9  ;;  %v4039_v16 = vcombine.high %v3668_v53, %v3668_v53 }
 0x12f   : > { %v6957_v18 = vcombine.low %v18827_v39, %v6955_v48  ;;  %v3069_v61 = vcombine.high %v3053_v13, %v3053_v13  ;;  %v4046_v6 = vrot.slane %v3668_v53, %v18098_v9  ;;  %v4104_v20 = vcombine.high %v4102_v10, %v4102_v10 }
 0x130   : > { %23132 = vst [vmem:[#allocation24_spill] sm:$0xff] %v18975_v4  ;;  %v4118_v17 = vrot.slane %v4102_v10, %v18098_v9  ;;  %v4133_v1 = vcombine.high %v18967_v35, %v18967_v35  ;;  %v4135_v12 = vcombine.high %v4125_v3, %v4125_v3  ;;  %v7005_v62 = vrot.slane %v6989_v8, %v18098_v9 }
 0x131   : > { %v6073_v21 = vcombine.low %v3053_v13, %v18971_v23  ;;  %v2988_v52 = vrot.slane %v2974_v30, %v18098_v9  ;;  %v2989_v39 = vcombine.high %v2981_v22, %v2981_v22  ;;  %v6071_v32 = vcombine.low %v3046_v7, %v3060_v55 }
 0x132   : > { %v4134_v2 = vcombine.high %v4118_v17, %v4118_v17  ;;  %v4053_v53 = vrot.slane %v4039_v16, %v18098_v9  ;;  %v18993_v10 = vrot.slane %v6957_v18, %v18098_v9  ;;  %v16610_v59 = vcombine.high %v3046_v7, %v3060_v55 }
 0x133   : > { %v18996_v38 = vrot.slane %v3069_v61, %v18098_v9  ;;  %v4054_v8 = vcombine.high %v4046_v6, %v4046_v6  ;;  %v4132_v13 = vrot.slane %v4104_v20, %v18098_v9  ;;  %v7118_v24 = vcombine.low %v4125_v3, %v4133_v1 }
 0x134   : > { %23133 = vst [vmem:[#allocation25_spill] sm:$0xff] %v18993_v10  ;;  %v7119_v30 = vcombine.low %v4135_v12, %v4118_v17  ;;  %v2997_v54 = vrot.slane %v2981_v22, %v18098_v9  ;;  %v19001_v48 = vrot.slane %v6073_v21, %v18098_v9  ;;  %v2973_v16 = vcombine.high %v18875_v58, %v18875_v58  ;;  %v17284_v17 = vpop.f32.mrf.mxu1 }
 0x135   : > { %23134 = vst [vmem:[#allocation26_spill] sm:$0xff] %v18996_v38  ;;  %v2990_v4 = vcombine.high %v2988_v52, %v2988_v52  ;;  %v3011_v18 = vrot.slane %v2989_v39, %v18098_v9  ;;  %v19006_v7 = vcombine.low %v6998_v42, %v7005_v62  ;;  %v19009_v55 = vrot.slane %v6071_v32, %v18098_v9  ;;  %v17251_v32 = vpop.f32.mrf.mxu0 }
 0x136   : > { %23135 = vst [vmem:[#allocation27_spill] sm:$0xff] %v19001_v48  ;;  %v7165_v61 = vcombine.low %v4132_v13, %v4134_v2  ;;  %v4055_v20 = vcombine.high %v4053_v53, %v4053_v53  ;;  %v19012_v3 = vrot.slane %v16610_v59, %v18098_v9  ;;  %v4062_v22 = vrot.slane %v4046_v6, %v18098_v9 }
 0x137   : > { %23136 = vst [vmem:[#allocation28_spill] sm:$0xff] %v19006_v7  ;;  %23137 = vst [vmem:[#allocation29_spill] sm:$0xff] %v19009_v55  ;;  %v4076_v58 = vrot.slane %v4054_v8, %v18098_v9  ;;  %v7140_v1 = vrot.slane %v7118_v24, %v18098_v9  ;;  %v7147_v42 = vrot.slane %v7119_v30, %v18098_v9 }
 0x138   : > { %23138 = vst [vmem:[#allocation30_spill] sm:$0xff] %v19012_v3  ;;  %v16628_v12 = vcombine.high %v4132_v13, %v4132_v13  ;;  %v3019_v62 = vcombine.high %v2997_v54, %v2997_v54  ;;  %v19023_v59 = vrot.slane %v2990_v4, %v18098_v9  ;;  %v3021_v21 = vcombine.high %v3011_v18, %v3011_v18 }
 0x139   : > { %v6008_v39 = vcombine.low %v2973_v16, %v2997_v54  ;;  %v7172_v6 = vrot.slane %v7165_v61, %v18098_v9  ;;  %v3004_v8 = vrot.slane %v2988_v52, %v18098_v9  ;;  %v4069_v24 = vrot.slane %v4053_v53, %v18098_v9 }
 0x13a   : > { %v4083_v30 = vrot.slane %v4055_v20, %v18098_v9  ;;  %v7054_v13 = vcombine.low %v4062_v22, %v4076_v58  ;;  %v16626_v38 = vcombine.high %v4062_v22, %v4076_v58  ;;  %v3121_v55 = vcombine.high %v17251_v32, %v17251_v32 }
 0x13b   : > { %v3128_v7 = vrot.slane %v17251_v32, %v18098_v9  ;;  %v19030_v2 = vcombine.low %v7140_v1, %v7147_v42  ;;  %v19033_v4 = vrot.slane %v16628_v12, %v18098_v9  ;;  %v19035_v54 = vcombine.low %v3011_v18, %v3019_v62 }
 0x13c   : > { %v4186_v16 = vcombine.high %v17284_v17, %v17284_v17  ;;  %v19037_v61 = vcombine.low %v3021_v21, %v3004_v8  ;;  %v6024_v52 = vrot.slane %v6008_v39, %v18098_v9  ;;  %v16609_v53 = vcombine.high %v3004_v8, %v19023_v59  ;;  %v3678_v8 = vpop.f32.mrf.mxu1 }
 0x13d   : > { %23139 = vst [vmem:[#allocation31_spill] sm:$0xff] %v19030_v2  ;;  %v4193_v20 = vrot.slane %v17284_v17, %v18098_v9  ;;  %v19043_v22 = vrot.slane %v7172_v6, %v18098_v9  ;;  %v4087_v58 = vcombine.high %v4083_v30, %v4083_v30  ;;  %v7101_v1 = vcombine.low %v4069_v24, %v4083_v30 }
 0x13e   : > { %v16627_v42 = vcombine.high %v4069_v24, %v4069_v24  ;;  %v7076_v12 = vrot.slane %v7054_v13, %v18098_v9  ;;  %v7083_v18 = vrot.slane %v16626_v38, %v18098_v9  ;;  %v3135_v62 = vrot.slane %v3121_v55, %v18098_v9  ;;  %v2613_v13 = vpop.f32.mrf.mxu0 }
 0x13f   : > { %23140 = vst [vmem:[#allocation32_spill] sm:$0xff] %v19043_v22  ;;  %v3136_v32 = vcombine.high %v3128_v7, %v3128_v7  ;;  %v4200_v6 = vrot.slane %v4186_v16, %v18098_v9  ;;  %v23141_v38 = vrot.slane %v18904_v34, %v18098_v9  ;;  %v19063_v55 = vrot.slane %v16609_v53, %v18098_v9 }
 0x140   : > { %v4201_v30 = vcombine.high %v4193_v20, %v4193_v20  ;;  %v19066_v21 = vrot.slane %v7101_v1, %v18098_v9  ;;  %v19069_v17 = vcombine.low %v4087_v58, %v18967_v35  ;;  %v19072_v16 = vrot.slane %v16627_v42, %v18098_v9  ;;  %v17254_v5 = vpop.f32.mrf.mxu0 }
 0x141   : > { %v19060_v24 = vcombine.low %v23141_v38, %v6024_v52  ;;  %23142 = vst [vmem:[#allocation33_spill] sm:$0xff] %v19063_v55  ;;  %v3144_v39 = vrot.slane %v3128_v7, %v18098_v9  ;;  %v7085_v34 = vcombine.low %v7076_v12, %v7083_v18  ;;  %v3137_v52 = vcombine.high %v3135_v62, %v3135_v62 }
 0x142   : > { %v19076_v38 = vrot.slane %v3135_v62, %v18098_v9  ;;  %v3158_v53 = vrot.slane %v3136_v32, %v18098_v9  ;;  %v4202_v2 = vcombine.high %v4200_v6, %v4200_v6  ;;  %v4209_v1 = vrot.slane %v4193_v20, %v18098_v9 }
 0x143   : > { %v3072_v48 = vcombine.high %v2613_v13, %v2613_v13  ;;  %v3079_v35 = vrot.slane %v2613_v13, %v18098_v9  ;;  %v4216_v58 = vrot.slane %v4200_v6, %v18098_v9  ;;  %v4223_v42 = vrot.slane %v4201_v30, %v18098_v9 }
 0x144   : > { %v3071_v7 = vcombine.high %v18971_v23, %v18971_v23  ;;  %v4137_v12 = vcombine.high %v3678_v8, %v3678_v8  ;;  %v4144_v3 = vrot.slane %v3678_v8, %v18098_v9  ;;  %v7133_v20 = vrot.slane %v19069_v17, %v18098_v9 }
 0x145   : > { %v3087_v62 = vcombine.high %v3079_v35, %v3079_v35  ;;  %v3095_v32 = vrot.slane %v3079_v35, %v18098_v9  ;;  %v3165_v13 = vrot.slane %v3137_v52, %v18098_v9  ;;  %v3086_v6 = vrot.slane %v3072_v48, %v18098_v9 }
 0x146   : > { %v4151_v30 = vrot.slane %v4137_v12, %v18098_v9  ;;  %v19095_v23 = vrot.slane %v4202_v2, %v18098_v9  ;;  %v4231_v22 = vcombine.high %v4209_v1, %v4209_v1  ;;  %v4232_v0 = vcombine.high %v4216_v58, %v4216_v58 }
 0x147   : > { %v3109_v18 = vrot.slane %v3087_v62, %v18098_v9  ;;  %v3117_v55 = vcombine.high %v3095_v32, %v3095_v32  ;;  %v4233_v35 = vcombine.high %v4223_v42, %v4223_v42  ;;  %v6133_v19 = vcombine.low %v3071_v7, %v3095_v32 }
 0x148   : > { %v4152_v8 = vcombine.high %v4144_v3, %v4144_v3  ;;  %v19099_v63 = vrot.slane %v7085_v34, %v18098_v9  ;;  %v6196_v17 = vcombine.low %v3144_v39, %v3158_v53  ;;  %v16611_v52 = vcombine.high %v3144_v39, %v3158_v53 }
 0x149   : > { %v6134_v10 = vcombine.low %v3109_v18, %v3117_v55  ;;  %v6198_v48 = vcombine.low %v19076_v38, %v3165_v13  ;;  %v3088_v12 = vcombine.high %v3086_v6, %v3086_v6  ;;  %v3102_v2 = vrot.slane %v3086_v6, %v18098_v9 }
 0x14a   : > { %v4153_v47 = vcombine.high %v4151_v30, %v4151_v30  ;;  %v7244_v49 = vcombine.low %v4209_v1, %v4209_v1  ;;  %v7245_v62 = vcombine.low %v4223_v42, %v4231_v22  ;;  %v6143_v41 = vrot.slane %v6133_v19, %v18098_v9 }
 0x14b   : > { %v6150_v7 = vrot.slane %v6134_v10, %v18098_v9  ;;  %v7246_v32 = vcombine.low %v4233_v35, %v4216_v58  ;;  %v7247_v34 = vcombine.low %v19095_v23, %v4232_v0  ;;  %v4160_v27 = vrot.slane %v4144_v3, %v18098_v9 }
 0x14c   : > { %v4174_v39 = vrot.slane %v4152_v8, %v18098_v9  ;;  %v4167_v53 = vrot.slane %v4151_v30, %v18098_v9  ;;  %v4181_v6 = vrot.slane %v4153_v47, %v18098_v9  ;;  %v3219_v14 = vcombine.high %v17254_v5, %v17254_v5 }
 0x14d   : > { %v19108_v55 = vcombine.low %v6143_v41, %v6150_v7  ;;  %v16612_v22 = vcombine.high %v19076_v38, %v3165_v13  ;;  %v3116_v19 = vrot.slane %v3088_v12, %v18098_v9  ;;  %v3118_v1 = vcombine.high %v3102_v2, %v3102_v2 }
 0x14e   : > { %v3119_v10 = vcombine.high %v3109_v18, %v3109_v18  ;;  %v19115_v58 = vrot.slane %v6196_v17, %v18098_v9  ;;  %v19118_v0 = vrot.slane %v16611_v52, %v18098_v9  ;;  %v7254_v41 = vrot.slane %v7244_v49, %v18098_v9  ;;  %v17287_v17 = vpop.f32.mrf.mxu1 }
 0x14f   : > { %23143 = vst [vmem:[#allocation34_spill] sm:$0xff] %v19108_v55  ;;  %v3226_v3 = vrot.slane %v17254_v5, %v18098_v9  ;;  %v7261_v42 = vrot.slane %v7245_v62, %v18098_v9  ;;  %v7268_v47 = vrot.slane %v7246_v32, %v18098_v9  ;;  %v7275_v38 = vrot.slane %v7247_v34, %v18098_v9  ;;  %v2623_v34 = vpop.f32.mrf.mxu0 }
 0x150   : > { %23144 = vst [vmem:[#allocation35_spill] sm:$0xff] %v19115_v58  ;;  %23145 = vst [vmem:[#allocation36_spill] sm:$0xff] %v19118_v0  ;;  %v7181_v13 = vcombine.low %v4160_v27, %v4174_v39  ;;  %v19126_v30 = vcombine.low %v19072_v16, %v7133_v20  ;;  %v16629_v18 = vcombine.high %v4160_v27, %v4174_v39 }
 0x151   : > { %v7183_v35 = vcombine.low %v4167_v53, %v4181_v6  ;;  %v3233_v8 = vrot.slane %v3219_v14, %v18098_v9  ;;  %v19130_v52 = vrot.slane %v6198_v48, %v18098_v9  ;;  %v6135_v49 = vcombine.low %v3119_v10, %v3102_v2  ;;  %v17257_v0 = vpop.f32.mrf.mxu0 }
 0x152   : > { %23146 = vst [vmem:[#allocation37_spill] sm:$0xff] %v19126_v30  ;;  %v6136_v5 = vcombine.low %v3116_v19, %v3118_v1  ;;  %v4291_v12 = vrot.slane %v17287_v17, %v18098_v9  ;;  %v19134_v62 = vrot.slane %v16612_v22, %v18098_v9  ;;  %v16630_v16 = vcombine.high %v4167_v53, %v4181_v6 }
 0x153   : > { %23147 = vst [vmem:[#allocation38_spill] sm:$0xff] %v19130_v52  ;;  %v3234_v20 = vcombine.high %v3226_v3, %v3226_v3  ;;  %v19138_v27 = vcombine.low %v7254_v41, %v7261_v42  ;;  %v19140_v32 = vcombine.low %v7268_v47, %v7275_v38  ;;  %v7197_v14 = vrot.slane %v7181_v13, %v18098_v9 }
 0x154   : > { %23148 = vst [vmem:[#allocation39_spill] sm:$0xff] %v19134_v62  ;;  %v4299_v48 = vcombine.high %v4291_v12, %v4291_v12  ;;  %v7204_v2 = vrot.slane %v16629_v18, %v18098_v9  ;;  %v7211_v39 = vrot.slane %v7183_v35, %v18098_v9  ;;  %v3235_v1 = vcombine.high %v3233_v8, %v3233_v8 }
 0x155   : > { %23149 = vst [vmem:[#allocation40_spill] sm:$0xff] %v19138_v27  ;;  %23150 = vst [vmem:[#allocation41_spill] sm:$0xff] %v19140_v32  ;;  %v4284_v22 = vcombine.high %v17287_v17, %v17287_v17  ;;  %v3120_v10 = vcombine.high %v3116_v19, %v3116_v19  ;;  %v6157_v30 = vrot.slane %v6135_v49, %v18098_v9 }
 0x156   : > { %v6164_v53 = vrot.slane %v6136_v5, %v18098_v9  ;;  %v4321_v6 = vrot.slane %v4299_v48, %v18098_v9  ;;  %v19151_v42 = vrot.slane %v16630_v16, %v18098_v9  ;;  %v3256_v47 = vrot.slane %v3234_v20, %v18098_v9 }
 0x157   : > { %v3170_v38 = vcombine.high %v2623_v34, %v2623_v34  ;;  %v7212_v18 = vcombine.low %v19033_v4, %v7197_v14  ;;  %v3177_v35 = vrot.slane %v2623_v34, %v18098_v9  ;;  %v7213_v17 = vcombine.low %v7204_v2, %v7211_v39  ;;  %v3688_v39 = vpop.f32.mrf.mxu1 }
 0x158   : > { %v3263_v49 = vrot.slane %v3235_v1, %v18098_v9  ;;  %v4298_v5 = vrot.slane %v4284_v22, %v18098_v9  ;;  %v4307_v16 = vrot.slane %v4291_v12, %v18098_v9  ;;  %v19163_v48 = vcombine.low %v6157_v30, %v6164_v53 }
 0x159   : > { %v19166_v20 = vrot.slane %v3120_v10, %v18098_v9  ;;  %v19169_v13 = vrot.slane %v3226_v3, %v18098_v9  ;;  %v4331_v19 = vcombine.high %v4321_v6, %v4321_v6  ;;  %v3249_v14 = vrot.slane %v3233_v8, %v18098_v9 }
 0x15a   : > { %23151 = vst [vmem:[#allocation42_spill] sm:$0xff] %v19163_v48  ;;  %v6314_v34 = vrot.slane %v3256_v47, %v18098_v9  ;;  %v3184_v2 = vrot.slane %v3170_v38, %v18098_v9  ;;  %v19177_v30 = vrot.slane %v7212_v18, %v18098_v9  ;;  %v4314_v1 = vrot.slane %v4298_v5, %v18098_v9 }
 0x15b   : > { %23152 = vst [vmem:[#allocation43_spill] sm:$0xff] %v19166_v20  ;;  %v16613_v12 = vcombine.high %v19169_v13, %v3256_v47  ;;  %v3185_v3 = vcombine.high %v3177_v35, %v3177_v35  ;;  %v19182_v22 = vrot.slane %v7213_v17, %v18098_v9  ;;  %v6323_v10 = vcombine.low %v3249_v14, %v3263_v49 }
 0x15c   : > { %23153 = vst [vmem:[#allocation44_spill] sm:$0xff] %v19177_v30  ;;  %v4300_v53 = vcombine.high %v4298_v5, %v4298_v5  ;;  %v16633_v41 = vcombine.high %v4307_v16, %v4307_v16  ;;  %v7373_v8 = vcombine.low %v4331_v19, %v4314_v1  ;;  %v3193_v7 = vrot.slane %v3177_v35, %v18098_v9 }
 0x15d   : > { %23154 = vst [vmem:[#allocation45_spill] sm:$0xff] %v19182_v22  ;;  %v4235_v4 = vcombine.high %v3688_v39, %v3688_v39  ;;  %v4242_v38 = vrot.slane %v3688_v39, %v18098_v9  ;;  %v19187_v18 = vrot.slane %v6314_v34, %v18098_v9  ;;  %v16614_v27 = vcombine.high %v3249_v14, %v3263_v49 }
 0x15e   : > { %v7357_v47 = vcombine.low %v4307_v16, %v4321_v6  ;;  %v3186_v32 = vcombine.high %v3184_v2, %v3184_v2  ;;  %v4330_v62 = vcombine.high %v4314_v1, %v4314_v1  ;;  %v3200_v52 = vrot.slane %v3184_v2, %v18098_v9 }
 0x15f   : > { %23155 = vst [vmem:[#allocation46_spill] sm:$0xff] %v19187_v18  ;;  %v3207_v17 = vrot.slane %v3185_v3, %v18098_v9  ;;  %v4249_v5 = vrot.slane %v4235_v4, %v18098_v9  ;;  %v19193_v19 = vrot.slane %v16613_v12, %v18098_v9  ;;  %v19196_v35 = vrot.slane %v6323_v10, %v18098_v9 }
 0x160   : > { %v19199_v34 = vrot.slane %v4300_v53, %v18098_v9  ;;  %v4250_v49 = vcombine.high %v4242_v38, %v4242_v38  ;;  %v7382_v6 = vrot.slane %v16633_v41, %v18098_v9  ;;  %v7389_v16 = vrot.slane %v7373_v8, %v18098_v9 }
 0x161   : > { %23156 = vst [vmem:[#allocation47_spill] sm:$0xff] %v19193_v19  ;;  %23157 = vst [vmem:[#allocation48_spill] sm:$0xff] %v19196_v35  ;;  %v3215_v14 = vcombine.high %v3193_v7, %v3193_v7  ;;  %v4251_v2 = vcombine.high %v4249_v5, %v4249_v5  ;;  %v19204_v39 = vrot.slane %v16614_v27, %v18098_v9  ;;  %v2633_v35 = vpop.f32.mrf.mxu0 }
 0x162   : > { %v19207_v4 = vrot.slane %v7357_v47, %v18098_v9  ;;  %v3214_v12 = vrot.slane %v3186_v32, %v18098_v9  ;;  %v3317_v1 = vcombine.high %v17257_v0, %v17257_v0  ;;  %v19211_v3 = vcombine.low %v19199_v34, %v4330_v62 }
 0x163   : > { %23158 = vst [vmem:[#allocation49_spill] sm:$0xff] %v19204_v39  ;;  %v3216_v10 = vcombine.high %v3200_v52, %v3200_v52  ;;  %v3217_v53 = vcombine.high %v3207_v17, %v3207_v17  ;;  %v4234_v41 = vcombine.high %v19095_v23, %v19095_v23  ;;  %v6251_v8 = vrot.slane %v3193_v7, %v18098_v9 }
 0x164   : > { %23159 = vst [vmem:[#allocation50_spill] sm:$0xff] %v19207_v4  ;;  %v4258_v58 = vrot.slane %v4242_v38, %v18098_v9  ;;  %v4272_v27 = vrot.slane %v4250_v49, %v18098_v9  ;;  %v3324_v47 = vrot.slane %v17257_v0, %v18098_v9  ;;  %v19219_v18 = vcombine.low %v7382_v6, %v7389_v16  ;;  %v17290_v49 = vpop.f32.mrf.mxu1 }
 0x165   : > { %v19221_v32 = vcombine.low %v3207_v17, %v3215_v14  ;;  %v4265_v62 = vrot.slane %v4249_v5, %v18098_v9  ;;  %v4279_v30 = vrot.slane %v4251_v2, %v18098_v9  ;;  %v3218_v7 = vcombine.high %v3214_v12, %v3214_v12 }
 0x166   : > { %23160 = vst [vmem:[#allocation51_spill] sm:$0xff] %v19219_v18  ;;  %v3331_v38 = vrot.slane %v3317_v1, %v18098_v9  ;;  %v19232_v6 = vcombine.low %v3217_v53, %v3200_v52  ;;  %v7293_v17 = vcombine.low %v4234_v41, %v4258_v58  ;;  %v4382_v16 = vcombine.high %v17290_v49, %v17290_v49 }
 0x167   : > { %23161 = vst [vmem:[#allocation52_spill] sm:$0xff] %v19221_v32  ;;  %v19235_v5 = vrot.slane %v6251_v8, %v18098_v9  ;;  %v7308_v14 = vcombine.low %v4272_v27, %v4272_v27  ;;  %v16631_v2 = vcombine.high %v4258_v58, %v4272_v27  ;;  %v3332_v22 = vcombine.high %v3324_v47, %v3324_v47 }
 0x168   : > { %23162 = vst [vmem:[#allocation53_spill] sm:$0xff] %v19232_v6  ;;  %v19239_v19 = vcombine.low %v3214_v12, %v3216_v10  ;;  %v7310_v0 = vcombine.low %v4265_v62, %v4279_v30  ;;  %v19244_v52 = vcombine.low %v3218_v7, %v19169_v13  ;;  %v16632_v53 = vcombine.high %v4265_v62, %v4279_v30 }
 0x169   : > { %23163 = vst [vmem:[#allocation54_spill] sm:$0xff] %v19235_v5  ;;  %v3333_v41 = vcombine.high %v3331_v38, %v3331_v38  ;;  %v3340_v8 = vrot.slane %v3324_v47, %v18098_v9  ;;  %v7300_v27 = vrot.slane %v7293_v17, %v18098_v9  ;;  %v4396_v23 = vrot.slane %v4382_v16, %v18098_v9 }
 0x16a   : > { %23164 = vst [vmem:[#allocation55_spill] sm:$0xff] %v19239_v19  ;;  %23165 = vst [vmem:[#allocation56_spill] sm:$0xff] %v19244_v52  ;;  %v3268_v12 = vcombine.high %v2633_v35, %v2633_v35  ;;  %v7318_v10 = vrot.slane %v7308_v14, %v18098_v9  ;;  %v7325_v1 = vrot.slane %v16631_v2, %v18098_v9  ;;  %v3698_v2 = vpop.f32.mrf.mxu1 }
 0x16b   : > { %v3354_v18 = vrot.slane %v3332_v22, %v18098_v9  ;;  %v4389_v13 = vrot.slane %v17290_v49, %v18098_v9  ;;  %v19258_v47 = vrot.slane %v7310_v0, %v18098_v9  ;;  %v4412_v62 = vrot.slane %v4396_v23, %v18098_v9 }
 0x16c   : > { %v3275_v7 = vrot.slane %v2633_v35, %v18098_v9  ;;  %v19263_v17 = vrot.slane %v16632_v53, %v18098_v9  ;;  %v3361_v16 = vrot.slane %v3333_v41, %v18098_v9  ;;  %v3362_v14 = vcombine.high %v3340_v8, %v3340_v8 }
 0x16d   : > { %23166 = vst [vmem:[#allocation57_spill] sm:$0xff] %v19258_v47  ;;  %v3282_v22 = vrot.slane %v3268_v12, %v18098_v9  ;;  %v19268_v49 = vrot.slane %v7300_v27, %v18098_v9  ;;  %v3347_v30 = vrot.slane %v3331_v38, %v18098_v9  ;;  %v4398_v0 = vcombine.high %v4396_v23, %v4396_v23 }
 0x16e   : > { %23167 = vst [vmem:[#allocation58_spill] sm:$0xff] %v19263_v17  ;;  %v3283_v58 = vcombine.high %v3275_v7, %v3275_v7  ;;  %v7340_v5 = vcombine.low %v7318_v10, %v7325_v1  ;;  %v3364_v19 = vcombine.high %v3354_v18, %v3354_v18  ;;  %v4397_v32 = vcombine.high %v4389_v13, %v4389_v13 }
 0x16f   : > { %23168 = vst [vmem:[#allocation59_spill] sm:$0xff] %v19268_v49  ;;  %v3284_v35 = vcombine.high %v3282_v22, %v3282_v22  ;;  %v4428_v6 = vcombine.high %v4412_v62, %v4412_v62  ;;  %v19272_v53 = vrot.slane %v3275_v7, %v18098_v9  ;;  %v4333_v52 = vcombine.high %v3698_v2, %v3698_v2 }
 0x170   : > { %v3305_v41 = vrot.slane %v3283_v58, %v18098_v9  ;;  %v19277_v27 = vcombine.low %v3354_v18, %v3362_v14  ;;  %v6448_v49 = vcombine.low %v3347_v30, %v3361_v16  ;;  %v16615_v38 = vcombine.high %v3347_v30, %v3361_v16 }
 0x171   : > { %v3312_v23 = vrot.slane %v3284_v35, %v18098_v9  ;;  %v19281_v1 = vrot.slane %v4398_v0, %v18098_v9  ;;  %v4347_v7 = vrot.slane %v4333_v52, %v18098_v9  ;;  %v19286_v4 = vrot.slane %v3364_v19, %v18098_v9  ;;  %v17260_v35 = vpop.f32.mrf.mxu0 }
 0x172   : > { %23169 = vst [vmem:[#allocation60_spill] sm:$0xff] %v19277_v27  ;;  %v6325_v10 = vcombine.low %v19272_v53, %v3305_v41  ;;  %v4405_v58 = vrot.slane %v4389_v13, %v18098_v9  ;;  %v4340_v18 = vrot.slane %v3698_v2, %v18098_v9  ;;  %v4419_v14 = vrot.slane %v4397_v32, %v18098_v9 }
 0x173   : > { %23170 = vst [vmem:[#allocation61_spill] sm:$0xff] %v19286_v4  ;;  %v3316_v20 = vcombine.high %v3312_v23, %v3312_v23  ;;  %v7500_v12 = vcombine.low %v4412_v62, %v4412_v62  ;;  %v7501_v30 = vcombine.low %v19281_v1, %v4428_v6  ;;  %v19296_v0 = vrot.slane %v7340_v5, %v18098_v9  ;;  %v2643_v47 = vpop.f32.mrf.mxu0 }
 0x174   : > { %v19293_v16 = vrot.slane %v6325_v10, %v18098_v9  ;;  %v19299_v52 = vrot.slane %v6448_v49, %v18098_v9  ;;  %v3298_v19 = vrot.slane %v3282_v22, %v18098_v9  ;;  %v19305_v2 = vrot.slane %v16615_v38, %v18098_v9 }
 0x175   : > { %23172 = vst [vmem:[#allocation63_spill] sm:$0xff] %v19296_v0  ;;  %v19302_v13 = vcombine.low %v3316_v20, %v3340_v8  ;;  %v4348_v6 = vcombine.high %v4340_v18, %v4340_v18  ;;  %v4349_v62 = vcombine.high %v4347_v7, %v4347_v7  ;;  %v16636_v10 = vcombine.high %v4405_v58, %v4419_v14  ;;  %v17293_v20 = vpop.f32.mrf.mxu1 }
 0x176   : > { %23171 = vst [vmem:[#allocation62_spill] sm:$0xff] %v19293_v16  ;;  %23173 = vst [vmem:[#allocation64_spill] sm:$0xff] %v19299_v52  ;;  %v4332_v49 = vcombine.high %v19199_v34, %v19199_v34  ;;  %v4356_v22 = vrot.slane %v4340_v18, %v18098_v9  ;;  %v7439_v8 = vcombine.low %v4405_v58, %v4419_v14 }
 0x177   : > { %23174 = vst [vmem:[#allocation65_spill] sm:$0xff] %v19302_v13  ;;  %23175 = vst [vmem:[#allocation66_spill] sm:$0xff] %v19305_v2  ;;  %v7510_v38 = vrot.slane %v7500_v12, %v18098_v9  ;;  %v7517_v32 = vrot.slane %v7501_v30, %v18098_v9  ;;  %v3314_v16 = vcombine.high %v3298_v19, %v3298_v19 }
 0x178   : > { %v3315_v39 = vcombine.high %v3305_v41, %v3305_v41  ;;  %v3415_v0 = vcombine.high %v17260_v35, %v17260_v35  ;;  %v3422_v17 = vrot.slane %v17260_v35, %v18098_v9  ;;  %v4363_v34 = vrot.slane %v4347_v7, %v18098_v9 }
 0x179   : > { %v4370_v18 = vrot.slane %v4348_v6, %v18098_v9  ;;  %v4377_v27 = vrot.slane %v4349_v62, %v18098_v9  ;;  %v19325_v58 = vrot.slane %v16636_v10, %v18098_v9  ;;  %v7375_v12 = vcombine.low %v4332_v49, %v4356_v22 }
 0x17a   : > { %v3430_v14 = vcombine.high %v3422_v17, %v3422_v17  ;;  %v4480_v30 = vcombine.high %v17293_v20, %v17293_v20  ;;  %v19328_v41 = vrot.slane %v7439_v8, %v18098_v9  ;;  %v19330_v35 = vcombine.low %v7510_v38, %v7517_v32 }
 0x17b   : > { %23176 = vst [vmem:[#allocation67_spill] sm:$0xff] %v19325_v58  ;;  %v3313_v5 = vcombine.high %v19272_v53, %v19272_v53  ;;  %v4378_v7 = vcombine.high %v4356_v22, %v4356_v22  ;;  %v6385_v2 = vcombine.low %v3315_v39, %v3298_v19  ;;  %v6386_v6 = vcombine.low %v3312_v23, %v3314_v16 }
 0x17c   : > { %23177 = vst [vmem:[#allocation68_spill] sm:$0xff] %v19328_v41  ;;  %23178 = vst [vmem:[#allocation69_spill] sm:$0xff] %v19330_v35  ;;  %v3429_v62 = vrot.slane %v3415_v0, %v18098_v9  ;;  %v19336_v52 = vrot.slane %v3422_v17, %v18098_v9  ;;  %v16634_v10 = vcombine.high %v4370_v18, %v4370_v18 }
 0x17d   : > { %v7437_v49 = vcombine.low %v4363_v34, %v4377_v27  ;;  %v3452_v4 = vrot.slane %v3430_v14, %v18098_v9  ;;  %v4487_v8 = vrot.slane %v17293_v20, %v18098_v9  ;;  %v7403_v53 = vrot.slane %v7375_v12, %v18098_v9 }
 0x17e   : > { %v16635_v22 = vcombine.high %v4363_v34, %v4377_v27  ;;  %v4494_v39 = vrot.slane %v4480_v30, %v18098_v9  ;;  %v19347_v17 = vrot.slane %v3313_v5, %v18098_v9  ;;  %v7421_v16 = vcombine.low %v4370_v18, %v4378_v7 }
 0x17f   : > { %v4495_v0 = vcombine.high %v4487_v8, %v4487_v8  ;;  %v6402_v19 = vrot.slane %v6386_v6, %v18098_v9  ;;  %v3431_v20 = vcombine.high %v3429_v62, %v3429_v62  ;;  %v3460_v38 = vcombine.high %v19336_v52, %v19336_v52 }
 0x180   : > { %23179 = vst [vmem:[#allocation70_spill] sm:$0xff] %v19347_v17  ;;  %v3366_v14 = vcombine.high %v2643_v47, %v2643_v47  ;;  %v6395_v12 = vrot.slane %v6385_v2, %v18098_v9  ;;  %v19354_v27 = vrot.slane %v16634_v10, %v18098_v9  ;;  %v19357_v34 = vrot.slane %v7437_v49, %v18098_v9 }
 0x181   : > { %v3462_v30 = vcombine.high %v3452_v4, %v3452_v4  ;;  %v23182_v5 = vrot.slane %v19211_v3, %v18098_v9  ;;  %v19365_v7 = vrot.slane %v16635_v22, %v18098_v9  ;;  %v4496_v6 = vcombine.high %v4494_v39, %v4494_v39 }
 0x182   : > { %23180 = vst [vmem:[#allocation71_spill] sm:$0xff] %v19354_v27  ;;  %23181 = vst [vmem:[#allocation72_spill] sm:$0xff] %v19357_v34  ;;  %v3373_v23 = vrot.slane %v2643_v47, %v18098_v9  ;;  %v7428_v2 = vrot.slane %v7421_v16, %v18098_v9  ;;  %v19370_v10 = vrot.slane %v3429_v62, %v18098_v9 }
 0x183   : > { %v19362_v18 = vcombine.low %v23182_v5, %v7403_v53  ;;  %23184 = vst [vmem:[#allocation74_spill] sm:$0xff] %v19365_v7  ;;  %v4503_v49 = vrot.slane %v4487_v8, %v18098_v9  ;;  %v4517_v32 = vrot.slane %v4495_v0, %v18098_v9  ;;  %v19377_v53 = vrot.slane %v3431_v20, %v18098_v9 }
 0x184   : > { %23185 = vst [vmem:[#allocation75_spill] sm:$0xff] %v19370_v10  ;;  %v6513_v22 = vcombine.low %v3452_v4, %v3460_v38  ;;  %v3380_v5 = vrot.slane %v3366_v14, %v18098_v9  ;;  %v19382_v16 = vcombine.low %v6395_v12, %v6402_v19  ;;  %v6514_v62 = vcombine.low %v3462_v30, %v19370_v10  ;;  %v3708_v38 = vpop.f32.mrf.mxu1 }
 0x185   : > { %23183 = vst [vmem:[#allocation73_spill] sm:$0xff] %v19362_v18  ;;  %23186 = vst [vmem:[#allocation76_spill] sm:$0xff] %v19377_v53  ;;  %v4510_v8 = vrot.slane %v4494_v39, %v18098_v9  ;;  %v19391_v20 = vrot.slane %v4496_v6, %v18098_v9  ;;  %v3381_v4 = vcombine.high %v3373_v23, %v3373_v23  ;;  %v17263_v39 = vpop.f32.mrf.mxu0 }
 0x186   : > { %23187 = vst [vmem:[#allocation77_spill] sm:$0xff] %v19382_v16  ;;  %v19396_v19 = vrot.slane %v7428_v2, %v18098_v9  ;;  %v7566_v12 = vcombine.low %v4503_v49, %v4517_v32  ;;  %v16638_v30 = vcombine.high %v4503_v49, %v4517_v32  ;;  %v6535_v47 = vrot.slane %v6513_v22, %v18098_v9 }
 0x187   : > { %v6566_v0 = vrot.slane %v19377_v53, %v18098_v9  ;;  %v7613_v3 = vcombine.low %v4510_v8, %v19391_v20  ;;  %v3382_v6 = vcombine.high %v3380_v5, %v3380_v5  ;;  %v6542_v35 = vrot.slane %v6514_v62, %v18098_v9 }
 0x188   : > { %23188 = vst [vmem:[#allocation78_spill] sm:$0xff] %v19396_v19  ;;  %v16639_v10 = vcombine.high %v4510_v8, %v4510_v8  ;;  %v4431_v17 = vcombine.high %v3708_v38, %v3708_v38  ;;  %v4438_v14 = vrot.slane %v3708_v38, %v18098_v9  ;;  %v19405_v2 = vrot.slane %v3380_v5, %v18098_v9 }
 0x189   : > { %v3403_v32 = vrot.slane %v3381_v4, %v18098_v9  ;;  %v3513_v49 = vcombine.high %v17263_v39, %v17263_v39  ;;  %v3520_v22 = vrot.slane %v17263_v39, %v18098_v9  ;;  %v7588_v18 = vrot.slane %v7566_v12, %v18098_v9 }
 0x18a   : > { %23189 = vst [vmem:[#allocation79_spill] sm:$0xff] %v19405_v2  ;;  %v7595_v53 = vrot.slane %v16638_v30, %v18098_v9  ;;  %v4446_v19 = vcombine.high %v4438_v14, %v4438_v14  ;;  %v4454_v41 = vrot.slane %v4438_v14, %v18098_v9  ;;  %v19413_v62 = vrot.slane %v7613_v3, %v18098_v9 }
 0x18b   : > { %v3389_v8 = vrot.slane %v3373_v23, %v18098_v9  ;;  %v3410_v5 = vrot.slane %v3382_v6, %v18098_v9  ;;  %v4445_v38 = vrot.slane %v4431_v17, %v18098_v9  ;;  %v19418_v4 = vcombine.low %v6535_v47, %v6542_v35 }
 0x18c   : > { %23190 = vst [vmem:[#allocation80_spill] sm:$0xff] %v19413_v62  ;;  %v19421_v39 = vrot.slane %v6566_v0, %v18098_v9  ;;  %v4430_v12 = vcombine.high %v19281_v1, %v19281_v1  ;;  %v3527_v30 = vrot.slane %v3513_v49, %v18098_v9  ;;  %v4468_v3 = vrot.slane %v4446_v19, %v18098_v9 }
 0x18d   : > { %23191 = vst [vmem:[#allocation81_spill] sm:$0xff] %v19418_v4  ;;  %v6450_v14 = vcombine.low %v3389_v8, %v3403_v32  ;;  %v4476_v7 = vcombine.high %v4454_v41, %v4454_v41  ;;  %v3528_v34 = vcombine.high %v3520_v22, %v3520_v22  ;;  %v7597_v23 = vcombine.low %v7588_v18, %v7595_v53 }
 0x18e   : > { %23192 = vst [vmem:[#allocation82_spill] sm:$0xff] %v19421_v39  ;;  %v19428_v6 = vrot.slane %v16639_v10, %v18098_v9  ;;  %v3412_v35 = vcombine.high %v19405_v2, %v19405_v2  ;;  %v16616_v17 = vcombine.high %v3389_v8, %v3403_v32  ;;  %v3414_v0 = vcombine.high %v3410_v5, %v3410_v5  ;;  %v17296_v39 = vpop.f32.mrf.mxu1 }
 0x18f   : > { %v4447_v1 = vcombine.high %v4445_v38, %v4445_v38  ;;  %v19435_v49 = vrot.slane %v3520_v22, %v18098_v9  ;;  %v7502_v19 = vcombine.low %v4430_v12, %v4454_v41  ;;  %v3529_v4 = vcombine.high %v3527_v30, %v3527_v30  ;;  %v2653_v12 = vpop.f32.mrf.mxu0 }
 0x190   : > { %23193 = vst [vmem:[#allocation83_spill] sm:$0xff] %v19428_v6  ;;  %v3543_v18 = vrot.slane %v3527_v30, %v18098_v9  ;;  %v4578_v53 = vcombine.high %v17296_v39, %v17296_v39  ;;  %v19439_v10 = vrot.slane %v6450_v14, %v18098_v9  ;;  %v7503_v6 = vcombine.low %v4468_v3, %v4476_v7 }
 0x191   : > { %v3550_v32 = vrot.slane %v3528_v34, %v18098_v9  ;;  %v4585_v8 = vrot.slane %v17296_v39, %v18098_v9  ;;  %v19444_v47 = vrot.slane %v7597_v23, %v18098_v9  ;;  %v19447_v22 = vrot.slane %v16616_v17, %v18098_v9 }
 0x192   : > { %23194 = vst [vmem:[#allocation84_spill] sm:$0xff] %v19439_v10  ;;  %v19449_v2 = vcombine.low %v3410_v5, %v3412_v35  ;;  %v4478_v41 = vcombine.high %v4468_v3, %v4468_v3  ;;  %v19452_v30 = vcombine.low %v3414_v0, %v19336_v52  ;;  %v4461_v14 = vrot.slane %v4445_v38, %v18098_v9  ;;  %v3718_v0 = vpop.f32.mrf.mxu1 }
 0x193   : > { %23195 = vst [vmem:[#allocation85_spill] sm:$0xff] %v19444_v47  ;;  %23196 = vst [vmem:[#allocation86_spill] sm:$0xff] %v19447_v22  ;;  %v4475_v7 = vrot.slane %v4447_v1, %v18098_v9  ;;  %v3558_v34 = vcombine.high %v19435_v49, %v19435_v49  ;;  %v7524_v39 = vrot.slane %v7502_v19, %v18098_v9 }
 0x194   : > { %23197 = vst [vmem:[#allocation87_spill] sm:$0xff] %v19449_v2  ;;  %23198 = vst [vmem:[#allocation88_spill] sm:$0xff] %v19452_v30  ;;  %v3557_v23 = vrot.slane %v3529_v4, %v18098_v9  ;;  %v3559_v17 = vcombine.high %v3543_v18, %v3543_v18  ;;  %v4592_v5 = vrot.slane %v4578_v53, %v18098_v9 }
 0x195   : > { %v7531_v3 = vrot.slane %v7503_v6, %v18098_v9  ;;  %v3560_v35 = vcombine.high %v3550_v32, %v3550_v32  ;;  %v4593_v47 = vcombine.high %v4585_v8, %v4585_v8  ;;  %v3464_v52 = vcombine.high %v2653_v12, %v2653_v12 }
 0x196   : > { %v7549_v30 = vcombine.low %v4478_v41, %v4461_v14  ;;  %v4594_v38 = vcombine.high %v4592_v5, %v4592_v5  ;;  %v4601_v1 = vrot.slane %v4585_v8, %v18098_v9  ;;  %v4608_v62 = vrot.slane %v4592_v5, %v18098_v9 }
 0x197   : > { %v7564_v27 = vcombine.low %v4475_v7, %v4475_v7  ;;  %v16637_v16 = vcombine.high %v4461_v14, %v4475_v7  ;;  %v4615_v19 = vrot.slane %v4593_v47, %v18098_v9  ;;  %v3478_v4 = vrot.slane %v3464_v52, %v18098_v9 }
 0x198   : > { %v3561_v13 = vcombine.high %v3557_v23, %v3557_v23  ;;  %v19466_v53 = vcombine.low %v3550_v32, %v3558_v34  ;;  %v4622_v6 = vrot.slane %v4594_v38, %v18098_v9  ;;  %v4529_v58 = vcombine.high %v3718_v0, %v3718_v0 }
 0x199   : > { %v19469_v48 = vcombine.low %v7524_v39, %v7531_v3  ;;  %v6639_v41 = vcombine.low %v3560_v35, %v3543_v18  ;;  %v6640_v55 = vcombine.low %v3557_v23, %v3559_v17  ;;  %v3480_v50 = vcombine.high %v3478_v4, %v3478_v4  ;;  %v17305_v35 = vpop.f32.mrf.mxu0 }
 0x19a   : > { %23199 = vst [vmem:[#allocation89_spill] sm:$0xff] %v19466_v53  ;;  %v16641_v47 = vcombine.high %v4601_v1, %v4615_v19  ;;  %v7695_v7 = vcombine.low %v4608_v62, %v4622_v6  ;;  %v7556_v5 = vrot.slane %v7549_v30, %v18098_v9  ;;  %v3471_v32 = vrot.slane %v2653_v12, %v18098_v9 }
 0x19b   : > { %23200 = vst [vmem:[#allocation90_spill] sm:$0xff] %v19469_v48  ;;  %v19478_v34 = vrot.slane %v3480_v50, %v18098_v9  ;;  %v4536_v39 = vrot.slane %v3718_v0, %v18098_v9  ;;  %v19482_v18 = vrot.slane %v7564_v27, %v18098_v9  ;;  %v19485_v23 = vrot.slane %v16637_v16, %v18098_v9 }
 0x19c   : > { %v4543_v3 = vrot.slane %v4529_v58, %v18098_v9  ;;  %v6661_v50 = vrot.slane %v6639_v41, %v18098_v9  ;;  %v6668_v30 = vrot.slane %v6640_v55, %v18098_v9  ;;  %v19495_v52 = vrot.slane %v3561_v13, %v18098_v9 }
 0x19d   : > { %23201 = vst [vmem:[#allocation91_spill] sm:$0xff] %v19478_v34  ;;  %23202 = vst [vmem:[#allocation92_spill] sm:$0xff] %v19482_v18  ;;  %v7716_v27 = vrot.slane %v16641_v47, %v18098_v9  ;;  %v7723_v16 = vrot.slane %v7695_v7, %v18098_v9  ;;  %v16642_v0 = vcombine.high %v4608_v62, %v4622_v6 }
 0x19e   : > { %23203 = vst [vmem:[#allocation93_spill] sm:$0xff] %v19485_v23  ;;  %23204 = vst [vmem:[#allocation94_spill] sm:$0xff] %v19495_v52  ;;  %v3512_v38 = vcombine.high %v19478_v34, %v19478_v34  ;;  %v19502_v58 = vrot.slane %v7556_v5, %v18098_v9  ;;  %v3479_v8 = vcombine.high %v3471_v32, %v3471_v32 }
 0x19f   : > { %v4544_v12 = vcombine.high %v4536_v39, %v4536_v39  ;;  %v4859_v17 = vcombine.high %v17305_v35, %v17305_v35  ;;  %v7693_v41 = vcombine.low %v4601_v1, %v4615_v19  ;;  %v4545_v13 = vcombine.high %v4543_v3, %v4543_v3 }
 0x1a0   : > { %23205 = vst [vmem:[#allocation95_spill] sm:$0xff] %v19502_v58  ;;  %v4552_v14 = vrot.slane %v4536_v39, %v18098_v9  ;;  %v19507_v47 = vcombine.low %v6661_v50, %v6668_v30  ;;  %v19510_v62 = vrot.slane %v3471_v32, %v18098_v9  ;;  %v19513_v6 = vrot.slane %v3478_v4, %v18098_v9  ;;  %v4703_v39 = vpop.f32.mrf.mxu0 }
 0x1a1   : > { %v4528_v7 = vcombine.high %v19391_v20, %v19391_v20  ;;  %v7725_v5 = vcombine.low %v7716_v27, %v7723_v16  ;;  %v19518_v48 = vrot.slane %v16642_v0, %v18098_v9  ;;  %v19521_v1 = vcombine.low %v3512_v38, %v19435_v49 }
 0x1a2   : > { %23206 = vst [vmem:[#allocation96_spill] sm:$0xff] %v19507_v47  ;;  %23207 = vst [vmem:[#allocation97_spill] sm:$0xff] %v19510_v62  ;;  %v4866_v19 = vrot.slane %v17305_v35, %v18098_v9  ;;  %v19525_v50 = vrot.slane %v3479_v8, %v18098_v9  ;;  %v4559_v32 = vrot.slane %v4543_v3, %v18098_v9 }
 0x1a3   : > { %23208 = vst [vmem:[#allocation98_spill] sm:$0xff] %v19513_v6  ;;  %23209 = vst [vmem:[#allocation99_spill] sm:$0xff] %v19518_v48  ;;  %v4566_v4 = vrot.slane %v4544_v12, %v18098_v9  ;;  %v4873_v30 = vrot.slane %v4859_v17, %v18098_v9  ;;  %v19531_v20 = vrot.slane %v7693_v41, %v18098_v9 }
 0x1a4   : > { %23210 = vst [vmem:[#allocation100_spill] sm:$0xff] %v19521_v1  ;;  %23211 = vst [vmem:[#allocation101_spill] sm:$0xff] %v19525_v50  ;;  %v4573_v27 = vrot.slane %v4545_v13, %v18098_v9  ;;  %v4574_v16 = vcombine.high %v4552_v14, %v4552_v14  ;;  %v4874_v49 = vcombine.high %v4866_v19, %v4866_v19 }
 0x1a5   : > { %23212 = vst [vmem:[#allocation102_spill] sm:$0xff] %v19531_v20  ;;  %v4575_v0 = vcombine.high %v4559_v32, %v4559_v32  ;;  %v4875_v38 = vcombine.high %v4873_v30, %v4873_v30  ;;  %v19535_v35 = vrot.slane %v4866_v19, %v18098_v9  ;;  %v4810_v8 = vcombine.high %v4703_v39, %v4703_v39 }
 0x1a6   : > { %v19538_v55 = vrot.slane %v7725_v5, %v18098_v9  ;;  %v4889_v12 = vrot.slane %v4873_v30, %v18098_v9  ;;  %v4576_v41 = vcombine.high %v4566_v4, %v4566_v4  ;;  %v19545_v13 = vcombine.low %v4528_v7, %v4552_v14  ;;  %v17308_v7 = vpop.f32.mrf.mxu0 }
 0x1a7   : > { %v4896_v22 = vrot.slane %v4874_v49, %v18098_v9  ;;  %v19549_v19 = vrot.slane %v4875_v38, %v18098_v9  ;;  %v19551_v10 = vcombine.low %v4566_v4, %v4574_v16  ;;  %v16640_v5 = vcombine.high %v4573_v27, %v4573_v27 }
 0x1a8   : > { %23213 = vst [vmem:[#allocation103_spill] sm:$0xff] %v19538_v55  ;;  %23214 = vst [vmem:[#allocation104_spill] sm:$0xff] %v19545_v13  ;;  %v4904_v6 = vcombine.high %v19535_v35, %v19535_v35  ;;  %v4905_v3 = vcombine.high %v4889_v12, %v4889_v12  ;;  %v19555_v34 = vcombine.low %v4573_v27, %v4575_v0  ;;  %v4713_v47 = vpop.f32.mrf.mxu0 }
 0x1a9   : > { %23215 = vst [vmem:[#allocation105_spill] sm:$0xff] %v19551_v10  ;;  %v4906_v17 = vcombine.high %v4896_v22, %v4896_v22  ;;  %v4817_v30 = vrot.slane %v4703_v39, %v18098_v9  ;;  %v4824_v14 = vrot.slane %v4810_v8, %v18098_v9  ;;  %v4957_v38 = vcombine.high %v17308_v7, %v17308_v7 }
 0x1aa   : > { %23216 = vst [vmem:[#allocation106_spill] sm:$0xff] %v19555_v34  ;;  %v7852_v13 = vcombine.low %v4896_v22, %v4904_v6  ;;  %v7854_v49 = vcombine.low %v19549_v19, %v4905_v3  ;;  %v4964_v4 = vrot.slane %v17308_v7, %v18098_v9 }
 0x1ab   : > { %v7853_v16 = vcombine.low %v4906_v17, %v4889_v12  ;;  %v4825_v10 = vcombine.high %v4817_v30, %v4817_v30  ;;  %v4826_v62 = vcombine.high %v4824_v14, %v4824_v14  ;;  %v4833_v50 = vrot.slane %v4817_v30, %v18098_v9 }
 0x1ac   : > { %v7861_v27 = vrot.slane %v7852_v13, %v18098_v9  ;;  %v7875_v0 = vrot.slane %v7854_v49, %v18098_v9  ;;  %v4840_v39 = vrot.slane %v4824_v14, %v18098_v9  ;;  %v4971_v8 = vrot.slane %v4957_v38, %v18098_v9 }
 0x1ad   : > { %v7868_v22 = vrot.slane %v7853_v16, %v18098_v9  ;;  %v4847_v6 = vrot.slane %v4825_v10, %v18098_v9  ;;  %v4854_v3 = vrot.slane %v4826_v62, %v18098_v9  ;;  %v4972_v7 = vcombine.high %v4964_v4, %v4964_v4 }
 0x1ae   : > { %v19570_v17 = vrot.slane %v16640_v5, %v18098_v9  ;;  %v7876_v12 = vcombine.low %v7861_v27, %v7861_v27  ;;  %v4980_v30 = vrot.slane %v4964_v4, %v18098_v9  ;;  %v4987_v13 = vrot.slane %v4971_v8, %v18098_v9 }
 0x1af   : > { %v7877_v49 = vcombine.low %v7868_v22, %v7875_v0  ;;  %v7788_v58 = vcombine.low %v4833_v50, %v4847_v6  ;;  %v16643_v14 = vcombine.high %v4833_v50, %v4847_v6  ;;  %v7790_v55 = vcombine.low %v4840_v39, %v4854_v3 }
 0x1b0   : > { %23217 = vst [vmem:[#allocation107_spill] sm:$0xff] %v19570_v17  ;;  %v19574_v38 = vcombine.low %v4576_v41, %v4559_v32  ;;  %v16644_v16 = vcombine.high %v4840_v39, %v4854_v3  ;;  %v4973_v52 = vcombine.high %v4971_v8, %v4971_v8  ;;  %v4994_v10 = vrot.slane %v4972_v7, %v18098_v9  ;;  %v17311_v39 = vpop.f32.mrf.mxu0 }
 0x1b1   : > { %v7891_v62 = vrot.slane %v7877_v49, %v18098_v9  ;;  %v7797_v5 = vrot.slane %v7788_v58, %v18098_v9  ;;  %v7804_v27 = vrot.slane %v16643_v14, %v18098_v9  ;;  %v7811_v4 = vrot.slane %v7790_v55, %v18098_v9 }
 0x1b2   : > { %23218 = vst [vmem:[#allocation108_spill] sm:$0xff] %v19574_v38  ;;  %v5002_v32 = vcombine.high %v4980_v30, %v4980_v30  ;;  %v5004_v41 = vcombine.high %v4994_v10, %v4994_v10  ;;  %v7884_v8 = vrot.slane %v7876_v12, %v18098_v9  ;;  %v5003_v58 = vcombine.high %v4987_v13, %v4987_v13 }
 0x1b3   : > { %v7813_v22 = vcombine.low %v7804_v27, %v7811_v4  ;;  %v19589_v6 = vrot.slane %v16644_v16, %v18098_v9  ;;  %v19592_v55 = vrot.slane %v4973_v52, %v18098_v9  ;;  %v7957_v3 = vcombine.low %v4980_v30, %v4994_v10 }
 0x1b4   : > { %v7980_v7 = vcombine.low %v5004_v41, %v4987_v13  ;;  %v19594_v49 = vcombine.low %v7884_v8, %v7891_v62  ;;  %v7812_v14 = vcombine.low %v7797_v5, %v7797_v5  ;;  %v19597_v0 = vrot.slane %v5002_v32, %v18098_v9 }
 0x1b5   : > { %v4908_v50 = vcombine.high %v4713_v47, %v4713_v47  ;;  %v4907_v27 = vcombine.high %v19549_v19, %v19549_v19  ;;  %v4915_v16 = vrot.slane %v4713_v47, %v18098_v9  ;;  %v5055_v4 = vcombine.high %v17311_v39, %v17311_v39 }
 0x1b6   : > { %v7989_v12 = vrot.slane %v7980_v7, %v18098_v9  ;;  %v19604_v52 = vrot.slane %v7813_v22, %v18098_v9  ;;  %v19607_v30 = vcombine.low %v19592_v55, %v5003_v58  ;;  %v5062_v10 = vrot.slane %v17311_v39, %v18098_v9 }
 0x1b7   : > { %v4922_v13 = vrot.slane %v4908_v50, %v18098_v9  ;;  %v19612_v62 = vrot.slane %v7957_v3, %v18098_v9  ;;  %v4923_v5 = vcombine.high %v4915_v16, %v4915_v16  ;;  %v4931_v32 = vrot.slane %v4915_v16, %v18098_v9 }
 0x1b8   : > { %v5069_v19 = vrot.slane %v5055_v4, %v18098_v9  ;;  %v19617_v47 = vrot.slane %v7812_v14, %v18098_v9  ;;  %v5070_v22 = vcombine.high %v5062_v10, %v5062_v10  ;;  %v8004_v58 = vcombine.low %v7989_v12, %v7989_v12 }
 0x1b9   : > { %v4924_v41 = vcombine.high %v4922_v13, %v4922_v13  ;;  %v4938_v8 = vrot.slane %v4922_v13, %v18098_v9  ;;  %v4945_v50 = vrot.slane %v4923_v5, %v18098_v9  ;;  %v7893_v7 = vcombine.low %v4907_v27, %v4931_v32  ;;  %v4723_v27 = vpop.f32.mrf.mxu0 }
 0x1ba   : > { %v5071_v39 = vcombine.high %v5069_v19, %v5069_v19  ;;  %v7996_v16 = vrot.slane %v19607_v30, %v18098_v9  ;;  %v5085_v14 = vrot.slane %v5069_v19, %v18098_v9  ;;  %v5078_v12 = vrot.slane %v5062_v10, %v18098_v9 }
 0x1bb   : > { %v4952_v4 = vrot.slane %v4924_v41, %v18098_v9  ;;  %v16645_v13 = vcombine.high %v4931_v32, %v4945_v50  ;;  %v5092_v5 = vrot.slane %v5070_v22, %v18098_v9  ;;  %v19635_v30 = vrot.slane %v8004_v58, %v18098_v9  ;;  %v17314_v1 = vpop.f32.mrf.mxu0 }
 0x1bc   : > { %v19632_v3 = vrot.slane %v5071_v39, %v18098_v9  ;;  %v5101_v17 = vcombine.high %v5085_v14, %v5085_v14  ;;  %v7900_v19 = vrot.slane %v7893_v7, %v18098_v9  ;;  %v5005_v32 = vcombine.high %v19592_v55, %v19592_v55 }
 0x1bd   : > { %v7917_v38 = vcombine.low %v4938_v8, %v4952_v4  ;;  %v16646_v20 = vcombine.high %v4938_v8, %v4952_v4  ;;  %23219 = vst [vmem:[#allocation109_spill] sm:$0xff] %v19635_v30  ;;  %v7925_v41 = vrot.slane %v16645_v13, %v18098_v9  ;;  %v16648_v34 = vcombine.high %v5078_v12, %v5092_v5 }
 0x1be   : > { %v8108_v8 = vcombine.low %v19632_v3, %v5101_v17  ;;  %v7907_v39 = vrot.slane %v4945_v50, %v18098_v9  ;;  %v5006_v48 = vcombine.high %v4723_v27, %v4723_v27  ;;  %v5013_v58 = vrot.slane %v4723_v27, %v18098_v9 }
 0x1bf   : > { %v7932_v10 = vrot.slane %v7917_v38, %v18098_v9  ;;  %v7939_v22 = vrot.slane %v16646_v20, %v18098_v9  ;;  %v7940_v4 = vcombine.low %v7925_v41, %v7925_v41  ;;  %v5153_v53 = vcombine.high %v17314_v1, %v17314_v1 }
 0x1c0   : > { %v8117_v13 = vrot.slane %v8108_v8, %v18098_v9  ;;  %v5160_v55 = vrot.slane %v17314_v1, %v18098_v9  ;;  %v8046_v2 = vcombine.low %v5078_v12, %v5092_v5  ;;  %v8099_v38 = vrot.slane %v5085_v14, %v18098_v9 }
 0x1c1   : > { %v7941_v7 = vcombine.low %v7932_v10, %v7939_v22  ;;  %v5020_v20 = vrot.slane %v5006_v48, %v18098_v9  ;;  %v5021_v23 = vcombine.high %v5013_v58, %v5013_v58  ;;  %v19651_v17 = vrot.slane %v7940_v4, %v18098_v9 }
 0x1c2   : > { %v8092_v50 = vrot.slane %v16648_v34, %v18098_v9  ;;  %v5029_v27 = vrot.slane %v5013_v58, %v18098_v9  ;;  %v5167_v41 = vrot.slane %v5153_v53, %v18098_v9  ;;  %v5168_v12 = vcombine.high %v5160_v55, %v5160_v55 }
 0x1c3   : > { %v5022_v10 = vcombine.high %v5020_v20, %v5020_v20  ;;  %v5036_v22 = vrot.slane %v5020_v20, %v18098_v9  ;;  %v5043_v1 = vrot.slane %v5021_v23, %v18098_v9  ;;  %v19659_v14 = vrot.slane %v7941_v7, %v18098_v9 }
 0x1c4   : > { %v8132_v48 = vcombine.low %v8117_v13, %v8117_v13  ;;  %v5051_v5 = vcombine.high %v5029_v27, %v5029_v27  ;;  %v7982_v8 = vcombine.low %v5005_v32, %v5029_v27  ;;  %v5169_v34 = vcombine.high %v5167_v41, %v5167_v41 }
 0x1c5   : > { %v5050_v4 = vrot.slane %v5022_v10, %v18098_v9  ;;  %v5053_v18 = vcombine.high %v5043_v1, %v5043_v1  ;;  %v5176_v58 = vrot.slane %v5160_v55, %v18098_v9  ;;  %v5183_v20 = vrot.slane %v5167_v41, %v18098_v9 }
 0x1c6   : > { %v8003_v53 = vrot.slane %v7982_v8, %v18098_v9  ;;  %v19664_v30 = vcombine.low %v5043_v1, %v5051_v5  ;;  %v5190_v23 = vrot.slane %v5168_v12, %v18098_v9  ;;  %v19668_v56 = vcombine.low %v7900_v19, %v7907_v39  ;;  %v4733_v19 = vpop.f32.mrf.mxu0 }
 0x1c7   : > { %v8067_v7 = vrot.slane %v8046_v2, %v18098_v9  ;;  %v8044_v13 = vcombine.low %v5036_v22, %v5050_v4  ;;  %v16647_v32 = vcombine.high %v5036_v22, %v5050_v4  ;;  %v19671_v27 = vcombine.low %v8092_v50, %v8099_v38 }
 0x1c8   : > { %23220 = vst [vmem:[#allocation110_spill] sm:$0xff] %v19664_v30  ;;  %v19673_v10 = vcombine.low %v7996_v16, %v8003_v53  ;;  %v19676_v55 = vrot.slane %v5169_v34, %v18098_v9  ;;  %v8173_v8 = vcombine.low %v5176_v58, %v5190_v23  ;;  %v5199_v5 = vcombine.high %v5183_v20, %v5183_v20 }
 0x1c9   : > { %23221 = vst [vmem:[#allocation111_spill] sm:$0xff] %v19671_v27  ;;  %v8053_v1 = vrot.slane %v8044_v13, %v18098_v9  ;;  %v8060_v41 = vrot.slane %v16647_v32, %v18098_v9  ;;  %v16650_v12 = vcombine.high %v5176_v58, %v5190_v23  ;;  %v19683_v39 = vrot.slane %v8132_v48, %v18098_v9  ;;  %v17317_v58 = vpop.f32.mrf.mxu0 }
 0x1ca   : > { %23222 = vst [vmem:[#allocation112_spill] sm:$0xff] %v19673_v10  ;;  %v19688_v38 = vrot.slane %v5053_v18, %v18098_v9  ;;  %v8188_v22 = vrot.slane %v8173_v8, %v18098_v9  ;;  %v8213_v34 = vcombine.low %v5183_v20, %v19676_v55  ;;  %v5104_v53 = vcombine.high %v4733_v19, %v4733_v19 }
 0x1cb   : > { %v8068_v50 = vcombine.low %v8053_v1, %v8053_v1  ;;  %v8195_v4 = vrot.slane %v16650_v12, %v18098_v9  ;;  %v5111_v23 = vrot.slane %v4733_v19, %v18098_v9  ;;  %v5251_v13 = vcombine.high %v17317_v58, %v17317_v58  ;;  %v4743_v10 = vpop.f32.mrf.mxu0 }
 0x1cc   : > { %23223 = vst [vmem:[#allocation113_spill] sm:$0xff] %v19688_v38  ;;  %v5258_v48 = vrot.slane %v17317_v58, %v18098_v9  ;;  %v8069_v16 = vcombine.low %v8060_v41, %v8067_v7  ;;  %v19698_v18 = vrot.slane %v5199_v5, %v18098_v9  ;;  %v5103_v8 = vcombine.high %v19632_v3, %v19632_v3 }
 0x1cd   : > { %v5118_v1 = vrot.slane %v5104_v53, %v18098_v9  ;;  %v5119_v20 = vcombine.high %v5111_v23, %v5111_v23  ;;  %v5127_v12 = vrot.slane %v5111_v23, %v18098_v9  ;;  %v5265_v19 = vrot.slane %v5251_v13, %v18098_v9 }
 0x1ce   : > { %23224 = vst [vmem:[#allocation114_spill] sm:$0xff] %v19698_v18  ;;  %v19706_v2 = vrot.slane %v8068_v50, %v18098_v9  ;;  %v19709_v58 = vrot.slane %v8213_v34, %v18098_v9  ;;  %v5266_v7 = vcombine.high %v5258_v48, %v5258_v48  ;;  %v5274_v41 = vrot.slane %v5258_v48, %v18098_v9 }
 0x1cf   : > { %v8197_v5 = vcombine.low %v8188_v22, %v8195_v4  ;;  %v5120_v32 = vcombine.high %v5118_v1, %v5118_v1  ;;  %v5141_v3 = vrot.slane %v5119_v20, %v18098_v9  ;;  %v5149_v27 = vcombine.high %v5127_v12, %v5127_v12 }
 0x1d0   : > { %23225 = vst [vmem:[#allocation115_spill] sm:$0xff] %v19706_v2  ;;  %23226 = vst [vmem:[#allocation116_spill] sm:$0xff] %v19709_v58  ;;  %v8109_v53 = vcombine.low %v5103_v8, %v5127_v12  ;;  %v5267_v30 = vcombine.high %v5265_v19, %v5265_v19  ;;  %v5281_v23 = vrot.slane %v5265_v19, %v18098_v9 }
 0x1d1   : > { %v5288_v13 = vrot.slane %v5266_v7, %v18098_v9  ;;  %v5134_v50 = vrot.slane %v5118_v1, %v18098_v9  ;;  %v19717_v2 = vrot.slane %v5120_v32, %v18098_v9  ;;  %v5151_v34 = vcombine.high %v5141_v3, %v5141_v3 }
 0x1d2   : > { %v8110_v38 = vcombine.low %v5141_v3, %v5149_v27  ;;  %v5295_v22 = vrot.slane %v5267_v30, %v18098_v9  ;;  %v5202_v20 = vcombine.high %v4743_v10, %v4743_v10  ;;  %v19721_v8 = vrot.slane %v8069_v16, %v18098_v9 }
 0x1d3   : > { %v8300_v4 = vcombine.low %v5274_v41, %v5288_v13  ;;  %v16651_v48 = vcombine.high %v5274_v41, %v5288_v13  ;;  %v8124_v12 = vrot.slane %v8109_v53, %v18098_v9  ;;  %v16649_v1 = vcombine.high %v5134_v50, %v19717_v2 }
 0x1d4   : > { %23227 = vst [vmem:[#allocation117_spill] sm:$0xff] %v19721_v8  ;;  %v8131_v19 = vrot.slane %v8110_v38, %v18098_v9  ;;  %v19727_v32 = vrot.slane %v8197_v5, %v18098_v9  ;;  %v8302_v7 = vcombine.low %v5281_v23, %v5295_v22  ;;  %v19732_v41 = vcombine.low %v5151_v34, %v5134_v50  ;;  %v17320_v8 = vpop.f32.mrf.mxu0 }
 0x1d5   : > { %v8309_v30 = vrot.slane %v8300_v4, %v18098_v9  ;;  %v8181_v16 = vrot.slane %v16649_v1, %v18098_v9  ;;  %v5201_v3 = vcombine.high %v19676_v55, %v19676_v55  ;;  %v5209_v38 = vrot.slane %v4743_v10, %v18098_v9 }
 0x1d6   : > { %23228 = vst [vmem:[#allocation118_spill] sm:$0xff] %v19727_v32  ;;  %v8316_v5 = vrot.slane %v16651_v48, %v18098_v9  ;;  %v8323_v13 = vrot.slane %v8302_v7, %v18098_v9  ;;  %v5216_v27 = vrot.slane %v5202_v20, %v18098_v9  ;;  %v19743_v18 = vcombine.low %v8124_v12, %v8131_v19 }
 0x1d7   : > { %v16652_v50 = vcombine.high %v5281_v23, %v5295_v22  ;;  %v5217_v34 = vcombine.high %v5209_v38, %v5209_v38  ;;  %v5225_v4 = vrot.slane %v5209_v38, %v18098_v9  ;;  %v8196_v1 = vcombine.low %v8181_v16, %v8181_v16 }
 0x1d8   : > { %v8324_v58 = vcombine.low %v8309_v30, %v8309_v30  ;;  %v5218_v55 = vcombine.high %v5216_v27, %v5216_v27  ;;  %v5232_v10 = vrot.slane %v5216_v27, %v18098_v9  ;;  %v8325_v20 = vcombine.low %v8316_v5, %v8323_v13 }
 0x1d9   : > { %v5239_v48 = vrot.slane %v5217_v34, %v18098_v9  ;;  %v5247_v32 = vcombine.high %v5225_v4, %v5225_v4  ;;  %v8236_v7 = vcombine.low %v5201_v3, %v5225_v4  ;;  %v5349_v22 = vcombine.high %v17320_v8, %v17320_v8 }
 0x1da   : > { %v5246_v12 = vrot.slane %v5218_v55, %v18098_v9  ;;  %v5248_v23 = vcombine.high %v5232_v10, %v5232_v10  ;;  %v19752_v19 = vrot.slane %v16652_v50, %v18098_v9  ;;  %v5356_v27 = vrot.slane %v17320_v8, %v18098_v9 }
 0x1db   : > { %v5249_v30 = vcombine.high %v5239_v48, %v5239_v48  ;;  %v8237_v16 = vcombine.low %v5239_v48, %v5247_v32  ;;  %v19758_v34 = vrot.slane %v8196_v1, %v18098_v9  ;;  %v19761_v3 = vrot.slane %v8324_v58, %v18098_v9 }
 0x1dc   : > { %v5363_v5 = vrot.slane %v5349_v22, %v18098_v9  ;;  %v8245_v4 = vrot.slane %v8236_v7, %v18098_v9  ;;  %v5364_v55 = vcombine.high %v5356_v27, %v5356_v27  ;;  %v19767_v32 = vrot.slane %v8325_v20, %v18098_v9 }
 0x1dd   : > { %v8238_v13 = vcombine.low %v5249_v30, %v5232_v10  ;;  %v8252_v50 = vrot.slane %v8237_v16, %v18098_v9  ;;  %v5250_v8 = vcombine.high %v5246_v12, %v5246_v12  ;;  %v19769_v48 = vcombine.low %v5246_v12, %v5248_v23  ;;  %v4753_v16 = vpop.f32.mrf.mxu0 }
 0x1de   : > { %v5365_v53 = vcombine.high %v5363_v5, %v5363_v5  ;;  %v19773_v58 = vrot.slane %v5356_v27, %v18098_v9  ;;  %v5379_v22 = vrot.slane %v5363_v5, %v18098_v9  ;;  %v19777_v10 = vrot.slane %v5364_v55, %v18098_v9 }
 0x1df   : > { %v8259_v1 = vrot.slane %v8238_v13, %v18098_v9  ;;  %v23229_v20 = vrot.slane %v18786_v57, %v18098_v9  ;;  %v23230_v12 = vrot.slane %v19535_v35, %v18098_v9  ;;  %v8260_v27 = vcombine.low %v8245_v4, %v8245_v4 }
 0x1e0   : > { %v5393_v7 = vrot.slane %v5365_v53, %v18098_v9  ;;  %v16653_v5 = vcombine.high %v19773_v58, %v19777_v10  ;;  %v23231_v57 = vcombine.low %v19617_v47, %v19604_v52 }
 0x1e1   : > { %v6795_v30 = vrot.slane %v23229_v20, %v18098_v9  ;;  %v7844_v23 = vcombine.low %v19589_v6, %v23230_v12  ;;  %v8261_v13 = vcombine.low %v8252_v50, %v8259_v1  ;;  %v18004_v12 = vmov 65535  }
 0x1e2   : > { %v8429_v55 = vcombine.low %v5379_v22, %v5393_v7  ;;  %v16654_v38 = vcombine.high %v5379_v22, %v5393_v7  ;;  %v8437_v6 = vrot.slane %v16653_v5, %v18098_v9  ;;  %v8933_v4 = vsel %vm8932_vm13, 4294967295, %v18004_v12 }
 0x1e3   : > { %v7851_v53 = vrot.slane %v7844_v23, %v18098_v9  ;;  %v8861_v20 = vsel %vm2503_vm0, %v6795_v30, %v23231_v57  ;;  %v5300_v50 = vcombine.high %v4753_v16, %v4753_v16  ;;  %v19802_v22 = vrot.slane %v5250_v8, %v18098_v9 }
 0x1e4   : > { %v8444_v7 = vrot.slane %v8429_v55, %v18098_v9  ;;  %v8451_v47 = vrot.slane %v16654_v38, %v18098_v9  ;;  %v19807_v30 = vsel %vm531_vm4, %v8933_v4, 0  ;;  %v5307_v23 = vrot.slane %v4753_v16, %v18098_v9 }
 0x1e5   : > { %v8880_v52 = vpack.c.bf16 %v7851_v53, %v8861_v20  ;;  %v5314_v5 = vrot.slane %v5300_v50, %v18098_v9  ;;  %v8268_v57 = vrot.slane %v8260_v27, %v18098_v9  ;;  %v8275_v12 = vrot.slane %v8261_v13, %v18098_v9 }
 0x1e6   : > { %v5725_v8 = vcombine.low %v18764_v15, %v18769_v25  ;;  %v8452_v55 = vcombine.low %v8437_v6, %v8437_v6  ;;  %v5315_v53 = vcombine.high %v5307_v23, %v5307_v23  ;;  %v19817_v38 = vrot.slane %v5307_v23, %v18098_v9 }
 0x1e7   : > { %v8936_v35 = vand.u32 %v19807_v30, %v8880_v52  ;;  %v5316_v20 = vcombine.high %v5314_v5, %v5314_v5  ;;  %v5330_v16 = vrot.slane %v5314_v5, %v18098_v9  ;;  %v23232_v27 = vcombine.low %v18752_v44, %v18758_v51 }
 0x1e8   : > { %v5739_v13 = vrot.slane %v5725_v8, %v18098_v9  ;;  %v6779_v50 = vrot.slane %v18795_v46, %v18098_v9  ;;  %v8453_v15 = vcombine.low %v8444_v7, %v8451_v47  ;;  %v5337_v25 = vrot.slane %v5315_v53, %v18098_v9  ;;  %v17323_v7 = vpop.f32.mrf.mxu0 }
 0x1e9   : > { %17331 = vmatpush3.bf16.msra.mxu1 %v8936_v35  ;;  %v5732_v4 = vrot.slane %v23232_v27, %v18098_v9  ;;  %v19829_v6 = vrot.slane %v5316_v20, %v18098_v9  ;;  %v5345_v35 = vcombine.high %v19817_v38, %v19817_v38  ;;  %v23233_v52 = vmov 0.0  }
 0x1ea   : > { %17332 = vmatprep.subr.bf16.mxu1 %v23233_v52  ;;  %v5346_v51 = vcombine.high %v5330_v16, %v5330_v16  ;;  %v23234_v5 = vrot.slane %v18774_v31, %v18098_v9  ;;  %v19839_v47 = vcombine.low %v8268_v57, %v8275_v12  ;;  %v19842_v8 = vrot.slane %v8452_v55, %v18098_v9 }
 0x1eb   : > { %v5740_v23 = vcombine.low %v5732_v4, %v5739_v13  ;;  %v5347_v53 = vcombine.high %v5337_v25, %v5337_v25  ;;  %v8364_v20 = vcombine.low %v5337_v25, %v5345_v35  ;;  %v5447_v1 = vcombine.high %v17323_v7, %v17323_v7  ;;  %v4763_v35 = vpop.f32.mrf.mxu0  ;;  %17334 = vmatprep.mubr.msk.bf16.mxu1 %vm18005_vm15, %v23233_v52 }
 0x1ec   : > { %v6780_v46 = vcombine.low %v23234_v5, %v6779_v50  ;;  %23235 = vst [vmem:[#allocation119_spill] sm:$0xff] %v19842_v8  ;;  %v8366_v27 = vcombine.low %v19829_v6, %v5346_v51  ;;  %v5454_v44 = vrot.slane %v17323_v7, %v18098_v9  ;;  %v19847_v4 = vrot.slane %v8453_v15, %v18098_v9 }
 0x1ed   : > { %v8355_v31 = vrot.slane %v19817_v38, %v18098_v9  ;;  %v8365_v13 = vcombine.low %v5347_v53, %v5330_v16  ;;  %v8373_v12 = vrot.slane %v8364_v20, %v18098_v9  ;;  %v5461_v50 = vrot.slane %v5447_v1, %v18098_v9  ;;  %v19863_v38 = vld [vmem:[%s22978_s1] sm:$0x1f]   ;;  %17374 = vmatprep.mubr.msk.bf16.mxu0 %vm18005_vm15, %v23233_v52 }
 0x1ee   : > { %23236 = vst [vmem:[#allocation120_spill] sm:$0xff] %v19847_v4  ;;  %v8845_v57 = vsel %vm8844_vm14, %v18732_v40, %v6780_v46  ;;  %v5462_v25 = vcombine.high %v5454_v44, %v5454_v44  ;;  %v8387_v5 = vrot.slane %v8366_v27, %v18098_v9  ;;  %v19858_v15 = vrot.slane %v5454_v44, %v18098_v9 }
 0x1ef   : > { %v8879_v55 = vpack.c.bf16 %v8845_v57, %v5740_v23  ;;  %v8380_v51 = vrot.slane %v8365_v13, %v18098_v9  ;;  %v5463_v40 = vcombine.high %v5461_v50, %v5461_v50  ;;  %v5477_v16 = vrot.slane %v5461_v50, %v18098_v9 }
 0x1f0   : > { %v5484_v1 = vrot.slane %v5462_v25, %v18098_v9  ;;  %v5348_v23 = vcombine.high %v19829_v6, %v19829_v6  ;;  %v5492_v46 = vcombine.high %v19858_v15, %v19858_v15  ;;  %v5398_v7 = vcombine.high %v4763_v35, %v4763_v35 }
 0x1f1   : > { %17333 = vmatpush3.bf16.msra.mxu1 %v8879_v55  ;;  %v5491_v53 = vrot.slane %v5463_v40, %v18098_v9  ;;  %v5405_v27 = vrot.slane %v4763_v35, %v18098_v9  ;;  %v7915_v13 = vrot.slane %v19668_v56, %v18098_v9  ;;  %v8388_v57 = vcombine.low %v8373_v12, %v8373_v12 }
 0x1f2   : > { %17338 = vmatprep.subr.bf16.mxu1 %v23233_v52  ;;  %v5494_v20 = vcombine.high %v5484_v1, %v5484_v1  ;;  %v8533_v55 = vcombine.low %v5484_v1, %v5492_v46  ;;  %v5412_v6 = vrot.slane %v5398_v7, %v18098_v9  ;;  %v23237_v50 = vrot.slane %v18868_v33, %v18098_v9 }
 0x1f3   : > { %v19890_v35 = vcombine.low %v8380_v51, %v8387_v5  ;;  %v8556_v40 = vcombine.low %v5477_v16, %v5491_v53  ;;  %v5413_v44 = vcombine.high %v5405_v27, %v5405_v27  ;;  %v16655_v12 = vcombine.high %v5477_v16, %v5491_v53 }
 0x1f4   : > { %17335 = vmatmul.mubr.msk.bf16.vlgmr.msra.gmra.mxu1 %vm8928_vm1, %v19863_v38  ;;  %v8862_v25 = vsel %vm2503_vm0, %v23237_v50, %v19594_v49  ;;  %v8547_v56 = vrot.slane %v5494_v20, %v18098_v9  ;;  %v5414_v1 = vcombine.high %v5412_v6, %v5412_v6  ;;  %v5421_v46 = vrot.slane %v5405_v27, %v18098_v9 }
 0x1f5   : > { %17342 = vmatprep.mubr.msk.bf16.mxu1 %vm18005_vm15, %v23233_v52  ;;  %v5428_v7 = vrot.slane %v5412_v6, %v18098_v9  ;;  %v8540_v4 = vrot.slane %v8533_v55, %v18098_v9  ;;  %v8565_v33 = vrot.slane %v8556_v40, %v18098_v9  ;;  %v5435_v49 = vrot.slane %v5413_v44, %v18098_v9 }
 0x1f6   : > { %v8882_v51 = vpack.c.bf16 %v7915_v13, %v8862_v25  ;;  %v19901_v5 = vcombine.low %v19752_v19, %v8355_v31  ;;  %v5442_v20 = vrot.slane %v5414_v1, %v18098_v9  ;;  %v5443_v50 = vcombine.high %v5421_v46, %v5421_v46 }
 0x1f7   : > { %v5444_v8 = vcombine.high %v5428_v7, %v5428_v7  ;;  %v19905_v16 = vcombine.low %v5348_v23, %v19773_v58  ;;  %v8580_v53 = vcombine.low %v8565_v33, %v8565_v33  ;;  %v5445_v27 = vcombine.high %v5435_v49, %v5435_v49 }
 0x1f8   : > { %v8980_v6 = vand.u32 %v19807_v30, %v8882_v51  ;;  %v19909_v55 = vrot.slane %v8388_v57, %v18098_v9  ;;  %v8403_v44 = vrot.slane %v19890_v35, %v18098_v9  ;;  %v5446_v13 = vcombine.high %v5442_v20, %v5442_v20  ;;  %v14959_v35 = vld [vmem:[%s22982_s5 + $0x8] sm:$0xff] }
 0x1f9   : > { %v23238_v19 = vrot.slane %v19743_v18, %v18098_v9  ;;  %v19917_v25 = vcombine.low %v8540_v4, %v8547_v56  ;;  %v19920_v58 = vrot.slane %v16655_v12, %v18098_v9  ;;  %v8469_v23 = vcombine.low %v5421_v46, %v5435_v49  ;;  %v17326_v49 = vpop.f32.mrf.mxu0 }
 0x1fa   : > { %17339 = vmatpush3.bf16.msra.mxu1 %v8980_v6  ;;  %v23239_v57 = vrot.slane %v19717_v2, %v18098_v9  ;;  %v23240_v40 = vrot.slane %v19732_v41, %v18098_v9  ;;  %v19929_v33 = vrot.slane %v8580_v53, %v18098_v9  ;;  %v19932_v18 = vrot.slane %v5443_v50, %v18098_v9 }
 0x1fb   : > { %v8148_v31 = vcombine.low %v19683_v39, %v23238_v19  ;;  %v8493_v39 = vcombine.low %v5442_v20, %v5444_v8  ;;  %v23241_v4 = vrot.slane %v19066_v21, %v18098_v9  ;;  %17340 = vmatprep.subr.bf16.mxu1 %v23233_v52  ;;  %v8492_v12 = vcombine.low %v5445_v27, %v5428_v7 }
 0x1fc   : > { %v8164_v1 = vcombine.low %v23240_v40, %v23239_v57  ;;  %v5795_v41 = vrot.slane %v18743_v37, %v18098_v9  ;;  %v5802_v46 = vrot.slane %v18843_v11, %v18098_v9  ;;  %v8494_v51 = vcombine.low %v5446_v13, %v19858_v15 }
 0x1fd   : > { %v8866_v56 = vsel %vm2503_vm0, %v23241_v4, %v8148_v31  ;;  %v6844_v8 = vcombine.low %v18746_v43, %v18749_v28  ;;  %v5545_v21 = vcombine.high %v17326_v49, %v17326_v49  ;;  %v5552_v20 = vrot.slane %v17326_v49, %v18098_v9 }
 0x1fe   : > { %v8171_v2 = vrot.slane %v8164_v1, %v18098_v9  ;;  %v19949_v50 = vrot.slane %v8469_v23, %v18098_v9  ;;  %v5803_v53 = vcombine.low %v5795_v41, %v5802_v46  ;;  %v23242_v37 = vrot.slane %v19037_v61, %v18098_v9  ;;  %v4773_v1 = vpop.f32.mrf.mxu0 }
 0x1ff   : > { %v23243_v11 = vrot.slane %v19035_v54, %v18098_v9  ;;  %v8508_v15 = vrot.slane %v8493_v39, %v18098_v9  ;;  %v8846_v43 = vsel %vm8844_vm14, %v18831_v60, %v6844_v8  ;;  %v5559_v28 = vrot.slane %v5545_v21, %v18098_v9 }
 0x200   : > { %v8890_v7 = vpack.c.bf16 %v8171_v2, %v8866_v56  ;;  %v5560_v6 = vcombine.high %v5552_v20, %v5552_v20  ;;  %v8501_v13 = vrot.slane %v8492_v12, %v18098_v9  ;;  %v8881_v31 = vpack.c.bf16 %v8846_v43, %v5803_v53 }
 0x201   : > { %v6040_v27 = vcombine.low %v23243_v11, %v23242_v37  ;;  %v19964_v23 = vrot.slane %v5552_v20, %v18098_v9  ;;  %v8515_v61 = vrot.slane %v8494_v51, %v18098_v9  ;;  %v5561_v54 = vcombine.high %v5559_v28, %v5559_v28 }
 0x202   : > { %v9156_v19 = vand.u32 %v19807_v30, %v8890_v7  ;;  %v5575_v57 = vrot.slane %v5559_v28, %v18098_v9  ;;  %v5582_v40 = vrot.slane %v5560_v6, %v18098_v9  ;;  %17341 = vmatpush3.bf16.msra.mxu1 %v8881_v31  ;;  %v6047_v39 = vrot.slane %v19060_v24, %v18098_v9 }
 0x203   : > { %v5590_v60 = vcombine.high %v19964_v23, %v19964_v23  ;;  %v6054_v4 = vrot.slane %v6040_v27, %v18098_v9  ;;  %v23244_v12 = vrot.slane %v19023_v59, %v18098_v9  ;;  %v7100_v41 = vcombine.low %v18953_v36, %v19099_v63  ;;  %17346 = vmatprep.subr.bf16.mxu1 %v23233_v52  ;;  %v8911_v59 = vld [vmem:[%s22979_s2] sm:$0xff] }
 0x204   : > { %17371 = vmatpush3.bf16.msra.mxu0 %v9156_v19  ;;  %v5592_v56 = vcombine.high %v5582_v40, %v5582_v40  ;;  %v8484_v46 = vcombine.low %v19949_v50, %v19932_v18  ;;  %v5496_v24 = vcombine.high %v4773_v1, %v4773_v1  ;;  %v5503_v51 = vrot.slane %v4773_v1, %v18098_v9  ;;  %v23376_v18 = vld [vmem:[#allocation103_spill] sm:$0xff] }
 0x205   : > { %17372 = vmatprep.subr.bf16.mxu0 %v23233_v52  ;;  %v6069_v2 = vrot.slane %v23244_v12, %v18098_v9  ;;  %v6055_v49 = vcombine.low %v6047_v39, %v6054_v4  ;;  %v23076_v8 = vmov 0   ;;  %v8516_v21 = vcombine.low %v8501_v13, %v8501_v13  ;;  %17343 = vmatmul.mubr.msk.bf16.vlgmr.msra.gmra.mxu1 %vm8928_vm1, %v19863_v38 }
 0x206   : > { %17967 = vset.pattern.permute.xlu0 %v23076_v8  ;;  %v5589_v20 = vrot.slane %v5561_v54, %v18098_v9  ;;  %v8661_v63 = vcombine.low %v5592_v56, %v5575_v57  ;;  %v19993_v7 = vcombine.low %v8508_v15, %v8515_v61  ;;  %v5510_v37 = vrot.slane %v5496_v24, %v18098_v9 }
 0x207   : > { %v8850_v36 = vsel %vm8844_vm14, %v6069_v2, %v7100_v41  ;;  %v5511_v11 = vcombine.high %v5503_v51, %v5503_v51  ;;  %17350 = vmatprep.mubr.msk.bf16.mxu1 %vm18005_vm15, %v23233_v52  ;;  %v19998_v27 = vcombine.low %v5582_v40, %v5590_v60  ;;  %v5519_v28 = vrot.slane %v5503_v51, %v18098_v9 }
 0x208   : > { %v8889_v53 = vpack.c.bf16 %v8850_v36, %v6055_v49  ;;  %v16657_v43 = vcombine.high %v5575_v57, %v5589_v20  ;;  %v23245_v6 = vcombine.low %v19612_v62, %v19597_v0  ;;  %8915 = vperm.xlu0 %17967, %v8911_v59   ;;  %v5512_v15 = vcombine.high %v5510_v37, %v5510_v37  ;;  %v9671_v49 = vld [vmem:[%s22980_s3] sm:$0xff] }
 0x209   : > { %v5526_v19 = vrot.slane %v5510_v37, %v18098_v9  ;;  %v5533_v31 = vrot.slane %v5511_v11, %v18098_v9  ;;  %v23246_v61 = vcombine.low %v19651_v17, %v19659_v14  ;;  %v8668_v57 = vrot.slane %v8661_v63, %v18098_v9  ;;  %17968 = vset.pattern.permute.xlu1 %v23076_v8  ;;  %v8912_v11 = vld [vmem:[%s22979_s2 + $0x8] sm:$0x3] }
 0x20a   : > { %v7979_v13 = vrot.slane %v23245_v6, %v18098_v9  ;;  %17373 = vmatpush3.bf16.msra.mxu0 %v8889_v53  ;;  %v8675_v40 = vrot.slane %v5589_v20, %v18098_v9  ;;  %v23247_v0 = vrot.slane %v19769_v48, %v18098_v9  ;;  %v5540_v60 = vrot.slane %v5512_v15, %v18098_v9  ;;  %v23250_v20 = vld [vmem:[#allocation9_spill] sm:$0xff]  ;;  %v23252_v53 = vld [vmem:[#allocation19_spill] sm:$0xff] }
 0x20b   : > { %v8863_v54 = vsel %vm2503_vm0, %v18838_v29, %v23246_v61  ;;  %17386 = vmatprep.subr.bf16.mxu0 %v23233_v52  ;;  %v5542_v39 = vcombine.high %v5526_v19, %v5526_v19  ;;  %v8558_v4 = vcombine.low %v5519_v28, %v5533_v31  ;;  %v16656_v17 = vcombine.high %v5519_v28, %v5533_v31 }
 0x20c   : > { %v8884_v1 = vpack.c.bf16 %v7979_v13, %v8863_v54  ;;  %v8292_v62 = vcombine.low %v23247_v0, %v19802_v22  ;;  %v20022_v29 = vrot.slane %v8516_v21, %v18098_v9  ;;  %v20025_v14 = vrot.slane %v16657_v43, %v18098_v9  ;;  %v23249_v21 = vld [vmem:[#allocation10_spill] sm:$0xff]  ;;  %v23253_v13 = vld [vmem:[#allocation15_spill] sm:$0xff]  ;;  %9675 = vperm.xlu0 %17967, %v9671_v49  }
 0x20d   : > { %17375 = vmatmul.mubr.msk.bf16.vlgmr.msra.gmra.mxu0 %vm8928_vm1, %v19863_v38  ;;  %v5544_v22 = vcombine.high %v5540_v60, %v5540_v60  ;;  %v8579_v12 = vrot.slane %v8558_v4, %v18098_v9  ;;  %v8604_v2 = vrot.slane %v16656_v17, %v18098_v9  ;;  %v8611_v41 = vrot.slane %v5526_v19, %v18098_v9 }
 0x20e   : > { %v9024_v56 = vand.u32 %v19807_v30, %v8884_v1  ;;  %v8299_v48 = vrot.slane %v8292_v62, %v18098_v9  ;;  %17390 = vmatprep.mubr.msk.bf16.mxu0 %vm18005_vm15, %v23233_v52  ;;  %v23248_v24 = vrot.slane %v19151_v42, %v18098_v9  ;;  %v5851_v59 = vcombine.low %v18850_v45, %v18806_v26  ;;  %v17329_v45 = vpop.f32.mrf.mxu0  ;;  %v23255_v1 = vld [vmem:[#allocation7_spill] sm:$0xff] }
 0x20f   : > { %v23251_v63 = vcombine.low %v23249_v21, %v23250_v20  ;;  %v6907_v37 = vrot.slane %v23252_v53, %v18098_v9  ;;  %v8643_v42 = vrot.slane %v19998_v27, %v18098_v9  ;;  %v20057_v43 = vcombine.low %v8668_v57, %v8675_v40  ;;  %8920 = vperm.xlu1 %17968, %v8912_v11   ;;  %v23259_v21 = vld [vmem:[#allocation43_spill] sm:$0xff]  ;;  %v23261_v11 = vld [vmem:[#allocation44_spill] sm:$0xff] }
 0x210   : > { %17347 = vmatpush3.bf16.msra.mxu1 %v9024_v56  ;;  %v8868_v51 = vsel %vm2503_vm0, %v23248_v24, %v19839_v47  ;;  %v8620_v47 = vcombine.low %v5540_v60, %v5542_v39  ;;  %v8621_v26 = vcombine.low %v5544_v22, %v19964_v23  ;;  %v5865_v6 = vrot.slane %v5851_v59, %v18098_v9  ;;  %v4783_v56 = vpop.f32.mrf.mxu0 }
 0x211   : > { %v5858_v36 = vrot.slane %v23251_v63, %v18098_v9  ;;  %17348 = vmatprep.subr.bf16.mxu1 %v23233_v52  ;;  %v8894_v28 = vpack.c.bf16 %v8299_v48, %v8868_v51  ;;  %v23254_v15 = vrot.slane %v23253_v13, %v18098_v9  ;;  %v5643_v31 = vcombine.high %v17329_v45, %v17329_v45  ;;  %v23258_v51 = vld [vmem:[#allocation42_spill] sm:$0xff] }
 0x212   : > { %v8708_v27 = vcombine.low %v20025_v14, %v20025_v14  ;;  %v8581_v61 = vcombine.low %v19920_v58, %v8579_v12  ;;  %v20068_v54 = vcombine.low %v8604_v2, %v8611_v41  ;;  %v5650_v23 = vrot.slane %v17329_v45, %v18098_v9  ;;  %v23257_v2 = vld [vmem:[#allocation34_spill] sm:$0xff] }
 0x213   : > { %v6908_v19 = vcombine.low %v23254_v15, %v6907_v37  ;;  %v9244_v57 = vand.u32 %v19807_v30, %v8894_v28  ;;  %v5866_v40 = vcombine.low %v5858_v36, %v5865_v6  ;;  %v23256_v0 = vrot.slane %v23255_v1, %v18098_v9  ;;  %v14958_v63 = vld [vmem:[%s22982_s5] sm:$0xff]  ;;  %v23260_v37 = vld [vmem:[#allocation45_spill] sm:$0xff] }
 0x214   : > { %v5657_v60 = vrot.slane %v5643_v31, %v18098_v9  ;;  %v8629_v39 = vrot.slane %v8620_v47, %v18098_v9  ;;  %v8636_v4 = vrot.slane %v8621_v26, %v18098_v9  ;;  %v5658_v58 = vcombine.high %v5650_v23, %v5650_v23  ;;  %14962 = vperm.xlu0 %17967, %v14958_v63  }
 0x215   : > { %v8847_v62 = vsel %vm8844_vm14, %v23256_v0, %v6908_v19  ;;  %v20080_v17 = vrot.slane %v5650_v23, %v18098_v9  ;;  %17387 = vmatpush3.bf16.msra.mxu0 %v9244_v57  ;;  %v6173_v41 = vrot.slane %v23257_v2, %v18098_v9  ;;  %v6180_v59 = vrot.slane %v23258_v51, %v18098_v9  ;;  %v23266_v51 = vld [vmem:[#allocation110_spill] sm:$0xff] }
 0x216   : > { %v8883_v48 = vpack.c.bf16 %v8847_v62, %v5866_v40  ;;  %v5659_v22 = vcombine.high %v5657_v60, %v5657_v60  ;;  %v5673_v12 = vrot.slane %v5657_v60, %v18098_v9  ;;  %17388 = vmatprep.subr.bf16.mxu0 %v23233_v52  ;;  %v5680_v49 = vrot.slane %v5658_v58, %v18098_v9 }
 0x217   : > { %v5688_v24 = vcombine.high %v20080_v17, %v20080_v17  ;;  %v6195_v20 = vrot.slane %v23259_v21, %v18098_v9  ;;  %v7228_v47 = vcombine.low %v23261_v11, %v23260_v37  ;;  %v5594_v26 = vcombine.high %v4783_v56, %v4783_v56  ;;  %v15255_v11 = vld [vmem:[%s22983_s6] sm:$0xff] }
 0x218   : > { %17349 = vmatpush3.bf16.msra.mxu1 %v8883_v48  ;;  %v5687_v36 = vrot.slane %v5659_v22, %v18098_v9  ;;  %v5689_v53 = vcombine.high %v5673_v12, %v5673_v12  ;;  %v5690_v45 = vcombine.high %v5680_v49, %v5680_v49  ;;  %v6181_v6 = vcombine.low %v6173_v41, %v6180_v59  ;;  %v23262_v48 = vld [vmem:[#allocation112_spill] sm:$0xff] }
 0x219   : > { %v8749_v28 = vcombine.low %v5680_v49, %v5688_v24  ;;  %17354 = vmatprep.subr.bf16.mxu1 %v23233_v52  ;;  %v5601_v13 = vrot.slane %v4783_v56, %v18098_v9  ;;  %v20102_v15 = vrot.slane %v8581_v61, %v18098_v9  ;;  %v8644_v19 = vcombine.low %v8629_v39, %v8629_v39  ;;  %v23265_v24 = vld [vmem:[#allocation113_spill] sm:$0xff] }
 0x21a   : > { %v8852_v31 = vsel %vm8844_vm14, %v6195_v20, %v7228_v47  ;;  %v5608_v23 = vrot.slane %v5594_v26, %v18098_v9  ;;  %v20106_v57 = vcombine.low %v8636_v4, %v8643_v42  ;;  %v8750_v40 = vcombine.low %v5690_v45, %v5673_v12  ;;  %v9672_v42 = vld [vmem:[%s22980_s3 + $0x8] sm:$0x3]  ;;  %v23264_v12 = vld [vmem:[#allocation109_spill] sm:$0xff]  ;;  %15259 = vperm.xlu0 %17967, %v15255_v11  }
 0x21b   : > { %v8893_v1 = vpack.c.bf16 %v8852_v31, %v6181_v6  ;;  %17351 = vmatmul.mubr.msk.bf16.vlgmr.msra.gmra.mxu1 %vm8928_vm1, %v19863_v38  ;;  %v5609_v0 = vcombine.high %v5601_v13, %v5601_v13  ;;  %v5691_v62 = vcombine.high %v5687_v36, %v5687_v36  ;;  %v8764_v60 = vrot.slane %v8749_v28, %v18098_v9  ;;  %v23268_v45 = vld [vmem:[#allocation23_spill] sm:$0xff] }
 0x21c   : > { %v5610_v58 = vcombine.high %v5608_v23, %v5608_v23  ;;  %v5617_v61 = vrot.slane %v5601_v13, %v18098_v9  ;;  %17358 = vmatprep.mubr.msk.bf16.mxu1 %vm18005_vm15, %v23233_v52  ;;  %v8771_v39 = vrot.slane %v8750_v40, %v18098_v9  ;;  %v20118_v4 = vcombine.low %v5687_v36, %v5689_v53 }
 0x21d   : > { %17389 = vmatpush3.bf16.msra.mxu0 %v8893_v1  ;;  %v5631_v56 = vrot.slane %v5609_v0, %v18098_v9  ;;  %v23263_v22 = vrot.slane %v23262_v48, %v18098_v9  ;;  %v20126_v41 = vrot.slane %v5608_v23, %v18098_v9  ;;  %v23267_v59 = vrot.slane %v23266_v51, %v18098_v9 }
 0x21e   : > { %v20129_v49 = vrot.slane %v5610_v58, %v18098_v9  ;;  %17402 = vmatprep.subr.bf16.mxu0 %v23233_v52  ;;  %v8412_v20 = vrot.slane %v19905_v16, %v18098_v9  ;;  %v20139_v63 = vrot.slane %v8644_v19, %v18098_v9  ;;  %v8404_v37 = vcombine.low %v19909_v55, %v8403_v44 }
 0x21f   : > { %v8020_v2 = vcombine.low %v23264_v12, %v23263_v22  ;;  %v8036_v21 = vcombine.low %v23267_v59, %v23265_v24  ;;  %v8685_v36 = vcombine.low %v5617_v61, %v5631_v56  ;;  %v16658_v53 = vcombine.high %v5617_v61, %v5631_v56  ;;  %9680 = vperm.xlu1 %17968, %v9672_v42   ;;  %v23273_v42 = vld [vmem:[#allocation8_spill] sm:$0xff]  ;;  %v23274_v56 = vld [vmem:[#allocation14_spill] sm:$0xff]  ;;  %v23275_v12 = vld [vmem:[#allocation25_spill] sm:$0xff] }
 0x220   : > { %v20148_v47 = vcombine.low %v8764_v60, %v8771_v39  ;;  %v5642_v16 = vcombine.high %v20129_v49, %v20129_v49  ;;  %v23269_v28 = vrot.slane %v23268_v45, %v18098_v9  ;;  %17391 = vmatmul.mubr.msk.bf16.vlgmr.msra.gmra.mxu0 %vm8928_vm1, %v19863_v38  ;;  %v8796_v55 = vrot.slane %v20118_v4, %v18098_v9  ;;  %v23271_v60 = vld [vmem:[#allocation50_spill] sm:$0xff] }
 0x221   : > { %v8043_v26 = vrot.slane %v8036_v21, %v18098_v9  ;;  %v20165_v44 = vrot.slane %v5691_v62, %v18098_v9  ;;  %v20168_v13 = vrot.slane %v8685_v36, %v18098_v9  ;;  %v20171_v19 = vrot.slane %v16658_v53, %v18098_v9  ;;  %17406 = vmatprep.mubr.msk.bf16.mxu0 %vm18005_vm15, %v23233_v52  ;;  %v23277_v21 = vld [vmem:[#allocation56_spill] sm:$0xff]  ;;  %v23278_v36 = vld [vmem:[#allocation53_spill] sm:$0xff] }
 0x222   : > { %v8864_v6 = vsel %vm2503_vm0, %v23269_v28, %v8020_v2  ;;  %v5640_v31 = vcombine.high %v20126_v41, %v20126_v41  ;;  %v8748_v23 = vcombine.low %v5642_v16, %v20080_v17  ;;  %v23270_v1 = vrot.slane %v19777_v10, %v18098_v9  ;;  %v23276_v2 = vld [vmem:[#allocation11_spill] sm:$0xff] }
 0x223   : > { %v8886_v40 = vpack.c.bf16 %v8043_v26, %v8864_v6  ;;  %v8725_v62 = vcombine.low %v20126_v41, %v20129_v49  ;;  %v23272_v58 = vrot.slane %v23271_v60, %v18098_v9  ;;  %v5921_v39 = vrot.slane %v23273_v42, %v18098_v9  ;;  %14967 = vperm.xlu1 %17968, %v14959_v35   ;;  %v15934_v26 = vld [vmem:[%s22985_s8 + $0x10] sm:$0xff]  ;;  %v23282_v6 = vld [vmem:[#allocation18_spill] sm:$0xff]  ;;  %v15256_v42 = vld [vmem:[%s22983_s6 + $0x8] sm:$0xff] }
 0x224   : > { %v8420_v0 = vcombine.low %v8412_v20, %v23270_v1  ;;  %v5928_v17 = vrot.slane %v23274_v56, %v18098_v9  ;;  %v8787_v10 = vrot.slane %v20148_v47, %v18098_v9  ;;  %v6972_v24 = vcombine.low %v23276_v2, %v23275_v12  ;;  %v23284_v1 = vld [vmem:[#allocation57_spill] sm:$0xff]  ;;  %15948 = vperm.xlu0 %17967, %v15934_v26   ;;  %v23387_v49 = vld [vmem:[#allocation70_spill] sm:$0xff] }
 0x225   : > { %v8870_v61 = vsel %vm2503_vm0, %v23272_v58, %v8404_v37  ;;  %v9068_v48 = vand.u32 %v19807_v30, %v8886_v40  ;;  %v8709_v51 = vcombine.low %v20168_v13, %v20171_v19  ;;  %v6290_v20 = vrot.slane %v23277_v21, %v18098_v9  ;;  %v23280_v37 = vld [vmem:[#allocation52_spill] sm:$0xff]  ;;  %v16257_v13 = vld [vmem:[%s22988_s11] sm:$0x1f] }
 0x226   : > { %v8427_v22 = vrot.slane %v8420_v0, %v18098_v9  ;;  %v5929_v59 = vcombine.low %v5921_v39, %v5928_v17  ;;  %v23279_v53 = vrot.slane %v23278_v36, %v18098_v9  ;;  %v23281_v11 = vrot.slane %v23280_v37, %v18098_v9  ;;  %v23285_v0 = vld [vmem:[#allocation58_spill] sm:$0xff]  ;;  %v23287_v39 = vld [vmem:[#allocation55_spill] sm:$0xff]  ;;  %v23394_v19 = vld [vmem:[#allocation104_spill] sm:$0xff] }
 0x227   : > { %v20211_v45 = vrot.slane %v8748_v23, %v18098_v9  ;;  %17355 = vmatpush3.bf16.msra.mxu1 %v9068_v48  ;;  %v23283_v35 = vrot.slane %v23282_v6, %v18098_v9  ;;  %v23286_v60 = vcombine.low %v23284_v1, %v23285_v0  ;;  %v23289_v48 = vld [vmem:[#allocation117_spill] sm:$0xff]  ;;  %v23292_v36 = vld [vmem:[#allocation111_spill] sm:$0xff]  ;;  %v8531_v37 = vrot.slane %v19993_v7, %v18098_v9  ;;  %v23294_v6 = vld [vmem:[#allocation20_spill] sm:$0xff] }
 0x228   : > { %v6291_v16 = vcombine.low %v23281_v11, %v23279_v53  ;;  %v8898_v28 = vpack.c.bf16 %v8427_v22, %v8870_v61  ;;  %17356 = vmatprep.subr.bf16.mxu1 %v23233_v52  ;;  %v23288_v61 = vrot.slane %v23287_v39, %v18098_v9  ;;  %v23290_v22 = vld [vmem:[#allocation115_spill] sm:$0xff]  ;;  %v8107_v53 = vrot.slane %v23292_v36, %v18098_v9  ;;  %v23293_v11 = vld [vmem:[#allocation22_spill] sm:$0xff]  ;;  %v16194_v1 = vld [vmem:[%s22986_s9 + $0x10] sm:$0xff] }
 0x229   : > { %v8848_v40 = vsel %vm8844_vm14, %v23283_v35, %v6972_v24  ;;  %v7355_v58 = vrot.slane %v23286_v60, %v18098_v9  ;;  %v8084_v12 = vcombine.low %v23290_v22, %v23289_v48  ;;  %v23291_v24 = vld [vmem:[#allocation63_spill] sm:$0xff]  ;;  %15264 = vperm.xlu1 %17968, %v15256_v42   ;;  %v23297_v7 = vld [vmem:[#allocation46_spill] sm:$0xff]  ;;  %v8532_v60 = vcombine.low %v20022_v29, %v8531_v37  ;;  %v23299_v39 = vld [vmem:[#allocation13_spill] sm:$0xff] }
 0x22a   : > { %v8885_v23 = vpack.c.bf16 %v8848_v40, %v5929_v59  ;;  %v6292_v56 = vcombine.low %v23288_v61, %v6290_v20  ;;  %v6299_v17 = vrot.slane %v6291_v16, %v18098_v9  ;;  %v9332_v2 = vand.u32 %v19807_v30, %v8898_v28  ;;  %v23295_v28 = vld [vmem:[#allocation21_spill] sm:$0xff]  ;;  %v23305_v29 = vld [vmem:[#allocation67_spill] sm:$0xff]  ;;  %16208 = vperm.xlu0 %17967, %v16194_v1   ;;  %v23314_v1 = vld [vmem:[#allocation72_spill] sm:$0xff] }
 0x22b   : > { %v7356_v21 = vcombine.low %v23291_v24, %v7355_v58  ;;  %v8865_v20 = vsel %vm2503_vm0, %v23293_v11, %v8084_v12  ;;  %v8555_v16 = vrot.slane %v19917_v25, %v18098_v9  ;;  %v23296_v35 = vcombine.low %v23294_v6, %v23295_v28  ;;  %v23298_v58 = vld [vmem:[#allocation12_spill] sm:$0xff]  ;;  %v23301_v48 = vld [vmem:[#allocation17_spill] sm:$0xff] }
 0x22c   : > { %v6306_v59 = vrot.slane %v6292_v56, %v18098_v9  ;;  %17403 = vmatpush3.bf16.msra.mxu0 %v9332_v2  ;;  %17357 = vmatpush3.bf16.msra.mxu1 %v8885_v23  ;;  %v8888_v0 = vpack.c.bf16 %v8107_v53, %v8865_v20  ;;  %v23300_v61 = vcombine.low %v23298_v58, %v23299_v39  ;;  %v23303_v23 = vld [vmem:[#allocation24_spill] sm:$0xff]  ;;  %v23313_v39 = vld [vmem:[#allocation71_spill] sm:$0xff] }
 0x22d   : > { %v5984_v40 = vrot.slane %v23296_v35, %v18098_v9  ;;  %v8854_v26 = vsel %vm8844_vm14, %v23297_v7, %v7356_v21  ;;  %17404 = vmatprep.subr.bf16.mxu0 %v23233_v52  ;;  %17362 = vmatprep.subr.bf16.mxu1 %v23233_v52  ;;  %v23302_v42 = vrot.slane %v23301_v48, %v18098_v9  ;;  %v23307_v21 = vld [vmem:[#allocation28_spill] sm:$0xff] }
 0x22e   : > { %v6307_v25 = vcombine.low %v6299_v17, %v6306_v59  ;;  %v5991_v56 = vrot.slane %v23300_v61, %v18098_v9  ;;  %v23304_v22 = vrot.slane %v23303_v23, %v18098_v9  ;;  %v9112_v2 = vand.u32 %v19807_v30, %v8888_v0  ;;  %v23308_v53 = vld [vmem:[#allocation60_spill] sm:$0xff]  ;;  %v23310_v59 = vld [vmem:[#allocation65_spill] sm:$0xff] }
 0x22f   : > { %v23306_v24 = vrot.slane %v23305_v29, %v18098_v9  ;;  %v7028_v36 = vrot.slane %v23307_v21, %v18098_v9  ;;  %v23309_v37 = vrot.slane %v23308_v53, %v18098_v9  ;;  %v23311_v11 = vrot.slane %v23310_v59, %v18098_v9  ;;  %17359 = vmatmul.mubr.msk.bf16.vlgmr.msra.gmra.mxu1 %vm8928_vm1, %v19863_v38  ;;  %v23312_v0 = vld [vmem:[#allocation77_spill] sm:$0xff]  ;;  %v23317_v48 = vld [vmem:[#allocation68_spill] sm:$0xff] }
 0x230   : > { %v7021_v12 = vcombine.low %v23304_v22, %v23302_v42  ;;  %v8897_v6 = vpack.c.bf16 %v8854_v26, %v6307_v25  ;;  %v5992_v35 = vcombine.low %v5984_v40, %v5991_v56  ;;  %17363 = vmatpush3.bf16.msra.mxu1 %v9112_v2  ;;  %17366 = vmatprep.mubr.msk.bf16.mxu1 %vm18005_vm15, %v23233_v52  ;;  %v23316_v56 = vld [vmem:[#allocation74_spill] sm:$0xff]  ;;  %v23320_v29 = vld [vmem:[#allocation116_spill] sm:$0xff] }
 0x231   : > { %v8872_v17 = vsel %vm2503_vm0, %v23306_v24, %v8532_v60  ;;  %v6418_v20 = vcombine.low %v23311_v11, %v23309_v37  ;;  %v6425_v60 = vrot.slane %v23312_v0, %v18098_v9  ;;  %v23315_v26 = vcombine.low %v23313_v39, %v23314_v1  ;;  %17364 = vmatprep.subr.bf16.mxu1 %v23233_v52  ;;  %v23321_v24 = vld [vmem:[#allocation114_spill] sm:$0xff] }
 0x232   : > { %v8902_v28 = vpack.c.bf16 %v8555_v16, %v8872_v17  ;;  %v7035_v7 = vrot.slane %v7021_v12, %v18098_v9  ;;  %v15932_v16 = vld [vmem:[%s22985_s8] sm:$0xff]  ;;  %17405 = vmatpush3.bf16.msra.mxu0 %v8897_v6  ;;  %v23318_v42 = vcombine.low %v23316_v56, %v23317_v48  ;;  %v23322_v17 = vcombine.low %v23320_v29, %v23321_v24  ;;  %v23325_v6 = vld [vmem:[#allocation33_spill] sm:$0xff]  ;;  %v23335_v24 = vld [vmem:[#allocation88_spill] sm:$0xff] }
 0x233   : > { %v6432_v58 = vrot.slane %v6418_v20, %v18098_v9  ;;  %v7476_v25 = vrot.slane %v23315_v26, %v18098_v9  ;;  %17418 = vmatprep.subr.bf16.mxu0 %v23233_v52  ;;  %v23319_v12 = vld [vmem:[#allocation118_spill] sm:$0xff]  ;;  %v8659_v53 = vrot.slane %v20106_v57, %v18098_v9  ;;  %v8683_v11 = vrot.slane %v20057_v43, %v18098_v9  ;;  %v23324_v20 = vld [vmem:[#allocation29_spill] sm:$0xff] }
 0x234   : > { %v9420_v40 = vand.u32 %v19807_v30, %v8902_v28  ;;  %v7036_v61 = vcombine.low %v7028_v36, %v7035_v7  ;;  %v7483_v23 = vrot.slane %v23318_v42, %v18098_v9  ;;  %v8212_v2 = vcombine.low %v19758_v34, %v23319_v12  ;;  %v23323_v36 = vld [vmem:[#allocation16_spill] sm:$0xff]  ;;  %15938 = vperm.xlu0 %17967, %v15932_v16   ;;  %v23330_v43 = vld [vmem:[#allocation61_spill] sm:$0xff] }
 0x235   : > { %v6433_v22 = vcombine.low %v6425_v60, %v6432_v58  ;;  %v8235_v21 = vrot.slane %v23322_v17, %v18098_v9  ;;  %v6102_v28 = vcombine.low %v23325_v6, %v23324_v20  ;;  %17407 = vmatmul.mubr.msk.bf16.vlgmr.msra.gmra.mxu0 %vm8928_vm1, %v19863_v38  ;;  %v23326_v7 = vld [vmem:[#allocation32_spill] sm:$0xff]  ;;  %v8660_v57 = vcombine.low %v20139_v63, %v8659_v53  ;;  %v23327_v60 = vld [vmem:[#allocation30_spill] sm:$0xff]  ;;  %v23328_v58 = vld [vmem:[#allocation27_spill] sm:$0xff] }
 0x236   : > { %v8849_v37 = vsel %vm8844_vm14, %v23323_v36, %v7036_v61  ;;  %v7484_v59 = vcombine.low %v7476_v25, %v7483_v23  ;;  %v8867_v0 = vsel %vm2503_vm0, %v23326_v7, %v8212_v2  ;;  %v23329_v39 = vcombine.low %v23327_v60, %v23328_v58  ;;  %17419 = vmatpush3.bf16.msra.mxu0 %v9420_v40  ;;  %v15935_v63 = vld [vmem:[%s22985_s8 + $0x18] sm:$0xff]  ;;  %v23332_v40 = vld [vmem:[#allocation80_spill] sm:$0xff] }
 0x237   : > { %v8887_v34 = vpack.c.bf16 %v8849_v37, %v5992_v35  ;;  %v23331_v26 = vrot.slane %v23330_v43, %v18098_v9  ;;  %v8892_v16 = vpack.c.bf16 %v8235_v21, %v8867_v0  ;;  %17422 = vmatprep.mubr.msk.bf16.mxu0 %vm18005_vm15, %v23233_v52  ;;  %v6110_v35 = vrot.slane %v6102_v28, %v18098_v9  ;;  %v23334_v42 = vld [vmem:[#allocation37_spill] sm:$0xff]  ;;  %v23336_v21 = vld [vmem:[#allocation31_spill] sm:$0xff]  ;;  %v23338_v37 = vld [vmem:[#allocation92_spill] sm:$0xff] }
 0x238   : > { %v6117_v1 = vrot.slane %v23329_v39, %v18098_v9  ;;  %17420 = vmatprep.subr.bf16.mxu0 %v23233_v52  ;;  %v23333_v56 = vrot.slane %v23332_v40, %v18098_v9  ;;  %v7156_v23 = vrot.slane %v23334_v42, %v18098_v9  ;;  %v8772_v12 = vcombine.low %v20211_v45, %v20211_v45  ;;  %v23341_v28 = vld [vmem:[#allocation87_spill] sm:$0xff] }
 0x239   : > { %v8856_v25 = vsel %vm8844_vm14, %v23331_v26, %v7484_v59  ;;  %17365 = vmatpush3.bf16.msra.mxu1 %v8887_v34  ;;  %v9200_v2 = vand.u32 %v19807_v30, %v8892_v16  ;;  %v6528_v17 = vrot.slane %v23335_v24, %v18098_v9  ;;  %v23337_v53 = vrot.slane %v23336_v21, %v18098_v9  ;;  %v23339_v59 = vld [vmem:[#allocation93_spill] sm:$0xff]  ;;  %v23354_v24 = vld [vmem:[#allocation39_spill] sm:$0xff] }
 0x23a   : > { %v8901_v61 = vpack.c.bf16 %v8856_v25, %v6433_v22  ;;  %v8874_v48 = vsel %vm2503_vm0, %v23333_v56, %v8660_v57  ;;  %17378 = vmatprep.subr.bf16.mxu1 %v23233_v52  ;;  %v6118_v22 = vcombine.low %v6110_v35, %v6117_v1  ;;  %v23340_v20 = vcombine.low %v23338_v37, %v23339_v59  ;;  %v23344_v57 = vld [vmem:[#allocation59_spill] sm:$0xff]  ;;  %v23347_v1 = vld [vmem:[#allocation81_spill] sm:$0xff]  ;;  %v23362_v59 = vld [vmem:[#allocation100_spill] sm:$0xff] }
 0x23b   : > { %v8906_v29 = vpack.c.bf16 %v8683_v11, %v8874_v48  ;;  %v7164_v36 = vcombine.low %v7156_v23, %v23337_v53  ;;  %v8363_v45 = vrot.slane %v19901_v5, %v18098_v9  ;;  %15953 = vperm.xlu1 %17968, %v15935_v63   ;;  %v23342_v34 = vrot.slane %v23341_v28, %v18098_v9  ;;  %v23345_v5 = vld [vmem:[#allocation26_spill] sm:$0xff]  ;;  %v23348_v26 = vld [vmem:[#allocation85_spill] sm:$0xff]  ;;  %v23350_v56 = vld [vmem:[#allocation35_spill] sm:$0xff] }
 0x23c   : > { %v7604_v6 = vrot.slane %v23340_v20, %v18098_v9  ;;  %17421 = vmatpush3.bf16.msra.mxu0 %v8901_v61  ;;  %17367 = vmatmul.mubr.msk.bf16.vlgmr.msra.gmra.mxu1 %vm8928_vm1, %v19863_v38  ;;  %v23343_v0 = vcombine.low %v19761_v3, %v19767_v32  ;;  %v23346_v58 = vrot.slane %v23345_v5, %v18098_v9  ;;  %v23349_v63 = vld [vmem:[#allocation82_spill] sm:$0xff]  ;;  %v23351_v48 = vld [vmem:[#allocation36_spill] sm:$0xff]  ;;  %v23364_v28 = vld [vmem:[#allocation99_spill] sm:$0xff] }
 0x23d   : > { %v9508_v11 = vand.u32 %v19807_v30, %v8906_v29  ;;  %v6543_v7 = vcombine.low %v23342_v34, %v6528_v17  ;;  %17379 = vmatpush3.bf16.msra.mxu1 %v9200_v2  ;;  %17434 = vmatprep.subr.bf16.mxu0 %v23233_v52  ;;  %v6558_v43 = vrot.slane %v23347_v1, %v18098_v9  ;;  %v23353_v29 = vld [vmem:[#allocation38_spill] sm:$0xff]  ;;  %v23358_v53 = vld [vmem:[#allocation40_spill] sm:$0xff] }
 0x23e   : > { %v8869_v60 = vsel %vm2503_vm0, %v23344_v57, %v23343_v0  ;;  %v8851_v39 = vsel %vm8844_vm14, %v23346_v58, %v7164_v36  ;;  %v7612_v25 = vcombine.low %v7604_v6, %v23348_v26  ;;  %17380 = vmatprep.subr.bf16.mxu1 %v23233_v52  ;;  %17382 = vmatprep.mubr.msk.bf16.mxu1 %vm18005_vm15, %v23233_v52  ;;  %v23360_v36 = vld [vmem:[#allocation89_spill] sm:$0xff] }
 0x23f   : > { %v6551_v3 = vrot.slane %v6543_v7, %v18098_v9  ;;  %v8896_v32 = vpack.c.bf16 %v8363_v45, %v8869_v60  ;;  %v8780_v16 = vrot.slane %v8772_v12, %v18098_v9  ;;  %17423 = vmatmul.mubr.msk.bf16.vlgmr.msra.gmra.mxu0 %vm8928_vm1, %v19863_v38  ;;  %v8891_v35 = vpack.c.bf16 %v8851_v39, %v6118_v22  ;;  %v23356_v22 = vld [vmem:[#allocation41_spill] sm:$0xff]  ;;  %v23366_v60 = vld [vmem:[#allocation54_spill] sm:$0xff]  ;;  %v23367_v39 = vld [vmem:[#allocation96_spill] sm:$0xff] }
 0x240   : > { %v8858_v61 = vsel %vm8844_vm14, %v23349_v63, %v7612_v25  ;;  %v8804_v40 = vcombine.low %v8796_v55, %v20165_v44  ;;  %v23352_v42 = vcombine.low %v23350_v56, %v23351_v48  ;;  %17435 = vmatpush3.bf16.msra.mxu0 %v9508_v11  ;;  %17438 = vmatprep.mubr.msk.bf16.mxu0 %vm18005_vm15, %v23233_v52  ;;  %v16192_v55 = vld [vmem:[%s22986_s9] sm:$0xff]  ;;  %v23369_v25 = vld [vmem:[#allocation107_spill] sm:$0xff]  ;;  %v23373_v56 = vld [vmem:[#allocation120_spill] sm:$0xff] }
 0x241   : > { %v6559_v2 = vcombine.low %v6551_v3, %v6558_v43  ;;  %v8788_v12 = vcombine.low %v8780_v16, %v8787_v10  ;;  %v23355_v17 = vcombine.low %v23353_v29, %v23354_v24  ;;  %17381 = vmatpush3.bf16.msra.mxu1 %v8891_v35  ;;  %17436 = vmatprep.subr.bf16.mxu0 %v23233_v52  ;;  %v23368_v43 = vld [vmem:[#allocation94_spill] sm:$0xff]  ;;  %v23378_v29 = vld [vmem:[#allocation48_spill] sm:$0xff] }
 0x242   : > { %v6236_v23 = vrot.slane %v23352_v42, %v18098_v9  ;;  %v8811_v44 = vrot.slane %v8804_v40, %v18098_v9  ;;  %v23357_v21 = vrot.slane %v23356_v22, %v18098_v9  ;;  %v23359_v47 = vrot.slane %v23358_v53, %v18098_v9  ;;  %17394 = vmatprep.subr.bf16.mxu1 %v23233_v52  ;;  %v23370_v3 = vld [vmem:[#allocation102_spill] sm:$0xff]  ;;  %v23372_v40 = vld [vmem:[#allocation119_spill] sm:$0xff] }
 0x243   : > { %v6243_v4 = vrot.slane %v23355_v17, %v18098_v9  ;;  %v23361_v37 = vrot.slane %v23360_v36, %v18098_v9  ;;  %v23363_v20 = vrot.slane %v23362_v59, %v18098_v9  ;;  %v8905_v45 = vpack.c.bf16 %v8858_v61, %v6559_v2  ;;  %16198 = vperm.xlu0 %17967, %v16192_v55   ;;  %v23375_v42 = vld [vmem:[#allocation78_spill] sm:$0xff] }
 0x244   : > { %v7292_v10 = vcombine.low %v23359_v47, %v23357_v21  ;;  %v9288_v11 = vand.u32 %v19807_v30, %v8896_v32  ;;  %v23365_v34 = vrot.slane %v23364_v28, %v18098_v9  ;;  %v6684_v1 = vrot.slane %v23367_v39, %v18098_v9  ;;  %17383 = vmatmul.mubr.msk.bf16.vlgmr.msra.gmra.mxu1 %vm8928_vm1, %v19863_v38  ;;  %v23381_v55 = vld [vmem:[#allocation62_spill] sm:$0xff]  ;;  %v23383_v21 = vld [vmem:[#allocation73_spill] sm:$0xff]  ;;  %v23385_v47 = vld [vmem:[#allocation51_spill] sm:$0xff] }
 0x245   : > { %v6669_v6 = vcombine.low %v23363_v20, %v23361_v37  ;;  %v6244_v0 = vcombine.low %v6236_v23, %v6243_v4  ;;  %17437 = vmatpush3.bf16.msra.mxu0 %v8905_v45  ;;  %v6699_v26 = vrot.slane %v23368_v43, %v18098_v9  ;;  %v23371_v32 = vcombine.low %v23369_v25, %v23370_v3  ;;  %v23380_v4 = vld [vmem:[#allocation49_spill] sm:$0xff]  ;;  %v23396_v43 = vld [vmem:[#allocation108_spill] sm:$0xff]  ;;  %v15933_v25 = vld [vmem:[%s22985_s8 + $0x8] sm:$0xff] }
 0x246   : > { %v8876_v7 = vsel %vm2503_vm0, %v23365_v34, %v8788_v12  ;;  %v8853_v5 = vsel %vm8844_vm14, %v23366_v60, %v7292_v10  ;;  %v8491_v35 = vrot.slane %v8484_v46, %v18098_v9  ;;  %17395 = vmatpush3.bf16.msra.mxu1 %v9288_v11  ;;  %17450 = vmatprep.subr.bf16.mxu0 %v23233_v52  ;;  %v23377_v12 = vld [vmem:[#allocation47_spill] sm:$0xff]  ;;  %v23395_v39 = vld [vmem:[#allocation105_spill] sm:$0xff] }
 0x247   : > { %v8910_v57 = vpack.c.bf16 %v8811_v44, %v8876_v7  ;;  %v6677_v58 = vrot.slane %v6669_v6, %v18098_v9  ;;  %v7732_v16 = vrot.slane %v23371_v32, %v18098_v9  ;;  %v8895_v61 = vpack.c.bf16 %v8853_v5, %v6244_v0  ;;  %17396 = vmatprep.subr.bf16.mxu1 %v23233_v52  ;;  %v23389_v34 = vld [vmem:[#allocation95_spill] sm:$0xff]  ;;  %v23390_v0 = vld [vmem:[#allocation101_spill] sm:$0xff]  ;;  %v23393_v5 = vld [vmem:[#allocation98_spill] sm:$0xff] }
 0x248   : > { %v23374_v48 = vcombine.low %v23372_v40, %v23373_v56  ;;  %17398 = vmatprep.mubr.msk.bf16.mxu1 %vm18005_vm15, %v23233_v52  ;;  %17439 = vmatmul.mubr.msk.bf16.vlgmr.msra.gmra.mxu0 %vm8928_vm1, %v19863_v38  ;;  %v23379_v24 = vcombine.low %v23377_v12, %v23378_v29  ;;  %v23382_v44 = vcombine.low %v23380_v4, %v23381_v55 }
 0x249   : > { %v9596_v63 = vand.u32 %v19807_v30, %v8910_v57  ;;  %v6685_v2 = vcombine.low %v6677_v58, %v6684_v1  ;;  %v7740_v50 = vcombine.low %v7732_v16, %v23376_v18  ;;  %v23384_v53 = vrot.slane %v23383_v21, %v18098_v9  ;;  %17454 = vmatprep.mubr.msk.bf16.mxu0 %vm18005_vm15, %v23233_v52  ;;  %v23391_v57 = vld [vmem:[#allocation97_spill] sm:$0xff] }
 0x24a   : > { %v8871_v23 = vsel %vm2503_vm0, %v23375_v42, %v23374_v48  ;;  %v6362_v17 = vrot.slane %v23379_v24, %v18098_v9  ;;  %v6369_v22 = vrot.slane %v23382_v44, %v18098_v9  ;;  %v23386_v10 = vrot.slane %v23385_v47, %v18098_v9  ;;  %17397 = vmatpush3.bf16.msra.mxu1 %v8895_v61  ;;  %v23398_v61 = vld [vmem:[#allocation106_spill] sm:$0xff]  ;;  %v23400_v42 = vld [vmem:[#allocation76_spill] sm:$0xff]  ;;  %v23408_v21 = vld [vmem:[#allocation69_spill] sm:$0xff] }
 0x24b   : > { %v8900_v46 = vpack.c.bf16 %v8491_v35, %v8871_v23  ;;  %v8596_v37 = vcombine.low %v19929_v33, %v20102_v15  ;;  %v8732_v59 = vrot.slane %v8725_v62, %v18098_v9  ;;  %v8739_v20 = vrot.slane %v5640_v31, %v18098_v9  ;;  %17451 = vmatpush3.bf16.msra.mxu0 %v9596_v63  ;;  %v16195_v33 = vld [vmem:[%s22986_s9 + $0x18] sm:$0xff]  ;;  %v23397_v35 = vld [vmem:[#allocation79_spill] sm:$0xff]  ;;  %v23406_v44 = vld [vmem:[#allocation90_spill] sm:$0xff] }
 0x24c   : > { %v7420_v36 = vcombine.low %v23386_v10, %v23384_v53  ;;  %v8860_v6 = vsel %vm8844_vm14, %v6699_v26, %v7740_v50  ;;  %17452 = vmatprep.subr.bf16.mxu0 %v23233_v52  ;;  %v6370_v15 = vcombine.low %v6362_v17, %v6369_v22  ;;  %v23388_v62 = vrot.slane %v23387_v49, %v18098_v9  ;;  %v23401_v23 = vld [vmem:[#allocation75_spill] sm:$0xff]  ;;  %v23402_v50 = vld [vmem:[#allocation84_spill] sm:$0xff] }
 0x24d   : > { %v8619_v31 = vrot.slane %v20068_v54, %v18098_v9  ;;  %v8716_v45 = vrot.slane %v8708_v27, %v18098_v9  ;;  %v8723_v11 = vrot.slane %v8709_v51, %v18098_v9  ;;  %v8909_v28 = vpack.c.bf16 %v8860_v6, %v6685_v2  ;;  %17410 = vmatprep.subr.bf16.mxu1 %v23233_v52  ;;  %v23392_v54 = vld [vmem:[#allocation91_spill] sm:$0xff] }
 0x24e   : > { %v8855_v41 = vsel %vm8844_vm14, %v23388_v62, %v7420_v36  ;;  %v8873_v7 = vsel %vm2503_vm0, %v23389_v34, %v8596_v37  ;;  %v6575_v60 = vcombine.low %v23391_v57, %v23390_v0  ;;  %v6577_v58 = vcombine.low %v23393_v5, %v23392_v54  ;;  %16213 = vperm.xlu1 %17968, %v16195_v33   ;;  %v23405_v17 = vld [vmem:[#allocation83_spill] sm:$0xff] }
 0x24f   : > { %v9376_v14 = vand.u32 %v19807_v30, %v8900_v46  ;;  %v8899_v27 = vpack.c.bf16 %v8855_v41, %v6370_v15  ;;  %v7645_v51 = vrot.slane %v23394_v19, %v18098_v9  ;;  %v7652_v1 = vrot.slane %v23395_v39, %v18098_v9  ;;  %17453 = vmatpush3.bf16.msra.mxu0 %v8909_v28  ;;  %v23403_v46 = vld [vmem:[#allocation86_spill] sm:$0xff]  ;;  %v16193_v10 = vld [vmem:[%s22986_s9 + $0x8] sm:$0xff] }
 0x250   : > { %v7659_v26 = vrot.slane %v23396_v43, %v18098_v9  ;;  %17399 = vmatmul.mubr.msk.bf16.vlgmr.msra.gmra.mxu1 %vm8928_vm1, %v19863_v38  ;;  %v16618_v3 = vcombine.high %v23391_v57, %v23390_v0  ;;  %v8904_v32 = vpack.c.bf16 %v8619_v31, %v8873_v7  ;;  %v8740_v16 = vcombine.low %v8732_v59, %v8739_v20  ;;  %v23410_v59 = vld [vmem:[#allocation64_spill] sm:$0xff]  ;;  %v23411_v20 = vld [vmem:[#allocation66_spill] sm:$0xff] }
 0x251   : > { %17411 = vmatpush3.bf16.msra.mxu1 %v9376_v14  ;;  %17414 = vmatprep.mubr.msk.bf16.mxu1 %vm18005_vm15, %v23233_v52  ;;  %v6503_v63 = vrot.slane %v23397_v35, %v18098_v9  ;;  %v23399_v40 = vrot.slane %v23398_v61, %v18098_v9  ;;  %v8724_v48 = vcombine.low %v8716_v45, %v8723_v11  ;;  %v18007_v61 = vmov 1983009808  }
 0x252   : > { %17412 = vmatprep.subr.bf16.mxu1 %v23233_v52  ;;  %16260 = vperm.xlu0 %17967, %v16257_v13   ;;  %v16617_v2 = vcombine.high %v23401_v23, %v23400_v42  ;;  %v6605_v18 = vrot.slane %v6577_v58, %v18098_v9  ;;  %v23404_v12 = vcombine.low %v23402_v50, %v23403_v46 }
 0x253   : > { %v7691_v56 = vrot.slane %v23399_v40, %v18098_v9  ;;  %17455 = vmatmul.mubr.msk.bf16.vlgmr.msra.gmra.mxu0 %vm8928_vm1, %v19863_v38  ;;  %15943 = vperm.xlu1 %17968, %v15933_v25   ;;  %v6591_v24 = vrot.slane %v6575_v60, %v18098_v9  ;;  %v7660_v4 = vcombine.low %v23405_v17, %v7645_v51  ;;  %v23416_v25 = vld [vmem:[#allocation2_spill] sm:$0xff]  ;;  %v9815_v40 = vunpack.c.l.s4 %v18007_v61 }
 0x254   : > { %v6495_v29 = vrot.slane %v23404_v12, %v18098_v9  ;;  %v7661_v55 = vcombine.low %v7652_v1, %v7659_v26  ;;  %v23407_v22 = vrot.slane %v23406_v44, %v18098_v9  ;;  %v23409_v53 = vrot.slane %v23408_v21, %v18098_v9  ;;  %v23414_v1 = vld [vmem:[#allocation5_spill] sm:$0xff] }
 0x255   : > { %v6598_v36 = vrot.slane %v16618_v3, %v18098_v9  ;;  %17413 = vmatpush3.bf16.msra.mxu1 %v8899_v27  ;;  %v9464_v37 = vand.u32 %v19807_v30, %v8904_v32  ;;  %v23412_v6 = vcombine.low %v23410_v59, %v23411_v20  ;;  %v8747_v15 = vrot.slane %v8740_v16, %v18098_v9 }
 0x256   : > { %v7548_v47 = vcombine.low %v23409_v53, %v23407_v22  ;;  %v6510_v49 = vrot.slane %v6503_v63, %v18098_v9  ;;  %v3510_v62 = vcombine.high %v23393_v5, %v23393_v5  ;;  %17426 = vmatprep.subr.bf16.mxu1 %v23233_v52  ;;  %v8875_v41 = vsel %vm2503_vm0, %v7691_v56, %v8724_v48 }
 0x257   : > { %v6488_v33 = vrot.slane %v23412_v6, %v18098_v9  ;;  %v6584_v31 = vrot.slane %v16617_v2, %v18098_v9  ;;  %v6607_v45 = vcombine.low %v6598_v36, %v6605_v18  ;;  %16203 = vperm.xlu1 %17968, %v16193_v10   ;;  %v7668_v28 = vrot.slane %v7660_v4, %v18098_v9 }
 0x258   : > { %17415 = vmatmul.mubr.msk.bf16.vlgmr.msra.gmra.mxu1 %vm8928_vm1, %v19863_v38  ;;  %v8857_v34 = vsel %vm8844_vm14, %v6510_v49, %v7548_v47  ;;  %v7675_v7 = vrot.slane %v7661_v55, %v18098_v9  ;;  %v8908_v57 = vpack.c.bf16 %v8747_v15, %v8875_v41  ;;  %v6629_v60 = vrot.slane %v3510_v62, %v18098_v9 }
 0x259   : > { %v6496_v11 = vcombine.low %v6488_v33, %v6495_v29  ;;  %v6606_v0 = vcombine.low %v6584_v31, %v6591_v24  ;;  %17427 = vmatpush3.bf16.msra.mxu1 %v9464_v37  ;;  %17430 = vmatprep.mubr.msk.bf16.mxu1 %vm18005_vm15, %v23233_v52  ;;  %v6621_v5 = vrot.slane %v6607_v45, %v18098_v9  ;;  %v23415_v26 = vmov 1.0  }
 0x25a   : > { %17428 = vmatprep.subr.bf16.mxu1 %v23233_v52  ;;  %v7676_v58 = vcombine.low %v7668_v28, %v7675_v7  ;;  %v9552_v14 = vand.u32 %v19807_v30, %v8908_v57  ;;  %v6636_v13 = vrot.slane %v6629_v60, %v18098_v9  ;;  %v9816_v23 = vunpack.c.0.s8 %v9815_v40 }
 0x25b   : > { %v8903_v54 = vpack.c.bf16 %v8857_v34, %v6496_v11  ;;  %v6614_v27 = vrot.slane %v6606_v0, %v18098_v9  ;;  %v23413_v9 = vld [vmem:[#allocation3_spill] sm:$0xff] }
 0x25c   : > { %v8859_v51 = vsel %vm8844_vm14, %v6636_v13, %v7676_v58  ;;  %v10005_v30 = vmul.u32 2, %v23413_v9  ;;  %v20609_v29 = vsub.s32 %v9816_v23, %v23416_v25 }
 0x25d   : > { %17429 = vmatpush3.bf16.msra.mxu1 %v8903_v54  ;;  %v6622_v19 = vcombine.low %v6614_v27, %v6621_v5 }
 0x25e   : > { %17442 = vmatprep.subr.bf16.mxu1 %v23233_v52  ;;  %vm10007_vm2 = vcmp.eq.s32.totalorder %v23414_v1, %v10005_v30  ;;  %v10315_v43 = vadd.s32 1, %v10005_v30  ;;  %vm10006_vm5 = vcmp.eq.s32.totalorder %v23416_v25, %v10005_v30 }
 0x25f   : > { %v8907_v39 = vpack.c.bf16 %v8859_v51, %v6622_v19 }
 0x260   : > { %17431 = vmatmul.mubr.msk.bf16.vlgmr.msra.gmra.mxu1 %vm8928_vm1, %v19863_v38  ;;  %vm10317_vm3 = vcmp.eq.s32.totalorder %v23414_v1, %v10315_v43  ;;  %vm10316_vm6 = vcmp.eq.s32.totalorder %v23416_v25, %v10315_v43 }
 0x261   : > { %17443 = vmatpush3.bf16.msra.mxu1 %v9552_v14  ;;  %17446 = vmatprep.mubr.msk.bf16.mxu1 %vm18005_vm15, %v23233_v52 }
 0x262   : > { %17444 = vmatprep.subr.bf16.mxu1 %v23233_v52  ;;  %17477 = vmatprep.subr.msk.mxu0 %vm10317_vm3, %v23415_v26 }
 0x263   : > { %17478 = vmatpush3.msk.msra.mxu0 %vm10317_vm3, %v23415_v26  ;;  %vm9751_vm3 = vcmask 123904  }
 0x264   : > { %17479 = vmatprep.subr.msk.mxu0 %vm10316_vm6, %v23415_v26 }
 0x265   : > { %17445 = vmatpush3.bf16.msra.mxu1 %v8907_v39  ;;  %17480 = vmatpush3.msk.msra.mxu0 %vm10316_vm6, %v23415_v26 }
 0x266   : > { %17458 = vmatprep.subr.msk.mxu1 %vm10007_vm2, %v23415_v26  ;;  %17567 = vmatprep.subr.mxu0 %v23233_v52 }
 0x268   : > { %17447 = vmatmul.mubr.msk.bf16.vlgmr.msra.gmra.mxu1 %vm8928_vm1, %v19863_v38 }
 0x269   : > { %17459 = vmatpush3.msk.msra.mxu1 %vm10007_vm2, %v23415_v26 }
 0x26a   : > { %17460 = vmatprep.subr.msk.mxu1 %vm10006_vm5, %v23415_v26 }
 0x26b   : > { %17461 = vmatpush3.msk.msra.mxu1 %vm10006_vm5, %v23415_v26 }
 0x26c   : > { %17496 = vmatprep.subr.mxu1 %v23233_v52 }
 0x283   : > { %v20600_v35 = vpop.permute.xlu0 %8915 }
 0x287   : > { %v20603_v56 = vpop.permute.xlu0 %9675 }
 0x28a   : > { %v20619_v28 = vpop.permute.xlu1 %8920 }
 0x29a   : > { %v20623_v5 = vpop.permute.xlu1 %9680 }
 0x2b4   : > { %v8972_v38 = vpop.f32.mrf.mxu1 }
 0x2b5   : > { %v8973_v63 = vadd.f32 %v8972_v38, %v20600_v35 }
 0x2b6   : > { %v17336_v3 = vpop.f32.mrf.mxu1 }
 0x2b7   : > { %v9683_v48 = vmul.f32 %v20603_v56, %v8973_v63  ;;  %vm9639_vm9 = vcmp.gt.f32.partialorder %v8973_v63, 0.0 }
 0x2b8   : > { %v8975_v32 = vpop.f32.mrf.mxu1 }
 0x2b9   : > { %v9715_v50 = vsel %vm9639_vm9, %v8973_v63, %v9683_v48  ;;  %v8976_v60 = vadd.f32 %v8975_v32, %v20619_v28 }
 0x2ba   : > { %v17337_v16 = vpop.f32.mrf.mxu1  ;;  %v9748_v17 = vsel %vm9747_vm10, %v9715_v50, -inf }
 0x2bb   : > { %v9684_v13 = vmul.f32 %v20623_v5, %v8976_v60  ;;  %vm9640_vm1 = vcmp.gt.f32.partialorder %v8976_v60, 0.0 }
 0x2bd   : > { %v9716_v1 = vsel %vm9640_vm1, %v8976_v60, %v9684_v13 }
 0x2be   : > { %v9752_v61 = vsel %vm9751_vm3, %v9716_v1, -inf }
 0x2c5   : > { %v9016_v42 = vpop.f32.mrf.mxu1 }
 0x2c6   : > { %v9017_v2 = vadd.f32 %v9016_v42, %v20600_v35 }
 0x2c7   : > { %v17344_v18 = vpop.f32.mrf.mxu1 }
 0x2c8   : > { %vm9641_vm11 = vcmp.gt.f32.partialorder %v9017_v2, 0.0  ;;  %v9685_v46 = vmul.f32 %v20603_v56, %v9017_v2 }
 0x2c9   : > { %v9019_v12 = vpop.f32.mrf.mxu1 }
 0x2ca   : > { %v9717_v24 = vsel %vm9641_vm11, %v9017_v2, %v9685_v46  ;;  %v9020_v0 = vadd.f32 %v9019_v12, %v20619_v28 }
 0x2cb   : > { %v9749_v4 = vsel %vm9747_vm10, %v9717_v24, -inf  ;;  %v17345_v44 = vpop.f32.mrf.mxu1 }
 0x2cc   : > { %v9750_v22 = vmax.f32 %v9748_v17, %v9749_v4  ;;  %v9686_v58 = vmul.f32 %v20623_v5, %v9020_v0  ;;  %vm9642_vm14 = vcmp.gt.f32.partialorder %v9020_v0, 0.0 }
 0x2cd   : > { %v9192_v55 = vpop.f32.mrf.mxu0 }
 0x2ce   : > { %v9813_v53 = vcombine.high %v9750_v22, %v9750_v22  ;;  %v9820_v47 = vrot.slane %v9750_v22, %v20609_v29  ;;  %v9193_v27 = vadd.f32 %v9192_v55, %v20600_v35  ;;  %v9718_v19 = vsel %vm9642_vm14, %v9020_v0, %v9686_v58 }
 0x2cf   : > { %v17376_v21 = vpop.f32.mrf.mxu0  ;;  %v9753_v38 = vsel %vm9751_vm3, %v9718_v19, -inf }
 0x2d0   : > { %v9827_v36 = vrot.slane %v9813_v53, %v20609_v29  ;;  %v9828_v37 = vcombine.high %v9820_v47, %v9820_v47  ;;  %v9693_v30 = vmul.f32 %v20603_v56, %v9193_v27  ;;  %vm9649_vm5 = vcmp.gt.f32.partialorder %v9193_v27, 0.0 }
 0x2d1   : > { %v9195_v10 = vpop.f32.mrf.mxu0  ;;  %v9754_v42 = vmax.f32 %v9752_v61, %v9753_v38 }
 0x2d2   : > { %v9829_v20 = vcombine.high %v9827_v36, %v9827_v36  ;;  %v10010_v6 = vcombine.low %v9820_v47, %v9828_v37  ;;  %v9725_v48 = vsel %vm9649_vm5, %v9193_v27, %v9693_v30  ;;  %v9196_v50 = vadd.f32 %v9195_v10, %v20619_v28 }
 0x2d3   : > { %v17377_v59 = vpop.f32.mrf.mxu0  ;;  %v9762_v37 = vsel %vm9747_vm10, %v9725_v48, -inf }
 0x2d4   : > { %v10011_v33 = vcombine.low %v9827_v36, %v9829_v20  ;;  %v10018_v15 = vrot.slane %v10010_v6, %v20609_v29  ;;  %v9836_v59 = vrot.slane %v9754_v42, %v20609_v29  ;;  %vm9650_vm14 = vcmp.gt.f32.partialorder %v9196_v50, 0.0 }
 0x2d6   : > { %v10025_v49 = vrot.slane %v10011_v33, %v20609_v29 }
 0x2d8   : > { %v10026_v41 = vcombine.low %v10018_v15, %v10025_v49  ;;  %v9694_v15 = vmul.f32 %v20623_v5, %v9196_v50 }
 0x2da   : > { %17462 = vmatprep.mubr.msk.f32.mxu1 %vm9747_vm10, %v10026_v41  ;;  %17481 = vmatprep.mubr.msk.f32.mxu0 %vm9747_vm10, %v10026_v41  ;;  %v9726_v30 = vsel %vm9650_vm14, %v9196_v50, %v9694_v15 }
 0x2db   : > { %v9060_v62 = vpop.f32.mrf.mxu1 }
 0x2dc   : > { %v9061_v14 = vadd.f32 %v9060_v62, %v20600_v35 }
 0x2dd   : > { %v17352_v31 = vpop.f32.mrf.mxu1 }
 0x2de   : > { %v9687_v51 = vmul.f32 %v20603_v56, %v9061_v14  ;;  %vm9643_vm2 = vcmp.gt.f32.partialorder %v9061_v14, 0.0 }
 0x2df   : > { %v9063_v45 = vpop.f32.mrf.mxu1 }
 0x2e0   : > { %v9280_v11 = vpop.f32.mrf.mxu0  ;;  %v9064_v3 = vadd.f32 %v9063_v45, %v20619_v28  ;;  %v9719_v16 = vsel %vm9643_vm2, %v9061_v14, %v9687_v51 }
 0x2e1   : > { %v17353_v34 = vpop.f32.mrf.mxu1  ;;  %v9755_v46 = vsel %vm9747_vm10, %v9719_v16, -inf  ;;  %v9281_v22 = vadd.f32 %v9280_v11, %v20600_v35 }
 0x2e2   : > { %v17392_v7 = vpop.f32.mrf.mxu0  ;;  %v9688_v12 = vmul.f32 %v20623_v5, %v9064_v3  ;;  %vm9644_vm9 = vcmp.gt.f32.partialorder %v9064_v3, 0.0 }
 0x2e3   : > { %v9697_v31 = vmul.f32 %v20603_v56, %v9281_v22  ;;  %vm9653_vm1 = vcmp.gt.f32.partialorder %v9281_v22, 0.0 }
 0x2e4   : > { %v9283_v57 = vpop.f32.mrf.mxu0  ;;  %v9720_v20 = vsel %vm9644_vm9, %v9064_v3, %v9688_v12 }
 0x2e5   : > { %v9284_v21 = vadd.f32 %v9283_v57, %v20619_v28  ;;  %v9758_v0 = vsel %vm9751_vm3, %v9720_v20, -inf  ;;  %v9729_v1 = vsel %vm9653_vm1, %v9281_v22, %v9697_v31 }
 0x2e6   : > { %v17393_v54 = vpop.f32.mrf.mxu0 }
 0x2e7   : > { %v9698_v57 = vmul.f32 %v20623_v5, %v9284_v21  ;;  %vm9654_vm2 = vcmp.gt.f32.partialorder %v9284_v21, 0.0 }
 0x2ef   : > { %v9104_v39 = vpop.f32.mrf.mxu1 }
 0x2f0   : > { %v9105_v43 = vadd.f32 %v9104_v39, %v20600_v35 }
 0x2f1   : > { %v17360_v32 = vpop.f32.mrf.mxu1 }
 0x2f2   : > { %vm9645_vm6 = vcmp.gt.f32.partialorder %v9105_v43, 0.0  ;;  %v9689_v63 = vmul.f32 %v20603_v56, %v9105_v43  ;;  %v9730_v32 = vsel %vm9654_vm2, %v9284_v21, %v9698_v57  ;;  %v9768_v21 = vsel %vm9747_vm10, %v9729_v1, -inf }
 0x2f3   : > { %v9107_v40 = vpop.f32.mrf.mxu1 }
 0x2f4   : > { %v9721_v23 = vsel %vm9645_vm6, %v9105_v43, %v9689_v63  ;;  %v9108_v18 = vadd.f32 %v9107_v40, %v20619_v28 }
 0x2f5   : > { %v9368_v2 = vpop.f32.mrf.mxu0  ;;  %v9756_v24 = vsel %vm9747_vm10, %v9721_v23, -inf  ;;  %v17361_v17 = vpop.f32.mrf.mxu1 }
 0x2f6   : > { %v9757_v4 = vmax.f32 %v9755_v46, %v9756_v24  ;;  %vm9646_vm11 = vcmp.gt.f32.partialorder %v9108_v18, 0.0  ;;  %v9690_v55 = vmul.f32 %v20623_v5, %v9108_v18  ;;  %v9369_v6 = vadd.f32 %v9368_v2, %v20600_v35 }
 0x2f7   : > { %v17408_v44 = vpop.f32.mrf.mxu0  ;;  %v9765_v17 = vsel %vm9751_vm3, %v9726_v30, -inf }
 0x2f8   : > { %v9837_v53 = vcombine.high %v9757_v4, %v9757_v4  ;;  %v9844_v47 = vrot.slane %v9757_v4, %v20609_v29  ;;  %v9722_v10 = vsel %vm9646_vm11, %v9108_v18, %v9690_v55  ;;  %v9701_v58 = vmul.f32 %v20603_v56, %v9369_v6 }
 0x2f9   : > { %v9371_v36 = vpop.f32.mrf.mxu0  ;;  %v9759_v11 = vsel %vm9751_vm3, %v9722_v10, -inf  ;;  %vm9657_vm6 = vcmp.gt.f32.partialorder %v9369_v6, 0.0 }
 0x2fa   : > { %v20650_v49 = vrot.slane %v9837_v53, %v20609_v29  ;;  %v9852_v62 = vcombine.high %v9844_v47, %v9844_v47  ;;  %v10027_v45 = vcombine.low %v9836_v59, %v9844_v47  ;;  %v9760_v13 = vmax.f32 %v9758_v0, %v9759_v11 }
 0x2fb   : > { %v17409_v41 = vpop.f32.mrf.mxu0  ;;  %v9372_v16 = vadd.f32 %v9371_v36, %v20619_v28  ;;  %v9733_v40 = vsel %vm9657_vm6, %v9369_v6, %v9701_v58  ;;  %v9771_v53 = vsel %vm9751_vm3, %v9730_v32, -inf }
 0x2fc   : > { %v9148_v33 = vpop.f32.mrf.mxu1  ;;  %v10028_v60 = vcombine.low %v9852_v62, %v20650_v49  ;;  %v10035_v43 = vrot.slane %v10027_v45, %v20609_v29  ;;  %v9853_v18 = vcombine.high %v20650_v49, %v20650_v49  ;;  %v9860_v50 = vrot.slane %v9760_v13, %v20609_v29 }
 0x2fd   : > { %v9149_v34 = vadd.f32 %v9148_v33, %v20600_v35  ;;  %vm9658_vm11 = vcmp.gt.f32.partialorder %v9372_v16, 0.0  ;;  %v9702_v47 = vmul.f32 %v20623_v5, %v9372_v16  ;;  %v9774_v33 = vsel %vm9747_vm10, %v9733_v40, -inf }
 0x2fe   : > { %v17368_v7 = vpop.f32.mrf.mxu1  ;;  %v10042_v39 = vrot.slane %v10028_v60, %v20609_v29  ;;  %v10044_v31 = vcombine.low %v9853_v18, %v9860_v50 }
 0x2ff   : > { %v9456_v54 = vpop.f32.mrf.mxu0  ;;  %vm9647_vm5 = vcmp.gt.f32.partialorder %v9149_v34, 0.0  ;;  %v9691_v14 = vmul.f32 %v20603_v56, %v9149_v34  ;;  %v9734_v7 = vsel %vm9658_vm11, %v9372_v16, %v9702_v47 }
 0x300   : > { %v9151_v27 = vpop.f32.mrf.mxu1  ;;  %v10043_v2 = vcombine.low %v10035_v43, %v10042_v39  ;;  %v9457_v46 = vadd.f32 %v9456_v54, %v20600_v35 }
 0x301   : > { %v9152_v19 = vadd.f32 %v9151_v27, %v20619_v28  ;;  %v17424_v51 = vpop.f32.mrf.mxu0  ;;  %v9723_v38 = vsel %vm9647_vm5, %v9149_v34, %v9691_v14 }
 0x302   : > { %v17369_v3 = vpop.f32.mrf.mxu1  ;;  %v9761_v63 = vsel %vm9747_vm10, %v9723_v38, -inf  ;;  %17463 = vmatmul.mubr.msk.f32.vlgmr.msra.gmra.mxu1 %vm9747_vm10, %v10043_v2  ;;  %17482 = vmatmul.mubr.msk.f32.vlgmr.msra.gmra.mxu0 %vm9747_vm10, %v10043_v2  ;;  %v9705_v15 = vmul.f32 %v20603_v56, %v9457_v46  ;;  %vm9661_vm1 = vcmp.gt.f32.partialorder %v9457_v46, 0.0 }
 0x303   : > { %vm9648_vm9 = vcmp.gt.f32.partialorder %v9152_v19, 0.0  ;;  %v9459_v61 = vpop.f32.mrf.mxu0  ;;  %v9763_v48 = vmax.f32 %v9761_v63, %v9762_v37  ;;  %v9692_v42 = vmul.f32 %v20623_v5, %v9152_v19  ;;  %17497 = vmatpush3.msk.msra.mxu1 %vm1578_vm7, %v23415_v26  ;;  %17568 = vmatpush3.msk.msra.mxu0 %vm3563_vm8, %v23415_v26  ;;  %v10052_v3 = vrot.slane %v10044_v31, %v20609_v29 }
 0x304   : > { %v9236_v23 = vpop.f32.mrf.mxu1  ;;  %v9460_v44 = vadd.f32 %v9459_v61, %v20619_v28  ;;  %17638 = vmatprep.subr.mxu1 %v23233_v52  ;;  %17709 = vmatprep.subr.bf16.mxu0 %v23233_v52  ;;  %v9737_v13 = vsel %vm9661_vm1, %v9457_v46, %v9705_v15 }
 0x305   : > { %v9237_v12 = vadd.f32 %v9236_v23, %v20600_v35  ;;  %v17425_v24 = vpop.f32.mrf.mxu0  ;;  %v9868_v4 = vrot.slane %v9763_v48, %v20609_v29  ;;  %v9724_v55 = vsel %vm9648_vm9, %v9152_v19, %v9692_v42  ;;  %v9861_v37 = vcombine.high %v9763_v48, %v9763_v48 }
 0x306   : > { %v17384_v22 = vpop.f32.mrf.mxu1  ;;  %v9764_v49 = vsel %vm9751_vm3, %v9724_v55, -inf  ;;  %v9706_v11 = vmul.f32 %v20623_v5, %v9460_v44  ;;  %vm9662_vm2 = vcmp.gt.f32.partialorder %v9460_v44, 0.0 }
 0x307   : > { %v9876_v59 = vcombine.high %v9868_v4, %v9868_v4  ;;  %vm9651_vm14 = vcmp.gt.f32.partialorder %v9237_v12, 0.0  ;;  %v9695_v20 = vmul.f32 %v20603_v56, %v9237_v12  ;;  %v9875_v60 = vrot.slane %v9861_v37, %v20609_v29 }
 0x308   : > { %v9544_v10 = vpop.f32.mrf.mxu0  ;;  %v9239_v6 = vpop.f32.mrf.mxu1  ;;  %v9766_v54 = vmax.f32 %v9764_v49, %v9765_v17  ;;  %v9738_v1 = vsel %vm9662_vm2, %v9460_v44, %v9706_v11 }
 0x309   : > { %v9240_v62 = vadd.f32 %v9239_v6, %v20619_v28  ;;  %v10045_v45 = vcombine.low %v9868_v4, %v9876_v59  ;;  %v9727_v0 = vsel %vm9651_vm14, %v9237_v12, %v9695_v20  ;;  %v9545_v51 = vadd.f32 %v9544_v10, %v20600_v35 }
 0x30a   : > { %v17440_v41 = vpop.f32.mrf.mxu0  ;;  %v17385_v34 = vpop.f32.mrf.mxu1  ;;  %v9767_v58 = vsel %vm9747_vm10, %v9727_v0, -inf  ;;  %v9877_v48 = vcombine.high %v9875_v60, %v9875_v60  ;;  %v9884_v42 = vrot.slane %v9766_v54, %v20609_v29  ;;  %v9777_v59 = vsel %vm9751_vm3, %v9734_v7, -inf }
 0x30b   : > { %vm9652_vm5 = vcmp.gt.f32.partialorder %v9240_v62, 0.0  ;;  %v9696_v14 = vmul.f32 %v20623_v5, %v9240_v62  ;;  %v9769_v19 = vmax.f32 %v9767_v58, %v9768_v21  ;;  %v10059_v32 = vrot.slane %v10045_v45, %v20609_v29 }
 0x30c   : > { %v9547_v57 = vpop.f32.mrf.mxu0  ;;  %vm9665_vm9 = vcmp.gt.f32.partialorder %v9545_v51, 0.0  ;;  %v9709_v46 = vmul.f32 %v20603_v56, %v9545_v51  ;;  %v9780_v20 = vsel %vm9747_vm10, %v9737_v13, -inf  ;;  %v10061_v49 = vcombine.low %v9875_v60, %v9877_v48 }
 0x30d   : > { %v9728_v43 = vsel %vm9652_vm5, %v9240_v62, %v9696_v14  ;;  %v9885_v16 = vcombine.high %v9769_v19, %v9769_v19  ;;  %v9892_v63 = vrot.slane %v9769_v19, %v20609_v29  ;;  %v9548_v12 = vadd.f32 %v9547_v57, %v20619_v28 }
 0x30e   : > { %v17441_v30 = vpop.f32.mrf.mxu0  ;;  %v9770_v61 = vsel %vm9751_vm3, %v9728_v43, -inf  ;;  %v10060_v47 = vcombine.low %v10052_v3, %v10059_v32  ;;  %v20721_v62 = vsel %vm9751_vm3, %v9738_v1, -inf  ;;  %v20724_v41 = vsel %vm9665_vm9, %v9545_v51, %v9709_v46 }
 0x30f   : > { %v9772_v23 = vmax.f32 %v9770_v61, %v9771_v53  ;;  %v9899_v50 = vrot.slane %v9885_v16, %v20609_v29  ;;  %v9900_v17 = vcombine.high %v9892_v63, %v9892_v63  ;;  %v10062_v4 = vcombine.low %v9884_v42, %v9892_v63 }
 0x310   : > { %v9324_v27 = vpop.f32.mrf.mxu1  ;;  %17465 = vmatprep.mubr.msk.f32.mxu1 %vm9747_vm10, %v10060_v47  ;;  %17484 = vmatprep.mubr.msk.f32.mxu0 %vm9747_vm10, %v10060_v47  ;;  %vm9666_vm14 = vcmp.gt.f32.partialorder %v9548_v12, 0.0  ;;  %v10069_v13 = vrot.slane %v10061_v49, %v20609_v29  ;;  %v9710_v51 = vmul.f32 %v20623_v5, %v9548_v12 }
 0x311   : > { %v9325_v39 = vadd.f32 %v9324_v27, %v20600_v35  ;;  %v9908_v55 = vrot.slane %v9772_v23, %v20609_v29  ;;  %v9901_v21 = vcombine.high %v9899_v50, %v9899_v50  ;;  %v10076_v60 = vrot.slane %v10062_v4, %v20609_v29 }
 0x312   : > { %v17400_v38 = vpop.f32.mrf.mxu1  ;;  %v10078_v54 = vcombine.low %v9900_v17, %v9899_v50  ;;  %v9742_v50 = vsel %vm9666_vm14, %v9548_v12, %v9710_v51 }
 0x313   : > { %vm9655_vm6 = vcmp.gt.f32.partialorder %v9325_v39, 0.0  ;;  %v9632_v40 = vpop.f32.mrf.mxu0  ;;  %v9699_v2 = vmul.f32 %v20603_v56, %v9325_v39  ;;  %v10079_v11 = vcombine.low %v9901_v21, %v9908_v55  ;;  %v10077_v38 = vcombine.low %v10069_v13, %v10076_v60 }
 0x314   : > { %v9327_v18 = vpop.f32.mrf.mxu1  ;;  %v9633_v16 = vadd.f32 %v9632_v40, %v20600_v35  ;;  %v10086_v61 = vrot.slane %v10078_v54, %v20609_v29 }
 0x315   : > { %v17456_v24 = vpop.f32.mrf.mxu0  ;;  %v9731_v44 = vsel %vm9655_vm6, %v9325_v39, %v9699_v2  ;;  %v9328_v10 = vadd.f32 %v9327_v18, %v20619_v28  ;;  %v10093_v48 = vrot.slane %v10079_v11, %v20609_v29  ;;  %17466 = vmatmul.mubr.msk.f32.gmra.mxu1 %vm9747_vm10, %v10077_v38  ;;  %17485 = vmatmul.mubr.msk.f32.gmra.mxu0 %vm9747_vm10, %v10077_v38  ;;  %v9786_v11 = vsel %vm9747_vm10, %v20724_v41, -inf }
 0x316   : > { %v17401_v22 = vpop.f32.mrf.mxu1  ;;  %v9773_v53 = vsel %vm9747_vm10, %v9731_v44, -inf  ;;  %v9713_v12 = vmul.f32 %v20603_v56, %v9633_v16  ;;  %vm9669_vm6 = vcmp.gt.f32.partialorder %v9633_v16, 0.0 }
 0x317   : > { %v20716_v37 = vpop.f32.mrf.mxu0  ;;  %v9775_v6 = vmax.f32 %v9773_v53, %v9774_v33  ;;  %vm9656_vm11 = vcmp.gt.f32.partialorder %v9328_v10, 0.0  ;;  %v9700_v31 = vmul.f32 %v20623_v5, %v9328_v10  ;;  %v10094_v40 = vcombine.low %v10086_v61, %v10093_v48 }
 0x318   : > { %v9412_v15 = vpop.f32.mrf.mxu1 }
 0x319   : > { %v17457_v45 = vpop.f32.mrf.mxu0  ;;  %v9909_v34 = vcombine.high %v9775_v6, %v9775_v6  ;;  %v9916_v33 = vrot.slane %v9775_v6, %v20609_v29  ;;  %v9732_v0 = vsel %vm9656_vm11, %v9328_v10, %v9700_v31  ;;  %v9413_v57 = vadd.f32 %v9412_v15, %v20600_v35  ;;  %17468 = vmatprep.mubr.msk.f32.mxu1 %vm9747_vm10, %v10094_v40 }
 0x31a   : > { %v17416_v7 = vpop.f32.mrf.mxu1  ;;  %v9776_v27 = vsel %vm9751_vm3, %v9732_v0, -inf  ;;  %17487 = vmatprep.mubr.msk.f32.mxu0 %vm9747_vm10, %v10094_v40 }
 0x31b   : > { %v9923_v58 = vrot.slane %v9909_v34, %v20609_v29  ;;  %v9924_v14 = vcombine.high %v9916_v33, %v9916_v33  ;;  %v9778_v39 = vmax.f32 %v9776_v27, %v9777_v59  ;;  %vm9659_vm1 = vcmp.gt.f32.partialorder %v9413_v57, 0.0 }
 0x31c   : > { %v9415_v19 = vpop.f32.mrf.mxu1  ;;  %v9703_v30 = vmul.f32 %v20603_v56, %v9413_v57  ;;  %v9789_v34 = vsel %vm9751_vm3, %v9742_v50, -inf  ;;  %v9636_v7 = vadd.f32 %v20716_v37, %v20619_v28  ;;  %v9745_v27 = vsel %vm9669_vm6, %v9633_v16, %v9713_v12 }
 0x31d   : > { %v9925_v1 = vcombine.high %v9923_v58, %v9923_v58  ;;  %v10095_v43 = vcombine.low %v9916_v33, %v9924_v14  ;;  %v9416_v3 = vadd.f32 %v9415_v19, %v20619_v28  ;;  %v9932_v17 = vrot.slane %v9778_v39, %v20609_v29 }
 0x31e   : > { %v17417_v32 = vpop.f32.mrf.mxu1  ;;  %v9735_v63 = vsel %vm9659_vm1, %v9413_v57, %v9703_v30  ;;  %vm9670_vm11 = vcmp.gt.f32.partialorder %v9636_v7, 0.0  ;;  %v9714_v38 = vmul.f32 %v20623_v5, %v9636_v7 }
 0x31f   : > { %v9779_v42 = vsel %vm9747_vm10, %v9735_v63, -inf  ;;  %vm9660_vm2 = vcmp.gt.f32.partialorder %v9416_v3, 0.0  ;;  %v9704_v23 = vmul.f32 %v20623_v5, %v9416_v3  ;;  %v10096_v18 = vcombine.low %v9923_v58, %v9925_v1 }
 0x320   : > { %v9500_v2 = vpop.f32.mrf.mxu1  ;;  %v9781_v46 = vmax.f32 %v9779_v42, %v9780_v20  ;;  %v10103_v44 = vrot.slane %v10095_v43, %v20609_v29  ;;  %v9746_v40 = vsel %vm9670_vm11, %v9636_v7, %v9714_v38 }
 0x321   : > { %v9501_v24 = vadd.f32 %v9500_v2, %v20600_v35  ;;  %v9736_v4 = vsel %vm9660_vm2, %v9416_v3, %v9704_v23  ;;  %v10110_v22 = vrot.slane %v10096_v18, %v20609_v29  ;;  %v9792_v2 = vsel %vm9747_vm10, %v9745_v27, -inf }
 0x322   : > { %v17432_v55 = vpop.f32.mrf.mxu1  ;;  %v9933_v21 = vcombine.high %v9781_v46, %v9781_v46  ;;  %v9940_v53 = vrot.slane %v9781_v46, %v20609_v29  ;;  %v9782_v47 = vsel %vm9751_vm3, %v9736_v4, -inf  ;;  %vm11007_vm2 = vcmask 1043456  }
 0x323   : > { %vm9663_vm5 = vcmp.gt.f32.partialorder %v9501_v24, 0.0  ;;  %v9784_v10 = vmax.f32 %v9782_v47, %v20721_v62  ;;  %v9707_v59 = vmul.f32 %v20603_v56, %v9501_v24  ;;  %v10111_v6 = vcombine.low %v10103_v44, %v10110_v22 }
 0x324   : > { %v9503_v20 = vpop.f32.mrf.mxu1  ;;  %v9947_v15 = vrot.slane %v9933_v21, %v20609_v29  ;;  %v9948_v49 = vcombine.high %v9940_v53, %v9940_v53  ;;  %v10112_v31 = vcombine.low %v9932_v17, %v9940_v53  ;;  %v9795_v47 = vsel %vm9751_vm3, %v9746_v40, -inf }
 0x325   : > { %v9504_v45 = vadd.f32 %v9503_v20, %v20619_v28  ;;  %v9739_v33 = vsel %vm9663_vm5, %v9501_v24, %v9707_v59  ;;  %17469 = vmatmul.mubr.msk.f32.gmra.mxu1 %vm9747_vm10, %v10111_v6  ;;  %17488 = vmatmul.mubr.msk.f32.gmra.mxu0 %vm9747_vm10, %v10111_v6  ;;  %v9956_v41 = vrot.slane %v9784_v10, %v20609_v29 }
 0x326   : > { %v17433_v62 = vpop.f32.mrf.mxu1  ;;  %v9785_v0 = vsel %vm9747_vm10, %v9739_v33, -inf  ;;  %v9949_v60 = vcombine.high %v9947_v15, %v9947_v15  ;;  %v10113_v14 = vcombine.low %v9948_v49, %v9947_v15  ;;  %v10120_v51 = vrot.slane %v10112_v31, %v20609_v29 }
 0x327   : > { %vm9664_vm9 = vcmp.gt.f32.partialorder %v9504_v45, 0.0  ;;  %v9708_v57 = vmul.f32 %v20623_v5, %v9504_v45  ;;  %v9787_v54 = vmax.f32 %v9785_v0, %v9786_v11 }
 0x328   : > { %v9588_v58 = vpop.f32.mrf.mxu1  ;;  %v10127_v43 = vrot.slane %v10113_v14, %v20609_v29  ;;  %v10129_v32 = vcombine.low %v9949_v60, %v9956_v41 }
 0x329   : > { %v9740_v13 = vsel %vm9664_vm9, %v9504_v45, %v9708_v57  ;;  %v9589_v19 = vadd.f32 %v9588_v58, %v20600_v35  ;;  %v9957_v39 = vcombine.high %v9787_v54, %v9787_v54  ;;  %v9964_v37 = vrot.slane %v9787_v54, %v20609_v29 }
 0x32a   : > { %v9788_v30 = vsel %vm9751_vm3, %v9740_v13, -inf  ;;  %v17448_v1 = vpop.f32.mrf.mxu1  ;;  %v10128_v63 = vcombine.low %v10120_v51, %v10127_v43  ;;  %v10137_v4 = vrot.slane %v10129_v32, %v20609_v29 }
 0x32b   : > { %vm9667_vm14 = vcmp.gt.f32.partialorder %v9589_v19, 0.0  ;;  %v9711_v3 = vmul.f32 %v20603_v56, %v9589_v19  ;;  %v9971_v16 = vrot.slane %v9957_v39, %v20609_v29  ;;  %v9972_v35 = vcombine.high %v9964_v37, %v9964_v37 }
 0x32c   : > { %v9591_v61 = vpop.f32.mrf.mxu1  ;;  %v9790_v48 = vmax.f32 %v9788_v30, %v9789_v34  ;;  %17471 = vmatprep.mubr.msk.f32.mxu1 %vm9747_vm10, %v10128_v63  ;;  %17490 = vmatprep.mubr.msk.f32.mxu0 %vm9747_vm10, %v10128_v63 }
 0x32d   : > { %v9743_v42 = vsel %vm9667_vm14, %v9589_v19, %v9711_v3  ;;  %v9592_v23 = vadd.f32 %v9591_v61, %v20619_v28  ;;  %v9973_v18 = vcombine.high %v9971_v16, %v9971_v16  ;;  %v10130_v50 = vcombine.low %v9964_v37, %v9972_v35 }
 0x32e   : > { %v9791_v46 = vsel %vm9747_vm10, %v9743_v42, -inf  ;;  %v17449_v56 = vpop.f32.mrf.mxu1  ;;  %v9980_v44 = vrot.slane %v9790_v48, %v20609_v29 }
 0x32f   : > { %v9793_v24 = vmax.f32 %v9791_v46, %v9792_v2  ;;  %vm9668_vm1 = vcmp.gt.f32.partialorder %v9592_v23, 0.0  ;;  %v9712_v17 = vmul.f32 %v20623_v5, %v9592_v23  ;;  %v10144_v28 = vrot.slane %v10130_v50, %v20609_v29 }
 0x330   : > { %v10146_v55 = vcombine.low %v9971_v16, %v9973_v18 }
 0x331   : > { %v9981_v22 = vcombine.high %v9793_v24, %v9793_v24  ;;  %v9988_v21 = vrot.slane %v9793_v24, %v20609_v29  ;;  %v9744_v53 = vsel %vm9668_vm1, %v9592_v23, %v9712_v17  ;;  %v10145_v10 = vcombine.low %v10137_v4, %v10144_v28 }
 0x332   : > { %v9794_v12 = vsel %vm9751_vm3, %v9744_v53, -inf  ;;  %v10154_v15 = vrot.slane %v10146_v55, %v20609_v29  ;;  %vm11810_vm3 = vcmask 64512  }
 0x333   : > { %v9995_v59 = vrot.slane %v9981_v22, %v20609_v29  ;;  %v9996_v20 = vcombine.high %v9988_v21, %v9988_v21  ;;  %v10147_v5 = vcombine.low %v9980_v44, %v9988_v21  ;;  %v9796_v6 = vmax.f32 %v9794_v12, %v9795_v47  ;;  %17472 = vmatmul.mubr.msk.f32.gmra.mxu1 %vm9747_vm10, %v10145_v10 }
 0x334   : > { %17491 = vmatmul.mubr.msk.f32.gmra.mxu0 %vm9747_vm10, %v10145_v10 }
 0x335   : > { %v9997_v49 = vcombine.high %v9995_v59, %v9995_v59  ;;  %v10004_v31 = vrot.slane %v9796_v6, %v20609_v29  ;;  %v10161_v45 = vrot.slane %v10147_v5, %v20609_v29  ;;  %v10163_v11 = vcombine.low %v9996_v20, %v9995_v59 }
 0x337   : > { %v10164_v34 = vcombine.low %v9997_v49, %v10004_v31  ;;  %v10162_v33 = vcombine.low %v10154_v15, %v10161_v45  ;;  %v10171_v62 = vrot.slane %v10163_v11, %v20609_v29 }
 0x339   : > { %17474 = vmatprep.mubr.msk.f32.mxu1 %vm9747_vm10, %v10162_v33  ;;  %17493 = vmatprep.mubr.msk.f32.mxu0 %vm9747_vm10, %v10162_v33  ;;  %v10178_v7 = vrot.slane %v10164_v34, %v20609_v29 }
 0x33b   : > { %v10179_v0 = vcombine.low %v10171_v62, %v10178_v7 }
 0x33d   : > { %17475 = vmatmul.mubr.msk.f32.gmra.mxu1 %vm9747_vm10, %v10179_v0  ;;  %17494 = vmatmul.mubr.msk.f32.gmra.mxu0 %vm9747_vm10, %v10179_v0 }
 0x33e   : > { %17498 = vmatprep.mubr.msk.f32.mxu1 %vm18005_vm15, %v23233_v52  ;;  %17569 = vmatprep.mubr.msk.f32.mxu0 %vm18005_vm15, %v23233_v52 }
 0x3c2   : > { %v17464_v57 = vpop.f32.mrf.mxu1  ;;  %v17483_v60 = vpop.f32.mrf.mxu0 }
 0x3c3   : > { %v10436_v41 = vmax.f32 %v17464_v57, %v17483_v60 }
 0x3c4   : > { %v10266_v54 = vpop.f32.mrf.mxu1  ;;  %v10386_v58 = vpop.f32.mrf.mxu0 }
 0x3c5   : > { %v10472_v14 = vcombine.high %v10436_v41, %v10436_v41  ;;  %v10479_v27 = vrot.slane %v10436_v41, %v20609_v29  ;;  %v10435_v13 = vmax.f32 %v10266_v54, %v10386_v58 }
 0x3c7   : > { %v20808_v19 = vrot.slane %v10472_v14, %v20609_v29  ;;  %v10455_v51 = vcombine.high %v10435_v13, %v10435_v13  ;;  %v10462_v39 = vrot.slane %v10435_v13, %v20609_v29  ;;  %v20811_v37 = vcombine.high %v10479_v27, %v10479_v27 }
 0x3c8   : > { %v10648_v61 = vrot.slane %v10479_v27, %v20609_v29 }
 0x3c9   : > { %v20815_v30 = vcombine.high %v20808_v19, %v20808_v19  ;;  %v10469_v1 = vrot.slane %v10455_v51, %v20609_v29  ;;  %v10470_v43 = vcombine.high %v10462_v39, %v10462_v39  ;;  %v10783_v16 = vrot.slane %v20811_v37, %v20609_v29 }
 0x3cb   : > { %v10776_v38 = vcombine.low %v20808_v19, %v20815_v30  ;;  %v10471_v3 = vcombine.high %v10469_v1, %v10469_v1  ;;  %v10625_v32 = vcombine.low %v10462_v39, %v10470_v43 }
 0x3cd   : > { %v10790_v35 = vrot.slane %v10776_v38, %v20609_v29  ;;  %v10626_v63 = vcombine.low %v10469_v1, %v10471_v3  ;;  %v10633_v42 = vrot.slane %v10625_v32, %v20609_v29 }
 0x3cf   : > { %v10791_v48 = vcombine.low %v10783_v16, %v10790_v35  ;;  %v10640_v23 = vrot.slane %v10626_v63, %v20609_v29 }
 0x3d1   : > { %v11001_v2 = vsel %vm2503_vm0, %v10648_v61, %v10791_v48  ;;  %v10641_v18 = vcombine.low %v10633_v42, %v10640_v23  ;;  %v16703_v50 = vcombine.low %v10640_v23, %v10640_v23  ;;  %v10649_v61 = vcombine.low %v20811_v37, %v20808_v19 }
 0x3d2   : > { %v11043_v46 = vcombine.high %v11001_v2, %v11001_v2  ;;  %v11050_v56 = vrot.slane %v11001_v2, %v20609_v29 }
 0x3d3   : > { %v11033_v40 = vrot.slane %v10641_v18, %v20609_v29  ;;  %v11040_v24 = vrot.slane %v16703_v50, %v20609_v29 }
 0x3d4   : > { %v11057_v17 = vrot.slane %v11043_v46, %v20609_v29  ;;  %v11058_v4 = vcombine.high %v11050_v56, %v11050_v56 }
 0x3d5   : > { %v11041_v28 = vcombine.high %v11033_v40, %v11033_v40  ;;  %v11042_v55 = vcombine.high %v11040_v24, %v11040_v24  ;;  %v17467_v53 = vpop.f32.mrf.mxu1  ;;  %v17486_v47 = vpop.f32.mrf.mxu0 }
 0x3d6   : > { %v11059_v44 = vcombine.high %v11057_v17, %v11057_v17  ;;  %v10438_v20 = vmax.f32 %v17467_v53, %v17486_v47  ;;  %v11445_v5 = vcombine.low %v11050_v56, %v11058_v4 }
 0x3d7   : > { %v11428_v22 = vcombine.low %v11033_v40, %v11041_v28  ;;  %v11429_v21 = vcombine.low %v11040_v24, %v11042_v55  ;;  %v10276_v6 = vpop.f32.mrf.mxu1  ;;  %v10396_v15 = vpop.f32.mrf.mxu0  ;;  %v10657_v40 = vrot.slane %v10649_v61, %v20609_v29 }
 0x3d8   : > { %v11446_v12 = vcombine.low %v11057_v17, %v11059_v44  ;;  %v10437_v31 = vmax.f32 %v10276_v6, %v10396_v15  ;;  %v20837_v11 = vrot.slane %v10438_v20, %v20609_v29  ;;  %v11453_v62 = vrot.slane %v11445_v5, %v20609_v29 }
 0x3d9   : > { %v11436_v10 = vrot.slane %v11428_v22, %v20609_v29  ;;  %v11443_v59 = vrot.slane %v11429_v21, %v20609_v29  ;;  %v10506_v58 = vcombine.high %v10438_v20, %v10438_v20 }
 0x3da   : > { %v11460_v45 = vrot.slane %v11446_v12, %v20609_v29  ;;  %v10489_v34 = vcombine.high %v10437_v31, %v10437_v31  ;;  %v10496_v33 = vrot.slane %v10437_v31, %v20609_v29  ;;  %v10521_v57 = vcombine.high %v20837_v11, %v20837_v11 }
 0x3db   : > { %v20833_v49 = vcombine.low %v11436_v10, %v11443_v59  ;;  %v10520_v51 = vrot.slane %v10506_v58, %v20609_v29 }
 0x3dc   : > { %v20848_v7 = vrot.slane %v10489_v34, %v20609_v29  ;;  %v20852_v0 = vcombine.low %v11453_v62, %v11460_v45  ;;  %v20856_v60 = vcombine.high %v10496_v33, %v10496_v33  ;;  %v10674_v13 = vcombine.low %v20837_v11, %v10521_v57 }
 0x3dd   : > { %17499 = vmatmul.mubr.msk.f32.vlgmr.msra.gmra.mxu1 %vm11810_vm3, %v20833_v49  ;;  %17570 = vmatmul.mubr.msk.f32.vlgmr.msra.gmra.mxu0 %vm11810_vm3, %v20833_v49  ;;  %v20888_v16 = vrot.slane %v10520_v51, %v20609_v29  ;;  %v10650_v35 = vcombine.low %v20815_v30, %v10496_v33  ;;  %v10817_v21 = vcombine.low %v10521_v57, %v10520_v51 }
 0x3de   : > { %17501 = vmatprep.mubr.msk.f32.mxu1 %vm18005_vm15, %v23233_v52  ;;  %17572 = vmatprep.mubr.msk.f32.mxu0 %vm18005_vm15, %v23233_v52  ;;  %v10505_v54 = vcombine.high %v20848_v7, %v20848_v7  ;;  %v10792_v27 = vcombine.low %v10496_v33, %v20856_v60  ;;  %v20884_v3 = vrot.slane %v10674_v13, %v20609_v29 }
 0x3df   : > { %17639 = vmatpush3.msk.msra.mxu1 %vm4628_vm12, %v23415_v26  ;;  %v20896_v18 = vrot.slane %v10650_v35, %v20609_v29  ;;  %v16704_v53 = vcombine.low %v20888_v16, %v20888_v16  ;;  %v10800_v12 = vcombine.low %v20848_v7, %v20848_v7  ;;  %v20923_v34 = vcombine.high %v10520_v51, %v10520_v51 }
 0x3e0   : > { %v10673_v14 = vcombine.low %v20848_v7, %v10505_v54  ;;  %17773 = vmatprep.subr.bf16.mxu1 %v23233_v52  ;;  %v10799_v39 = vrot.slane %v10792_v27, %v20609_v29  ;;  %v10938_v48 = vcombine.low %v20884_v3, %v20888_v16  ;;  %v10801_v37 = vcombine.low %v10505_v54, %v20837_v11 }
 0x3e1   : > { %17502 = vmatmul.mubr.msk.f32.gmra.mxu1 %vm11810_vm3, %v20852_v0  ;;  %17573 = vmatmul.mubr.msk.f32.gmra.mxu0 %vm11810_vm3, %v20852_v0  ;;  %v10665_v19 = vcombine.low %v10657_v40, %v20896_v18  ;;  %v20921_v11 = vrot.slane %v10817_v21, %v20609_v29  ;;  %v11091_v7 = vrot.slane %v16704_v53, %v20609_v29 }
 0x3e2   : > { %17504 = vmatprep.mubr.msk.f32.mxu1 %vm18005_vm15, %v23233_v52  ;;  %17575 = vmatprep.mubr.msk.f32.mxu0 %vm18005_vm15, %v23233_v52  ;;  %v20876_v26 = vrot.slane %v10673_v14, %v20609_v29  ;;  %v11084_v24 = vrot.slane %v10938_v48, %v20609_v29  ;;  %v10815_v6 = vrot.slane %v10801_v37, %v20609_v29 }
 0x3e3   : > { %v20914_v5 = vrot.slane %v10665_v19, %v20609_v29  ;;  %v16707_v54 = vcombine.low %v20884_v3, %v20884_v3  ;;  %v10672_v58 = vrot.slane %v20856_v60, %v20609_v29  ;;  %v10808_v14 = vrot.slane %v10800_v12, %v20609_v29 }
 0x3e4   : > { %v10937_v1 = vcombine.low %v20876_v26, %v20876_v26  ;;  %v11092_v47 = vcombine.high %v11084_v24, %v11084_v24 }
 0x3e5   : > { %v17470_v43 = vpop.f32.mrf.mxu1  ;;  %v17489_v38 = vpop.f32.mrf.mxu0  ;;  %v11108_v53 = vcombine.high %v20914_v5, %v20914_v5 }
 0x3e6   : > { %v11008_v32 = vsel %vm11007_vm2, %v10799_v39, %v10937_v1  ;;  %v10440_v63 = vmax.f32 %v17470_v43, %v17489_v38  ;;  %v11479_v57 = vcombine.low %v11084_v24, %v11092_v47  ;;  %v11480_v1 = vcombine.low %v11091_v7, %v20914_v5 }
 0x3e7   : > { %v10286_v42 = vpop.f32.mrf.mxu1  ;;  %v10406_v23 = vpop.f32.mrf.mxu0  ;;  %v11060_v2 = vcombine.high %v11008_v32, %v11008_v32  ;;  %v11067_v46 = vrot.slane %v11008_v32, %v20609_v29  ;;  %v10816_v43 = vcombine.low %v10808_v14, %v10815_v6  ;;  %v16705_v38 = vcombine.low %v20896_v18, %v20896_v18 }
 0x3e8   : > { %v10540_v50 = vcombine.high %v10440_v63, %v10440_v63  ;;  %v10439_v56 = vmax.f32 %v10286_v42, %v10406_v23  ;;  %v10547_v28 = vrot.slane %v10440_v63, %v20609_v29  ;;  %v11487_v23 = vrot.slane %v11479_v57, %v20609_v29 }
 0x3e9   : > { %v11074_v30 = vrot.slane %v11060_v2, %v20609_v29  ;;  %v11075_v4 = vcombine.high %v11067_v46, %v11067_v46  ;;  %v10833_v18 = vrot.slane %v20923_v34, %v20609_v29  ;;  %v11107_v21 = vrot.slane %v16705_v38, %v20609_v29 }
 0x3ea   : > { %v10554_v17 = vrot.slane %v10540_v50, %v20609_v29  ;;  %v10523_v55 = vcombine.high %v10439_v56, %v10439_v56  ;;  %v10530_v44 = vrot.slane %v10439_v56, %v20609_v29  ;;  %v10555_v15 = vcombine.high %v10547_v28, %v10547_v28 }
 0x3eb   : > { %v11076_v22 = vcombine.high %v11074_v30, %v11074_v30  ;;  %v11462_v59 = vcombine.low %v11067_v46, %v11075_v4  ;;  %v10850_v27 = vcombine.low %v10547_v28, %v10547_v28  ;;  %v11109_v7 = vcombine.high %v11107_v21, %v11107_v21 }
 0x3ec   : > { %v20911_v10 = vcombine.high %v10554_v17, %v10554_v17  ;;  %v20918_v31 = vrot.slane %v10523_v55, %v20609_v29  ;;  %v10538_v45 = vcombine.high %v10530_v44, %v10530_v44  ;;  %v10721_v32 = vcombine.low %v10547_v28, %v10555_v15 }
 0x3ed   : > { %v11463_v20 = vcombine.low %v11074_v30, %v11076_v22  ;;  %v11470_v39 = vrot.slane %v11462_v59, %v20609_v29  ;;  %v10851_v63 = vcombine.low %v10555_v15, %v10554_v17  ;;  %v20942_v2 = vrot.slane %v10850_v27, %v20609_v29 }
 0x3ee   : > { %v10722_v13 = vcombine.low %v10554_v17, %v20911_v10  ;;  %v10698_v35 = vcombine.low %v10538_v45, %v20918_v31  ;;  %v10539_v50 = vcombine.high %v20918_v31, %v20918_v31  ;;  %v10697_v46 = vcombine.low %v20923_v34, %v10530_v44 }
 0x3ef   : > { %v11477_v51 = vrot.slane %v11463_v20, %v20609_v29  ;;  %v10826_v40 = vcombine.low %v10530_v44, %v10538_v45  ;;  %v11494_v30 = vrot.slane %v11480_v1, %v20609_v29  ;;  %v20958_v24 = vrot.slane %v10721_v32, %v20609_v29 }
 0x3f0   : > { %v20950_v56 = vrot.slane %v10722_v13, %v20609_v29  ;;  %v20961_v19 = vrot.slane %v10698_v35, %v20609_v29  ;;  %v20968_v17 = vrot.slane %v10851_v63, %v20609_v29  ;;  %v11002_v55 = vsel %vm2503_vm0, %v10672_v58, %v10816_v43 }
 0x3f1   : > { %v20938_v42 = vcombine.low %v11470_v39, %v11477_v51  ;;  %v20970_v28 = vcombine.low %v11487_v23, %v11494_v30  ;;  %v10705_v44 = vrot.slane %v10697_v46, %v20609_v29  ;;  %v10840_v12 = vrot.slane %v10826_v40, %v20609_v29 }
 0x3f2   : > { %v10737_v47 = vcombine.low %v20958_v24, %v20950_v56  ;;  %v10842_v59 = vcombine.low %v20918_v31, %v10539_v50  ;;  %v11117_v5 = vrot.slane %v11002_v55, %v20609_v29  ;;  %v10689_v15 = vcombine.low %v20876_v26, %v20884_v3 }
 0x3f3   : > { %v17473_v33 = vpop.f32.mrf.mxu1  ;;  %17505 = vmatmul.mubr.msk.f32.gmra.mxu1 %vm11810_vm3, %v20938_v42  ;;  %17576 = vmatmul.mubr.msk.f32.gmra.mxu0 %vm11810_vm3, %v20938_v42  ;;  %v10713_v20 = vcombine.low %v10705_v44, %v20961_v19  ;;  %v10866_v31 = vcombine.low %v20942_v2, %v20968_v17  ;;  %v11496_v57 = vcombine.low %v11108_v53, %v11107_v21 }
 0x3f4   : > { %v17492_v62 = vpop.f32.mrf.mxu0  ;;  %17507 = vmatprep.mubr.msk.f32.mxu1 %vm18005_vm15, %v23233_v52  ;;  %17578 = vmatprep.mubr.msk.f32.mxu0 %vm18005_vm15, %v23233_v52  ;;  %v10941_v58 = vcombine.low %v20958_v24, %v20958_v24  ;;  %v21007_v14 = vrot.slane %v10737_v47, %v20609_v29  ;;  %v21010_v26 = vrot.slane %v10539_v50, %v20609_v29 }
 0x3f5   : > { %v10442_v60 = vmax.f32 %v17473_v33, %v17492_v62  ;;  %v10296_v61 = vpop.f32.mrf.mxu1  ;;  %v10939_v33 = vcombine.low %v10705_v44, %v10705_v44  ;;  %v10849_v27 = vrot.slane %v10842_v59, %v20609_v29  ;;  %v10841_v13 = vcombine.low %v10833_v18, %v10840_v12 }
 0x3f6   : > { %v10416_v48 = vpop.f32.mrf.mxu0  ;;  %v21014_v39 = vrot.slane %v10713_v20, %v20609_v29  ;;  %v11497_v1 = vcombine.low %v11109_v7, %v11117_v5  ;;  %v11110_v46 = vcombine.high %v11002_v55, %v11002_v55  ;;  %v11125_v18 = vcombine.high %v11117_v5, %v11117_v5 }
 0x3f7   : > { %v10441_v37 = vmax.f32 %v10296_v61, %v10416_v48  ;;  %v10574_v4 = vcombine.high %v10442_v60, %v10442_v60  ;;  %v20975_v22 = vrot.slane %v10442_v60, %v20609_v29  ;;  %17508 = vmatmul.mubr.msk.f32.gmra.mxu1 %vm11810_vm3, %v20970_v28  ;;  %17579 = vmatmul.mubr.msk.f32.gmra.mxu0 %vm11810_vm3, %v20970_v28 }
 0x3f8   : > { %17510 = vmatprep.mubr.msk.f32.mxu1 %vm18005_vm15, %v23233_v52  ;;  %17581 = vmatprep.mubr.msk.f32.mxu0 %vm18005_vm15, %v23233_v52  ;;  %v11504_v60 = vrot.slane %v11496_v57, %v20609_v29  ;;  %v11511_v61 = vrot.slane %v11497_v1, %v20609_v29  ;;  %v11009_v48 = vsel %vm11007_vm2, %v20921_v11, %v10939_v33 }
 0x3f9   : > { %v10557_v6 = vcombine.high %v10441_v37, %v10441_v37  ;;  %v20999_v45 = vrot.slane %v10574_v4, %v20609_v29  ;;  %v10564_v34 = vrot.slane %v10441_v37, %v20609_v29  ;;  %v10589_v62 = vcombine.high %v20975_v22, %v20975_v22 }
 0x3fa   : > { %v21043_v40 = vcombine.low %v11504_v60, %v11511_v61  ;;  %v11134_v30 = vrot.slane %v11009_v48, %v20609_v29  ;;  %v10940_v24 = vcombine.low %v20961_v19, %v21010_v26  ;;  %v11124_v11 = vrot.slane %v11110_v46, %v20609_v29 }
 0x3fb   : > { %v21017_v51 = vrot.slane %v10557_v6, %v20609_v29  ;;  %v21021_v43 = vcombine.high %v20999_v45, %v20999_v45  ;;  %v21023_v38 = vcombine.high %v10564_v34, %v10564_v34  ;;  %v21026_v32 = vrot.slane %v10564_v34, %v20609_v29 }
 0x3fc   : > { %v10867_v35 = vcombine.low %v20911_v10, %v10564_v34  ;;  %v21030_v63 = vrot.slane %v10589_v62, %v20609_v29  ;;  %v10892_v23 = vcombine.low %v20975_v22, %v10589_v62  ;;  %v10900_v50 = vcombine.low %v20999_v45, %v20999_v45  ;;  %17511 = vmatmul.mubr.msk.f32.gmra.mxu1 %vm11810_vm3, %v21043_v40 }
 0x3fd   : > { %v21041_v10 = vcombine.high %v21017_v51, %v21017_v51  ;;  %v11127_v37 = vcombine.high %v11009_v48, %v11009_v48  ;;  %v16706_v4 = vcombine.low %v21010_v26, %v21010_v26  ;;  %v11167_v55 = vrot.slane %v10689_v15, %v20609_v29  ;;  %17582 = vmatmul.mubr.msk.f32.gmra.mxu0 %vm11810_vm3, %v21043_v40 }
 0x3fe   : > { %v11142_v44 = vcombine.high %v11134_v30, %v11134_v30  ;;  %v11151_v21 = vrot.slane %v10940_v24, %v20609_v29  ;;  %v11003_v53 = vsel %vm2503_vm0, %v20888_v16, %v10841_v13  ;;  %17513 = vmatprep.mubr.msk.f32.mxu1 %vm18005_vm15, %v23233_v52  ;;  %17584 = vmatprep.mubr.msk.f32.mxu0 %vm18005_vm15, %v23233_v52 }
 0x3ff   : > { %v11126_v47 = vcombine.high %v11124_v11, %v11124_v11  ;;  %v11513_v12 = vcombine.low %v11125_v18, %v11124_v11  ;;  %v11141_v59 = vrot.slane %v11127_v37, %v20609_v29  ;;  %v10745_v20 = vcombine.low %v21023_v38, %v21017_v51 }
 0x400   : > { %v21067_v6 = vrot.slane %v10867_v35, %v20609_v29  ;;  %v10883_v5 = vrot.slane %v21023_v38, %v20609_v29  ;;  %v11159_v16 = vcombine.high %v11151_v21, %v11151_v21  ;;  %v21072_v15 = vrot.slane %v10892_v23, %v20609_v29 }
 0x401   : > { %v11514_v34 = vcombine.low %v11126_v47, %v11134_v30  ;;  %v11143_v33 = vcombine.high %v11141_v59, %v11141_v59  ;;  %v11158_v62 = vrot.slane %v16706_v4, %v20609_v29  ;;  %v11521_v7 = vrot.slane %v11513_v12, %v20609_v29 }
 0x402   : > { %v11175_v57 = vcombine.high %v11167_v55, %v11167_v55  ;;  %v11174_v13 = vrot.slane %v16707_v54, %v20609_v29  ;;  %v11184_v1 = vrot.slane %v11003_v53, %v20609_v29  ;;  %v11530_v60 = vcombine.low %v11142_v44, %v11141_v59 }
 0x403   : > { %v11528_v35 = vrot.slane %v11514_v34, %v20609_v29  ;;  %v11531_v61 = vcombine.low %v11143_v33, %v11151_v21  ;;  %v11010_v48 = vsel %vm11007_vm2, %v10849_v27, %v10941_v58  ;;  %v10945_v23 = vcombine.low %v20999_v45, %v21021_v43  ;;  %v21095_v58 = vpop.f32.mrf.mxu1  ;;  %v21097_v27 = vpop.f32.mrf.mxu0 }
 0x404   : > { %v10746_v46 = vcombine.low %v21041_v10, %v20975_v22  ;;  %v10942_v18 = vcombine.low %v20950_v56, %v21026_v32  ;;  %v11547_v30 = vcombine.low %v11159_v16, %v11158_v62  ;;  %v11192_v24 = vcombine.high %v11184_v1, %v11184_v1 }
 0x405   : > { %v21089_v3 = vcombine.low %v11521_v7, %v11528_v35  ;;  %v11545_v54 = vrot.slane %v11531_v61, %v20609_v29  ;;  %v11177_v11 = vcombine.high %v11003_v53, %v11003_v53  ;;  %v21093_v37 = vrot.slane %v10745_v20, %v20609_v29  ;;  %v10306_v7 = vpop.f32.mrf.mxu1 }
 0x406   : > { %v11176_v4 = vcombine.high %v11174_v13, %v11174_v13  ;;  %v11201_v22 = vrot.slane %v11010_v48, %v20609_v29  ;;  %v11194_v44 = vcombine.high %v11010_v48, %v11010_v48  ;;  %v11538_v21 = vrot.slane %v11530_v60, %v20609_v29 }
 0x407   : > { %17514 = vmatmul.mubr.msk.f32.gmra.mxu1 %vm11810_vm3, %v21089_v3  ;;  %17585 = vmatmul.mubr.msk.f32.gmra.mxu0 %vm11810_vm3, %v21089_v3  ;;  %v11548_v53 = vcombine.low %v11167_v55, %v11175_v57  ;;  %v11191_v47 = vrot.slane %v11177_v11, %v20609_v29  ;;  %v21107_v12 = vrot.slane %v10945_v23, %v20609_v29  ;;  %v10426_v57 = vpop.f32.mrf.mxu0 }
 0x408   : > { %v10876_v59 = vcombine.low %v21017_v51, %v21041_v10  ;;  %17516 = vmatprep.mubr.msk.f32.mxu1 %vm18005_vm15, %v23233_v52  ;;  %17587 = vmatprep.mubr.msk.f32.mxu0 %vm18005_vm15, %v23233_v52  ;;  %v11218_v20 = vrot.slane %v10942_v18, %v20609_v29  ;;  %v21116_v16 = vcombine.low %v11538_v21, %v11545_v54 }
 0x409   : > { %v11555_v55 = vrot.slane %v11547_v30, %v20609_v29  ;;  %v11565_v34 = vcombine.low %v11184_v1, %v11192_v24  ;;  %v11193_v33 = vcombine.high %v11191_v47, %v11191_v47  ;;  %v16708_v62 = vcombine.low %v21026_v32, %v21026_v32 }
 0x40a   : > { %v11564_v51 = vcombine.low %v11174_v13, %v11176_v4  ;;  %v11209_v10 = vcombine.high %v11201_v22, %v11201_v22  ;;  %v11208_v35 = vrot.slane %v11194_v44, %v20609_v29  ;;  %v21123_v60 = vrot.slane %v10746_v46, %v20609_v29 }
 0x40b   : > { %17517 = vmatmul.mubr.msk.f32.gmra.mxu1 %vm11810_vm3, %v21116_v16  ;;  %17588 = vmatmul.mubr.msk.f32.gmra.mxu0 %vm11810_vm3, %v21116_v16  ;;  %v11562_v1 = vrot.slane %v11548_v53, %v20609_v29  ;;  %v16709_v61 = vcombine.low %v20961_v19, %v20961_v19  ;;  %v10890_v48 = vrot.slane %v10876_v59, %v20609_v29 }
 0x40c   : > { %17519 = vmatprep.mubr.msk.f32.mxu1 %vm18005_vm15, %v23233_v52  ;;  %17590 = vmatprep.mubr.msk.f32.mxu0 %vm18005_vm15, %v23233_v52  ;;  %v11581_v13 = vcombine.low %v11191_v47, %v11193_v33  ;;  %v11226_v23 = vcombine.high %v11218_v20, %v11218_v20  ;;  %v10943_v46 = vcombine.low %v21093_v37, %v21093_v37 }
 0x40d   : > { %v10443_v18 = vmax.f32 %v10306_v7, %v10426_v57  ;;  %v21139_v30 = vcombine.low %v11555_v55, %v11562_v1  ;;  %v11579_v54 = vrot.slane %v11565_v34, %v20609_v29  ;;  %v11572_v19 = vrot.slane %v11564_v51, %v20609_v29 }
 0x40e   : > { %v11582_v24 = vcombine.low %v11201_v22, %v11209_v10  ;;  %v11210_v11 = vcombine.high %v11208_v35, %v11208_v35  ;;  %v11004_v4 = vsel %vm2503_vm0, %v21010_v26, %v10866_v31  ;;  %v11225_v44 = vrot.slane %v16708_v62, %v20609_v29 }
 0x40f   : > { %17520 = vmatmul.mubr.msk.f32.gmra.mxu1 %vm11810_vm3, %v21139_v30  ;;  %17591 = vmatmul.mubr.msk.f32.gmra.mxu0 %vm11810_vm3, %v21139_v30  ;;  %v11241_v21 = vrot.slane %v16709_v61, %v20609_v29  ;;  %v11242_v22 = vcombine.high %v21014_v39, %v21014_v39  ;;  %v10953_v53 = vcombine.low %v21107_v12, %v21107_v12 }
 0x410   : > { %17522 = vmatprep.mubr.msk.f32.mxu1 %vm18005_vm15, %v23233_v52  ;;  %17593 = vmatprep.mubr.msk.f32.mxu0 %vm18005_vm15, %v23233_v52  ;;  %v11589_v2 = vrot.slane %v11581_v13, %v20609_v29  ;;  %v11599_v17 = vcombine.low %v11218_v20, %v11226_v23  ;;  %v21163_v31 = vcombine.low %v11572_v19, %v11579_v54 }
 0x411   : > { %v11244_v26 = vcombine.high %v11004_v4, %v11004_v4  ;;  %v11251_v47 = vrot.slane %v11004_v4, %v20609_v29  ;;  %v11011_v59 = vsel %vm11007_vm2, %v21067_v6, %v10943_v46  ;;  %v10891_v12 = vcombine.low %v10883_v5, %v10890_v48 }
 0x412   : > { %v21172_v55 = vrot.slane %v10443_v18, %v20609_v29  ;;  %v11596_v34 = vrot.slane %v11582_v24, %v20609_v29  ;;  %v11598_v33 = vcombine.low %v11208_v35, %v11210_v11  ;;  %v11615_v20 = vcombine.low %v11225_v44, %v21014_v39 }
 0x413   : > { %17523 = vmatmul.mubr.msk.f32.gmra.mxu1 %vm11810_vm3, %v21163_v31  ;;  %17594 = vmatmul.mubr.msk.f32.gmra.mxu0 %vm11810_vm3, %v21163_v31  ;;  %v11616_v62 = vcombine.low %v11242_v22, %v11241_v21  ;;  %v11243_v6 = vcombine.high %v11241_v21, %v11241_v21  ;;  %v11613_v5 = vrot.slane %v11599_v17, %v20609_v29 }
 0x414   : > { %17525 = vmatprep.mubr.msk.f32.mxu1 %vm18005_vm15, %v23233_v52  ;;  %17596 = vmatprep.mubr.msk.f32.mxu0 %vm18005_vm15, %v23233_v52  ;;  %v21184_v38 = vcombine.low %v11589_v2, %v11596_v34  ;;  %v11261_v7 = vcombine.high %v11011_v59, %v11011_v59  ;;  %v11258_v57 = vrot.slane %v11244_v26, %v20609_v29 }
 0x415   : > { %v11259_v51 = vcombine.high %v11251_v47, %v11251_v47  ;;  %v11268_v10 = vrot.slane %v11011_v59, %v20609_v29  ;;  %v10944_v39 = vcombine.low %v21123_v60, %v21030_v63  ;;  %v21193_v35 = vsel %vm11007_vm2, %v21072_v15, %v10953_v53 }
 0x416   : > { %v11005_v1 = vsel %vm2503_vm0, %v21026_v32, %v10891_v12  ;;  %v10591_v61 = vcombine.high %v10443_v18, %v10443_v18  ;;  %v11606_v48 = vrot.slane %v11598_v33, %v20609_v29  ;;  %v21200_v13 = vcombine.high %v21172_v55, %v21172_v55 }
 0x417   : > { %17526 = vmatmul.mubr.msk.f32.gmra.mxu1 %vm11810_vm3, %v21184_v38  ;;  %17597 = vmatmul.mubr.msk.f32.gmra.mxu0 %vm11810_vm3, %v21184_v38  ;;  %v11623_v23 = vrot.slane %v11615_v20, %v20609_v29  ;;  %v11630_v15 = vrot.slane %v11616_v62, %v20609_v29  ;;  %v11632_v46 = vcombine.low %v11243_v6, %v11251_v47 }
 0x418   : > { %17528 = vmatprep.mubr.msk.f32.mxu1 %vm18005_vm15, %v23233_v52  ;;  %17599 = vmatprep.mubr.msk.f32.mxu0 %vm18005_vm15, %v23233_v52  ;;  %v21212_v32 = vcombine.low %v11606_v48, %v11613_v5  ;;  %v11275_v18 = vrot.slane %v11261_v7, %v20609_v29  ;;  %v11633_v54 = vcombine.low %v11259_v51, %v11258_v57 }
 0x419   : > { %v11276_v19 = vcombine.high %v11268_v10, %v11268_v10  ;;  %v11285_v24 = vrot.slane %v10944_v39, %v20609_v29  ;;  %v16711_v11 = vcombine.low %v20950_v56, %v20950_v56  ;;  %v16710_v4 = vcombine.low %v21030_v63, %v21030_v63 }
 0x41a   : > { %v11328_v44 = vcombine.high %v21193_v35, %v21193_v35  ;;  %v10444_v21 = vmax.f32 %v21095_v58, %v21097_v27  ;;  %v21225_v22 = vrot.slane %v10591_v61, %v20609_v29  ;;  %v11311_v53 = vcombine.high %v11005_v1, %v11005_v1 }
 0x41b   : > { %v10954_v2 = vcombine.low %v21172_v55, %v21200_v13  ;;  %17529 = vmatmul.mubr.msk.f32.gmra.mxu1 %vm11810_vm3, %v21212_v32  ;;  %17600 = vmatmul.mubr.msk.f32.gmra.mxu0 %vm11810_vm3, %v21212_v32  ;;  %v21233_v56 = vcombine.low %v11623_v23, %v11630_v15  ;;  %v11640_v58 = vrot.slane %v11632_v46, %v20609_v29 }
 0x41c   : > { %17531 = vmatprep.mubr.msk.f32.mxu1 %vm18005_vm15, %v23233_v52  ;;  %17602 = vmatprep.mubr.msk.f32.mxu0 %vm18005_vm15, %v23233_v52  ;;  %v11260_v27 = vcombine.high %v11258_v57, %v11258_v57  ;;  %v11277_v17 = vcombine.high %v11275_v18, %v11275_v18  ;;  %v11647_v26 = vrot.slane %v11633_v54, %v20609_v29 }
 0x41d   : > { %v11650_v47 = vcombine.low %v11276_v19, %v11275_v18  ;;  %v11293_v59 = vcombine.high %v11285_v24, %v11285_v24  ;;  %v11308_v12 = vrot.slane %v16711_v11, %v20609_v29  ;;  %v21243_v34 = vrot.slane %v10444_v21, %v20609_v29 }
 0x41e   : > { %v10607_v33 = vcombine.high %v21225_v22, %v21225_v22  ;;  %v10901_v20 = vcombine.low %v21021_v43, %v21172_v55  ;;  %v21251_v62 = vrot.slane %v21225_v22, %v20609_v29  ;;  %v10961_v6 = vrot.slane %v10954_v2, %v20609_v29 }
 0x41f   : > { %17532 = vmatmul.mubr.msk.f32.gmra.mxu1 %vm11810_vm3, %v21233_v56  ;;  %17603 = vmatmul.mubr.msk.f32.gmra.mxu0 %vm11810_vm3, %v21233_v56  ;;  %v11649_v5 = vcombine.low %v11260_v27, %v11268_v10  ;;  %v11292_v7 = vrot.slane %v16710_v4, %v20609_v29  ;;  %v11666_v43 = vcombine.low %v11277_v17, %v11285_v24 }
 0x420   : > { %17534 = vmatprep.mubr.msk.f32.mxu1 %vm18005_vm15, %v23233_v52  ;;  %17605 = vmatprep.mubr.msk.f32.mxu0 %vm18005_vm15, %v23233_v52  ;;  %v11309_v55 = vcombine.high %v21007_v14, %v21007_v14  ;;  %v11325_v57 = vrot.slane %v11311_v53, %v20609_v29  ;;  %v21266_v51 = vcombine.low %v11640_v58, %v11647_v26 }
 0x421   : > { %v11664_v39 = vrot.slane %v11650_v47, %v20609_v29  ;;  %v11667_v61 = vcombine.low %v11293_v59, %v11292_v7  ;;  %v11310_v10 = vcombine.high %v11308_v12, %v11308_v12  ;;  %v10908_v48 = vrot.slane %v10900_v50, %v20609_v29 }
 0x422   : > { %v10915_v23 = vrot.slane %v10901_v20, %v20609_v29  ;;  %v10970_v15 = vcombine.low %v10607_v33, %v21243_v34  ;;  %v11318_v46 = vrot.slane %v11005_v1, %v20609_v29  ;;  %v10608_v18 = vcombine.high %v10444_v21, %v10444_v21 }
 0x423   : > { %v10969_v54 = vcombine.low %v10961_v6, %v21251_v62  ;;  %17535 = vmatmul.mubr.msk.f32.gmra.mxu1 %vm11810_vm3, %v21266_v51  ;;  %17606 = vmatmul.mubr.msk.f32.gmra.mxu0 %vm11810_vm3, %v21266_v51  ;;  %v11657_v19 = vrot.slane %v11649_v5, %v20609_v29  ;;  %v11674_v45 = vrot.slane %v11666_v43, %v20609_v29 }
 0x424   : > { %17537 = vmatprep.mubr.msk.f32.mxu1 %vm18005_vm15, %v23233_v52  ;;  %17608 = vmatprep.mubr.msk.f32.mxu0 %vm18005_vm15, %v23233_v52  ;;  %v11683_v50 = vcombine.low %v21007_v14, %v11309_v55  ;;  %v11327_v1 = vcombine.high %v11325_v57, %v11325_v57  ;;  %v11681_v11 = vrot.slane %v11667_v61, %v20609_v29 }
 0x425   : > { %v21288_v24 = vcombine.low %v11657_v19, %v11664_v39  ;;  %v11684_v4 = vcombine.low %v11308_v12, %v11310_v10  ;;  %v11342_v21 = vrot.slane %v11328_v44, %v20609_v29  ;;  %v10916_v53 = vcombine.low %v10908_v48, %v10915_v23 }
 0x426   : > { %v10977_v2 = vrot.slane %v10970_v15, %v20609_v29  ;;  %v11326_v58 = vcombine.high %v11318_v46, %v11318_v46  ;;  %v11335_v27 = vrot.slane %v21193_v35, %v20609_v29  ;;  %v10622_v17 = vrot.slane %v10608_v18, %v20609_v29 }
 0x427   : > { %v10623_v14 = vcombine.high %v21243_v34, %v21243_v34  ;;  %17538 = vmatmul.mubr.msk.f32.gmra.mxu1 %vm11810_vm3, %v21288_v24  ;;  %17609 = vmatmul.mubr.msk.f32.gmra.mxu0 %vm11810_vm3, %v21288_v24  ;;  %v10917_v44 = vcombine.low %v21200_v13, %v21225_v22  ;;  %v11352_v26 = vrot.slane %v10969_v54, %v20609_v29 }
 0x428   : > { %17540 = vmatprep.mubr.msk.f32.mxu1 %vm18005_vm15, %v23233_v52  ;;  %17611 = vmatprep.mubr.msk.f32.mxu0 %vm18005_vm15, %v23233_v52  ;;  %v11701_v35 = vcombine.low %v11325_v57, %v11327_v1  ;;  %v21309_v47 = vcombine.low %v11674_v45, %v11681_v11  ;;  %v11691_v59 = vrot.slane %v11683_v50, %v20609_v29 }
 0x429   : > { %v11698_v12 = vrot.slane %v11684_v4, %v20609_v29  ;;  %v11344_v34 = vcombine.high %v11342_v21, %v11342_v21  ;;  %v10978_v33 = vcombine.low %v10977_v2, %v10977_v2  ;;  %v11700_v20 = vcombine.low %v11318_v46, %v11326_v58 }
 0x42a   : > { %v11343_v6 = vcombine.high %v11335_v27, %v11335_v27  ;;  %v11006_v13 = vsel %vm2503_vm0, %v21030_v63, %v10916_v53  ;;  %v10761_v22 = vcombine.low %v21093_v37, %v21123_v60  ;;  %v16712_v5 = vcombine.low %v21251_v62, %v21251_v62 }
 0x42b   : > { %17541 = vmatmul.mubr.msk.f32.gmra.mxu1 %vm11810_vm3, %v21309_v47  ;;  %17612 = vmatmul.mubr.msk.f32.gmra.mxu0 %vm11810_vm3, %v21309_v47  ;;  %v16713_v7 = vcombine.low %v21123_v60, %v21123_v60  ;;  %v10924_v43 = vrot.slane %v10917_v44, %v20609_v29  ;;  %v11715_v63 = vrot.slane %v11701_v35, %v20609_v29  ;;  %vm14975_vm0 = vcmask 736256  }
 0x42c   : > { %17543 = vmatprep.mubr.msk.f32.mxu1 %vm18005_vm15, %v23233_v52  ;;  %17614 = vmatprep.mubr.msk.f32.mxu0 %vm18005_vm15, %v23233_v52  ;;  %v11360_v37 = vcombine.high %v11352_v26, %v11352_v26  ;;  %v10624_v62 = vcombine.high %v10622_v17, %v10622_v17  ;;  %v21331_v55 = vcombine.low %v11691_v59, %v11698_v12 }
 0x42d   : > { %v11718_v57 = vcombine.low %v11342_v21, %v11344_v34  ;;  %v11378_v39 = vcombine.high %v11006_v13, %v11006_v13  ;;  %v10979_v61 = vcombine.low %v10623_v14, %v10622_v17  ;;  %v11708_v10 = vrot.slane %v11700_v20, %v20609_v29 }
 0x42e   : > { %v11717_v60 = vcombine.low %v11335_v27, %v11343_v6  ;;  %v11013_v48 = vsel %vm11007_vm2, %v10924_v43, %v10978_v33  ;;  %v11359_v23 = vrot.slane %v16712_v5, %v20609_v29  ;;  %v11368_v15 = vrot.slane %v10761_v22, %v20609_v29 }
 0x42f   : > { %17544 = vmatmul.mubr.msk.f32.gmra.mxu1 %vm11810_vm3, %v21331_v55  ;;  %17615 = vmatmul.mubr.msk.f32.gmra.mxu0 %vm11810_vm3, %v21331_v55  ;;  %v11375_v46 = vrot.slane %v16713_v7, %v20609_v29  ;;  %v21346_v18 = vcombine.low %v11708_v10, %v11715_v63  ;;  %v11734_v54 = vcombine.low %v11352_v26, %v11360_v37 }
 0x430   : > { %17546 = vmatprep.mubr.msk.f32.mxu1 %vm18005_vm15, %v23233_v52  ;;  %17617 = vmatprep.mubr.msk.f32.mxu0 %vm18005_vm15, %v23233_v52  ;;  %v11732_v19 = vrot.slane %v11718_v57, %v20609_v29  ;;  %v11385_v45 = vrot.slane %v11006_v13, %v20609_v29  ;;  %v11392_v50 = vrot.slane %v11378_v39, %v20609_v29 }
 0x431   : > { %v11395_v1 = vcombine.high %v11013_v48, %v11013_v48  ;;  %v10986_v11 = vrot.slane %v10979_v61, %v20609_v29  ;;  %v10993_v4 = vrot.slane %v10624_v62, %v20609_v29  ;;  %v11725_v21 = vrot.slane %v11717_v60, %v20609_v29 }
 0x432   : > { %v11735_v53 = vcombine.low %v11359_v23, %v11368_v15  ;;  %v11376_v2 = vcombine.high %v11368_v15, %v11368_v15  ;;  %v11377_v58 = vcombine.high %v11375_v46, %v11375_v46  ;;  %v11742_v27 = vrot.slane %v11734_v54, %v20609_v29 }
 0x433   : > { %17547 = vmatmul.mubr.msk.f32.gmra.mxu1 %vm11810_vm3, %v21346_v18  ;;  %17618 = vmatmul.mubr.msk.f32.gmra.mxu0 %vm11810_vm3, %v21346_v18  ;;  %v11402_v17 = vrot.slane %v11013_v48, %v20609_v29  ;;  %v21364_v14 = vcombine.low %v11725_v21, %v11732_v19  ;;  %v11394_v26 = vcombine.high %v11392_v50, %v11392_v50 }
 0x434   : > { %17549 = vmatprep.mubr.msk.f32.mxu1 %vm18005_vm15, %v23233_v52  ;;  %17620 = vmatprep.mubr.msk.f32.mxu0 %vm18005_vm15, %v23233_v52  ;;  %v11752_v44 = vcombine.low %v11377_v58, %v11385_v45  ;;  %v11409_v35 = vrot.slane %v11395_v1, %v20609_v29  ;;  %v10994_v59 = vcombine.low %v10986_v11, %v10993_v4 }
 0x435   : > { %v11749_v12 = vrot.slane %v11735_v53, %v20609_v29  ;;  %v11751_v34 = vcombine.low %v11376_v2, %v11375_v46  ;;  %v11393_v33 = vcombine.high %v11385_v45, %v11385_v45  ;;  %v11769_v13 = vcombine.low %v11394_v26, %v11402_v17 }
 0x436   : > { %v11766_v6 = vrot.slane %v11752_v44, %v20609_v29  ;;  %v11411_v22 = vcombine.high %v11409_v35, %v11409_v35  ;;  %v11419_v5 = vrot.slane %v10994_v59, %v20609_v29  ;;  %v11410_v63 = vcombine.high %v11402_v17, %v11402_v17 }
 0x437   : > { %17550 = vmatmul.mubr.msk.f32.gmra.mxu1 %vm11810_vm3, %v21364_v14  ;;  %17621 = vmatmul.mubr.msk.f32.gmra.mxu0 %vm11810_vm3, %v21364_v14  ;;  %v21376_v20 = vcombine.low %v11742_v27, %v11749_v12  ;;  %v11759_v7 = vrot.slane %v11751_v34, %v20609_v29  ;;  %v11768_v43 = vcombine.low %v11393_v33, %v11392_v50 }
 0x438   : > { %17552 = vmatprep.mubr.msk.f32.mxu1 %vm18005_vm15, %v23233_v52  ;;  %17623 = vmatprep.mubr.msk.f32.mxu0 %vm18005_vm15, %v23233_v52  ;;  %v11783_v62 = vrot.slane %v11769_v13, %v20609_v29  ;;  %v11786_v57 = vcombine.low %v11411_v22, %v11419_v5  ;;  %v16714_v39 = vcombine.low %v10993_v4, %v10993_v4 }
 0x439   : > { %v21389_v37 = vcombine.low %v11759_v7, %v11766_v6  ;;  %v11776_v61 = vrot.slane %v11768_v43, %v20609_v29  ;;  %v11785_v10 = vcombine.low %v11410_v63, %v11409_v35  ;;  %v11427_v60 = vcombine.high %v11419_v5, %v11419_v5 }
 0x43a   : > { %v11800_v23 = vrot.slane %v11786_v57, %v20609_v29  ;;  %v11426_v15 = vrot.slane %v16714_v39, %v20609_v29 }
 0x43b   : > { %17553 = vmatmul.mubr.msk.f32.gmra.mxu1 %vm11810_vm3, %v21376_v20  ;;  %17624 = vmatmul.mubr.msk.f32.gmra.mxu0 %vm11810_vm3, %v21376_v20  ;;  %v21401_v48 = vcombine.low %v11776_v61, %v11783_v62  ;;  %v11793_v46 = vrot.slane %v11785_v10, %v20609_v29 }
 0x43c   : > { %17555 = vmatprep.mubr.msk.f32.mxu1 %vm18005_vm15, %v23233_v52  ;;  %17626 = vmatprep.mubr.msk.f32.mxu0 %vm18005_vm15, %v23233_v52  ;;  %v11802_v19 = vcombine.low %v11427_v60, %v11426_v15 }
 0x43d   : > { %v21414_v54 = vcombine.low %v11793_v46, %v11800_v23 }
 0x43e   : > { %v21425_v45 = vrot.slane %v11802_v19, %v20609_v29 }
 0x43f   : > { %17556 = vmatmul.mubr.msk.f32.gmra.mxu1 %vm11810_vm3, %v21389_v37  ;;  %17627 = vmatmul.mubr.msk.f32.gmra.mxu0 %vm11810_vm3, %v21389_v37 }
 0x440   : > { %17558 = vmatprep.mubr.msk.f32.mxu1 %vm18005_vm15, %v23233_v52  ;;  %17629 = vmatprep.mubr.msk.f32.mxu0 %vm18005_vm15, %v23233_v52 }
 0x443   : > { %17559 = vmatmul.mubr.msk.f32.gmra.mxu1 %vm11810_vm3, %v21401_v48  ;;  %17630 = vmatmul.mubr.msk.f32.gmra.mxu0 %vm11810_vm3, %v21401_v48 }
 0x444   : > { %17561 = vmatprep.mubr.msk.f32.mxu1 %vm18005_vm15, %v23233_v52  ;;  %17632 = vmatprep.mubr.msk.f32.mxu0 %vm18005_vm15, %v23233_v52 }
 0x447   : > { %17562 = vmatmul.mubr.msk.f32.gmra.mxu1 %vm11810_vm3, %v21414_v54  ;;  %17633 = vmatmul.mubr.msk.f32.gmra.mxu0 %vm11810_vm3, %v21414_v54 }
 0x448   : > { %17564 = vmatprep.mubr.msk.f32.mxu1 %vm18005_vm15, %v23233_v52  ;;  %17635 = vmatprep.mubr.msk.f32.mxu0 %vm18005_vm15, %v23233_v52 }
 0x44b   : > { %17565 = vmatmul.mubr.msk.f32.gmra.mxu1 %vm11810_vm3, %v21425_v45  ;;  %17636 = vmatmul.mubr.msk.f32.gmra.mxu0 %vm11810_vm3, %v21425_v45 }
 0x44c   : > { %17640 = vmatprep.mubr.msk.f32.mxu1 %vm18005_vm15, %v23233_v52  ;;  %17721 = vmatprep.mubr.msk.bf16.mxu0 %vm18005_vm15, %v23233_v52 }
 0x44f   : > { %17641 = vmatmul.mubr.msk.f32.vlgmr.msra.gmra.mxu1 %vm11810_vm3, %v20833_v49 }
 0x450   : > { %17643 = vmatprep.mubr.msk.f32.mxu1 %vm18005_vm15, %v23233_v52 }
 0x453   : > { %17644 = vmatmul.mubr.msk.f32.gmra.mxu1 %vm11810_vm3, %v20852_v0 }
 0x454   : > { %17646 = vmatprep.mubr.msk.f32.mxu1 %vm18005_vm15, %v23233_v52 }
 0x457   : > { %17647 = vmatmul.mubr.msk.f32.gmra.mxu1 %vm11810_vm3, %v20938_v42 }
 0x458   : > { %17649 = vmatprep.mubr.msk.f32.mxu1 %vm18005_vm15, %v23233_v52 }
 0x45b   : > { %17650 = vmatmul.mubr.msk.f32.gmra.mxu1 %vm11810_vm3, %v20970_v28 }
 0x45c   : > { %17652 = vmatprep.mubr.msk.f32.mxu1 %vm18005_vm15, %v23233_v52 }
 0x45f   : > { %17653 = vmatmul.mubr.msk.f32.gmra.mxu1 %vm11810_vm3, %v21043_v40 }
 0x460   : > { %17655 = vmatprep.mubr.msk.f32.mxu1 %vm18005_vm15, %v23233_v52 }
 0x463   : > { %17656 = vmatmul.mubr.msk.f32.gmra.mxu1 %vm11810_vm3, %v21089_v3 }
 0x464   : > { %17658 = vmatprep.mubr.msk.f32.mxu1 %vm18005_vm15, %v23233_v52 }
 0x467   : > { %17659 = vmatmul.mubr.msk.f32.gmra.mxu1 %vm11810_vm3, %v21116_v16 }
 0x468   : > { %17661 = vmatprep.mubr.msk.f32.mxu1 %vm18005_vm15, %v23233_v52 }
 0x46b   : > { %17662 = vmatmul.mubr.msk.f32.gmra.mxu1 %vm11810_vm3, %v21139_v30 }
 0x46c   : > { %17664 = vmatprep.mubr.msk.f32.mxu1 %vm18005_vm15, %v23233_v52 }
 0x46f   : > { %17665 = vmatmul.mubr.msk.f32.gmra.mxu1 %vm11810_vm3, %v21163_v31 }
 0x470   : > { %17667 = vmatprep.mubr.msk.f32.mxu1 %vm18005_vm15, %v23233_v52 }
 0x473   : > { %17668 = vmatmul.mubr.msk.f32.gmra.mxu1 %vm11810_vm3, %v21184_v38 }
 0x474   : > { %17670 = vmatprep.mubr.msk.f32.mxu1 %vm18005_vm15, %v23233_v52 }
 0x477   : > { %17671 = vmatmul.mubr.msk.f32.gmra.mxu1 %vm11810_vm3, %v21212_v32 }
 0x478   : > { %17673 = vmatprep.mubr.msk.f32.mxu1 %vm18005_vm15, %v23233_v52 }
 0x47b   : > { %17674 = vmatmul.mubr.msk.f32.gmra.mxu1 %vm11810_vm3, %v21233_v56 }
 0x47c   : > { %17676 = vmatprep.mubr.msk.f32.mxu1 %vm18005_vm15, %v23233_v52 }
 0x47f   : > { %17677 = vmatmul.mubr.msk.f32.gmra.mxu1 %vm11810_vm3, %v21266_v51 }
 0x480   : > { %17679 = vmatprep.mubr.msk.f32.mxu1 %vm18005_vm15, %v23233_v52 }
 0x483   : > { %17680 = vmatmul.mubr.msk.f32.gmra.mxu1 %vm11810_vm3, %v21288_v24 }
 0x484   : > { %17682 = vmatprep.mubr.msk.f32.mxu1 %vm18005_vm15, %v23233_v52 }
 0x487   : > { %17683 = vmatmul.mubr.msk.f32.gmra.mxu1 %vm11810_vm3, %v21309_v47 }
 0x488   : > { %17685 = vmatprep.mubr.msk.f32.mxu1 %vm18005_vm15, %v23233_v52 }
 0x48b   : > { %17686 = vmatmul.mubr.msk.f32.gmra.mxu1 %vm11810_vm3, %v21331_v55 }
 0x48c   : > { %17688 = vmatprep.mubr.msk.f32.mxu1 %vm18005_vm15, %v23233_v52 }
 0x48f   : > { %17689 = vmatmul.mubr.msk.f32.gmra.mxu1 %vm11810_vm3, %v21346_v18 }
 0x490   : > { %17691 = vmatprep.mubr.msk.f32.mxu1 %vm18005_vm15, %v23233_v52 }
 0x493   : > { %17692 = vmatmul.mubr.msk.f32.gmra.mxu1 %vm11810_vm3, %v21364_v14 }
 0x494   : > { %17694 = vmatprep.mubr.msk.f32.mxu1 %vm18005_vm15, %v23233_v52 }
 0x497   : > { %17695 = vmatmul.mubr.msk.f32.gmra.mxu1 %vm11810_vm3, %v21376_v20 }
 0x498   : > { %17697 = vmatprep.mubr.msk.f32.mxu1 %vm18005_vm15, %v23233_v52 }
 0x49b   : > { %17698 = vmatmul.mubr.msk.f32.gmra.mxu1 %vm11810_vm3, %v21389_v37 }
 0x49c   : > { %17700 = vmatprep.mubr.msk.f32.mxu1 %vm18005_vm15, %v23233_v52 }
 0x49d   : > { %v11923_v49 = vpop.f32.mrf.mxu1  ;;  %v12508_v28 = vpop.f32.mrf.mxu0 }
 0x49e   : > { %v12060_v0 = vcombine.high %v11923_v49, %v11923_v49  ;;  %v12067_v42 = vrot.slane %v11923_v49, %v20609_v29  ;;  %v12645_v40 = vcombine.high %v12508_v28, %v12508_v28  ;;  %v21505_v3 = vrot.slane %v12508_v28, %v20609_v29 }
 0x49f   : > { %v17500_v16 = vpop.f32.mrf.mxu1  ;;  %v17571_v31 = vpop.f32.mrf.mxu0  ;;  %17701 = vmatmul.mubr.msk.f32.gmra.mxu1 %vm11810_vm3, %v21401_v48 }
 0x4a0   : > { %v12074_v30 = vrot.slane %v12060_v0, %v20609_v29  ;;  %v12659_v38 = vrot.slane %v12645_v40, %v20609_v29  ;;  %v12660_v32 = vcombine.high %v21505_v3, %v21505_v3  ;;  %v12075_v51 = vcombine.high %v12067_v42, %v12067_v42  ;;  %17703 = vmatprep.mubr.msk.f32.mxu1 %vm18005_vm15, %v23233_v52 }
 0x4a1   : > { %v11928_v56 = vpop.f32.mrf.mxu1  ;;  %v12513_v18 = vpop.f32.mrf.mxu0 }
 0x4a2   : > { %v12076_v24 = vcombine.high %v12074_v30, %v12074_v30  ;;  %v12077_v47 = vcombine.high %v11928_v56, %v11928_v56  ;;  %v12084_v55 = vrot.slane %v11928_v56, %v20609_v29  ;;  %v12661_v50 = vcombine.high %v12659_v38, %v12659_v38 }
 0x4a3   : > { %v17503_v1 = vpop.f32.mrf.mxu1  ;;  %v17574_v53 = vpop.f32.mrf.mxu0  ;;  %v14047_v2 = vcombine.low %v12660_v32, %v12659_v38  ;;  %v12669_v58 = vrot.slane %v12513_v18, %v20609_v29  ;;  %v13612_v27 = vcombine.low %v12067_v42, %v12075_v51  ;;  %17704 = vmatmul.mubr.msk.f32.gmra.mxu1 %vm11810_vm3, %v21414_v54  ;;  %v12662_v7 = vcombine.high %v12513_v18, %v12513_v18 }
 0x4a4   : > { %v13613_v11 = vcombine.low %v12074_v30, %v12076_v24  ;;  %v12091_v4 = vrot.slane %v12077_v47, %v20609_v29  ;;  %v12092_v21 = vcombine.high %v12084_v55, %v12084_v55  ;;  %17706 = vmatprep.mubr.msk.f32.mxu1 %vm18005_vm15, %v23233_v52  ;;  %v14038_v56 = vcombine.low %v21505_v3, %v21505_v3 }
 0x4a5   : > { %v14048_v44 = vcombine.low %v12661_v50, %v12669_v58  ;;  %v14055_v59 = vrot.slane %v14047_v2, %v20609_v29  ;;  %v13620_v34 = vrot.slane %v13612_v27, %v20609_v29  ;;  %v12676_v43 = vrot.slane %v12662_v7, %v20609_v29 }
 0x4a6   : > { %v12093_v17 = vcombine.high %v12091_v4, %v12091_v4  ;;  %v13629_v14 = vcombine.low %v12084_v55, %v12092_v21  ;;  %v13627_v26 = vrot.slane %v13613_v11, %v20609_v29  ;;  %v12677_v63 = vcombine.high %v12669_v58, %v12669_v58 }
 0x4a7   : > { %v14062_v12 = vrot.slane %v14048_v44, %v20609_v29  ;;  %17707 = vmatmul.mubr.msk.f32.gmra.mxu1 %vm11810_vm3, %v21425_v45  ;;  %v12678_v60 = vcombine.high %v12676_v43, %v12676_v43  ;;  %v14045_v21 = vrot.slane %v14038_v56, %v20609_v29 }
 0x4a8   : > { %v13630_v35 = vcombine.low %v12091_v4, %v12093_v17  ;;  %v13637_v33 = vrot.slane %v13629_v14, %v20609_v29  ;;  %v21534_v13 = vcombine.low %v13620_v34, %v13627_v26  ;;  %17785 = vmatprep.mubr.msk.bf16.mxu1 %vm18005_vm15, %v23233_v52  ;;  %v14064_v10 = vcombine.low %v12677_v63, %v12676_v43 }
 0x4a9   : > { %v21532_v6 = vcombine.low %v14055_v59, %v14062_v12  ;;  %v14046_v59 = vcombine.low %v14045_v21, %v14045_v21 }
 0x4aa   : > { %v13644_v20 = vrot.slane %v13630_v35, %v20609_v29  ;;  %v14072_v40 = vrot.slane %v14064_v10, %v20609_v29 }
 0x4ac   : > { %v21536_v22 = vcombine.low %v13637_v33, %v13644_v20 }
 0x4b3   : > { %v11933_v37 = vpop.f32.mrf.mxu1  ;;  %v12518_v62 = vpop.f32.mrf.mxu0 }
 0x4b4   : > { %v12094_v57 = vcombine.high %v11933_v37, %v11933_v37  ;;  %v12679_v39 = vcombine.high %v12518_v62, %v12518_v62  ;;  %v12686_v61 = vrot.slane %v12518_v62, %v20609_v29  ;;  %v12101_v15 = vrot.slane %v11933_v37, %v20609_v29 }
 0x4b5   : > { %v17506_v48 = vpop.f32.mrf.mxu1  ;;  %v17577_v23 = vpop.f32.mrf.mxu0 }
 0x4b6   : > { %v12108_v46 = vrot.slane %v12094_v57, %v20609_v29  ;;  %v12693_v54 = vrot.slane %v12679_v39, %v20609_v29  ;;  %v12694_v19 = vcombine.high %v12686_v61, %v12686_v61  ;;  %v14065_v45 = vcombine.low %v12678_v60, %v12686_v61 }
 0x4b7   : > { %v11938_v49 = vpop.f32.mrf.mxu1  ;;  %v21557_v0 = vpop.f32.mrf.mxu0  ;;  %v12109_v51 = vcombine.high %v12101_v15, %v12101_v15 }
 0x4b8   : > { %v12110_v42 = vcombine.high %v12108_v46, %v12108_v46  ;;  %v12111_v28 = vcombine.high %v11938_v49, %v11938_v49  ;;  %v14079_v16 = vrot.slane %v14065_v45, %v20609_v29  ;;  %v12118_v30 = vrot.slane %v11938_v49, %v20609_v29 }
 0x4b9   : > { %v12695_v31 = vcombine.high %v12693_v54, %v12693_v54  ;;  %v17509_v38 = vpop.f32.mrf.mxu1  ;;  %v17580_v32 = vpop.f32.mrf.mxu0  ;;  %v14081_v24 = vcombine.low %v12694_v19, %v12693_v54  ;;  %v21569_v50 = vrot.slane %v21557_v0, %v20609_v29  ;;  %v13646_v53 = vcombine.low %v12101_v15, %v12109_v51 }
 0x4ba   : > { %v21564_v47 = vcombine.low %v14072_v40, %v14079_v16  ;;  %v12125_v55 = vrot.slane %v12111_v28, %v20609_v29  ;;  %v12126_v18 = vcombine.high %v12118_v30, %v12118_v30  ;;  %v13647_v1 = vcombine.low %v12108_v46, %v12110_v42 }
 0x4bb   : > { %v14082_v4 = vcombine.low %v12695_v31, %v21569_v50  ;;  %v14089_v2 = vrot.slane %v14081_v24, %v20609_v29  ;;  %v13654_v12 = vrot.slane %v13646_v53, %v20609_v29 }
 0x4bc   : > { %v13663_v11 = vcombine.low %v12118_v30, %v12126_v18  ;;  %v13677_v27 = vrot.slane %v12125_v55, %v20609_v29  ;;  %v13661_v14 = vrot.slane %v13647_v1, %v20609_v29  ;;  %v12127_v35 = vcombine.high %v12125_v55, %v12125_v55  ;;  %v11943_v34 = vpop.f32.mrf.mxu1 }
 0x4bd   : > { %v14096_v17 = vrot.slane %v14082_v4, %v20609_v29  ;;  %v21583_v33 = vpop.f32.mrf.mxu0  ;;  %v12128_v20 = vcombine.high %v11943_v34, %v11943_v34  ;;  %v12135_v7 = vrot.slane %v11943_v34, %v20609_v29 }
 0x4be   : > { %v13670_v58 = vrot.slane %v13663_v11, %v20609_v29  ;;  %v21586_v43 = vcombine.low %v13654_v12, %v13661_v14  ;;  %v17512_v63 = vpop.f32.mrf.mxu1 }
 0x4bf   : > { %v21580_v26 = vcombine.low %v14089_v2, %v14096_v17  ;;  %v17583_v37 = vpop.f32.mrf.mxu0  ;;  %v12142_v57 = vrot.slane %v12128_v20, %v20609_v29  ;;  %v12143_v39 = vcombine.high %v12135_v7, %v12135_v7  ;;  %v13679_v61 = vcombine.low %v12127_v35, %v12135_v7 }
 0x4c0   : > { %v13678_v44 = vcombine.low %v13670_v58, %v13677_v27 }
 0x4c1   : > { %v13680_v60 = vcombine.low %v12143_v39, %v12142_v57  ;;  %v13687_v48 = vrot.slane %v13679_v61, %v20609_v29  ;;  %v12144_v15 = vcombine.high %v12142_v57, %v12142_v57 }
 0x4c2   : > { %v21589_v62 = vsel %vm531_vm4, %v13678_v44, %v14046_v59 }
 0x4c3   : > { %v13694_v23 = vrot.slane %v13680_v60, %v20609_v29 }
 0x4c5   : > { %v21596_v46 = vcombine.low %v13687_v48, %v13694_v23 }
 0x4c7   : > { %v11948_v54 = vpop.f32.mrf.mxu1  ;;  %v21598_v19 = vpop.f32.mrf.mxu0 }
 0x4c8   : > { %v12145_v45 = vcombine.high %v11948_v54, %v11948_v54  ;;  %v12152_v49 = vrot.slane %v11948_v54, %v20609_v29 }
 0x4c9   : > { %v17515_v42 = vpop.f32.mrf.mxu1  ;;  %v17586_v28 = vpop.f32.mrf.mxu0 }
 0x4ca   : > { %v12159_v40 = vrot.slane %v12145_v45, %v20609_v29  ;;  %v12160_v16 = vcombine.high %v12152_v49, %v12152_v49  ;;  %v13696_v30 = vcombine.low %v12144_v15, %v12152_v49 }
 0x4cb   : > { %v11953_v31 = vpop.f32.mrf.mxu1  ;;  %v21602_v38 = vpop.f32.mrf.mxu0 }
 0x4cc   : > { %v13697_v32 = vcombine.low %v12160_v16, %v12159_v40  ;;  %v12161_v56 = vcombine.high %v12159_v40, %v12159_v40  ;;  %v12162_v51 = vcombine.high %v11953_v31, %v11953_v31  ;;  %v12169_v24 = vrot.slane %v11953_v31, %v20609_v29 }
 0x4cd   : > { %v17518_v55 = vpop.f32.mrf.mxu1  ;;  %v17589_v18 = vpop.f32.mrf.mxu0  ;;  %v13704_v1 = vrot.slane %v13696_v30, %v20609_v29 }
 0x4ce   : > { %v13711_v11 = vrot.slane %v13697_v32, %v20609_v29  ;;  %v12176_v4 = vrot.slane %v12162_v51, %v20609_v29  ;;  %v12177_v21 = vcombine.high %v12169_v24, %v12169_v24  ;;  %v13713_v53 = vcombine.low %v12161_v56, %v12169_v24 }
 0x4cf   : > { %v11958_v2 = vpop.f32.mrf.mxu1  ;;  %v21608_v58 = vpop.f32.mrf.mxu0 }
 0x4d0   : > { %v21610_v27 = vcombine.low %v13704_v1, %v13711_v11  ;;  %v13714_v17 = vcombine.low %v12177_v21, %v12176_v4  ;;  %v12178_v14 = vcombine.high %v12176_v4, %v12176_v4  ;;  %v12179_v44 = vcombine.high %v11958_v2, %v11958_v2 }
 0x4d1   : > { %v17521_v35 = vpop.f32.mrf.mxu1  ;;  %v17592_v59 = vpop.f32.mrf.mxu0  ;;  %v12186_v12 = vrot.slane %v11958_v2, %v20609_v29  ;;  %v13721_v34 = vrot.slane %v13713_v53, %v20609_v29  ;;  %v12764_v63 = vcombine.high %v21608_v58, %v21608_v58 }
 0x4d2   : > { %v13728_v20 = vrot.slane %v13714_v17, %v20609_v29  ;;  %v12193_v7 = vrot.slane %v12179_v44, %v20609_v29 }
 0x4d3   : > { %v11963_v37 = vpop.f32.mrf.mxu1  ;;  %v12548_v57 = vpop.f32.mrf.mxu0  ;;  %v12194_v39 = vcombine.high %v12186_v12, %v12186_v12  ;;  %v13730_v61 = vcombine.low %v12178_v14, %v12186_v12  ;;  %v21621_v23 = vrot.slane %v12764_v63, %v20609_v29 }
 0x4d4   : > { %v21618_v60 = vcombine.low %v13721_v34, %v13728_v20  ;;  %v12195_v48 = vcombine.high %v12193_v7, %v12193_v7  ;;  %v12196_v42 = vcombine.high %v11963_v37, %v11963_v37  ;;  %v12203_v40 = vrot.slane %v11963_v37, %v20609_v29 }
 0x4d5   : > { %v17524_v15 = vpop.f32.mrf.mxu1  ;;  %v17595_v54 = vpop.f32.mrf.mxu0  ;;  %v13737_v45 = vrot.slane %v13730_v61, %v20609_v29  ;;  %v13744_v49 = vrot.slane %v12194_v39, %v20609_v29  ;;  %v12780_v56 = vcombine.high %v21621_v23, %v21621_v23  ;;  %v12781_v1 = vcombine.high %v12548_v57, %v12548_v57 }
 0x4d6   : > { %v13746_v28 = vcombine.low %v12193_v7, %v12195_v48  ;;  %v12210_v32 = vrot.slane %v12196_v42, %v20609_v29  ;;  %v12211_v51 = vcombine.high %v12203_v40, %v12203_v40  ;;  %v12788_v11 = vrot.slane %v12548_v57, %v20609_v29 }
 0x4d7   : > { %v11968_v16 = vpop.f32.mrf.mxu1  ;;  %v12553_v30 = vpop.f32.mrf.mxu0  ;;  %v21626_v31 = vcombine.low %v13737_v45, %v13744_v49  ;;  %v12795_v59 = vrot.slane %v12781_v1, %v20609_v29 }
 0x4d8   : > { %v12212_v18 = vcombine.high %v12210_v32, %v12210_v32  ;;  %v12213_v4 = vcombine.high %v11968_v16, %v11968_v16  ;;  %v13754_v21 = vrot.slane %v13746_v28, %v20609_v29  ;;  %v13747_v53 = vcombine.low %v12203_v40, %v12211_v51 }
 0x4d9   : > { %v17527_v24 = vpop.f32.mrf.mxu1  ;;  %v17598_v55 = vpop.f32.mrf.mxu0  ;;  %v12220_v2 = vrot.slane %v11968_v16, %v20609_v29  ;;  %v12798_v17 = vcombine.high %v12553_v30, %v12553_v30  ;;  %v12796_v12 = vcombine.high %v12788_v11, %v12788_v11  ;;  %v14183_v34 = vcombine.low %v12780_v56, %v12788_v11 }
 0x4da   : > { %v13763_v35 = vcombine.low %v12210_v32, %v12212_v18  ;;  %v13761_v20 = vrot.slane %v13747_v53, %v20609_v29  ;;  %v12227_v7 = vrot.slane %v12213_v4, %v20609_v29  ;;  %v12805_v37 = vrot.slane %v12553_v30, %v20609_v29 }
 0x4db   : > { %v11973_v14 = vpop.f32.mrf.mxu1  ;;  %v12558_v44 = vpop.f32.mrf.mxu0  ;;  %v12228_v63 = vcombine.high %v12220_v2, %v12220_v2  ;;  %v14184_v61 = vcombine.low %v12796_v12, %v12795_v59  ;;  %v14191_v48 = vrot.slane %v14183_v34, %v20609_v29  ;;  %v12797_v15 = vcombine.high %v12795_v59, %v12795_v59 }
 0x4dc   : > { %v21639_v54 = vcombine.low %v13754_v21, %v13761_v20  ;;  %v12229_v45 = vcombine.high %v12227_v7, %v12227_v7  ;;  %v12812_v42 = vrot.slane %v12798_v17, %v20609_v29  ;;  %v12813_v32 = vcombine.high %v12805_v37, %v12805_v37 }
 0x4dd   : > { %v17530_v57 = vpop.f32.mrf.mxu1  ;;  %v17601_v39 = vpop.f32.mrf.mxu0  ;;  %v13764_v49 = vcombine.low %v12220_v2, %v12228_v63  ;;  %v14198_v16 = vrot.slane %v14184_v61, %v20609_v29  ;;  %v14200_v56 = vcombine.low %v12797_v15, %v12805_v37  ;;  %v12230_v51 = vcombine.high %v11973_v14, %v11973_v14 }
 0x4de   : > { %23419 = vst [vmem:[#allocation10_spill] sm:$0xff] %v21639_v54  ;;  %v13771_v30 = vrot.slane %v13763_v35, %v20609_v29  ;;  %v13780_v55 = vcombine.low %v12227_v7, %v12229_v45  ;;  %v12237_v18 = vrot.slane %v11973_v14, %v20609_v29  ;;  %v14201_v21 = vcombine.low %v12813_v32, %v12812_v42 }
 0x4df   : > { %v11978_v28 = vpop.f32.mrf.mxu1  ;;  %v12563_v40 = vpop.f32.mrf.mxu0  ;;  %v13778_v24 = vrot.slane %v13764_v49, %v20609_v29  ;;  %v21646_v4 = vcombine.low %v14191_v48, %v14198_v16  ;;  %v12244_v53 = vrot.slane %v12230_v51, %v20609_v29  ;;  %v12814_v2 = vcombine.high %v12812_v42, %v12812_v42 }
 0x4e0   : > { %v14208_v59 = vrot.slane %v14200_v56, %v20609_v29  ;;  %v12245_v12 = vcombine.high %v12237_v18, %v12237_v18  ;;  %v12815_v34 = vcombine.high %v12558_v44, %v12558_v44  ;;  %v14215_v7 = vrot.slane %v14201_v21, %v20609_v29 }
 0x4e1   : > { %v17533_v1 = vpop.f32.mrf.mxu1  ;;  %v17604_v11 = vpop.f32.mrf.mxu0  ;;  %23420 = vst [vmem:[#allocation9_spill] sm:$0xff] %v21646_v4  ;;  %v21649_v17 = vcombine.low %v13771_v30, %v13778_v24  ;;  %v12246_v63 = vcombine.high %v12244_v53, %v12244_v53  ;;  %v12822_v14 = vrot.slane %v12558_v44, %v20609_v29  ;;  %v12247_v37 = vcombine.high %v11978_v28, %v11978_v28 }
 0x4e2   : > { %v13781_v57 = vcombine.low %v12237_v18, %v12245_v12  ;;  %v12829_v39 = vrot.slane %v12815_v34, %v20609_v29  ;;  %v12254_v61 = vrot.slane %v11978_v28, %v20609_v29  ;;  %v12832_v48 = vcombine.high %v12563_v40, %v12563_v40 }
 0x4e3   : > { %23421 = vst [vmem:[#allocation19_spill] sm:$0xff] %v21649_v17  ;;  %v11983_v35 = vpop.f32.mrf.mxu1  ;;  %v12568_v20 = vpop.f32.mrf.mxu0  ;;  %v21656_v49 = vcombine.low %v14208_v59, %v14215_v7  ;;  %v13797_v42 = vcombine.low %v12244_v53, %v12246_v63  ;;  %v12830_v16 = vcombine.high %v12822_v14, %v12822_v14  ;;  %v14217_v32 = vcombine.low %v12814_v2, %v12822_v14 }
 0x4e4   : > { %v13788_v56 = vrot.slane %v13780_v55, %v20609_v29  ;;  %v13795_v51 = vrot.slane %v13781_v57, %v20609_v29  ;;  %v12261_v44 = vrot.slane %v12247_v37, %v20609_v29  ;;  %v12262_v30 = vcombine.high %v12254_v61, %v12254_v61 }
 0x4e5   : > { %v17536_v15 = vpop.f32.mrf.mxu1  ;;  %v17607_v45 = vpop.f32.mrf.mxu0  ;;  %23422 = vst [vmem:[#allocation15_spill] sm:$0xff] %v21656_v49  ;;  %v14218_v1 = vcombine.low %v12830_v16, %v12829_v39  ;;  %v13804_v28 = vrot.slane %v13797_v42, %v20609_v29  ;;  %v13811_v11 = vrot.slane %v12254_v61, %v20609_v29  ;;  %v12831_v21 = vcombine.high %v12829_v39, %v12829_v39 }
 0x4e6   : > { %v21663_v59 = vcombine.low %v13788_v56, %v13795_v51  ;;  %v14225_v53 = vrot.slane %v14217_v32, %v20609_v29  ;;  %v21667_v2 = vrot.slane %v12563_v40, %v20609_v29  ;;  %v12846_v55 = vrot.slane %v12832_v48, %v20609_v29 }
 0x4e7   : > { %v11988_v24 = vpop.f32.mrf.mxu1  ;;  %v12573_v18 = vpop.f32.mrf.mxu0  ;;  %v14232_v7 = vrot.slane %v14218_v1, %v20609_v29  ;;  %v21671_v63 = vcombine.low %v13804_v28, %v13811_v11  ;;  %v12263_v14 = vcombine.high %v12261_v44, %v12261_v44  ;;  %v12264_v37 = vcombine.high %v11983_v35, %v11983_v35 }
 0x4e8   : > { %23423 = vst [vmem:[#allocation7_spill] sm:$0xff] %v21663_v59  ;;  %v13813_v57 = vcombine.low %v12262_v30, %v12261_v44  ;;  %v12848_v61 = vcombine.high %v12846_v55, %v12846_v55  ;;  %v21674_v39 = vcombine.low %v12831_v21, %v21667_v2  ;;  %v12271_v48 = vrot.slane %v11983_v35, %v20609_v29 }
 0x4e9   : > { %v17539_v12 = vpop.f32.mrf.mxu1  ;;  %v17610_v34 = vpop.f32.mrf.mxu0  ;;  %23424 = vst [vmem:[#allocation34_spill] sm:$0xff] %v21671_v63  ;;  %v21680_v40 = vcombine.low %v14225_v53, %v14232_v7  ;;  %v12278_v42 = vrot.slane %v12264_v37, %v20609_v29  ;;  %v12849_v16 = vcombine.high %v12568_v20, %v12568_v20  ;;  %v12696_v32 = vcombine.high %v21557_v0, %v21557_v0 }
 0x4ea   : > { %v12856_v56 = vrot.slane %v12568_v20, %v20609_v29  ;;  %v14251_v30 = vcombine.low %v12846_v55, %v12848_v61  ;;  %v12279_v1 = vcombine.high %v12271_v48, %v12271_v48  ;;  %v13814_v28 = vcombine.low %v12263_v14, %v12271_v48 }
 0x4eb   : > { %v21676_v15 = vpop.f32.mrf.mxu1  ;;  %v21678_v45 = vpop.f32.mrf.mxu0  ;;  %23425 = vst [vmem:[#allocation42_spill] sm:$0xff] %v21680_v40  ;;  %v12863_v11 = vrot.slane %v12849_v16, %v20609_v29  ;;  %v13821_v21 = vrot.slane %v13813_v57, %v20609_v29  ;;  %v12280_v12 = vcombine.high %v12278_v42, %v12278_v42  ;;  %v12281_v35 = vcombine.high %v11988_v24, %v11988_v24 }
 0x4ec   : > { %v12864_v53 = vcombine.high %v12856_v56, %v12856_v56  ;;  %v13828_v37 = vrot.slane %v13814_v28, %v20609_v29  ;;  %v13830_v0 = vcombine.low %v12279_v1, %v12278_v42  ;;  %v12288_v20 = vrot.slane %v11988_v24, %v20609_v29 }
 0x4ed   : > { %v17542_v51 = vpop.f32.mrf.mxu1  ;;  %v17613_v44 = vpop.f32.mrf.mxu0  ;;  %v12865_v8 = vcombine.high %v12863_v11, %v12863_v11  ;;  %v12295_v55 = vrot.slane %v12281_v35, %v20609_v29  ;;  %v12866_v14 = vcombine.high %v12573_v18, %v12573_v18  ;;  %v12873_v61 = vrot.slane %v12573_v18, %v20609_v29 }
 0x4ee   : > { %v14252_v51 = vcombine.low %v12856_v56, %v12864_v53  ;;  %v14259_v16 = vrot.slane %v14251_v30, %v20609_v29  ;;  %v21696_v44 = vcombine.low %v13821_v21, %v13828_v37  ;;  %v12296_v10 = vcombine.high %v12288_v20, %v12288_v20 }
 0x4ef   : > { %v21689_v34 = vpop.f32.mrf.mxu1  ;;  %v12583_v7 = vpop.f32.mrf.mxu0  ;;  %v14268_v5 = vcombine.low %v12863_v11, %v12865_v8  ;;  %v13831_v42 = vcombine.low %v12280_v12, %v12288_v20  ;;  %v12880_v1 = vrot.slane %v12866_v14, %v20609_v29  ;;  %v12881_v24 = vcombine.high %v12873_v61, %v12873_v61 }
 0x4f0   : > { %23426 = vst [vmem:[#allocation43_spill] sm:$0xff] %v21696_v44  ;;  %v14266_v28 = vrot.slane %v14252_v51, %v20609_v29  ;;  %v13838_v18 = vrot.slane %v13830_v0, %v20609_v29  ;;  %v12297_v35 = vcombine.high %v12295_v55, %v12295_v55  ;;  %v12710_v12 = vrot.slane %v12696_v32, %v20609_v29 }
 0x4f1   : > { %v17545_v48 = vpop.f32.mrf.mxu1  ;;  %v17616_v57 = vpop.f32.mrf.mxu0  ;;  %v13845_v30 = vrot.slane %v13831_v42, %v20609_v29  ;;  %v12882_v21 = vcombine.high %v12880_v1, %v12880_v1  ;;  %v14269_v8 = vcombine.low %v12873_v61, %v12881_v24  ;;  %v13847_v20 = vcombine.low %v12296_v10, %v12295_v55 }
 0x4f2   : > { %v21705_v48 = vcombine.low %v14259_v16, %v14266_v28  ;;  %v21711_v51 = vrot.slane %v21676_v15, %v20609_v29  ;;  %v14276_v14 = vrot.slane %v14268_v5, %v20609_v29  ;;  %v12890_v16 = vrot.slane %v21678_v45, %v20609_v29 }
 0x4f3   : > { %v21700_v56 = vpop.f32.mrf.mxu1  ;;  %v21702_v53 = vpop.f32.mrf.mxu0  ;;  %v21714_v57 = vcombine.low %v13838_v18, %v13845_v30  ;;  %v14283_v0 = vrot.slane %v14269_v8, %v20609_v29  ;;  %v12713_v10 = vcombine.high %v21583_v33, %v21583_v33  ;;  %v14285_v42 = vcombine.low %v12880_v1, %v12882_v21 }
 0x4f4   : > { %23427 = vst [vmem:[#allocation45_spill] sm:$0xff] %v21705_v48  ;;  %v13848_v32 = vcombine.low %v12297_v35, %v21711_v51  ;;  %v12898_v5 = vcombine.high %v12890_v16, %v12890_v16  ;;  %v12730_v30 = vcombine.high %v21598_v19, %v21598_v19  ;;  %v13855_v8 = vrot.slane %v13847_v20, %v20609_v29 }
 0x4f5   : > { %v17548_v11 = vpop.f32.mrf.mxu1  ;;  %v17619_v37 = vpop.f32.mrf.mxu0  ;;  %23428 = vst [vmem:[#allocation44_spill] sm:$0xff] %v21714_v57  ;;  %v21726_v55 = vcombine.low %v14276_v14, %v14283_v0  ;;  %v16787_v3 = vcombine.high %v12710_v12, %v12710_v12  ;;  %v12900_v36 = vcombine.high %v12583_v7, %v12583_v7  ;;  %v12720_v1 = vrot.slane %v21583_v33, %v20609_v29 }
 0x4f6   : > { %v13862_v11 = vrot.slane %v13848_v32, %v20609_v29  ;;  %v12711_v37 = vcombine.high %v21569_v50, %v21569_v50  ;;  %v14286_v41 = vcombine.low %v12890_v16, %v12898_v5  ;;  %v12727_v21 = vrot.slane %v12713_v10, %v20609_v29 }
 0x4f7   : > { %v21719_v28 = vpop.f32.mrf.mxu1  ;;  %v21721_v61 = vpop.f32.mrf.mxu0  ;;  %23429 = vst [vmem:[#allocation112_spill] sm:$0xff] %v21726_v55  ;;  %v21744_v20 = vrot.slane %v12583_v7, %v20609_v29  ;;  %v12747_v50 = vcombine.high %v21602_v38, %v21602_v38  ;;  %v14293_v16 = vrot.slane %v14285_v42, %v20609_v29  ;;  %v12914_v5 = vrot.slane %v12900_v36, %v20609_v29 }
 0x4f8   : > { %v21741_v0 = vcombine.low %v13855_v8, %v13862_v11  ;;  %v14300_v32 = vrot.slane %v14286_v41, %v20609_v29  ;;  %v12744_v33 = vrot.slane %v12730_v30, %v20609_v29  ;;  %v21754_v8 = vcombine.low %v12711_v37, %v12710_v12 }
 0x4f9   : > { %v17551_v24 = vpop.f32.mrf.mxu1  ;;  %v17622_v18 = vpop.f32.mrf.mxu0  ;;  %v12915_v10 = vcombine.high %v21744_v20, %v21744_v20  ;;  %v21757_v7 = vrot.slane %v16787_v3, %v20609_v29  ;;  %v12728_v41 = vcombine.high %v12720_v1, %v12720_v1  ;;  %v12729_v36 = vcombine.high %v12727_v21, %v12727_v21 }
 0x4fa   : > { %23430 = vst [vmem:[#allocation109_spill] sm:$0xff] %v21741_v0  ;;  %v21759_v11 = vcombine.low %v14293_v16, %v14300_v32  ;;  %v12737_v30 = vrot.slane %v21598_v19, %v20609_v29  ;;  %v12917_v12 = vcombine.high %v21702_v53, %v21702_v53  ;;  %v12746_v25 = vcombine.high %v12744_v33, %v12744_v33 }
 0x4fb   : > { %v21734_v35 = vpop.f32.mrf.mxu1  ;;  %v21736_v14 = vpop.f32.mrf.mxu0  ;;  %v14319_v16 = vcombine.low %v12915_v10, %v12914_v5  ;;  %v12924_v32 = vrot.slane %v21702_v53, %v20609_v29  ;;  %v12754_v19 = vrot.slane %v21602_v38, %v20609_v29  ;;  %v12934_v0 = vcombine.high %v21721_v61, %v21721_v61 }
 0x4fc   : > { %23431 = vst [vmem:[#allocation113_spill] sm:$0xff] %v21759_v11  ;;  %v12745_v53 = vcombine.high %v12737_v30, %v12737_v30  ;;  %v14133_v17 = vcombine.low %v12744_v33, %v12746_v25  ;;  %v12771_v38 = vrot.slane %v21608_v58, %v20609_v29  ;;  %v14174_v63 = vcombine.low %v21621_v23, %v21621_v23 }
 0x4fd   : > { %v17554_v24 = vpop.f32.mrf.mxu1  ;;  %v17625_v18 = vpop.f32.mrf.mxu0  ;;  %v12932_v10 = vcombine.high %v12924_v32, %v12924_v32  ;;  %v12298_v23 = vcombine.high %v21676_v15, %v21676_v15 }
 0x4fe   : > { %v12916_v24 = vcombine.high %v12914_v5, %v12914_v5  ;;  %v12761_v18 = vrot.slane %v12747_v50, %v20609_v29  ;;  %v12931_v50 = vrot.slane %v12917_v12, %v20609_v29  ;;  %v14116_v5 = vcombine.low %v12727_v21, %v12729_v36 }
 0x4ff   : > { %v21761_v9 = vpop.f32.mrf.mxu1  ;;  %v21763_v42 = vpop.f32.mrf.mxu0  ;;  %v14327_v12 = vrot.slane %v14319_v16, %v20609_v29  ;;  %v12948_v36 = vrot.slane %v12934_v0, %v20609_v29  ;;  %v12779_v0 = vcombine.high %v12771_v38, %v12771_v38  ;;  %v21831_v15 = vrot.slane %v14174_v63, %v20609_v29 }
 0x500   : > { %v14320_v55 = vcombine.low %v12916_v24, %v12924_v32  ;;  %v12763_v48 = vcombine.high %v12761_v18, %v12761_v18  ;;  %v12933_v11 = vcombine.high %v12931_v50, %v12931_v50  ;;  %v14336_v21 = vcombine.low %v12932_v10, %v12931_v50 }
 0x501   : > { %v17557_v37 = vpop.f32.mrf.mxu1  ;;  %v17628_v3 = vpop.f32.mrf.mxu0  ;;  %23434 = vst [vmem:[#allocation50_spill] sm:$0xff] %v21831_v15  ;;  %v12312_v63 = vrot.slane %v12298_v23, %v20609_v29 }
 0x502   : > { %v14115_v3 = vcombine.low %v12720_v1, %v12728_v41  ;;  %v14334_v54 = vrot.slane %v14320_v55, %v20609_v29  ;;  %v12762_v1 = vcombine.high %v12754_v19, %v12754_v19  ;;  %v12941_v41 = vrot.slane %v21721_v61, %v20609_v29 }
 0x503   : > { %v21779_v44 = vpop.f32.mrf.mxu1  ;;  %v21781_v37 = vpop.f32.mrf.mxu0  ;;  %v14132_v55 = vcombine.low %v12737_v30, %v12745_v53  ;;  %v14150_v33 = vcombine.low %v12761_v18, %v12763_v48 }
 0x504   : > { %v14123_v25 = vrot.slane %v14115_v3, %v20609_v29  ;;  %v21798_v58 = vcombine.low %v14327_v12, %v14334_v54  ;;  %v12949_v16 = vcombine.high %v12941_v41, %v12941_v41  ;;  %v14337_v50 = vcombine.low %v12933_v11, %v12941_v41 }
 0x505   : > { %v17560_v57 = vpop.f32.mrf.mxu1  ;;  %v17631_v59 = vpop.f32.mrf.mxu0  ;;  %v12950_v3 = vcombine.high %v12948_v36, %v12948_v36  ;;  %v14147_v54 = vrot.slane %v14133_v17, %v20609_v29  ;;  %v14344_v12 = vrot.slane %v14336_v21, %v20609_v29  ;;  %v21820_v41 = vrot.slane %v21736_v14, %v20609_v29 }
 0x506   : > { %v14130_v59 = vrot.slane %v14116_v5, %v20609_v29  ;;  %23432 = vst [vmem:[#allocation110_spill] sm:$0xff] %v21798_v58  ;;  %v12366_v57 = vcombine.high %v21734_v35, %v21734_v35  ;;  %v14149_v5 = vcombine.low %v12754_v19, %v12762_v1  ;;  %v14351_v30 = vrot.slane %v14337_v50, %v20609_v29 }
 0x507   : > { %v21792_v24 = vpop.f32.mrf.mxu1  ;;  %v21794_v32 = vpop.f32.mrf.mxu0  ;;  %v14353_v53 = vcombine.low %v12949_v16, %v12948_v36  ;;  %v14140_v17 = vrot.slane %v14132_v55, %v20609_v29  ;;  %v14164_v19 = vrot.slane %v14150_v33, %v20609_v29  ;;  %v14354_v36 = vcombine.low %v12950_v3, %v21820_v41 }
 0x508   : > { %v21805_v49 = vrot.slane %v12366_v57, %v20609_v29  ;;  %v21814_v18 = vcombine.low %v14123_v25, %v14130_v59  ;;  %v21824_v1 = vcombine.low %v14344_v12, %v14351_v30  ;;  %v21828_v59 = vcombine.low %v12771_v38, %v12779_v0 }
 0x509   : > { %v17563_v61 = vpop.f32.mrf.mxu1  ;;  %v17634_v10 = vpop.f32.mrf.mxu0  ;;  %v12383_v16 = vcombine.high %v21761_v9, %v21761_v9  ;;  %v21836_v55 = vcombine.low %v14140_v17, %v14147_v54  ;;  %v14157_v33 = vrot.slane %v14149_v5, %v20609_v29  ;;  %v12883_v50 = vcombine.high %v21678_v45, %v21678_v45 }
 0x50a   : > { %23433 = vst [vmem:[#allocation23_spill] sm:$0xff] %v21824_v1  ;;  %v12382_v21 = vcombine.high %v21805_v49, %v21805_v49  ;;  %v12390_v61 = vrot.slane %v21761_v9, %v20609_v29  ;;  %v14361_v10 = vrot.slane %v14353_v53, %v20609_v29  ;;  %v14368_v0 = vrot.slane %v14354_v36, %v20609_v29 }
 0x50b   : > { %v21810_v48 = vpop.f32.mrf.mxu1  ;;  %v21812_v11 = vpop.f32.mrf.mxu0  ;;  %v12397_v3 = vrot.slane %v12383_v16, %v20609_v29  ;;  %v12313_v54 = vcombine.high %v21711_v51, %v21711_v51  ;;  %v12315_v5 = vcombine.high %v21689_v34, %v21689_v34  ;;  %v21853_v9 = vcombine.low %v14157_v33, %v14164_v19 }
 0x50c   : > { %v12398_v45 = vcombine.high %v12390_v61, %v12390_v61  ;;  %v13947_v12 = vcombine.low %v12382_v21, %v12390_v61  ;;  %v21859_v17 = vcombine.low %v14361_v10, %v14368_v0  ;;  %v12897_v51 = vrot.slane %v12883_v50, %v20609_v29 }
 0x50d   : > { %v17566_v57 = vpop.f32.mrf.mxu1  ;;  %v17637_v25 = vpop.f32.mrf.mxu0  ;;  %v12314_v19 = vcombine.high %v12312_v63, %v12312_v63  ;;  %v12399_v16 = vcombine.high %v12397_v3, %v12397_v3  ;;  %v12400_v33 = vcombine.high %v21779_v44, %v21779_v44  ;;  %v12407_v61 = vrot.slane %v21779_v44, %v20609_v29 }
 0x50e   : > { %23435 = vst [vmem:[#allocation8_spill] sm:$0xff] %v21859_v17  ;;  %v16788_v57 = vcombine.high %v21667_v2, %v21667_v2  ;;  %v12322_v25 = vrot.slane %v21689_v34, %v20609_v29  ;;  %v13948_v21 = vcombine.low %v12398_v45, %v12397_v3  ;;  %v13864_v10 = vcombine.low %v12313_v54, %v12312_v63 }
 0x50f   : > { %v21843_v38 = vpop.f32.mrf.mxu1  ;;  %v12329_v0 = vrot.slane %v12315_v5, %v20609_v29  ;;  %v13955_v2 = vrot.slane %v13947_v12, %v20609_v29  ;;  %v12414_v45 = vrot.slane %v12400_v33, %v20609_v29  ;;  %v12415_v3 = vcombine.high %v12407_v61, %v12407_v61 }
 0x510   : > { %v13962_v50 = vrot.slane %v13948_v21, %v20609_v29  ;;  %v13964_v53 = vcombine.low %v12399_v16, %v12407_v61  ;;  %v21879_v23 = vrot.slane %v16788_v57, %v20609_v29  ;;  %v12899_v17 = vcombine.high %v12897_v51, %v12897_v51 }
 0x511   : > { %v17642_v30 = vpop.f32.mrf.mxu1  ;;  %v12330_v44 = vcombine.high %v12322_v25, %v12322_v25  ;;  %v12332_v5 = vcombine.high %v21700_v56, %v21700_v56  ;;  %v13965_v12 = vcombine.low %v12415_v3, %v12414_v45  ;;  %v12416_v21 = vcombine.high %v12414_v45, %v12414_v45 }
 0x512   : > { %23436 = vst [vmem:[#allocation14_spill] sm:$0xff] %v21879_v23  ;;  %v21881_v63 = vcombine.low %v13955_v2, %v13962_v50  ;;  %v13871_v33 = vrot.slane %v13864_v10, %v20609_v29  ;;  %v13878_v16 = vrot.slane %v12314_v19, %v20609_v29  ;;  %v12331_v57 = vcombine.high %v12329_v0, %v12329_v0 }
 0x513   : > { %v21866_v36 = vpop.f32.mrf.mxu1  ;;  %v12424_v61 = vrot.slane %v21792_v24, %v20609_v29  ;;  %v14310_v50 = vcombine.low %v21744_v20, %v21744_v20  ;;  %v13972_v34 = vrot.slane %v13964_v53, %v20609_v29  ;;  %v13979_v3 = vrot.slane %v13965_v12, %v20609_v29 }
 0x514   : > { %23437 = vst [vmem:[#allocation25_spill] sm:$0xff] %v21881_v63  ;;  %v21898_v63 = vcombine.low %v12897_v51, %v12899_v17  ;;  %v13880_v1 = vcombine.low %v12322_v25, %v12330_v44  ;;  %v12349_v17 = vcombine.high %v21719_v28, %v21719_v28  ;;  %v12440_v25 = vrot.slane %v21810_v48, %v20609_v29 }
 0x515   : > { %v17645_v30 = vpop.f32.mrf.mxu1  ;;  %v12432_v10 = vcombine.high %v12424_v61, %v12424_v61  ;;  %v13981_v58 = vcombine.low %v12416_v21, %v12424_v61  ;;  %v21905_v15 = vcombine.low %v13972_v34, %v13979_v3  ;;  %v21913_v12 = vcombine.low %v13871_v33, %v13878_v16 }
 0x516   : > { %v12417_v30 = vcombine.high %v21792_v24, %v21792_v24  ;;  %23438 = vst [vmem:[#allocation11_spill] sm:$0xff] %v21898_v63  ;;  %v12339_v24 = vrot.slane %v21700_v56, %v20609_v29  ;;  %v13881_v21 = vcombine.low %v12329_v0, %v12331_v57  ;;  %v21916_v56 = vrot.slane %v14310_v50, %v20609_v29 }
 0x517   : > { %v21883_v54 = vpop.f32.mrf.mxu1  ;;  %23439 = vst [vmem:[#allocation56_spill] sm:$0xff] %v21905_v15  ;;  %23440 = vst [vmem:[#allocation53_spill] sm:$0xff] %v21913_v12  ;;  %v12356_v34 = vrot.slane %v21719_v28, %v20609_v29  ;;  %v12441_v61 = vcombine.high %v12440_v25, %v12440_v25  ;;  %v13888_v33 = vrot.slane %v13880_v1, %v20609_v29 }
 0x518   : > { %v12431_v45 = vrot.slane %v12417_v30, %v20609_v29  ;;  %23441 = vst [vmem:[#allocation52_spill] sm:$0xff] %v21916_v56  ;;  %v12347_v0 = vcombine.high %v12339_v24, %v12339_v24  ;;  %v12363_v57 = vrot.slane %v12349_v17, %v20609_v29  ;;  %v13247_v1 = vcombine.high %v21866_v36, %v21866_v36 }
 0x519   : > { %v17648_v2 = vpop.f32.mrf.mxu1  ;;  %v12373_v48 = vrot.slane %v21734_v35, %v20609_v29 }
 0x51a   : > { %v12346_v2 = vrot.slane %v12332_v5, %v20609_v29  ;;  %v12433_v20 = vcombine.high %v12431_v45, %v12431_v45  ;;  %v13982_v51 = vcombine.low %v12432_v10, %v12431_v45  ;;  %v13989_v5 = vrot.slane %v13981_v58, %v20609_v29 }
 0x51b   : > { %v21900_v19 = vpop.f32.mrf.mxu1  ;;  %v14012_v58 = vrot.slane %v12441_v61, %v20609_v29  ;;  %v13261_v53 = vrot.slane %v13247_v1, %v20609_v29 }
 0x51c   : > { %v13996_v30 = vrot.slane %v13982_v51, %v20609_v29  ;;  %v13998_v3 = vcombine.low %v12433_v20, %v12440_v25  ;;  %v12348_v16 = vcombine.high %v12346_v2, %v12346_v2  ;;  %v12364_v51 = vcombine.high %v12356_v34, %v12356_v34 }
 0x51d   : > { %v17651_v44 = vpop.f32.mrf.mxu1  ;;  %v13230_v20 = vcombine.high %v21843_v38, %v21843_v38  ;;  %v13237_v25 = vrot.slane %v21843_v38, %v20609_v29  ;;  %v13254_v38 = vrot.slane %v21866_v36, %v20609_v29  ;;  %v13288_v36 = vrot.slane %v21900_v19, %v20609_v29 }
 0x51e   : > { %v21928_v50 = vcombine.low %v13989_v5, %v13996_v30  ;;  %v14005_v28 = vrot.slane %v13998_v3, %v20609_v29  ;;  %v13895_v44 = vrot.slane %v13881_v21, %v20609_v29  ;;  %v13264_v30 = vcombine.high %v21883_v54, %v21883_v54 }
 0x51f   : > { %v21922_v45 = vpop.f32.mrf.mxu1  ;;  %v21947_v3 = vcombine.low %v12339_v24, %v12347_v0  ;;  %v12365_v21 = vcombine.high %v12363_v57, %v12363_v57  ;;  %v13244_v24 = vrot.slane %v13230_v20, %v20609_v29  ;;  %v12951_v0 = vcombine.high %v21736_v14, %v21736_v14 }
 0x520   : > { %23442 = vst [vmem:[#allocation18_spill] sm:$0xff] %v21928_v50  ;;  %v21941_v5 = vcombine.low %v14005_v28, %v14012_v58  ;;  %v13271_v28 = vrot.slane %v21883_v54, %v20609_v29  ;;  %v13278_v58 = vrot.slane %v13264_v30, %v20609_v29  ;;  %v21959_v50 = vcombine.low %v12356_v34, %v12364_v51 }
 0x521   : > { %v17654_v10 = vpop.f32.mrf.mxu1  ;;  %v13281_v35 = vcombine.high %v21900_v19, %v21900_v19  ;;  %v21968_v15 = vcombine.low %v13888_v33, %v13895_v44  ;;  %v13263_v34 = vcombine.high %v13261_v53, %v13261_v53  ;;  %v13296_v51 = vcombine.high %v13288_v36, %v13288_v36 }
 0x522   : > { %23443 = vst [vmem:[#allocation57_spill] sm:$0xff] %v21941_v5  ;;  %v21949_v10 = vcombine.low %v12346_v2, %v12348_v16  ;;  %v13245_v2 = vcombine.high %v13237_v25, %v13237_v25  ;;  %v13279_v16 = vcombine.high %v13271_v28, %v13271_v28  ;;  %v13280_v1 = vcombine.high %v13278_v58, %v13278_v58 }
 0x523   : > { %v21945_v61 = vpop.f32.mrf.mxu1  ;;  %23444 = vst [vmem:[#allocation58_spill] sm:$0xff] %v21968_v15  ;;  %v21972_v30 = vcombine.low %v12363_v57, %v12365_v21  ;;  %v12381_v5 = vcombine.high %v12373_v48, %v12373_v48  ;;  %v13246_v14 = vcombine.high %v13244_v24, %v13244_v24  ;;  %v14520_v4 = vcombine.low %v13288_v36, %v13296_v51 }
 0x524   : > { %v14519_v12 = vcombine.low %v13278_v58, %v13280_v1  ;;  %v14476_v63 = vcombine.low %v13237_v25, %v13245_v2  ;;  %v14503_v56 = vcombine.low %v13271_v28, %v13279_v16  ;;  %v13912_v19 = vrot.slane %v21949_v10, %v20609_v29 }
 0x525   : > { %v17657_v17 = vpop.f32.mrf.mxu1  ;;  %v13922_v33 = vrot.slane %v21959_v50, %v20609_v29  ;;  %v12965_v44 = vrot.slane %v12951_v0, %v20609_v29  ;;  %v13295_v15 = vrot.slane %v13281_v35, %v20609_v29  ;;  %v12968_v57 = vcombine.high %v21763_v42, %v21763_v42 }
 0x526   : > { %v13262_v17 = vcombine.high %v13254_v38, %v13254_v38  ;;  %v14534_v25 = vrot.slane %v14520_v4, %v20609_v29  ;;  %v13929_v28 = vrot.slane %v21972_v30, %v20609_v29  ;;  %v13931_v58 = vcombine.low %v12373_v48, %v12381_v5 }
 0x527   : > { %v13123_v54 = vpop.f32.mrf.mxu1  ;;  %v13945_v10 = vrot.slane %v21805_v49, %v20609_v29  ;;  %v14527_v50 = vrot.slane %v14519_v12, %v20609_v29  ;;  %v14483_v36 = vrot.slane %v14476_v63, %v20609_v29  ;;  %v14485_v0 = vcombine.low %v13244_v24, %v13246_v14 }
 0x528   : > { %v14486_v21 = vcombine.low %v13254_v38, %v13262_v17  ;;  %v14517_v16 = vrot.slane %v14503_v56, %v20609_v29  ;;  %v13332_v1 = vcombine.high %v13123_v54, %v13123_v54  ;;  %v16789_v4 = vcombine.high %v12965_v44, %v12965_v44 }
 0x529   : > { %v17660_v23 = vpop.f32.mrf.mxu1  ;;  %v14542_v38 = vrot.slane %v13295_v15, %v20609_v29  ;;  %v14535_v35 = vcombine.low %v14527_v50, %v14534_v25  ;;  %v12975_v49 = vrot.slane %v21763_v42, %v20609_v29  ;;  %v12982_v12 = vrot.slane %v12968_v57, %v20609_v29 }
 0x52a   : > { %v14502_v23 = vcombine.low %v13261_v53, %v13263_v34  ;;  %v12966_v53 = vcombine.high %v21820_v41, %v21820_v41  ;;  %v14500_v63 = vrot.slane %v14486_v21, %v20609_v29  ;;  %v12985_v56 = vcombine.high %v21781_v37, %v21781_v37 }
 0x52b   : > { %v13128_v20 = vpop.f32.mrf.mxu1  ;;  %v13297_v24 = vcombine.high %v13295_v15, %v13295_v15  ;;  %v22004_v41 = vrot.slane %v21922_v45, %v20609_v29  ;;  %v14927_v17 = vpack.c.bf16 %v14542_v38, %v14535_v35  ;;  %v14484_v51 = vcombine.low %v14483_v36, %v14483_v36 }
 0x52c   : > { %v14510_v5 = vrot.slane %v14502_v23, %v20609_v29  ;;  %v14493_v30 = vrot.slane %v14485_v0, %v20609_v29  ;;  %v13346_v14 = vrot.slane %v13332_v1, %v20609_v29  ;;  %v13938_v57 = vrot.slane %v13931_v58, %v20609_v29 }
 0x52d   : > { %v17663_v2 = vpop.f32.mrf.mxu1  ;;  %v22009_v21 = vcombine.low %v12966_v53, %v12965_v44  ;;  %v14980_v23 = vsel %vm8932_vm13, %v14927_v17, 0  ;;  %v13349_v25 = vcombine.high %v13128_v20, %v13128_v20  ;;  %v12983_v50 = vcombine.high %v12975_v49, %v12975_v49 }
 0x52e   : > { %v14518_v42 = vcombine.low %v14510_v5, %v14517_v16  ;;  %v12984_v2 = vcombine.high %v12982_v12, %v12982_v12  ;;  %v14501_v40 = vcombine.low %v14493_v30, %v14500_v63  ;;  %v22015_v38 = vrot.slane %v13123_v54, %v20609_v29  ;;  %17710 = vmatpush3.bf16.msra.mxu0 %v14980_v23 }
 0x52f   : > { %v21993_v48 = vpop.f32.mrf.mxu1  ;;  %v12999_v36 = vrot.slane %v12985_v56, %v20609_v29  ;;  %v14543_v0 = vcombine.low %v13297_v24, %v22004_v41  ;;  %v13315_v44 = vcombine.high %v21945_v61, %v21945_v61  ;;  %v13363_v58 = vrot.slane %v13349_v25, %v20609_v29  ;;  %17711 = vmatprep.subr.bf16.mxu0 %v23233_v52 }
 0x530   : > { %v13348_v1 = vcombine.high %v13346_v14, %v13346_v14  ;;  %v22024_v53 = vrot.slane %v13128_v20, %v20609_v29  ;;  %v14926_v35 = vpack.c.bf16 %v14518_v42, %v14501_v40  ;;  %v23445_v54 = vrot.slane %v21754_v8, %v20609_v29 }
 0x531   : > { %v17666_v34 = vpop.f32.mrf.mxu1  ;;  %v23446_v5 = vrot.slane %v21947_v3, %v20609_v29  ;;  %v22035_v24 = vcombine.low %v13922_v33, %v13929_v28  ;;  %v22038_v17 = vrot.slane %v16789_v4, %v20609_v29  ;;  %v22042_v20 = vcombine.low %v13938_v57, %v13945_v10 }
 0x532   : > { %v14914_v63 = vsel %vm11007_vm2, %v23445_v54, %v14484_v51  ;;  %v13365_v34 = vcombine.high %v13363_v58, %v13363_v58  ;;  %v13298_v40 = vcombine.high %v21922_v45, %v21922_v45  ;;  %v13347_v8 = vcombine.high %v22015_v38, %v22015_v38  ;;  %17712 = vmatpush3.bf16.msra.mxu0 %v14926_v35 }
 0x533   : > { %v22012_v15 = vpop.f32.mrf.mxu1  ;;  %v22033_v56 = vcombine.low %v23446_v5, %v13912_v19  ;;  %v14925_v3 = vpack.c.bf16 %v14914_v63, %v21580_v26  ;;  %v14387_v33 = vcombine.low %v12975_v49, %v12983_v50  ;;  %v14388_v28 = vcombine.low %v12982_v12, %v12984_v2  ;;  %17713 = vmatprep.subr.bf16.mxu0 %v23233_v52 }
 0x534   : > { %v12992_v4 = vrot.slane %v21781_v37, %v20609_v29  ;;  %v13001_v51 = vcombine.high %v12999_v36, %v12999_v36  ;;  %v14550_v45 = vrot.slane %v14543_v0, %v20609_v29  ;;  %v13329_v42 = vrot.slane %v13315_v44, %v20609_v29 }
 0x535   : > { %v17669_v16 = vpop.f32.mrf.mxu1  ;;  %v14587_v57 = vcombine.low %v13348_v1, %v22024_v53  ;;  %v13002_v49 = vcombine.high %v21794_v32, %v21794_v32  ;;  %v13009_v12 = vrot.slane %v21794_v32, %v20609_v29  ;;  %v14610_v37 = vcombine.low %v13363_v58, %v13365_v34 }
 0x536   : > { %v13312_v25 = vrot.slane %v13298_v40, %v20609_v29  ;;  %v13322_v50 = vrot.slane %v21945_v61, %v20609_v29  ;;  %v14586_v2 = vcombine.low %v13347_v8, %v13346_v14  ;;  %17714 = vmatpush3.bf16.msra.mxu0 %v14925_v3  ;;  %v14395_v44 = vrot.slane %v14387_v33, %v20609_v29 }
 0x537   : > { %v22040_v30 = vpop.f32.mrf.mxu1  ;;  %v14402_v16 = vrot.slane %v14388_v28, %v20609_v29  ;;  %v13000_v1 = vcombine.high %v12992_v4, %v12992_v4  ;;  %17715 = vmatprep.subr.bf16.mxu0 %v23233_v52  ;;  %v14405_v58 = vcombine.low %v12999_v36, %v13001_v51  ;;  %v14551_v54 = vcombine.low %v14550_v45, %v14550_v45 }
 0x538   : > { %v13331_v63 = vcombine.high %v13329_v42, %v13329_v42  ;;  %v14601_v5 = vrot.slane %v14587_v57, %v20609_v29  ;;  %v13016_v61 = vrot.slane %v13002_v49, %v20609_v29  ;;  %v14617_v14 = vrot.slane %v14610_v37, %v20609_v29 }
 0x539   : > { %v17672_v10 = vpop.f32.mrf.mxu1  ;;  %v13017_v3 = vcombine.high %v13009_v12, %v13009_v12  ;;  %v13314_v33 = vcombine.high %v13312_v25, %v13312_v25  ;;  %v13330_v28 = vcombine.high %v13322_v50, %v13322_v50  ;;  %v14594_v36 = vrot.slane %v14586_v2, %v20609_v29 }
 0x53a   : > { %v23447_v10 = vpack.c.bf16 %v21564_v47, %v21532_v6  ;;  %v22086_v51 = vcombine.low %v14395_v44, %v14402_v16  ;;  %v14404_v45 = vcombine.low %v12992_v4, %v13000_v1  ;;  %v13313_v57 = vcombine.high %v22004_v41, %v22004_v41 }
 0x53b   : > { %v13148_v23 = vpop.f32.mrf.mxu1  ;;  %v13364_v49 = vcombine.high %v22024_v53, %v22024_v53  ;;  %v14570_v2 = vcombine.low %v13331_v63, %v22015_v38  ;;  %v23449_v6 = vrot.slane %v21828_v59, %v20609_v29  ;;  %v14618_v4 = vcombine.low %v14617_v14, %v14617_v14 }
 0x53c   : > { %v13417_v0 = vcombine.high %v13148_v23, %v13148_v23  ;;  %v22070_v35 = vrot.slane %v13148_v23, %v20609_v29  ;;  %17716 = vmatpush3.bf16.msra.mxu0 %v23447_v10  ;;  %23448 = vst [vmem:[#allocation55_spill] sm:$0xff] %v22086_v51  ;;  %v14419_v23 = vrot.slane %v14405_v58, %v20609_v29 }
 0x53d   : > { %v17675_v32 = vpop.f32.mrf.mxu1  ;;  %17717 = vmatprep.subr.bf16.mxu0 %v23233_v52  ;;  %v22099_v47 = vsel %vm11007_vm2, %v23449_v6, %v14551_v54  ;;  %v13018_v1 = vcombine.high %v13016_v61, %v13016_v61  ;;  %v22108_v38 = vcombine.low %v13009_v12, %v13017_v3  ;;  %v14569_v58 = vcombine.low %v13330_v28, %v13329_v42 }
 0x53e   : > { %v22076_v34 = vrot.slane %v13417_v0, %v20609_v29  ;;  %v13432_v40 = vcombine.high %v22070_v35, %v22070_v35  ;;  %v14602_v0 = vcombine.low %v14594_v36, %v14601_v5  ;;  %v14553_v32 = vcombine.low %v13314_v33, %v13322_v50 }
 0x53f   : > { %v22080_v8 = vpop.f32.mrf.mxu1  ;;  %v23450_v59 = vpack.c.bf16 %v21589_v62, %v21586_v43  ;;  %v14552_v54 = vcombine.low %v13313_v57, %v13312_v25  ;;  %v14609_v63 = vrot.slane %v13364_v49, %v20609_v29  ;;  %v23451_v14 = vcombine.low %v21757_v7, %v21757_v7  ;;  %v23468_v25 = vld [vmem:[#allocation11_spill] sm:$0xff] }
 0x540   : > { %v14677_v41 = vcombine.low %v13432_v40, %v22076_v34  ;;  %v14412_v12 = vrot.slane %v14404_v45, %v20609_v29  ;;  %v14584_v43 = vrot.slane %v14570_v2, %v20609_v29  ;;  %v13400_v62 = vcombine.high %v22040_v30, %v22040_v30 }
 0x541   : > { %v17678_v37 = vpop.f32.mrf.mxu1  ;;  %17718 = vmatpush3.bf16.msra.mxu0 %v23450_v59  ;;  %v22120_v40 = vsel %vm531_vm4, %v21626_v31, %v23451_v14  ;;  %v13025_v7 = vrot.slane %v21812_v11, %v20609_v29  ;;  %v22136_v31 = vld [vmem:[%s22981_s4] sm:$0xff]   ;;  %v14933_v3 = vpack.c.bf16 %v14609_v63, %v14602_v0  ;;  %v23452_v28 = vrot.slane %v21674_v39, %v20609_v29 }
 0x542   : > { %17719 = vmatprep.subr.bf16.mxu0 %v23233_v52  ;;  %v14684_v50 = vrot.slane %v14677_v41, %v20609_v29  ;;  %v22146_v10 = vcombine.low %v14412_v12, %v14419_v23  ;;  %v22148_v45 = vcombine.low %v13016_v61, %v13018_v1  ;;  %v14567_v11 = vrot.slane %v14553_v32, %v20609_v29  ;;  %v23455_v23 = vld [vmem:[#allocation42_spill] sm:$0xff]  ;;  %v23457_v41 = vld [vmem:[#allocation15_spill] sm:$0xff]  ;;  %v23466_v37 = vld [vmem:[#allocation52_spill] sm:$0xff] }
 0x543   : > { %v22102_v44 = vpop.f32.mrf.mxu1  ;;  %v22144_v36 = vsel %vm11007_vm2, %v23452_v28, %v14618_v4  ;;  %v14577_v57 = vrot.slane %v14569_v58, %v20609_v29  ;;  %v23454_v49 = vpack.c.bf16 %v21536_v22, %v21534_v13  ;;  %v14560_v39 = vrot.slane %v14552_v54, %v20609_v29  ;;  %v23456_v22 = vld [vmem:[#allocation9_spill] sm:$0xff]  ;;  %v23458_v54 = vld [vmem:[#allocation50_spill] sm:$0xff]  ;;  %v23462_v12 = vld [vmem:[#allocation19_spill] sm:$0xff] }
 0x544   : > { %23453 = vst [vmem:[#allocation117_spill] sm:$0xff] %v22146_v10  ;;  %v13366_v2 = vcombine.high %v21993_v48, %v21993_v48  ;;  %v13373_v4 = vrot.slane %v21993_v48, %v20609_v29  ;;  %v13414_v13 = vrot.slane %v13400_v62, %v20609_v29  ;;  %v14685_v32 = vcombine.low %v14684_v50, %v14684_v50  ;;  %v23461_v48 = vld [vmem:[#allocation10_spill] sm:$0xff] }
 0x545   : > { %v17681_v5 = vpop.f32.mrf.mxu1  ;;  %17720 = vmatpush3.bf16.msra.mxu0 %v23454_v49  ;;  %v14585_v6 = vcombine.low %v14577_v57, %v14584_v43  ;;  %v15024_v58 = vsel %vm8932_vm13, %v14933_v3, 0  ;;  %v23459_v63 = vcombine.low %v23458_v54, %v23458_v54  ;;  %v13026_v62 = vcombine.high %v13025_v7, %v13025_v7 }
 0x546   : > { %17725 = vmatprep.subr.bf16.mxu0 %v23233_v52  ;;  %v23460_v5 = vld [vmem:[#allocation34_spill] sm:$0xff]  ;;  %v14568_v28 = vcombine.low %v14560_v39, %v14567_v11  ;;  %v13383_v50 = vcombine.high %v22012_v15, %v22012_v15  ;;  %v13407_v3 = vrot.slane %v22040_v30, %v20609_v29  ;;  %v22187_v57 = vrot.slane %v13366_v2, %v20609_v29  ;;  %v23463_v11 = vld [vmem:[#allocation7_spill] sm:$0xff] }
 0x547   : > { %v22138_v33 = vpop.f32.mrf.mxu1  ;;  %v22178_v14 = vsel %vm531_vm4, %v23460_v5, %v23459_v63  ;;  %v13381_v54 = vcombine.high %v13373_v4, %v13373_v4  ;;  %v13416_v63 = vcombine.high %v13414_v13, %v13414_v13  ;;  %v23464_v30 = vld [vmem:[#allocation110_spill] sm:$0xff]  ;;  %v23469_v39 = vrot.slane %v23468_v25, %v20609_v29 }
 0x548   : > { %17722 = vmatmul.mubr.msk.bf16.vlgmr.msra.gmra.mxu0 %vm14975_vm0, %v22136_v31  ;;  %v14932_v5 = vpack.c.bf16 %v14585_v6, %v14568_v28  ;;  %v22213_v28 = vcombine.low %v13025_v7, %v13026_v62  ;;  %v13390_v43 = vrot.slane %v22012_v15, %v20609_v29  ;;  %v13397_v2 = vrot.slane %v13383_v50, %v20609_v29 }
 0x549   : > { %v17684_v61 = vpop.f32.mrf.mxu1  ;;  %17726 = vmatpush3.bf16.msra.mxu0 %v15024_v58  ;;  %17737 = vmatprep.mubr.msk.bf16.mxu0 %vm18005_vm15, %v23233_v52  ;;  %v23465_v58 = vld [vmem:[#allocation23_spill] sm:$0xff]  ;;  %v22211_v6 = vsel %vm11007_vm2, %v23469_v39, %v14685_v32  ;;  %v13415_v16 = vcombine.high %v13407_v3, %v13407_v3  ;;  %v13382_v15 = vcombine.high %v22187_v57, %v22187_v57  ;;  %v23477_v32 = vld [vmem:[#allocation53_spill] sm:$0xff] }
 0x54a   : > { %17727 = vmatprep.subr.bf16.mxu0 %v23233_v52  ;;  %23470 = vst [vmem:[#allocation115_spill] sm:$0xff] %v22211_v6  ;;  %v22227_v62 = vcombine.low %v13373_v4, %v13381_v54  ;;  %v14654_v50 = vcombine.low %v13414_v13, %v13416_v63  ;;  %v13398_v4 = vcombine.high %v13390_v43, %v13390_v43 }
 0x54b   : > { %v22171_v59 = vpop.f32.mrf.mxu1  ;;  %v13399_v54 = vcombine.high %v13397_v2, %v13397_v2  ;;  %v23481_v13 = vpack.c.bf16 %v22099_v47, %v21853_v9  ;;  %v14653_v19 = vcombine.low %v13407_v3, %v13415_v16  ;;  %v23491_v51 = vpack.c.bf16 %v22120_v40, %v21618_v60 }
 0x54c   : > { %v13492_v49 = vrot.slane %v22171_v59, %v20609_v29  ;;  %v13485_v63 = vcombine.high %v22171_v59, %v22171_v59  ;;  %v14668_v16 = vrot.slane %v14654_v50, %v20609_v29  ;;  %v23483_v59 = vrot.slane %v22009_v21, %v20609_v29 }
 0x54d   : > { %v17687_v61 = vpop.f32.mrf.mxu1  ;;  %17728 = vmatpush3.bf16.msra.mxu0 %v14932_v5  ;;  %v23488_v50 = vpack.c.bf16 %v21836_v55, %v21814_v18  ;;  %v14627_v60 = vrot.slane %v22227_v62, %v20609_v29 }
 0x54e   : > { %v13500_v1 = vcombine.high %v13492_v49, %v13492_v49  ;;  %v23467_v61 = vcombine.low %v23466_v37, %v23466_v37  ;;  %17729 = vmatprep.subr.bf16.mxu0 %v23233_v52  ;;  %v13499_v47 = vrot.slane %v13485_v63, %v20609_v29 }
 0x54f   : > { %v13173_v0 = vpop.f32.mrf.mxu1 }
 0x550   : > { %v22205_v42 = vsel %vm531_vm4, %v22042_v20, %v23467_v61  ;;  %v14744_v37 = vcombine.low %v13492_v49, %v13500_v1  ;;  %v13502_v5 = vcombine.high %v13173_v0, %v13173_v0  ;;  %v23475_v61 = vld [vmem:[#allocation14_spill] sm:$0xff]  ;;  %v13509_v7 = vrot.slane %v13173_v0, %v20609_v29  ;;  %v23485_v0 = vld [vmem:[#allocation57_spill] sm:$0xff] }
 0x551   : > { %v17690_v20 = vpop.f32.mrf.mxu1  ;;  %v23476_v53 = vcombine.low %v23475_v61, %v23475_v61  ;;  %17730 = vmatpush3.bf16.msra.mxu0 %v23481_v13  ;;  %v14637_v13 = vcombine.low %v13397_v2, %v13399_v54  ;;  %v14445_v2 = vrot.slane %v22213_v28, %v20609_v29  ;;  %v14676_v54 = vrot.slane %v22070_v35, %v20609_v29 }
 0x552   : > { %v14751_v26 = vrot.slane %v14744_v37, %v20609_v29  ;;  %17731 = vmatprep.subr.bf16.mxu0 %v23233_v52  ;;  %v13516_v6 = vrot.slane %v13502_v5, %v20609_v29 }
 0x553   : > { %v13178_v1 = vpop.f32.mrf.mxu1  ;;  %v22237_v25 = vsel %vm531_vm4, %v23477_v32, %v23476_v53 }
 0x554   : > { %23478 = vst [vmem:[#allocation63_spill] sm:$0xff] %v22237_v25  ;;  %v13519_v37 = vcombine.high %v13178_v1, %v13178_v1  ;;  %v14752_v49 = vcombine.low %v14751_v26, %v14751_v26  ;;  %v13526_v53 = vrot.slane %v13178_v1, %v20609_v29  ;;  %v23484_v1 = vcombine.low %v22038_v17, %v22038_v17 }
 0x555   : > { %v17693_v61 = vpop.f32.mrf.mxu1  ;;  %17732 = vmatpush3.bf16.msra.mxu0 %v23488_v50  ;;  %v13518_v18 = vcombine.high %v13516_v6, %v13516_v6  ;;  %v14620_v50 = vcombine.low %v22187_v57, %v13382_v15 }
 0x556   : > { %v13533_v9 = vrot.slane %v13519_v37, %v20609_v29  ;;  %v22260_v3 = vsel %vm11007_vm2, %v23483_v59, %v14752_v49  ;;  %v22267_v5 = vsel %vm531_vm4, %v23485_v0, %v23484_v1  ;;  %v13534_v21 = vcombine.high %v13526_v53, %v13526_v53  ;;  %17733 = vmatprep.subr.bf16.mxu0 %v23233_v52  ;;  %v23489_v0 = vld [vmem:[#allocation8_spill] sm:$0xff]  ;;  %v23490_v61 = vld [vmem:[#allocation18_spill] sm:$0xff] }
 0x557   : > { %v13183_v26 = vpop.f32.mrf.mxu1  ;;  %v14661_v59 = vrot.slane %v14653_v19, %v20609_v29  ;;  %v13517_v37 = vcombine.high %v13509_v7, %v13509_v7  ;;  %v14770_v15 = vcombine.low %v13516_v6, %v13518_v18 }
 0x558   : > { %v13535_v39 = vcombine.high %v13533_v9, %v13533_v9  ;;  %v13536_v49 = vcombine.high %v13183_v26, %v13183_v26  ;;  %v13543_v17 = vrot.slane %v13183_v26, %v20609_v29  ;;  %v14636_v26 = vcombine.low %v13390_v43, %v13398_v4 }
 0x559   : > { %v17696_v1 = vpop.f32.mrf.mxu1  ;;  %v14669_v32 = vcombine.low %v14661_v59, %v14668_v16  ;;  %17734 = vmatpush3.bf16.msra.mxu0 %v23491_v51  ;;  %v14771_v20 = vcombine.low %v13526_v53, %v13534_v21  ;;  %v14651_v51 = vrot.slane %v14637_v13, %v20609_v29  ;;  %v14754_v40 = vcombine.low %v13509_v7, %v13517_v37 }
 0x55a   : > { %v13550_v55 = vrot.slane %v13536_v49, %v20609_v29  ;;  %v14787_v10 = vcombine.low %v13533_v9, %v13535_v39  ;;  %v13551_v19 = vcombine.high %v13543_v17, %v13543_v17  ;;  %v13501_v1 = vcombine.high %v13499_v47, %v13499_v47  ;;  %17735 = vmatprep.subr.bf16.mxu0 %v23233_v52 }
 0x55b   : > { %v22284_v25 = vpop.f32.mrf.mxu1  ;;  %v14939_v35 = vpack.c.bf16 %v14676_v54, %v14669_v32  ;;  %v14634_v16 = vrot.slane %v14620_v50, %v20609_v29  ;;  %v14644_v21 = vrot.slane %v14636_v26, %v20609_v29  ;;  %v14785_v62 = vrot.slane %v14771_v20, %v20609_v29 }
 0x55c   : > { %v13552_v63 = vcombine.high %v13550_v55, %v13550_v55  ;;  %v14788_v57 = vcombine.low %v13543_v17, %v13551_v19  ;;  %v22296_v39 = vrot.slane %v22284_v25, %v20609_v29  ;;  %v14795_v28 = vrot.slane %v14787_v10, %v20609_v29 }
 0x55d   : > { %v17699_v43 = vpop.f32.mrf.mxu1  ;;  %v14753_v49 = vcombine.low %v13499_v47, %v13501_v1  ;;  %v23492_v7 = vpack.c.bf16 %v21610_v27, %v21596_v46  ;;  %v13451_v10 = vcombine.high %v22102_v44, %v22102_v44  ;;  %v14810_v6 = vrot.slane %v13550_v55, %v20609_v29 }
 0x55e   : > { %v14802_v4 = vrot.slane %v14788_v57, %v20609_v29  ;;  %v14811_v53 = vcombine.low %v13552_v63, %v22296_v39  ;;  %v14652_v59 = vcombine.low %v14644_v21, %v14651_v51  ;;  %v13468_v47 = vcombine.high %v22138_v33, %v22138_v33 }
 0x55f   : > { %v22304_v9 = vpop.f32.mrf.mxu1  ;;  %17736 = vmatpush3.bf16.msra.mxu0 %v23492_v7  ;;  %v14768_v20 = vrot.slane %v14754_v40, %v20609_v29  ;;  %v14778_v46 = vrot.slane %v14770_v15, %v20609_v29  ;;  %v13475_v27 = vrot.slane %v22138_v33, %v20609_v29  ;;  %v15068_v17 = vsel %vm8932_vm13, %v14939_v35, 0 }
 0x560   : > { %17741 = vmatprep.subr.bf16.mxu0 %v23233_v52  ;;  %v14818_v32 = vrot.slane %v14811_v53, %v20609_v29  ;;  %v14803_v37 = vcombine.low %v14795_v28, %v14802_v4  ;;  %v23493_v50 = vrot.slane %v22148_v45, %v20609_v29  ;;  %v23494_v19 = vrot.slane %v22108_v38, %v20609_v29 }
 0x561   : > { %v17702_v13 = vpop.f32.mrf.mxu1  ;;  %v14635_v1 = vcombine.low %v14627_v60, %v14634_v16  ;;  %v14761_v33 = vrot.slane %v14753_v49, %v20609_v29  ;;  %v14786_v54 = vcombine.low %v14778_v46, %v14785_v62  ;;  %v13465_v57 = vrot.slane %v13451_v10, %v20609_v29 }
 0x562   : > { %17738 = vmatmul.mubr.msk.bf16.vlgmr.msra.gmra.mxu0 %vm14975_vm0, %v22136_v31  ;;  %v14819_v63 = vcombine.low %v14818_v32, %v14818_v32  ;;  %v14951_v55 = vpack.c.bf16 %v14810_v6, %v14803_v37  ;;  %v22334_v26 = vcombine.low %v23494_v19, %v23493_v50  ;;  %v13482_v15 = vrot.slane %v13468_v47, %v20609_v29 }
 0x563   : > { %v22326_v18 = vpop.f32.mrf.mxu1  ;;  %17742 = vmatpush3.bf16.msra.mxu0 %v15068_v17  ;;  %17753 = vmatprep.mubr.msk.bf16.mxu0 %vm18005_vm15, %v23233_v52  ;;  %v14769_v38 = vcombine.low %v14761_v33, %v14768_v20  ;;  %v14938_v40 = vpack.c.bf16 %v14652_v59, %v14635_v1  ;;  %v13483_v28 = vcombine.high %v13475_v27, %v13475_v27 }
 0x564   : > { %17743 = vmatprep.subr.bf16.mxu0 %v23233_v52  ;;  %v15156_v51 = vsel %vm8932_vm13, %v14951_v55, 0  ;;  %v22343_v45 = vsel %vm11007_vm2, %v14445_v2, %v14819_v63  ;;  %v13434_v35 = vcombine.high %v22080_v8, %v22080_v8  ;;  %v13467_v16 = vcombine.high %v13465_v57, %v13465_v57 }
 0x565   : > { %v17705_v43 = vpop.f32.mrf.mxu1  ;;  %17774 = vmatpush3.bf16.msra.mxu1 %v15156_v51  ;;  %v14955_v60 = vpack.c.bf16 %v22343_v45, %v22334_v26  ;;  %v14950_v53 = vpack.c.bf16 %v14786_v54, %v14769_v38  ;;  %v13458_v21 = vrot.slane %v22102_v44, %v20609_v29  ;;  %v14721_v49 = vcombine.low %v13483_v28, %v13482_v15  ;;  %v23523_v45 = vld [vmem:[#allocation56_spill] sm:$0xff] }
 0x566   : > { %17775 = vmatprep.subr.bf16.mxu1 %v23233_v52  ;;  %v13441_v62 = vrot.slane %v22080_v8, %v20609_v29  ;;  %v13448_v7 = vrot.slane %v13434_v35, %v20609_v29  ;;  %v23495_v10 = vpack.c.bf16 %v22144_v36, %v23455_v23  ;;  %v14720_v6 = vcombine.low %v13467_v16, %v13475_v27  ;;  %v23504_v35 = vld [vmem:[#allocation115_spill] sm:$0xff] }
 0x567   : > { %v13203_v4 = vpop.f32.mrf.mxu1  ;;  %17744 = vmatpush3.bf16.msra.mxu0 %v14938_v40  ;;  %v13466_v32 = vcombine.high %v13458_v21, %v13458_v21  ;;  %v23496_v44 = vpack.c.bf16 %v22260_v3, %v23489_v0  ;;  %v14735_v13 = vrot.slane %v14721_v49, %v20609_v29  ;;  %v23497_v59 = vpack.c.bf16 %v23457_v41, %v23456_v22 }
 0x568   : > { %17745 = vmatprep.subr.bf16.mxu0 %v23233_v52  ;;  %v13449_v37 = vcombine.high %v13441_v62, %v13441_v62  ;;  %v13450_v8 = vcombine.high %v13448_v7, %v13448_v7  ;;  %v13484_v36 = vcombine.high %v13482_v15, %v13482_v15  ;;  %v14728_v23 = vrot.slane %v14720_v6, %v20609_v29 }
 0x569   : > { %v17708_v2 = vpop.f32.mrf.mxu1  ;;  %17776 = vmatpush3.bf16.msra.mxu1 %v14950_v53  ;;  %v13433_v47 = vcombine.high %v22076_v34, %v22076_v34  ;;  %v14704_v3 = vcombine.low %v13466_v32, %v13465_v57  ;;  %v23498_v0 = vpack.c.bf16 %v23465_v58, %v23464_v30  ;;  %v23499_v22 = vpack.c.bf16 %v22178_v14, %v23463_v11  ;;  %v23505_v53 = vld [vmem:[#allocation113_spill] sm:$0xff] }
 0x56a   : > { %17777 = vmatprep.subr.bf16.mxu1 %v23233_v52  ;;  %v14736_v20 = vcombine.low %v14728_v23, %v14735_v13  ;;  %v14687_v46 = vcombine.low %v13449_v37, %v13448_v7  ;;  %v14703_v27 = vcombine.low %v13450_v8, %v13458_v21  ;;  %v14743_v41 = vrot.slane %v13484_v36, %v20609_v29  ;;  %v23508_v7 = vld [vmem:[#allocation45_spill] sm:$0xff] }
 0x56b   : > { %17746 = vmatpush3.bf16.msra.mxu0 %v23495_v10  ;;  %v14686_v17 = vcombine.low %v13433_v47, %v13441_v62  ;;  %v14718_v34 = vrot.slane %v14704_v3, %v20609_v29  ;;  %v23500_v30 = vpack.c.bf16 %v22205_v42, %v22035_v24  ;;  %v13587_v58 = vcombine.high %v22326_v18, %v22326_v18  ;;  %v23502_v42 = vld [vmem:[#allocation58_spill] sm:$0xff]  ;;  %v23507_v62 = vld [vmem:[#allocation112_spill] sm:$0xff]  ;;  %v23511_v36 = vld [vmem:[#allocation109_spill] sm:$0xff] }
 0x56c   : > { %17747 = vmatprep.subr.bf16.mxu0 %v23233_v52  ;;  %v14945_v63 = vpack.c.bf16 %v14743_v41, %v14736_v20  ;;  %v14701_v14 = vrot.slane %v14687_v46, %v20609_v29  ;;  %v14711_v11 = vrot.slane %v14703_v27, %v20609_v29  ;;  %v23501_v55 = vpack.c.bf16 %v23462_v12, %v23461_v48  ;;  %v23513_v27 = vld [vmem:[#allocation44_spill] sm:$0xff] }
 0x56d   : > { %17778 = vmatpush3.bf16.msra.mxu1 %v23496_v44  ;;  %v14694_v50 = vrot.slane %v14686_v17, %v20609_v29  ;;  %v23503_v19 = vpack.c.bf16 %v22033_v56, %v23502_v42  ;;  %v13601_v1 = vrot.slane %v13587_v58, %v20609_v29  ;;  %v13594_v48 = vrot.slane %v22326_v18, %v20609_v29 }
 0x56e   : > { %17779 = vmatprep.subr.bf16.mxu1 %v23233_v52  ;;  %v14719_v24 = vcombine.low %v14711_v11, %v14718_v34  ;;  %v15112_v33 = vsel %vm8932_vm13, %v14945_v63, 0  ;;  %v13570_v56 = vcombine.high %v22304_v9, %v22304_v9  ;;  %v13610_v43 = vrot.slane %v13203_v4, %v20609_v29  ;;  %v23516_v63 = vld [vmem:[#allocation2_spill] sm:$0xff] }
 0x56f   : > { %17748 = vmatpush3.bf16.msra.mxu0 %v23497_v59  ;;  %v14702_v54 = vcombine.low %v14694_v50, %v14701_v14  ;;  %v13603_v57 = vcombine.high %v13601_v1, %v13601_v1  ;;  %v13553_v51 = vcombine.high %v22284_v25, %v22284_v25  ;;  %v13602_v38 = vcombine.high %v13594_v48, %v13594_v48  ;;  %v23510_v59 = vld [vmem:[#allocation63_spill] sm:$0xff] }
 0x570   : > { %17749 = vmatprep.subr.bf16.mxu0 %v23233_v52  ;;  %v13584_v18 = vrot.slane %v13570_v56, %v20609_v29  ;;  %v13577_v28 = vrot.slane %v22304_v9, %v20609_v29  ;;  %v23506_v16 = vpack.c.bf16 %v23504_v35, %v23505_v53  ;;  %v23509_v10 = vpack.c.bf16 %v23507_v62, %v23508_v7  ;;  %v23519_v50 = vld [vmem:[#allocation55_spill] sm:$0xff] }
 0x571   : > { %17780 = vmatpush3.bf16.msra.mxu1 %v23498_v0  ;;  %v14944_v12 = vpack.c.bf16 %v14719_v24, %v14702_v54  ;;  %v14855_v40 = vcombine.low %v13603_v57, %v13610_v43  ;;  %v13567_v15 = vrot.slane %v13553_v51, %v20609_v29  ;;  %v14854_v4 = vcombine.low %v13602_v38, %v13601_v1  ;;  %v22488_v54 = vpop.permute.xlu0 %14962 }
 0x572   : > { %17781 = vmatprep.subr.bf16.mxu1 %v23233_v52  ;;  %v13586_v25 = vcombine.high %v13584_v18, %v13584_v18  ;;  %v13585_v49 = vcombine.high %v13577_v28, %v13577_v28  ;;  %v13611_v32 = vcombine.high %v13610_v43, %v13610_v43  ;;  %v13568_v9 = vcombine.high %v22296_v39, %v22296_v39 }
 0x573   : > { %17750 = vmatpush3.bf16.msra.mxu0 %v23499_v22  ;;  %v14869_v2 = vrot.slane %v14855_v40, %v20609_v29  ;;  %v13569_v21 = vcombine.high %v13567_v15, %v13567_v15  ;;  %v14862_v6 = vrot.slane %v14854_v4, %v20609_v29  ;;  %v23512_v23 = vpack.c.bf16 %v23510_v59, %v23511_v36  ;;  %v23514_v22 = vld [vmem:[#allocation43_spill] sm:$0xff] }
 0x574   : > { %17751 = vmatprep.subr.bf16.mxu0 %v23233_v52  ;;  %v14838_v44 = vcombine.low %v13586_v25, %v13594_v48  ;;  %v14837_v8 = vcombine.low %v13585_v49, %v13584_v18  ;;  %v14877_v47 = vrot.slane %v13611_v32, %v20609_v29  ;;  %v14820_v3 = vcombine.low %v13568_v9, %v13567_v15  ;;  %v22490_v48 = vpop.permute.xlu1 %14967 }
 0x575   : > { %17782 = vmatpush3.bf16.msra.mxu1 %v23500_v30  ;;  %v14870_v13 = vcombine.low %v14862_v6, %v14869_v2  ;;  %v14821_v37 = vcombine.low %v13569_v21, %v13577_v28  ;;  %v23515_v41 = vpack.c.bf16 %v23513_v27, %v23514_v22  ;;  %v1581_v11 = vsel %vm1578_vm7, 1.0, %v23233_v52  ;;  %v22493_v57 = vpop.permute.xlu0 %15259 }
 0x576   : > { %17783 = vmatprep.subr.bf16.mxu1 %v23233_v52  ;;  %v14852_v0 = vrot.slane %v14838_v44, %v20609_v29  ;;  %v14845_v39 = vrot.slane %v14837_v8, %v20609_v29  ;;  %v14828_v17 = vrot.slane %v14820_v3, %v20609_v29  ;;  %v23521_v42 = vpack.c.bf16 %v22267_v5, %v23490_v61 }
 0x577   : > { %17752 = vmatpush3.bf16.msra.mxu0 %v23501_v55  ;;  %v14957_v20 = vpack.c.bf16 %v14877_v47, %v14870_v13  ;;  %v14835_v46 = vrot.slane %v14821_v37, %v20609_v29  ;;  %v23518_v55 = vld [vmem:[#allocation117_spill] sm:$0xff]  ;;  %v3566_v26 = vsel %vm3563_vm8, 1.0, %v23233_v52  ;;  %v23526_v5 = vmov 0  }
 0x578   : > { %17757 = vmatprep.subr.bf16.mxu0 %v23233_v52  ;;  %v14853_v34 = vcombine.low %v14845_v39, %v14852_v0  ;;  %v23520_v24 = vpack.c.bf16 %v23518_v55, %v23519_v50  ;;  %vm15291_vm8 = vcmask 48128   ;;  %v22499_v40 = vpop.permute.xlu1 %15264 }
 0x579   : > { %17784 = vmatpush3.bf16.msra.mxu1 %v23503_v19  ;;  %v15200_v30 = vsel %vm8932_vm13, %v14957_v20, 0  ;;  %v14836_v58 = vcombine.low %v14828_v17, %v14835_v46 }
 0x57a   : > { %17754 = vmatmul.mubr.msk.bf16.vlgmr.msra.gmra.mxu0 %vm14975_vm0, %v22136_v31  ;;  %17805 = vmatprep.subr.msk.mxu1 %vm531_vm4, %v1581_v11 }
 0x57b   : > { %17758 = vmatpush3.bf16.msra.mxu0 %v15112_v33  ;;  %17769 = vmatprep.mubr.msk.bf16.mxu0 %vm18005_vm15, %v23233_v52  ;;  %v14956_v29 = vpack.c.bf16 %v14853_v34, %v14836_v58  ;;  %v4631_v33 = vsel %vm4628_vm12, 1.0, %v23233_v52 }
 0x57c   : > { %17759 = vmatprep.subr.bf16.mxu0 %v23233_v52  ;;  %17786 = vmatmul.mubr.msk.bf16.vlgmr.msra.gmra.mxu1 %vm14975_vm0, %v22136_v31 }
 0x57d   : > { %17806 = vmatpush3.msk.msra.mxu1 %vm531_vm4, %v1581_v11 }
 0x57e   : > { %17881 = vmatprep.subr.msk.mxu1 %vm531_vm4, %v4631_v33 }
 0x57f   : > { %17760 = vmatpush3.bf16.msra.mxu0 %v14944_v12 }
 0x580   : > { %17761 = vmatprep.subr.bf16.mxu0 %v23233_v52 }
 0x583   : > { %17762 = vmatpush3.bf16.msra.mxu0 %v23506_v16 }
 0x584   : > { %17763 = vmatprep.subr.bf16.mxu0 %v23233_v52 }
 0x587   : > { %17764 = vmatpush3.bf16.msra.mxu0 %v23509_v10 }
 0x588   : > { %17765 = vmatprep.subr.bf16.mxu0 %v23233_v52 }
 0x58b   : > { %17766 = vmatpush3.bf16.msra.mxu0 %v23512_v23 }
 0x58c   : > { %17767 = vmatprep.subr.bf16.mxu0 %v23233_v52 }
 0x58f   : > { %17768 = vmatpush3.bf16.msra.mxu0 %v23515_v41 }
 0x590   : > { %17789 = vmatprep.subr.bf16.mxu0 %v23233_v52 }
 0x592   : > { %17770 = vmatmul.mubr.msk.bf16.vlgmr.msra.gmra.mxu0 %vm14975_vm0, %v22136_v31 }
 0x593   : > { %17790 = vmatpush3.bf16.msra.mxu0 %v15200_v30  ;;  %17801 = vmatprep.mubr.msk.bf16.mxu0 %vm18005_vm15, %v23233_v52 }
 0x594   : > { %17791 = vmatprep.subr.bf16.mxu0 %v23233_v52 }
 0x597   : > { %17792 = vmatpush3.bf16.msra.mxu0 %v14956_v29 }
 0x598   : > { %17793 = vmatprep.subr.bf16.mxu0 %v23233_v52 }
 0x59b   : > { %17794 = vmatpush3.bf16.msra.mxu0 %v14955_v60  ;;  %v23524_v60 = vld [vmem:[#allocation25_spill] sm:$0xff] }
 0x59c   : > { %17795 = vmatprep.subr.bf16.mxu0 %v23233_v52  ;;  %v23525_v1 = vpack.c.bf16 %v23523_v45, %v23524_v60 }
 0x59f   : > { %17796 = vmatpush3.bf16.msra.mxu0 %v23520_v24 }
 0x5a0   : > { %17797 = vmatprep.subr.bf16.mxu0 %v23233_v52 }
 0x5a3   : > { %17798 = vmatpush3.bf16.msra.mxu0 %v23521_v42 }
 0x5a4   : > { %17799 = vmatprep.subr.bf16.mxu0 %v23233_v52 }
 0x5a7   : > { %17800 = vmatpush3.bf16.msra.mxu0 %v23525_v1 }
 0x5a8   : > { %17843 = vmatprep.subr.msk.mxu0 %vm531_vm4, %v3566_v26 }
 0x5aa   : > { %17802 = vmatmul.mubr.msk.bf16.vlgmr.msra.gmra.mxu0 %vm14975_vm0, %v22136_v31 }
 0x5ab   : > { %17844 = vmatpush3.msk.msra.mxu0 %vm531_vm4, %v3566_v26 }
 0x5ac   : > { %15980 = vmatprep.subr.bf16.mxu0 %v23526_v5 }
 0x608   : > { %v15016_v56 = vpop.f32.mrf.mxu0 }
 0x609   : > { %v15017_v12 = vadd.f32 %v15016_v56, %v22488_v54 }
 0x60a   : > { %v17723_v31 = vpop.f32.mrf.mxu0 }
 0x60b   : > { %vm15243_vm7 = vcmp.gt.f32.partialorder %v15017_v12, 0.0  ;;  %v15267_v43 = vmul.f32 %v22493_v57, %v15017_v12 }
 0x60c   : > { %v15019_v51 = vpop.f32.mrf.mxu0 }
 0x60d   : > { %v15020_v38 = vadd.f32 %v15019_v51, %v22490_v48  ;;  %v22497_v18 = vsel %vm15243_vm7, %v15017_v12, %v15267_v43  ;;  %v22673_v43 = vld [vmem:[%s22984_s7 + $0x4] ss:$8 sps:$4 sm:$0xff]  }
 0x60e   : > { %17807 = vmatprep.mubr.msk.f32.mxu1 %vm15291_vm8, %v22497_v18  ;;  %17845 = vmatprep.mubr.msk.f32.mxu0 %vm15291_vm8, %v22497_v18  ;;  %v17724_v15 = vpop.f32.mrf.mxu0 }
 0x60f   : > { %vm15244_vm12 = vcmp.gt.f32.partialorder %v15020_v38, 0.0  ;;  %v15268_v28 = vmul.f32 %v22499_v40, %v15020_v38 }
 0x611   : > { %v22506_v35 = vsel %vm15244_vm12, %v15020_v38, %v15268_v28  ;;  %vm16263_vm12 = vcmask 261120  }
 0x612   : > { %17808 = vmatmul.mubr.msk.f32.vlgmr.msra.gmra.mxu1 %vm15291_vm8, %v22506_v35  ;;  %17846 = vmatmul.mubr.msk.f32.vlgmr.msra.gmra.mxu0 %vm15291_vm8, %v22506_v35 }
 0x613   : > { %17882 = vmatpush3.msk.msra.mxu1 %vm531_vm4, %v4631_v33 }
 0x614   : > { %16078 = vmatprep.subr.bf16.mxu1 %v23526_v5 }
 0x622   : > { %v15060_v53 = vpop.f32.mrf.mxu0 }
 0x623   : > { %v15061_v16 = vadd.f32 %v15060_v53, %v22488_v54 }
 0x624   : > { %v17739_v4 = vpop.f32.mrf.mxu0 }
 0x625   : > { %vm15245_vm13 = vcmp.gt.f32.partialorder %v15061_v16, 0.0  ;;  %v15269_v25 = vmul.f32 %v22493_v57, %v15061_v16 }
 0x626   : > { %v15063_v2 = vpop.f32.mrf.mxu0 }
 0x627   : > { %v22516_v21 = vsel %vm15245_vm13, %v15061_v16, %v15269_v25  ;;  %v15064_v49 = vadd.f32 %v15063_v2, %v22490_v48 }
 0x628   : > { %17810 = vmatprep.mubr.msk.f32.mxu1 %vm15291_vm8, %v22516_v21  ;;  %17848 = vmatprep.mubr.msk.f32.mxu0 %vm15291_vm8, %v22516_v21  ;;  %v17740_v62 = vpop.f32.mrf.mxu0 }
 0x629   : > { %vm15246_vm4 = vcmp.gt.f32.partialorder %v15064_v49, 0.0  ;;  %v15270_v7 = vmul.f32 %v22499_v40, %v15064_v49 }
 0x62b   : > { %v22524_v10 = vsel %vm15246_vm4, %v15064_v49, %v15270_v7 }
 0x62c   : > { %17811 = vmatmul.mubr.msk.f32.gmra.mxu1 %vm15291_vm8, %v22524_v10  ;;  %17849 = vmatmul.mubr.msk.f32.gmra.mxu0 %vm15291_vm8, %v22524_v10 }
 0x63a   : > { %v15104_v6 = vpop.f32.mrf.mxu0 }
 0x63b   : > { %v15105_v32 = vadd.f32 %v15104_v6, %v22488_v54 }
 0x63c   : > { %v17755_v9 = vpop.f32.mrf.mxu0  ;;  %v15192_v44 = vpop.f32.mrf.mxu1 }
 0x63d   : > { %vm15247_vm5 = vcmp.gt.f32.partialorder %v15105_v32, 0.0  ;;  %v15271_v13 = vmul.f32 %v22493_v57, %v15105_v32  ;;  %v15193_v11 = vadd.f32 %v15192_v44, %v22488_v54 }
 0x63e   : > { %v15107_v37 = vpop.f32.mrf.mxu0  ;;  %v17787_v8 = vpop.f32.mrf.mxu1 }
 0x63f   : > { %v22532_v59 = vsel %vm15247_vm5, %v15105_v32, %v15271_v13  ;;  %v15108_v36 = vadd.f32 %v15107_v37, %v22490_v48  ;;  %v15275_v55 = vmul.f32 %v22493_v57, %v15193_v11  ;;  %vm15251_vm14 = vcmp.gt.f32.partialorder %v15193_v11, 0.0 }
 0x640   : > { %17813 = vmatprep.mubr.msk.f32.mxu1 %vm15291_vm8, %v22532_v59  ;;  %17851 = vmatprep.mubr.msk.f32.mxu0 %vm15291_vm8, %v22532_v59  ;;  %v15195_v23 = vpop.f32.mrf.mxu1  ;;  %v17756_v47 = vpop.f32.mrf.mxu0 }
 0x641   : > { %vm15248_vm6 = vcmp.gt.f32.partialorder %v15108_v36, 0.0  ;;  %v15272_v3 = vmul.f32 %v22499_v40, %v15108_v36  ;;  %v15196_v29 = vadd.f32 %v15195_v23, %v22490_v48  ;;  %v15287_v24 = vsel %vm15251_vm14, %v15193_v11, %v15275_v55 }
 0x642   : > { %v17788_v0 = vpop.f32.mrf.mxu1 }
 0x643   : > { %v22540_v20 = vsel %vm15248_vm6, %v15108_v36, %v15272_v3  ;;  %v15276_v50 = vmul.f32 %v22499_v40, %v15196_v29  ;;  %vm15252_vm1 = vcmp.gt.f32.partialorder %v15196_v29, 0.0 }
 0x644   : > { %17814 = vmatmul.mubr.msk.f32.gmra.mxu1 %vm15291_vm8, %v22540_v20  ;;  %17852 = vmatmul.mubr.msk.f32.gmra.mxu0 %vm15291_vm8, %v22540_v20 }
 0x645   : > { %17816 = vmatprep.mubr.msk.f32.mxu1 %vm15291_vm8, %v22516_v21  ;;  %17854 = vmatprep.mubr.msk.f32.mxu0 %vm15291_vm8, %v22516_v21  ;;  %v15288_v42 = vsel %vm15252_vm1, %v15196_v29, %v15276_v50 }
 0x648   : > { %17817 = vmatmul.mubr.msk.f32.gmra.mxu1 %vm15291_vm8, %v22524_v10  ;;  %17855 = vmatmul.mubr.msk.f32.gmra.mxu0 %vm15291_vm8, %v22524_v10 }
 0x649   : > { %17819 = vmatprep.mubr.msk.f32.mxu1 %vm15291_vm8, %v22532_v59  ;;  %17857 = vmatprep.mubr.msk.f32.mxu0 %vm15291_vm8, %v22532_v59 }
 0x64c   : > { %17820 = vmatmul.mubr.msk.f32.gmra.mxu1 %vm15291_vm8, %v22540_v20  ;;  %17858 = vmatmul.mubr.msk.f32.gmra.mxu0 %vm15291_vm8, %v22540_v20 }
 0x652   : > { %v15148_v46 = vpop.f32.mrf.mxu0 }
 0x653   : > { %v15149_v39 = vadd.f32 %v15148_v46, %v22488_v54 }
 0x654   : > { %v17771_v27 = vpop.f32.mrf.mxu0 }
 0x655   : > { %vm15249_vm9 = vcmp.gt.f32.partialorder %v15149_v39, 0.0  ;;  %v15273_v22 = vmul.f32 %v22493_v57, %v15149_v39 }
 0x656   : > { %v15151_v41 = vpop.f32.mrf.mxu0 }
 0x657   : > { %v22564_v17 = vsel %vm15249_vm9, %v15149_v39, %v15273_v22  ;;  %v15152_v34 = vadd.f32 %v15151_v41, %v22490_v48 }
 0x658   : > { %17822 = vmatprep.mubr.msk.f32.mxu1 %vm15291_vm8, %v22564_v17  ;;  %17860 = vmatprep.mubr.msk.f32.mxu0 %vm15291_vm8, %v22564_v17  ;;  %v17772_v30 = vpop.f32.mrf.mxu0 }
 0x659   : > { %vm15250_vm11 = vcmp.gt.f32.partialorder %v15152_v34, 0.0  ;;  %v15274_v58 = vmul.f32 %v22499_v40, %v15152_v34 }
 0x65b   : > { %v22572_v14 = vsel %vm15250_vm11, %v15152_v34, %v15274_v58 }
 0x65c   : > { %17823 = vmatmul.mubr.msk.f32.gmra.mxu1 %vm15291_vm8, %v22572_v14  ;;  %17861 = vmatmul.mubr.msk.f32.gmra.mxu0 %vm15291_vm8, %v22572_v14 }
 0x65d   : > { %17825 = vmatprep.mubr.msk.f32.mxu1 %vm15291_vm8, %v22532_v59  ;;  %17863 = vmatprep.mubr.msk.f32.mxu0 %vm15291_vm8, %v22532_v59 }
 0x660   : > { %17826 = vmatmul.mubr.msk.f32.gmra.mxu1 %vm15291_vm8, %v22540_v20  ;;  %17864 = vmatmul.mubr.msk.f32.gmra.mxu0 %vm15291_vm8, %v22540_v20 }
 0x661   : > { %17828 = vmatprep.mubr.msk.f32.mxu1 %vm15291_vm8, %v22564_v17  ;;  %17866 = vmatprep.mubr.msk.f32.mxu0 %vm15291_vm8, %v22564_v17 }
 0x664   : > { %17829 = vmatmul.mubr.msk.f32.gmra.mxu1 %vm15291_vm8, %v22572_v14  ;;  %17867 = vmatmul.mubr.msk.f32.gmra.mxu0 %vm15291_vm8, %v22572_v14 }
 0x665   : > { %17831 = vmatprep.mubr.msk.f32.mxu1 %vm15291_vm8, %v15287_v24  ;;  %17869 = vmatprep.mubr.msk.f32.mxu0 %vm15291_vm8, %v15287_v24 }
 0x668   : > { %17832 = vmatmul.mubr.msk.f32.gmra.mxu1 %vm15291_vm8, %v15288_v42  ;;  %17870 = vmatmul.mubr.msk.f32.gmra.mxu0 %vm15291_vm8, %v15288_v42 }
 0x669   : > { %17834 = vmatprep.mubr.msk.f32.mxu1 %vm15291_vm8, %v22564_v17  ;;  %17872 = vmatprep.mubr.msk.f32.mxu0 %vm15291_vm8, %v22564_v17 }
 0x66a   : > { %v15236_v19 = vpop.f32.mrf.mxu0 }
 0x66b   : > { %v15237_v26 = vadd.f32 %v15236_v19, %v22488_v54 }
 0x66c   : > { %v17803_v45 = vpop.f32.mrf.mxu0  ;;  %17835 = vmatmul.mubr.msk.f32.gmra.mxu1 %vm15291_vm8, %v22572_v14  ;;  %17873 = vmatmul.mubr.msk.f32.gmra.mxu0 %vm15291_vm8, %v22572_v14 }
 0x66d   : > { %vm15253_vm3 = vcmp.gt.f32.partialorder %v15237_v26, 0.0  ;;  %v15277_v60 = vmul.f32 %v22493_v57, %v15237_v26  ;;  %17837 = vmatprep.mubr.msk.f32.mxu1 %vm15291_vm8, %v15287_v24  ;;  %17875 = vmatprep.mubr.msk.f32.mxu0 %vm15291_vm8, %v15287_v24 }
 0x66e   : > { %v15239_v1 = vpop.f32.mrf.mxu0 }
 0x66f   : > { %v15240_v61 = vadd.f32 %v15239_v1, %v22490_v48  ;;  %v15289_v33 = vsel %vm15253_vm3, %v15237_v26, %v15277_v60 }
 0x670   : > { %17838 = vmatmul.mubr.msk.f32.gmra.mxu1 %vm15291_vm8, %v15288_v42  ;;  %17876 = vmatmul.mubr.msk.f32.gmra.mxu0 %vm15291_vm8, %v15288_v42  ;;  %v17804_v54 = vpop.f32.mrf.mxu0 }
 0x671   : > { %vm15254_vm2 = vcmp.gt.f32.partialorder %v15240_v61, 0.0  ;;  %v15278_v56 = vmul.f32 %v22499_v40, %v15240_v61  ;;  %17840 = vmatprep.mubr.msk.f32.mxu1 %vm15291_vm8, %v15289_v33  ;;  %17878 = vmatprep.mubr.msk.f32.mxu0 %vm15291_vm8, %v15289_v33 }
 0x673   : > { %v15290_v12 = vsel %vm15254_vm2, %v15240_v61, %v15278_v56 }
 0x674   : > { %17841 = vmatmul.mubr.msk.f32.gmra.mxu1 %vm15291_vm8, %v15290_v12  ;;  %17879 = vmatmul.mubr.msk.f32.gmra.mxu0 %vm15291_vm8, %v15290_v12 }
 0x675   : > { %17883 = vmatprep.mubr.msk.f32.mxu1 %vm15291_vm8, %v22497_v18  ;;  %16876 = vmatprep.mubr.msk.bf16.mxu0 %vm9747_vm10, %v22673_v43 }
 0x678   : > { %17884 = vmatmul.mubr.msk.f32.vlgmr.msra.gmra.mxu1 %vm15291_vm8, %v22506_v35 }
 0x679   : > { %17886 = vmatprep.mubr.msk.f32.mxu1 %vm15291_vm8, %v22516_v21 }
 0x67c   : > { %17887 = vmatmul.mubr.msk.f32.gmra.mxu1 %vm15291_vm8, %v22524_v10 }
 0x67d   : > { %17889 = vmatprep.mubr.msk.f32.mxu1 %vm15291_vm8, %v22532_v59 }
 0x680   : > { %17890 = vmatmul.mubr.msk.f32.gmra.mxu1 %vm15291_vm8, %v22540_v20 }
 0x681   : > { %17892 = vmatprep.mubr.msk.f32.mxu1 %vm15291_vm8, %v22516_v21 }
 0x684   : > { %17893 = vmatmul.mubr.msk.f32.gmra.mxu1 %vm15291_vm8, %v22524_v10 }
 0x685   : > { %17895 = vmatprep.mubr.msk.f32.mxu1 %vm15291_vm8, %v22532_v59 }
 0x688   : > { %17896 = vmatmul.mubr.msk.f32.gmra.mxu1 %vm15291_vm8, %v22540_v20 }
 0x689   : > { %17898 = vmatprep.mubr.msk.f32.mxu1 %vm15291_vm8, %v22564_v17 }
 0x68c   : > { %17899 = vmatmul.mubr.msk.f32.gmra.mxu1 %vm15291_vm8, %v22572_v14 }
 0x68d   : > { %17901 = vmatprep.mubr.msk.f32.mxu1 %vm15291_vm8, %v22532_v59 }
 0x690   : > { %17902 = vmatmul.mubr.msk.f32.gmra.mxu1 %vm15291_vm8, %v22540_v20 }
 0x691   : > { %17904 = vmatprep.mubr.msk.f32.mxu1 %vm15291_vm8, %v22564_v17 }
 0x694   : > { %17905 = vmatmul.mubr.msk.f32.gmra.mxu1 %vm15291_vm8, %v22572_v14 }
 0x695   : > { %17907 = vmatprep.mubr.msk.f32.mxu1 %vm15291_vm8, %v15287_v24 }
 0x698   : > { %17908 = vmatmul.mubr.msk.f32.gmra.mxu1 %vm15291_vm8, %v15288_v42 }
 0x699   : > { %17910 = vmatprep.mubr.msk.f32.mxu1 %vm15291_vm8, %v22564_v17 }
 0x69c   : > { %17911 = vmatmul.mubr.msk.f32.gmra.mxu1 %vm15291_vm8, %v22572_v14 }
 0x69d   : > { %17913 = vmatprep.mubr.msk.f32.mxu1 %vm15291_vm8, %v15287_v24 }
 0x6a0   : > { %17914 = vmatmul.mubr.msk.f32.gmra.mxu1 %vm15291_vm8, %v15288_v42 }
 0x6a1   : > { %17916 = vmatprep.mubr.msk.f32.mxu1 %vm15291_vm8, %v15289_v33 }
 0x6a4   : > { %17917 = vmatmul.mubr.msk.f32.gmra.mxu1 %vm15291_vm8, %v15290_v12 }
 0x6a5   : > { %16880 = vmatprep.mubr.msk.bf16.mxu1 %vm9747_vm10, %v22673_v43 }
 0x6d2   : > { %v22664_v48 = vpop.f32.mrf.mxu1  ;;  %v17847_v49 = vpop.f32.mrf.mxu0 }
 0x6d4   : > { %v22666_v57 = vpop.f32.mrf.mxu1  ;;  %v15585_v6 = vpop.f32.mrf.mxu0 }
 0x6d5   : > { %v15896_v31 = vpack.c.bf16 %v22664_v48, %v22666_v57 }
 0x6ec   : > { %v22679_v51 = vpop.f32.mrf.mxu1  ;;  %v17850_v44 = vpop.f32.mrf.mxu0 }
 0x6ee   : > { %v22681_v38 = vpop.f32.mrf.mxu1  ;;  %v15595_v59 = vpop.f32.mrf.mxu0 }
 0x6ef   : > { %v15897_v18 = vpack.c.bf16 %v22679_v51, %v22681_v38  ;;  %v22783_v51 = vld [vmem:[%s22984_s7] ss:$8 sps:$4 sm:$0xff]  }
 0x704   : > { %v22685_v40 = vpop.f32.mrf.mxu1  ;;  %v17853_v23 = vpop.f32.mrf.mxu0 }
 0x706   : > { %v22687_v15 = vpop.f32.mrf.mxu1  ;;  %v15605_v20 = vpop.f32.mrf.mxu0 }
 0x707   : > { %v15898_v28 = vpack.c.bf16 %v22685_v40, %v22687_v15  ;;  %v15901_v56 = vpack.c.bf16 %v17853_v23, %v15605_v20 }
 0x708   : > { %v22691_v35 = vpop.f32.mrf.mxu1  ;;  %v22735_v22 = vpop.f32.mrf.mxu0 }
 0x70a   : > { %v22693_v53 = vpop.f32.mrf.mxu1  ;;  %v22743_v30 = vpop.f32.mrf.mxu0 }
 0x70b   : > { %v15905_v16 = vpack.c.bf16 %v22691_v35, %v22693_v53 }
 0x70c   : > { %v22697_v4 = vpop.f32.mrf.mxu1  ;;  %v22749_v29 = vpop.f32.mrf.mxu0 }
 0x70e   : > { %v22699_v25 = vpop.f32.mrf.mxu1  ;;  %v22751_v24 = vpop.f32.mrf.mxu0 }
 0x70f   : > { %v15906_v2 = vpack.c.bf16 %v22697_v4, %v22699_v25 }
 0x71c   : > { %v22703_v21 = vpop.f32.mrf.mxu1  ;;  %v22753_v26 = vpop.f32.mrf.mxu0 }
 0x71e   : > { %v22705_v62 = vpop.f32.mrf.mxu1  ;;  %v22756_v61 = vpop.f32.mrf.mxu0 }
 0x71f   : > { %v15907_v7 = vpack.c.bf16 %v22703_v21, %v22705_v62 }
 0x720   : > { %v22709_v10 = vpop.f32.mrf.mxu1  ;;  %v17865_v12 = vpop.f32.mrf.mxu0 }
 0x722   : > { %v22711_v32 = vpop.f32.mrf.mxu1 }
 0x723   : > { %v15914_v9 = vpack.c.bf16 %v22709_v10, %v22711_v32 }
 0x724   : > { %v22715_v13 = vpop.f32.mrf.mxu1 }
 0x726   : > { %v22717_v37 = vpop.f32.mrf.mxu1 }
 0x727   : > { %v15915_v8 = vpack.c.bf16 %v22715_v13, %v22717_v37 }
 0x728   : > { %v22721_v36 = vpop.f32.mrf.mxu1 }
 0x72a   : > { %v22723_v47 = vpop.f32.mrf.mxu1 }
 0x72b   : > { %v15916_v3 = vpack.c.bf16 %v22721_v36, %v22723_v47  ;;  %v15908_v36 = vpack.c.bf16 %v22735_v22, %v22743_v30 }
 0x72c   : > { %v22727_v0 = vpop.f32.mrf.mxu1 }
 0x72e   : > { %v22729_v46 = vpop.f32.mrf.mxu1 }
 0x730   : > { %v22733_v27 = vpop.f32.mrf.mxu1 }
 0x732   : > { %v22737_v41 = vpop.f32.mrf.mxu1 }
 0x734   : > { %v22741_v34 = vpop.f32.mrf.mxu1 }
 0x736   : > { %v22745_v58 = vpop.f32.mrf.mxu1 }
 0x738   : > { %v17885_v11 = vpop.f32.mrf.mxu1 }
 0x73a   : > { %v15773_v55 = vpop.f32.mrf.mxu1 }
 0x73b   : > { %v15902_v1 = vpack.c.bf16 %v17885_v11, %v15773_v55  ;;  %v15899_v55 = vpack.c.bf16 %v17847_v49, %v15585_v6 }
 0x73c   : > { %v17888_v50 = vpop.f32.mrf.mxu1 }
 0x73e   : > { %v15783_v42 = vpop.f32.mrf.mxu1 }
 0x73f   : > { %v15903_v19 = vpack.c.bf16 %v17888_v50, %v15783_v42  ;;  %v15900_v42 = vpack.c.bf16 %v17850_v44, %v15595_v59 }
 0x740   : > { %v17891_v45 = vpop.f32.mrf.mxu1 }
 0x741   : > { %15981 = vmatpush1.bf16.msra.mxu0 %v15903_v19  ;;  %v15645_v19 = vpop.f32.mrf.mxu0 }
 0x742   : > { %v15793_v60 = vpop.f32.mrf.mxu1  ;;  %15982 = vmatprep.subr.bf16.mxu0 %v23526_v5  ;;  %v15917_v38 = vpack.c.bf16 %v17865_v12, %v15645_v19 }
 0x743   : > { %v15904_v15 = vpack.c.bf16 %v17891_v45, %v15793_v60 }
 0x744   : > { %v17894_v33 = vpop.f32.mrf.mxu1 }
 0x745   : > { %15983 = vmatpush1.bf16.msra.mxu0 %v15902_v1  ;;  %v17868_v1 = vpop.f32.mrf.mxu0 }
 0x746   : > { %v15803_v54 = vpop.f32.mrf.mxu1  ;;  %15984 = vmatprep.subr.bf16.mxu0 %v23526_v5 }
 0x747   : > { %v15655_v20 = vpop.f32.mrf.mxu0 }
 0x748   : > { %v17897_v39 = vpop.f32.mrf.mxu1  ;;  %v15918_v48 = vpack.c.bf16 %v17868_v1, %v15655_v20 }
 0x749   : > { %15985 = vmatpush1.bf16.msra.mxu0 %v15901_v56 }
 0x74a   : > { %v15813_v50 = vpop.f32.mrf.mxu1  ;;  %15986 = vmatprep.subr.bf16.mxu0 %v23526_v5 }
 0x74b   : > { %v15912_v57 = vpack.c.bf16 %v17897_v39, %v15813_v50  ;;  %v15910_v39 = vpack.c.bf16 %v22753_v26, %v22756_v61 }
 0x74c   : > { %v22760_v17 = vpop.f32.mrf.mxu1 }
 0x74d   : > { %15987 = vmatpush1.bf16.msra.mxu0 %v15900_v42  ;;  %v17871_v42 = vpop.f32.mrf.mxu0 }
 0x74e   : > { %v22762_v11 = vpop.f32.mrf.mxu1  ;;  %15988 = vmatprep.subr.bf16.mxu0 %v23526_v5 }
 0x74f   : > { %v15665_v6 = vpop.f32.mrf.mxu0 }
 0x750   : > { %v17903_v14 = vpop.f32.mrf.mxu1  ;;  %v15919_v40 = vpack.c.bf16 %v17871_v42, %v15665_v6 }
 0x751   : > { %15989 = vmatpush1.bf16.msra.mxu0 %v15899_v55  ;;  %v17874_v13 = vpop.f32.mrf.mxu0 }
 0x752   : > { %v15833_v23 = vpop.f32.mrf.mxu1  ;;  %15990 = vmatprep.subr.bf16.mxu0 %v23526_v5 }
 0x753   : > { %v15920_v49 = vpack.c.bf16 %v17903_v14, %v15833_v23  ;;  %v15909_v14 = vpack.c.bf16 %v22749_v29, %v22751_v24  ;;  %v23530_v24 = vpack.c.bf16 %v22727_v0, %v22729_v46 }
 0x754   : > { %v17906_v56 = vpop.f32.mrf.mxu1 }
 0x755   : > { %15991 = vmatpush1.bf16.msra.mxu0 %v15898_v28  ;;  %v22800_v28 = vld [vmem:[%s22984_s7 + $0x10] ss:$8 sps:$4 sm:$0xff]  }
 0x756   : > { %v15843_v44 = vpop.f32.mrf.mxu1  ;;  %15992 = vmatprep.subr.bf16.mxu0 %v23526_v5 }
 0x757   : > { %v15921_v59 = vpack.c.bf16 %v17906_v56, %v15843_v44 }
 0x758   : > { %v17909_v45 = vpop.f32.mrf.mxu1 }
 0x759   : > { %15993 = vmatpush1.bf16.msra.mxu0 %v15897_v18  ;;  %16079 = vmatpush1.bf16.msra.mxu1 %v15921_v59  ;;  %v15911_v18 = vpack.c.bf16 %v17894_v33, %v15803_v54 }
 0x75a   : > { %15994 = vmatprep.subr.bf16.mxu0 %v23526_v5  ;;  %16080 = vmatprep.subr.bf16.mxu1 %v23526_v5  ;;  %v15853_v47 = vpop.f32.mrf.mxu1 }
 0x75c   : > { %v17912_v37 = vpop.f32.mrf.mxu1 }
 0x75d   : > { %15995 = vmatpush1.bf16.msra.mxu0 %v15896_v31  ;;  %16081 = vmatpush1.bf16.msra.mxu1 %v15920_v49  ;;  %v22790_v31 = vld [vmem:[%s22984_s7 + $0x14] ss:$8 sps:$4 sm:$0xff]  }
 0x75e   : > { %16010 = vmatprep.subr.bf16.mxu0 %v23526_v5  ;;  %16082 = vmatprep.subr.bf16.mxu1 %v23526_v5  ;;  %v15863_v22 = vpop.f32.mrf.mxu1 }
 0x75f   : > { %v15929_v35 = vpack.c.bf16 %v17912_v37, %v15863_v22 }
 0x760   : > { %v17915_v62 = vpop.f32.mrf.mxu1 }
 0x761   : > { %16011 = vmatpush2.bf16.msra.mxu0 %v15904_v15  ;;  %16083 = vmatpush1.bf16.msra.mxu1 %v15919_v40 }
 0x762   : > { %16029 = vmatprep.subr.bf16.mxu0 %v23526_v5  ;;  %16084 = vmatprep.subr.bf16.mxu1 %v23526_v5  ;;  %v15873_v32 = vpop.f32.mrf.mxu1 }
 0x763   : > { %v15930_v4 = vpack.c.bf16 %v17915_v62, %v15873_v32 }
 0x764   : > { %16013 = vmatmul.mubr.bf16.vlgmr.msra.gmra.mxu0 %v22783_v51  ;;  %v17918_v30 = vpop.f32.mrf.mxu1 }
 0x765   : > { %16030 = vmatpush1.bf16.msra.mxu0 %v15912_v57  ;;  %16085 = vmatpush1.bf16.msra.mxu1 %v15918_v48 }
 0x766   : > { %16031 = vmatprep.subr.bf16.mxu0 %v23526_v5  ;;  %16086 = vmatprep.subr.bf16.mxu1 %v23526_v5  ;;  %v15883_v29 = vpop.f32.mrf.mxu1 }
 0x767   : > { %16877 = vmatprep.mubr.msk.bf16.mxu0 %vm9747_vm10, %v22790_v31  ;;  %v15931_v26 = vpack.c.bf16 %v17918_v30, %v15883_v29 }
 0x769   : > { %16032 = vmatpush1.bf16.msra.mxu0 %v15911_v18  ;;  %16087 = vmatpush1.bf16.msra.mxu1 %v15917_v38  ;;  %v22905_v38 = vld [vmem:[%s22987_s10] sm:$0x7] }
 0x76a   : > { %16033 = vmatprep.subr.bf16.mxu0 %v23526_v5  ;;  %16088 = vmatprep.subr.bf16.mxu1 %v23526_v5 }
 0x76c   : > { %16021 = vmatmul.mubr.bf16.gmra.mxu0 %v22800_v28 }
 0x76d   : > { %16034 = vmatpush1.bf16.msra.mxu0 %v15910_v39  ;;  %16089 = vmatpush1.bf16.msra.mxu1 %v15916_v3  ;;  %v15922_v3 = vpack.c.bf16 %v17909_v45, %v15853_v47 }
 0x76e   : > { %16035 = vmatprep.subr.bf16.mxu0 %v23526_v5  ;;  %16090 = vmatprep.subr.bf16.mxu1 %v23526_v5 }
 0x76f   : > { %16878 = vmatprep.mubr.msk.bf16.mxu0 %vm9747_vm10, %v22673_v43 }
 0x771   : > { %16036 = vmatpush1.bf16.msra.mxu0 %v15909_v14  ;;  %16091 = vmatpush1.bf16.msra.mxu1 %v15915_v8  ;;  %v15675_v8 = vpop.f32.mrf.mxu0 }
 0x772   : > { %16037 = vmatprep.subr.bf16.mxu0 %v23526_v5  ;;  %16092 = vmatprep.subr.bf16.mxu1 %v23526_v5 }
 0x773   : > { %v17877_v21 = vpop.f32.mrf.mxu0 }
 0x775   : > { %16038 = vmatpush1.bf16.msra.mxu0 %v15908_v36  ;;  %16093 = vmatpush1.bf16.msra.mxu1 %v15914_v9  ;;  %v15685_v10 = vpop.f32.mrf.mxu0  ;;  %v15926_v9 = vpack.c.bf16 %v17874_v13, %v15675_v8 }
 0x776   : > { %16039 = vmatprep.subr.bf16.mxu0 %v23526_v5  ;;  %16108 = vmatprep.subr.bf16.mxu1 %v23526_v5 }
 0x777   : > { %v17880_v25 = vpop.f32.mrf.mxu0 }
 0x779   : > { %16040 = vmatpush1.bf16.msra.mxu0 %v15907_v7  ;;  %16109 = vmatpush2.bf16.msra.mxu1 %v15922_v3  ;;  %v15913_v7 = vpack.c.bf16 %v22760_v17, %v22762_v11  ;;  %v15695_v53 = vpop.f32.mrf.mxu0  ;;  %v23528_v17 = vpack.c.bf16 %v22741_v34, %v22745_v58 }
 0x77a   : > { %16041 = vmatprep.subr.bf16.mxu0 %v23526_v5  ;;  %17919 = vmatprep.subr.bf16.mxu1 %v23233_v52 }
 0x77c   : > { %16111 = vmatmul.mubr.bf16.vlgmr.msra.gmra.mxu1 %v22783_v51 }
 0x77d   : > { %16042 = vmatpush1.bf16.msra.mxu0 %v15906_v2  ;;  %16881 = vmatprep.mubr.msk.bf16.mxu1 %vm9747_vm10, %v22790_v31  ;;  %v15927_v2 = vpack.c.bf16 %v17877_v21, %v15685_v10 }
 0x77e   : > { %16043 = vmatprep.subr.bf16.mxu0 %v23526_v5 }
 0x781   : > { %16044 = vmatpush1.bf16.msra.mxu0 %v15905_v16  ;;  %v15928_v16 = vpack.c.bf16 %v17880_v25, %v15695_v53 }
 0x782   : > { %16059 = vmatprep.subr.bf16.mxu0 %v23526_v5 }
 0x784   : > { %16119 = vmatmul.mubr.bf16.gmra.mxu1 %v22800_v28 }
 0x785   : > { %16060 = vmatpush2.bf16.msra.mxu0 %v15913_v7  ;;  %17923 = vmatprep.mubr.msk.bf16.mxu1 %vm18005_vm15, %v23233_v52 }
 0x786   : > { %16127 = vmatprep.subr.bf16.mxu0 %v23526_v5 }
 0x788   : > { %16062 = vmatmul.mubr.bf16.vlgmr.msra.gmra.mxu0 %v22783_v51 }
 0x789   : > { %16128 = vmatpush1.bf16.msra.mxu0 %v15930_v4  ;;  %16879 = vmatprep.mubr.msk.bf16.mxu0 %vm9747_vm10, %v22790_v31 }
 0x78a   : > { %16129 = vmatprep.subr.bf16.mxu0 %v23526_v5 }
 0x78d   : > { %16130 = vmatpush1.bf16.msra.mxu0 %v15929_v35 }
 0x78e   : > { %16131 = vmatprep.subr.bf16.mxu0 %v23526_v5 }
 0x790   : > { %16070 = vmatmul.mubr.bf16.gmra.mxu0 %v22800_v28 }
 0x791   : > { %16132 = vmatpush1.bf16.msra.mxu0 %v15928_v16  ;;  %16882 = vmatprep.mubr.msk.bf16.mxu0 %vm9747_vm10, %v22673_v43  ;;  %v23529_v43 = vpack.c.bf16 %v22733_v27, %v22737_v41  ;;  %v22877_v27 = vpop.permute.xlu1 %15953  ;;  %v22879_v41 = vpop.permute.xlu0 %15948 }
 0x792   : > { %16133 = vmatprep.subr.bf16.mxu0 %v23526_v5 }
 0x795   : > { %16134 = vmatpush1.bf16.msra.mxu0 %v15927_v2  ;;  %v22881_v58 = vpop.permute.xlu1 %16213  ;;  %v22883_v46 = vpop.permute.xlu0 %16208 }
 0x796   : > { %16135 = vmatprep.subr.bf16.mxu0 %v23526_v5 }
 0x799   : > { %16136 = vmatpush1.bf16.msra.mxu0 %v15926_v9  ;;  %v22885_v61 = vpop.permute.xlu1 %15943  ;;  %v22888_v12 = vpop.permute.xlu0 %15938 }
 0x79a   : > { %16137 = vmatprep.subr.bf16.mxu0 %v23526_v5 }
 0x79d   : > { %16138 = vmatpush1.bf16.msra.mxu0 %v23528_v17  ;;  %v22894_v20 = vpop.permute.xlu1 %16203  ;;  %v22898_v42 = vpop.permute.xlu0 %16198 }
 0x79e   : > { %16139 = vmatprep.subr.bf16.mxu0 %v23526_v5 }
 0x7a1   : > { %16140 = vmatpush1.bf16.msra.mxu0 %v23529_v43 }
 0x7a2   : > { %16141 = vmatprep.subr.bf16.mxu0 %v23526_v5 }
 0x7a5   : > { %16142 = vmatpush1.bf16.msra.mxu0 %v23530_v24 }
 0x7a6   : > { %16157 = vmatprep.subr.bf16.mxu0 %v23526_v5 }
 0x7a9   : > { %16158 = vmatpush2.bf16.msra.mxu0 %v15931_v26 }
 0x7ac   : > { %16160 = vmatmul.mubr.bf16.vlgmr.msra.gmra.mxu0 %v22783_v51 }
 0x7ad   : > { %16883 = vmatprep.mubr.msk.bf16.mxu0 %vm9747_vm10, %v22790_v31 }
 0x7b4   : > { %16168 = vmatmul.mubr.bf16.gmra.mxu0 %v22800_v28 }
 0x824   : > { %v16014_v34 = vpop.f32.mrf.mxu0 }
 0x825   : > { %v16015_v55 = vadd.f32 %v16014_v34, %v22888_v12 }
 0x826   : > { %v16016_v0 = vpop.f32.mrf.mxu0 }
 0x827   : > { %v16216_v49 = vmul.f32 %v22898_v42, %v16015_v55  ;;  %vm16176_vm8 = vcmp.gt.f32.partialorder %v16015_v55, 0.0 }
 0x828   : > { %v16017_v5 = vpop.f32.mrf.mxu0 }
 0x829   : > { %v16018_v19 = vadd.f32 %v16017_v5, %v22885_v61  ;;  %v16232_v48 = vsel %vm16176_vm8, %v16015_v55, %v16216_v49 }
 0x82a   : > { %v16019_v60 = vpop.f32.mrf.mxu0 }
 0x82b   : > { %v16217_v44 = vmul.f32 %v22894_v20, %v16018_v19  ;;  %vm16177_vm7 = vcmp.gt.f32.partialorder %v16018_v19, 0.0 }
 0x82c   : > { %v16022_v33 = vpop.f32.mrf.mxu0 }
 0x82d   : > { %v16023_v54 = vadd.f32 %v16022_v33, %v22879_v41  ;;  %v16233_v51 = vsel %vm16177_vm7, %v16018_v19, %v16217_v44  ;;  %vm16456_vm7 = vcmask 28672  }
 0x82e   : > { %v16024_v50 = vpop.f32.mrf.mxu0  ;;  %v16249_v57 = vpack.c.bf16 %v16233_v51, %v16232_v48 }
 0x82f   : > { %v16218_v1 = vmul.f32 %v22883_v46, %v16023_v54  ;;  %vm16178_vm10 = vcmp.gt.f32.partialorder %v16023_v54, 0.0 }
 0x830   : > { %v16025_v11 = vpop.f32.mrf.mxu0 }
 0x831   : > { %v16026_v23 = vadd.f32 %v16025_v11, %v22877_v27  ;;  %v16234_v6 = vsel %vm16178_vm10, %v16023_v54, %v16218_v1 }
 0x832   : > { %v16027_v56 = vpop.f32.mrf.mxu0 }
 0x833   : > { %vm16179_vm0 = vcmp.gt.f32.partialorder %v16026_v23, 0.0  ;;  %v16219_v59 = vmul.f32 %v22881_v58, %v16026_v23 }
 0x835   : > { %v16235_v40 = vsel %vm16179_vm0, %v16026_v23, %v16219_v59  ;;  %vm16427_vm0 = vcmp.eq.s32.totalorder %v23516_v63, 0 }
 0x836   : > { %v16250_v15 = vpack.c.bf16 %v16235_v40, %v16234_v6 }
 0x838   : > { %17920 = vmatpush3.bf16.msra.mxu1 %v16250_v15 }
 0x839   : > { %17921 = vmatprep.subr.bf16.mxu1 %v23233_v52 }
 0x83c   : > { %v16112_v31 = vpop.f32.mrf.mxu1  ;;  %17922 = vmatpush3.bf16.msra.mxu1 %v16249_v57 }
 0x83d   : > { %17927 = vmatprep.subr.bf16.mxu1 %v23233_v52  ;;  %v16113_v0 = vadd.f32 %v16112_v31, %v22888_v12 }
 0x83e   : > { %v16114_v18 = vpop.f32.mrf.mxu1 }
 0x83f   : > { %17924 = vmatmul.mubr.msk.bf16.vlgmr.msra.gmra.mxu1 %vm16263_vm12, %v22905_v38  ;;  %v16224_v19 = vmul.f32 %v22898_v42, %v16113_v0  ;;  %vm16184_vm1 = vcmp.gt.f32.partialorder %v16113_v0, 0.0 }
 0x840   : > { %v16115_v28 = vpop.f32.mrf.mxu1  ;;  %17931 = vmatprep.mubr.msk.bf16.mxu1 %vm18005_vm15, %v23233_v52 }
 0x841   : > { %v16116_v24 = vadd.f32 %v16115_v28, %v22885_v61  ;;  %v16240_v23 = vsel %vm16184_vm1, %v16113_v0, %v16224_v19 }
 0x842   : > { %v16117_v39 = vpop.f32.mrf.mxu1 }
 0x843   : > { %v16225_v54 = vmul.f32 %v22894_v20, %v16116_v24  ;;  %vm16185_vm14 = vcmp.gt.f32.partialorder %v16116_v24, 0.0 }
 0x844   : > { %v16120_v14 = vpop.f32.mrf.mxu1 }
 0x845   : > { %v16121_v9 = vadd.f32 %v16120_v14, %v22879_v41  ;;  %v16241_v1 = vsel %vm16185_vm14, %v16116_v24, %v16225_v54 }
 0x846   : > { %v16122_v45 = vpop.f32.mrf.mxu1  ;;  %v16253_v56 = vpack.c.bf16 %v16241_v1, %v16240_v23 }
 0x847   : > { %v16226_v5 = vmul.f32 %v22883_v46, %v16121_v9  ;;  %vm16186_vm11 = vcmp.gt.f32.partialorder %v16121_v9, 0.0 }
 0x848   : > { %v16063_v36 = vpop.f32.mrf.mxu0  ;;  %v16123_v47 = vpop.f32.mrf.mxu1 }
 0x849   : > { %v16064_v32 = vadd.f32 %v16063_v36, %v22888_v12  ;;  %v16124_v53 = vadd.f32 %v16123_v47, %v22877_v27  ;;  %v16242_v11 = vsel %vm16186_vm11, %v16121_v9, %v16226_v5 }
 0x84a   : > { %v16065_v3 = vpop.f32.mrf.mxu0  ;;  %v16125_v13 = vpop.f32.mrf.mxu1 }
 0x84b   : > { %v16220_v17 = vmul.f32 %v22898_v42, %v16064_v32  ;;  %vm16180_vm6 = vcmp.gt.f32.partialorder %v16064_v32, 0.0  ;;  %v16227_v26 = vmul.f32 %v22881_v58, %v16124_v53  ;;  %vm16187_vm9 = vcmp.gt.f32.partialorder %v16124_v53, 0.0 }
 0x84c   : > { %v16066_v37 = vpop.f32.mrf.mxu0 }
 0x84d   : > { %v16067_v7 = vadd.f32 %v16066_v37, %v22885_v61  ;;  %v16236_v60 = vsel %vm16180_vm6, %v16064_v32, %v16220_v17  ;;  %v16243_v50 = vsel %vm16187_vm9, %v16124_v53, %v16227_v26 }
 0x84e   : > { %v16068_v8 = vpop.f32.mrf.mxu0  ;;  %v16254_v55 = vpack.c.bf16 %v16243_v50, %v16242_v11 }
 0x84f   : > { %v16221_v16 = vmul.f32 %v22894_v20, %v16067_v7  ;;  %vm16181_vm5 = vcmp.gt.f32.partialorder %v16067_v7, 0.0 }
 0x850   : > { %v16071_v22 = vpop.f32.mrf.mxu0 }
 0x851   : > { %v16072_v21 = vadd.f32 %v16071_v22, %v22879_v41  ;;  %v16237_v34 = vsel %vm16181_vm5, %v16067_v7, %v16221_v16 }
 0x852   : > { %v16073_v62 = vpop.f32.mrf.mxu0  ;;  %v16251_v33 = vpack.c.bf16 %v16237_v34, %v16236_v60 }
 0x853   : > { %v16222_v4 = vmul.f32 %v22883_v46, %v16072_v21  ;;  %vm16182_vm13 = vcmp.gt.f32.partialorder %v16072_v21, 0.0 }
 0x854   : > { %v16074_v10 = vpop.f32.mrf.mxu0 }
 0x855   : > { %v16075_v25 = vadd.f32 %v16074_v10, %v22877_v27  ;;  %v16238_v30 = vsel %vm16182_vm13, %v16072_v21, %v16222_v4 }
 0x856   : > { %v16076_v35 = vpop.f32.mrf.mxu0 }
 0x857   : > { %vm16183_vm4 = vcmp.gt.f32.partialorder %v16075_v25, 0.0  ;;  %v16223_v2 = vmul.f32 %v22881_v58, %v16075_v25 }
 0x859   : > { %v16239_v43 = vsel %vm16183_vm4, %v16075_v25, %v16223_v2 }
 0x85a   : > { %v16252_v29 = vpack.c.bf16 %v16239_v43, %v16238_v30 }
 0x85c   : > { %17928 = vmatpush3.bf16.msra.mxu1 %v16252_v29 }
 0x85d   : > { %17929 = vmatprep.subr.bf16.mxu1 %v23233_v52 }
 0x860   : > { %17930 = vmatpush3.bf16.msra.mxu1 %v16251_v33 }
 0x861   : > { %17935 = vmatprep.subr.bf16.mxu1 %v23233_v52 }
 0x863   : > { %17932 = vmatmul.mubr.msk.bf16.vlgmr.msra.gmra.mxu1 %vm16263_vm12, %v22905_v38 }
 0x864   : > { %17936 = vmatpush3.bf16.msra.mxu1 %v16254_v55  ;;  %17939 = vmatprep.mubr.msk.bf16.mxu1 %vm18005_vm15, %v23233_v52 }
 0x865   : > { %17937 = vmatprep.subr.bf16.mxu1 %v23233_v52 }
 0x868   : > { %17938 = vmatpush3.bf16.msra.mxu1 %v16253_v56 }
 0x869   : > { %17943 = vmatprep.subr.bf16.mxu1 %v23233_v52 }
 0x86b   : > { %17940 = vmatmul.mubr.msk.bf16.vlgmr.msra.gmra.mxu1 %vm16263_vm12, %v22905_v38 }
 0x86c   : > { %v16161_v44 = vpop.f32.mrf.mxu0  ;;  %17947 = vmatprep.mubr.msk.bf16.mxu1 %vm18005_vm15, %v23233_v52 }
 0x86d   : > { %v16162_v31 = vadd.f32 %v16161_v44, %v22888_v12 }
 0x86e   : > { %v16163_v59 = vpop.f32.mrf.mxu0 }
 0x86f   : > { %vm16188_vm10 = vcmp.gt.f32.partialorder %v16162_v31, 0.0 }
 0x870   : > { %v16164_v49 = vpop.f32.mrf.mxu0 }
 0x871   : > { %v16165_v48 = vadd.f32 %v16164_v49, %v22885_v61 }
 0x872   : > { %v16166_v6 = vpop.f32.mrf.mxu0 }
 0x873   : > { %v16229_v14 = vmul.f32 %v22894_v20, %v16165_v48  ;;  %vm16189_vm2 = vcmp.gt.f32.partialorder %v16165_v48, 0.0 }
 0x874   : > { %v16169_v40 = vpop.f32.mrf.mxu0 }
 0x875   : > { %v16170_v15 = vadd.f32 %v16169_v40, %v22879_v41  ;;  %v16228_v41 = vmul.f32 %v22898_v42, %v16162_v31  ;;  %v16245_v3 = vsel %vm16189_vm2, %v16165_v48, %v16229_v14 }
 0x876   : > { %v16171_v51 = vpop.f32.mrf.mxu0 }
 0x877   : > { %v16230_v18 = vmul.f32 %v22883_v46, %v16170_v15  ;;  %vm16190_vm3 = vcmp.gt.f32.partialorder %v16170_v15, 0.0  ;;  %v16244_v12 = vsel %vm16188_vm10, %v16162_v31, %v16228_v41  ;;  %v16261_v46 = vpop.permute.xlu0 %16260 }
 0x878   : > { %v16172_v57 = vpop.f32.mrf.mxu0 }
 0x879   : > { %v16173_v28 = vadd.f32 %v16172_v57, %v22877_v27  ;;  %v16246_v36 = vsel %vm16190_vm3, %v16170_v15, %v16230_v18  ;;  %v16255_v27 = vpack.c.bf16 %v16245_v3, %v16244_v12 }
 0x87a   : > { %v16174_v39 = vpop.f32.mrf.mxu0 }
 0x87b   : > { %vm16191_vm15 = vcmp.gt.f32.partialorder %v16173_v28, 0.0  ;;  %v16231_v45 = vmul.f32 %v22881_v58, %v16173_v28 }
 0x87d   : > { %v16247_v47 = vsel %vm16191_vm15, %v16173_v28, %v16231_v45 }
 0x87e   : > { %v16256_v61 = vpack.c.bf16 %v16247_v47, %v16246_v36 }
 0x880   : > { %17944 = vmatpush3.bf16.msra.mxu1 %v16256_v61 }
 0x881   : > { %17945 = vmatprep.subr.bf16.mxu1 %v23233_v52 }
 0x884   : > { %17946 = vmatpush3.bf16.msra.mxu1 %v16255_v27 }
 0x887   : > { %17948 = vmatmul.mubr.msk.bf16.vlgmr.msra.gmra.mxu1 %vm16263_vm12, %v22905_v38 }
 0x8ff   : > { %v16301_v58 = vpop.f32.mrf.mxu1 }
 0x900   : > { %v16302_v20 = vadd.f32 %v16301_v58, %v16261_v46 }
 0x901   : > { %v17925_v13 = vpop.f32.mrf.mxu1 }
 0x902   : > { %v16888_v42 = vmul.f32 -1.442695, %v16302_v20 }
 0x903   : > { %v16304_v37 = vpop.f32.mrf.mxu1 }
 0x904   : > { %17977 = vpow2.f32 %v16888_v42 }
 0x905   : > { %v17926_v8 = vpop.f32.mrf.mxu1 }
 0x911   : > { %v17978_v22 = vpop.eup %17977 }
 0x912   : > { %v16440_v21 = vadd.f32 1.0, %v17978_v22 }
 0x914   : > { %17979 = vrcp.f32 %v16440_v21 }
 0x921   : > { %v17980_v52 = vpop.eup %17979 }
 0x922   : > { %v16452_v38 = vsel %vm16427_vm0, %v17980_v52, %v16302_v20 }
 0x923   : > { %16457 = vst.msk [vmem:[%s22956_s30] sm:$0x1f] %vm16456_vm7, %v16452_v38  ;;  %v16341_v62 = vpop.f32.mrf.mxu1 }
 0x924   : > { %v16342_v7 = vadd.f32 %v16341_v62, %v16261_v46 }
 0x925   : > { %v17933_v10 = vpop.f32.mrf.mxu1 }
 0x926   : > { %v16889_v32 = vmul.f32 -1.442695, %v16342_v7 }
 0x927   : > { %v16344_v4 = vpop.f32.mrf.mxu1 }
 0x928   : > { %17981 = vpow2.f32 %v16889_v32 }
 0x929   : > { %v17934_v25 = vpop.f32.mrf.mxu1 }
 0x92b   : > { %v16381_v35 = vpop.f32.mrf.mxu1 }
 0x92c   : > { %v16382_v53 = vadd.f32 %v16381_v35, %v16261_v46 }
 0x92d   : > { %v17941_v16 = vpop.f32.mrf.mxu1 }
 0x92e   : > { %v16890_v2 = vmul.f32 -1.442695, %v16382_v53 }
 0x92f   : > { %v16384_v9 = vpop.f32.mrf.mxu1 }
 0x930   : > { %17983 = vpow2.f32 %v16890_v2 }
 0x931   : > { %v17942_v17 = vpop.f32.mrf.mxu1 }
 0x935   : > { %v17982_v30 = vpop.eup %17981 }
 0x936   : > { %v16441_v43 = vadd.f32 1.0, %v17982_v30 }
 0x938   : > { %17985 = vrcp.f32 %v16441_v43 }
 0x93d   : > { %v17984_v29 = vpop.eup %17983 }
 0x93e   : > { %v16442_v24 = vadd.f32 1.0, %v17984_v29 }
 0x940   : > { %17987 = vrcp.f32 %v16442_v24 }
 0x945   : > { %v17986_v26 = vpop.eup %17985 }
 0x946   : > { %v16453_v34 = vsel %vm16427_vm0, %v17986_v26, %v16342_v7 }
 0x947   : > { %16458 = vst.msk [vmem:[%s22956_s30 + $0x8] sm:$0x1f] %vm16456_vm7, %v16453_v34  ;;  %v16421_v0 = vpop.f32.mrf.mxu1 }
 0x948   : > { %v16422_v5 = vadd.f32 %v16421_v0, %v16261_v46 }
 0x949   : > { %v17949_v60 = vpop.f32.mrf.mxu1 }
 0x94a   : > { %v16891_v33 = vmul.f32 -1.442695, %v16422_v5 }
 0x94b   : > { %v16424_v54 = vpop.f32.mrf.mxu1 }
 0x94c   : > { %17989 = vpow2.f32 %v16891_v33 }
 0x94d   : > { %v17988_v50 = vpop.eup %17987  ;;  %v17950_v19 = vpop.f32.mrf.mxu1 }
 0x94e   : > { %v16454_v11 = vsel %vm16427_vm0, %v17988_v50, %v16382_v53 }
 0x94f   : > { %16459 = vst.msk [vmem:[%s22956_s30 + $0x10] sm:$0x1f] %vm16456_vm7, %v16454_v11 }
 0x959   : > { %v17990_v55 = vpop.eup %17989 }
 0x95a   : > { %v16443_v1 = vadd.f32 1.0, %v17990_v55 }
 0x95c   : > { %17991 = vrcp.f32 %v16443_v1 }
 0x969   : > { %v17992_v23 = vpop.eup %17991 }
 0x96a   : > { %v16455_v56 = vsel %vm16427_vm0, %v17992_v23, %v16422_v5 }
 0x96b   : > { %16460 = vst.msk [vmem:[%s22956_s30 + $0x18] sm:$0x1f] %vm16456_vm7, %v16455_v56 }
 0x96c PF: > { %s22_s21 = sadd.s32 1, %s17999_s21  }
 0x96d   : > { %p19_p4 = scmp.ge.s32.totalorder %s22_s21, 4  }
 0x96f   :  { %21 = sbr.rel (!%p19_p4) target bundleno = 1 (0x1), region = 98 }

</bundles_post_ra>
